<compile_context>
chip_gen: v5e
topology: v5e:2x2
jax: 0.10.0
libtpu: 0.0.40
codegen_flags: <defaults>
</compile_context>

<pallas_src>
import functools
import math

import jax
import jax.numpy as jnp
from jax.experimental import pallas as pl
from jax.experimental.pallas import tpu as pltpu

LN_EPS = 1e-12   # espnet LayerNorm eps
BN_EPS = 1e-05   # conv_mod_norm_eps default


def _bf16(x):
    return x.astype(jnp.bfloat16)


def _layer_norm(x, g, b):
    m = jnp.mean(x, axis=-1, keepdims=True)
    v = jnp.mean((x - m) ** 2, axis=-1, keepdims=True)
    return (x - m) * jax.lax.rsqrt(v + LN_EPS) * g + b


# ------------------------ packed parameter slab layouts -----------------------

def _wd_layout(D, U):
    """Column layout of the (D, *) bf16 matmul-weight slab."""
    widths = [("mac_w1", U), ("qkv_w", 3 * D), ("wo", D),
              ("pw1_w", 2 * D), ("pw2_w", D), ("ff_w1", U)]
    offs, o = {}, 0
    for name, w in widths:
        offs[name] = (o, o + w)
        o += w
    return offs, o


def _vec_layout(D, U):
    """Column layout of the (1, *) f32 bias / norm-parameter slab."""
    widths = [("mac_ln_g", D), ("mac_ln_b", D), ("mac_b1", U), ("mac_b2", D),
              ("att_ln_g", D), ("att_ln_b", D), ("qkv_b", 3 * D),
              ("pos_u", D), ("pos_v", D), ("att_bo", D),
              ("cv_ln_g", D), ("cv_ln_b", D), ("pw1_b", 2 * D), ("dw_b", D),
              ("bn_g", D), ("bn_b", D), ("bn_m", D), ("bn_v", D), ("pw2_b", D),
              ("ff_ln_g", D), ("ff_ln_b", D), ("ff_b1", U), ("ff_b2", D),
              ("nf_g", D), ("nf_b", D), ("out_g", D), ("out_b", D)]
    offs, o = {}, 0
    for name, w in widths:
        offs[name] = (o, o + w)
        o += w
    return offs, o


# --------------------------------- kernels ------------------------------------

def _embed_kernel(x_ref, w_ref, b_ref, o_ref):
    # (TM, Fp) bf16 @ (Fp, D) bf16 + (1, D) f32 -> bf16
    o_ref[...] = (jnp.dot(x_ref[...], w_ref[...],
                          preferred_element_type=jnp.float32)
                  + b_ref[...]).astype(o_ref.dtype)


def _layer_kernel(x_ref, p_ref, mask_ref, wd_ref, wu_ref, vec_ref, dw_ref,
                  o_ref, *, n_heads, kernel_size, apply_out_norm):
    """One fused ChunkEncoderLayer for a single batch element (grid=(B,))."""
    T, D = x_ref.shape[1], x_ref.shape[2]
    U = wu_ref.shape[0]
    dk = D // n_heads
    wd_off, _ = _wd_layout(D, U)
    vec_off, _ = _vec_layout(D, U)

    def wd(name):                                   # (D, width) bf16 slab slice
        a, b = wd_off[name]
        return wd_ref[:, a:b]

    def vec(name):                                  # (1, width) f32 slab slice
        a, b = vec_off[name]
        return vec_ref[:, a:b]

    x = x_ref[0].astype(jnp.float32)                # (T, D) residual stream, f32

    def _ffn(v, ln_g, ln_b, w1, b1, w2, b2):
        # v + 0.5 * W2(swish(W1(LN(v))))   (PositionwiseFeedForward, eval mode)
        h = _bf16(_layer_norm(v, ln_g, ln_b))
        h = jnp.dot(h, w1, preferred_element_type=jnp.float32) + b1
        h = h * jax.nn.sigmoid(h)                   # swish (f32)
        h = jnp.dot(_bf16(h), w2, preferred_element_type=jnp.float32) + b2
        return v + 0.5 * h

    # ---- 1) macaron feed-forward --------------------------------------------
    x = _ffn(x, vec("mac_ln_g"), vec("mac_ln_b"),
             wd("mac_w1"), vec("mac_b1"), wu_ref[:, 0:D], vec("mac_b2"))

    # ---- 2) relative-position multi-head self-attention ----------------------
    xn = _bf16(_layer_norm(x, vec("att_ln_g"), vec("att_ln_b")))
    qkv = jnp.dot(xn, wd("qkv_w"), preferred_element_type=jnp.float32) + vec("qkv_b")
    q = qkv[:, 0:D]
    q_u = _bf16(q + vec("pos_u"))                   # + pos_bias_u (all heads)
    q_v = _bf16(q + vec("pos_v"))                   # + pos_bias_v
    kb = _bf16(qkv[:, D:2 * D])
    vb = _bf16(qkv[:, 2 * D:3 * D])
    wo = wd("wo")                                   # (D, D) bf16
    mrow = mask_ref[0]                              # (1, T) int32, 1 = padded key
    neg = jnp.where(mrow > 0, -1e9, 0.0).astype(jnp.float32)    # additive bias
    keep = jnp.where(mrow > 0, 0.0, 1.0).astype(jnp.float32)    # post-softmax mult
    scale = 1.0 / math.sqrt(dk)

    att_out = jnp.zeros((T, D), jnp.float32)
    for h in range(n_heads):                        # static unrolled head loop
        lo, hi = h * dk, (h + 1) * dk
        p_h = p_ref[h]                              # (P_pad, dk) bf16 (pos @ W_pos)
        ac = jax.lax.dot_general(q_u[:, lo:hi], kb[:, lo:hi],
                                 (((1,), (1,)), ((), ())),
                                 preferred_element_type=jnp.float32)       # (T, T)
        bd_raw = jax.lax.dot_general(q_v[:, lo:hi], p_h,
                                     (((1,), (1,)), ((), ())),
                                     preferred_element_type=jnp.float32)   # (T, P_pad)
        # Transformer-XL relative shift: bd[i, j] = bd_raw[i, (T-1-i)+j].
        # Row i is rotated by i lanes (strided XLU rotate); the read window
        # [T-1, 2T-1) never wraps, so lane padding of P is harmless.
        rolled = pltpu.roll(bd_raw, 0, axis=1, stride=1, stride_axis=0)
        bd = rolled[:, T - 1:2 * T - 1]                                    # (T, T)
        scores = (ac + bd) * scale + neg
        smax = jnp.max(scores, axis=-1, keepdims=True)
        e = jnp.exp(scores - smax)
        attn = e * pl.reciprocal(jnp.sum(e, axis=-1, keepdims=True), approx=True)
        attn = attn * keep
        ctx = jnp.dot(_bf16(attn), vb[:, lo:hi], preferred_element_type=jnp.float32)
        # consume ctx immediately through the output projection (no lane concat)
        att_out = att_out + jnp.dot(_bf16(ctx), wo[lo:hi, :],
                                    preferred_element_type=jnp.float32)
    x = x + att_out + vec("att_bo")

    # ---- 3) convolution module (CausalConvolution, causal=False, cache=None) --
    xn = _bf16(_layer_norm(x, vec("cv_ln_g"), vec("cv_ln_b")))
    pw1 = jnp.dot(xn, wd("pw1_w"), preferred_element_type=jnp.float32) + vec("pw1_b")
    hcv = pw1[:, 0:D] * jax.nn.sigmoid(pw1[:, D:2 * D])          # GLU, (T, D) f32
    pad = (kernel_size - 1) // 2
    if pad > 0:
        zrow = jnp.zeros((pad, D), jnp.float32)
        hpad = jnp.concatenate([zrow, hcv, zrow], axis=0)        # (T+K-1, D)
    else:
        hpad = hcv
    dw = dw_ref[...]                                             # (K, D) f32
    acc = jnp.zeros((T, D), jnp.float32)
    for kk in range(kernel_size):                                # static tap loop
        acc = acc + hpad[kk:kk + T, :] * dw[kk:kk + 1, :]
    hcv = acc + vec("dw_b")
    # TODO(synk): BatchNorm1d reproduced in eval mode only (running statistics).
    hcv = (hcv - vec("bn_m")) * jax.lax.rsqrt(vec("bn_v") + BN_EPS) \
        * vec("bn_g") + vec("bn_b")
    hcv = hcv * jax.nn.sigmoid(hcv)                              # swish
    hcv = jnp.dot(_bf16(hcv), wd("pw2_w"), preferred_element_type=jnp.float32) \
        + vec("pw2_b")
    x = x + hcv                                                  # residual

    # ---- 4) feed-forward ------------------------------------------------------
    x = _ffn(x, vec("ff_ln_g"), vec("ff_ln_b"),
             wd("ff_w1"), vec("ff_b1"), wu_ref[:, D:2 * D], vec("ff_b2"))

    # ---- 5) norm_final (+ MultiBlocks output LayerNorm on the last layer) -----
    x = _layer_norm(x, vec("nf_g"), vec("nf_b"))
    if apply_out_norm:                                           # static flag
        x = _layer_norm(x, vec("out_g"), vec("out_b"))
    o_ref[0] = x.astype(o_ref.dtype)


# -------------------------------- wrappers ------------------------------------

def _row_tile(n, target=512):
    if n <= target:
        return n
    for t in range(target, 7, -1):
        if n % t == 0 and t % 8 == 0:
            return t
    return n


def embed_linear(x_bf16, w, b):
    # TODO(synk): StreamingConvInput (conv frontend) is not part of the provided
    # module; approximated (subsampling_factor = 1) by a linear projection.
    B, T, Fp = x_bf16.shape
    D = w.shape[1]
    rows = B * T
    xf = x_bf16.reshape(rows, Fp)
    tm = _row_tile(rows)
    cost = pl.CostEstimate(
        flops=2 * rows * Fp * D,
        transcendentals=0,
        bytes_accessed=rows * Fp * 2 + Fp * D * 2 + D * 4 + rows * D * 2)
    out = pl.pallas_call(
        _embed_kernel,
        out_shape=jax.ShapeDtypeStruct((rows, D), jnp.bfloat16),
        grid=(rows // tm,),
        in_specs=[pl.BlockSpec((tm, Fp), lambda i: (i, 0)),
                  pl.BlockSpec((Fp, D), lambda i: (0, 0)),
                  pl.BlockSpec((1, D), lambda i: (0, 0))],
        out_specs=pl.BlockSpec((tm, D), lambda i: (i, 0)),
        compiler_params=pltpu.CompilerParams(dimension_semantics=("parallel",)),
        cost_estimate=cost,
    )(xf, w, b)
    return out.reshape(B, T, D)


def encoder_layer(x, p3, mask_i, lp, *, n_heads, apply_out_norm):
    B, T, D = x.shape
    H, P_pad, dk = p3.shape
    U = lp["w_u"].shape[0]
    K = lp["dw_w"].shape[0]
    WD = lp["w_d"].shape[1]
    VT = lp["vec"].shape[1]

    kernel = functools.partial(_layer_kernel, n_heads=n_heads, kernel_size=K,
                               apply_out_norm=apply_out_norm)

    weight_bytes = (lp["w_d"].size + lp["w_u"].size) * 2 + lp["vec"].size * 4 \
        + lp["dw_w"].size * 4 + p3.size * 2
    act_bytes = B * T * D * 2 * 2 + B * T * 4
    mm_flops = 2 * T * (4 * D * U + 3 * D * D + 2 * D * D + D * D) \
        + 2 * T * dk * H * (2 * T + P_pad + D)
    trans = T * (2 * U + 2 * D) + H * T * (T + 1)
    cost = pl.CostEstimate(flops=int(B * mm_flops),
                           transcendentals=int(B * trans),
                           bytes_accessed=int(weight_bytes + act_bytes))
    # Weights are fetched once (constant index map); leave headroom for the
    # per-step activation buffers.  Capped at v7x's 64 MiB physical VMEM.
    vmem_limit = int(min(64 * 2 ** 20,
                         max(32 * 2 ** 20,
                             3 * weight_bytes + 8 * act_bytes + (4 << 20))))

    # TODO(synk): on single-TC chips (v5e/v6e) folding the whole batch into one
    # grid step (block (B, T, D)) would fill the MXU better at small T; grid=(B,)
    # is kept so v7x's two TensorCores each take a batch element.
    # TODO(synk): for very small T/B, fusing 2+ encoder layers per pallas_call
    # would amortize per-call prologue overhead further.
    return pl.pallas_call(
        kernel,
        out_shape=jax.ShapeDtypeStruct((B, T, D), jnp.bfloat16),
        grid=(B,),
        in_specs=[pl.BlockSpec((1, T, D), lambda b: (b, 0, 0)),     # activations
                  pl.BlockSpec((H, P_pad, dk), lambda b: (0, 0, 0)),  # pos @ W_pos
                  pl.BlockSpec((1, 1, T), lambda b: (b, 0, 0)),     # source mask
                  pl.BlockSpec((D, WD), lambda b: (0, 0)),          # bf16 slab (D, *)
                  pl.BlockSpec((U, 2 * D), lambda b: (0, 0)),       # bf16 slab (U, 2D)
                  pl.BlockSpec((1, VT), lambda b: (0, 0)),          # f32 vector slab
                  pl.BlockSpec((K, D), lambda b: (0, 0))],          # depthwise filter
        out_specs=pl.BlockSpec((1, T, D), lambda b: (b, 0, 0)),
        compiler_params=pltpu.CompilerParams(
            dimension_semantics=("parallel",),
            vmem_limit_bytes=vmem_limit),
        cost_estimate=cost,
    )(x, p3, mask_i, lp["w_d"], lp["w_u"], lp["vec"], lp["dw_w"])


# ---------------------------------- glue --------------------------------------

def rel_positional_encoding(T, D):
    # StreamingRelPositionalEncoding: sinusoids for relative positions T-1 .. -(T-1).
    pos = jnp.arange(T - 1, -T, -1, dtype=jnp.float32)                 # (2T-1,)
    div = jnp.exp(jnp.arange(0, D, 2, dtype=jnp.float32) * -(math.log(10000.0) / D))
    ang = pos[:, None] * div[None, :]
    pe = jnp.zeros((2 * T - 1, D), jnp.float32)
    pe = pe.at[:, 0::2].set(jnp.sin(ang))
    pe = pe.at[:, 1::2].set(jnp.cos(ang))
    return pe                                                          # (2T-1, D)


def conformer_chunk_encoder_forward(x, x_len, params, *, attention_heads):
    """ConformerChunkEncoder.forward, default path (no dynamic chunking).
    Dropout is identity (eval mode)."""
    B, T_in, F = x.shape
    Fp, D = params["embed_w"].shape
    H = attention_heads
    dk = D // H
    # make_source_mask: True at padded frames.
    mask = jnp.arange(T_in, dtype=jnp.int32)[None, :] >= x_len[:, None]   # (B, T)
    xp = _bf16(jnp.pad(x, ((0, 0), (0, 0), (0, Fp - F))))                 # lane-pad F
    h = embed_linear(xp, params["embed_w"], params["embed_b"])            # (B, T, D) bf16
    T = h.shape[1]
    mask_i = mask.astype(jnp.int32).reshape(B, 1, T)

    P = 2 * T - 1
    P_pad = ((P + 127) // 128) * 128          # lane aligned; padded rows stay zero
    pe = jnp.pad(rel_positional_encoding(T, D), ((0, P_pad - P), (0, 0)))

    n_layers = len(params["layers"])
    for li, lp in enumerate(params["layers"]):                            # ChunkEncoderLayer x N
        # pos @ W_pos is batch-invariant: hoisted out of the kernel and pre-split
        # per head so the kernel indexes heads on the (free) leading axis.
        p_proj = jnp.dot(_bf16(pe), lp["wp"], preferred_element_type=jnp.float32)
        p3 = _bf16(p_proj.reshape(P_pad, H, dk).transpose(1, 0, 2))       # (H, P_pad, dk)
        h = encoder_layer(h, p3, mask_i, lp, n_heads=H,
                          apply_out_norm=(li == n_layers - 1))
    olens = jnp.sum(jnp.logical_not(mask), axis=1).astype(jnp.int32)      # mask.eq(0).sum(1)
    # time_reduction_factor == 1 -> no output subsampling.
    # TODO(synk): dynamic_chunk_training / unified_model_training branches not implemented.
    return h.astype(jnp.float32), olens, None


def init_params(key, input_size, output_size, attention_heads, linear_units,
                num_blocks, cnn_kernel):
    D, U, K = output_size, linear_units, cnn_kernel
    assert D % 128 == 0 and U % 128 == 0, "packed slab offsets must be lane-aligned"
    assert D % attention_heads == 0 and (D // attention_heads) % 8 == 0
    Fp = ((input_size + 127) // 128) * 128
    keys = iter(jax.random.split(key, 4096))

    def wnrm(shape, scale=0.05):            # matmul weights stored in bf16
        return (scale * jax.random.normal(next(keys), shape)).astype(jnp.bfloat16)

    def fnrm(shape, scale=0.05):            # elementwise params stay f32
        return (scale * jax.random.normal(next(keys), shape)).astype(jnp.float32)

    ones = lambda n: jnp.ones((n,), jnp.float32)
    zeros = lambda n: jnp.zeros((n,), jnp.float32)

    embed_w = jnp.zeros((Fp, D), jnp.bfloat16).at[:input_size, :].set(
        wnrm((input_size, D), 0.1))
    params = {"embed_w": embed_w,
              "embed_b": jnp.zeros((1, D), jnp.float32),
              "layers": []}

    wd_off, wd_total = _wd_layout(D, U)
    vec_off, vec_total = _vec_layout(D, U)

    for _ in range(num_blocks):
        wd_pieces = {"mac_w1": wnrm((D, U)), "qkv_w": wnrm((D, 3 * D)),
                     "wo": wnrm((D, D)), "pw1_w": wnrm((D, 2 * D)),
                     "pw2_w": wnrm((D, D)), "ff_w1": wnrm((D, U))}
        vec_pieces = {
            "mac_ln_g": ones(D), "mac_ln_b": zeros(D), "mac_b1": zeros(U), "mac_b2": zeros(D),
            "att_ln_g": ones(D), "att_ln_b": zeros(D), "qkv_b": zeros(3 * D),
            "pos_u": fnrm((D,)), "pos_v": fnrm((D,)), "att_bo": zeros(D),
            "cv_ln_g": ones(D), "cv_ln_b": zeros(D), "pw1_b": zeros(2 * D), "dw_b": zeros(D),
            "bn_g": ones(D), "bn_b": zeros(D), "bn_m": zeros(D), "bn_v": ones(D),
            "pw2_b": zeros(D),
            "ff_ln_g": ones(D), "ff_ln_b": zeros(D), "ff_b1": zeros(U), "ff_b2": zeros(D),
            "nf_g": ones(D), "nf_b": zeros(D), "out_g": ones(D), "out_b": zeros(D),
        }
        w_d = jnp.concatenate([wd_pieces[n] for n in wd_off], axis=1)
        assert w_d.shape == (D, wd_total)
        w_u = jnp.concatenate([wnrm((U, D)), wnrm((U, D))], axis=1)   # [mac_w2 | ff_w2]
        vec = jnp.concatenate([vec_pieces[n] for n in vec_off],
                              axis=0).reshape(1, vec_total)
        layer = {"w_d": w_d, "w_u": w_u, "vec": vec,
                 "dw_w": fnrm((K, D)), "wp": wnrm((D, D))}
        params["layers"].append(layer)
    return params


if __name__ == "__main__":
    key = jax.random.PRNGKey(0)
    kx, kp = jax.random.split(key)

    B, T, F = 2, 32, 80                   # batch, frames, input feature dim
    D, H, U, K, NB = 128, 4, 256, 7, 2    # output_size, heads, linear_units, cnn kernel, blocks

    x = jax.random.normal(kx, (B, T, F), dtype=jnp.float32)
    x_len = jnp.array([32, 25], dtype=jnp.int32)

    params = init_params(kp, input_size=F, output_size=D, attention_heads=H,
                         linear_units=U, num_blocks=NB, cnn_kernel=K)

    fwd = jax.jit(functools.partial(conformer_chunk_encoder_forward,
                                    attention_heads=H))
    y, olens, _ = fwd(x, x_len, params)
    jax.block_until_ready((y, olens))
    assert y.shape == (B, T, D) and olens.shape == (B,)
    print("KERNEL_OK")
</pallas_src>

<mosaic_0001>
module attributes {stable_mosaic.version = 11 : i64} {
  func.func @_embed_kernel(%arg0: i32, %arg1: memref<64x128xbf16, #tpu.memory_space<vmem>>, %arg2: memref<128x128xbf16, #tpu.memory_space<vmem>>, %arg3: memref<1x128xf32, #tpu.memory_space<vmem>>, %arg4: memref<64x128xbf16, #tpu.memory_space<vmem>>) attributes {dimension_semantics = [#tpu.dimension_semantics<parallel>], iteration_bounds = array<i64: 1>, scalar_prefetch = 0 : i64, scratch_operands = 0 : i64, tpu.core_type = #tpu.core_type<tc>, window_params = [{transform_indices = @transform_0, window_bounds = array<i64: 64, 128>}, {pipeline_mode = #tpu.pipeline_mode<synchronous>, transform_indices = @transform_1, window_bounds = array<i64: 128, 128>}, {pipeline_mode = #tpu.pipeline_mode<synchronous>, transform_indices = @transform_2, window_bounds = array<i64: 1, 128>}, {transform_indices = @transform_3, window_bounds = array<i64: 64, 128>}]} {
    %c0 = arith.constant 0 : index
    %c0_0 = arith.constant 0 : index
    %0 = vector.load %arg1[%c0, %c0_0] : memref<64x128xbf16, #tpu.memory_space<vmem>>, vector<64x128xbf16>
    %c0_1 = arith.constant 0 : index
    %c0_2 = arith.constant 0 : index
    %1 = vector.load %arg2[%c0_1, %c0_2] : memref<128x128xbf16, #tpu.memory_space<vmem>>, vector<128x128xbf16>
    %cst = arith.constant dense<0.000000e+00> : vector<64x128xf32>
    %2 = tpu.matmul %0, %1, %cst {dimension_numbers = #tpu.dot_dimension_numbers<[1], [0], [0], [1], [0, 0, 1, 1], [], []>} : vector<64x128xbf16>, vector<128x128xbf16>, vector<64x128xf32> -> vector<64x128xf32>
    %c0_3 = arith.constant 0 : index
    %c0_4 = arith.constant 0 : index
    %3 = vector.load %arg3[%c0_3, %c0_4] : memref<1x128xf32, #tpu.memory_space<vmem>>, vector<1x128xf32>
    %4 = vector.broadcast %3 : vector<1x128xf32> to vector<64x128xf32>
    %5 = arith.addf %2, %4 : vector<64x128xf32>
    %6 = arith.truncf %5 : vector<64x128xf32> to vector<64x128xbf16>
    %c0_5 = arith.constant 0 : index
    %c0_6 = arith.constant 0 : index
    %7 = vector.load %arg4[%c0_5, %c0_6] : memref<64x128xbf16, #tpu.memory_space<vmem>>, vector<64x128xbf16>
    tpu.vector_store %arg4[%c0_5, %c0_6], %6 {strides = array<i32>} : memref<64x128xbf16, #tpu.memory_space<vmem>>, vector<64x128xbf16>,
    return
  }
  func.func @transform_0(%arg0: i32) -> (i32, i32) {
    %c0_i32 = arith.constant 0 : i32
    %c0_i32_0 = arith.constant 0 : i32
    return %arg0, %c0_i32 : i32, i32
  }
  func.func @transform_1(%arg0: i32) -> (i32, i32) {
    %c0_i32 = arith.constant 0 : i32
    %c0_i32_0 = arith.constant 0 : i32
    %c0_i32_1 = arith.constant 0 : i32
    return %c0_i32, %c0_i32_0 : i32, i32
  }
  func.func @transform_2(%arg0: i32) -> (i32, i32) {
    %c0_i32 = arith.constant 0 : i32
    %c0_i32_0 = arith.constant 0 : i32
    %c0_i32_1 = arith.constant 0 : i32
    return %c0_i32, %c0_i32_0 : i32, i32
  }
  func.func @transform_3(%arg0: i32) -> (i32, i32) {
    %c0_i32 = arith.constant 0 : i32
    %c0_i32_0 = arith.constant 0 : i32
    return %arg0, %c0_i32 : i32, i32
  }
}

module attributes {stable_mosaic.version = 11 : i64} {
  func.func @_layer_kernel(%arg0: i32, %arg1: memref<1x32x128xbf16, #tpu.memory_space<vmem>>, %arg2: memref<4x128x32xbf16, #tpu.memory_space<vmem>>, %arg3: memref<1x1x32xi32, #tpu.memory_space<vmem>>, %arg4: memref<128x1408xbf16, #tpu.memory_space<vmem>>, %arg5: memref<256x256xbf16, #tpu.memory_space<vmem>>, %arg6: memref<1x4096xf32, #tpu.memory_space<vmem>>, %arg7: memref<7x128xf32, #tpu.memory_space<vmem>>, %arg8: memref<1x32x128xbf16, #tpu.memory_space<vmem>>) attributes {dimension_semantics = [#tpu.dimension_semantics<parallel>], iteration_bounds = array<i64: 2>, scalar_prefetch = 0 : i64, scratch_operands = 0 : i64, tpu.core_type = #tpu.core_type<tc>, window_params = [{transform_indices = @transform_0, window_bounds = array<i64: 1, 32, 128>}, {pipeline_mode = #tpu.pipeline_mode<synchronous>, transform_indices = @transform_1, window_bounds = array<i64: 4, 128, 32>}, {transform_indices = @transform_2, window_bounds = array<i64: 1, 1, 32>}, {pipeline_mode = #tpu.pipeline_mode<synchronous>, transform_indices = @transform_3, window_bounds = array<i64: 128, 1408>}, {pipeline_mode = #tpu.pipeline_mode<synchronous>, transform_indices = @transform_4, window_bounds = array<i64: 256, 256>}, {pipeline_mode = #tpu.pipeline_mode<synchronous>, transform_indices = @transform_5, window_bounds = array<i64: 1, 4096>}, {pipeline_mode = #tpu.pipeline_mode<synchronous>, transform_indices = @transform_6, window_bounds = array<i64: 7, 128>}, {transform_indices = @transform_7, window_bounds = array<i64: 1, 32, 128>}]} {
    %c0 = arith.constant 0 : index
    %c0_0 = arith.constant 0 : index
    %c0_1 = arith.constant 0 : index
    %0 = vector.load %arg1[%c0, %c0_0, %c0_1] : memref<1x32x128xbf16, #tpu.memory_space<vmem>>, vector<1x32x128xbf16>
    %1 = vector.shape_cast %0 : vector<1x32x128xbf16> to vector<32x128xbf16>
    %2 = arith.extf %1 : vector<32x128xbf16> to vector<32x128xf32>
    %c0_2 = arith.constant 0 : index
    %c0_3 = arith.constant 0 : index
    %3 = vector.load %arg6[%c0_2, %c0_3] : memref<1x4096xf32, #tpu.memory_space<vmem>>, vector<1x128xf32>
    %c0_4 = arith.constant 0 : index
    %c128 = arith.constant 128 : index
    %4 = vector.load %arg6[%c0_4, %c128] : memref<1x4096xf32, #tpu.memory_space<vmem>>, vector<1x128xf32>
    %c0_5 = arith.constant 0 : index
    %c0_6 = arith.constant 0 : index
    %5 = vector.load %arg4[%c0_5, %c0_6] : memref<128x1408xbf16, #tpu.memory_space<vmem>>, vector<128x256xbf16>
    %c0_7 = arith.constant 0 : index
    %c256 = arith.constant 256 : index
    %6 = vector.load %arg6[%c0_7, %c256] : memref<1x4096xf32, #tpu.memory_space<vmem>>, vector<1x256xf32>
    %c0_8 = arith.constant 0 : index
    %c0_9 = arith.constant 0 : index
    %7 = vector.load %arg5[%c0_8, %c0_9] : memref<256x256xbf16, #tpu.memory_space<vmem>>, vector<256x128xbf16>
    %c0_10 = arith.constant 0 : index
    %c512 = arith.constant 512 : index
    %8 = vector.load %arg6[%c0_10, %c512] : memref<1x4096xf32, #tpu.memory_space<vmem>>, vector<1x128xf32>
    %cst = arith.constant dense<0.000000e+00> : vector<32xf32>
    %9 = vector.multi_reduction <add>, %2, %cst [1] : vector<32x128xf32> to vector<32xf32>
    %10 = vector.shape_cast %9 : vector<32xf32> to vector<32x1xf32>
    %cst_11 = arith.constant 1.280000e+02 : f32
    %11 = vector.broadcast %cst_11 : f32 to vector<32x1xf32>
    %12 = arith.divf %10, %11 : vector<32x1xf32>
    %13 = vector.broadcast %12 : vector<32x1xf32> to vector<32x128xf32>
    %14 = arith.subf %2, %13 : vector<32x128xf32>
    %15 = arith.mulf %14, %14 : vector<32x128xf32>
    %cst_12 = arith.constant dense<0.000000e+00> : vector<32xf32>
    %16 = vector.multi_reduction <add>, %15, %cst_12 [1] : vector<32x128xf32> to vector<32xf32>
    %17 = vector.shape_cast %16 : vector<32xf32> to vector<32x1xf32>
    %cst_13 = arith.constant 1.280000e+02 : f32
    %18 = vector.broadcast %cst_13 : f32 to vector<32x1xf32>
    %19 = arith.divf %17, %18 : vector<32x1xf32>
    %20 = vector.broadcast %12 : vector<32x1xf32> to vector<32x128xf32>
    %21 = arith.subf %2, %20 : vector<32x128xf32>
    %cst_14 = arith.constant 9.99999996E-13 : f32
    %22 = vector.broadcast %cst_14 : f32 to vector<32x1xf32>
    %23 = arith.addf %19, %22 : vector<32x1xf32>
    %24 = math.rsqrt %23 : vector<32x1xf32>
    %25 = vector.broadcast %24 : vector<32x1xf32> to vector<32x128xf32>
    %26 = arith.mulf %21, %25 : vector<32x128xf32>
    %27 = vector.broadcast %3 : vector<1x128xf32> to vector<32x128xf32>
    %28 = arith.mulf %26, %27 : vector<32x128xf32>
    %29 = vector.broadcast %4 : vector<1x128xf32> to vector<32x128xf32>
    %30 = arith.addf %28, %29 : vector<32x128xf32>
    %31 = arith.truncf %30 : vector<32x128xf32> to vector<32x128xbf16>
    %cst_15 = arith.constant dense<0.000000e+00> : vector<32x256xf32>
    %32 = tpu.matmul %31, %5, %cst_15 {dimension_numbers = #tpu.dot_dimension_numbers<[1], [0], [0], [1], [0, 0, 1, 1], [], []>} : vector<32x128xbf16>, vector<128x256xbf16>, vector<32x256xf32> -> vector<32x256xf32>
    %33 = vector.broadcast %6 : vector<1x256xf32> to vector<32x256xf32>
    %34 = arith.addf %32, %33 : vector<32x256xf32>
    %35 = arith.negf %34 : vector<32x256xf32>
    %36 = math.exp %35 : vector<32x256xf32>
    %cst_16 = arith.constant 1.000000e+00 : f32
    %37 = vector.broadcast %cst_16 : f32 to vector<32x256xf32>
    %38 = arith.addf %37, %36 : vector<32x256xf32>
    %39 = arith.divf %37, %38 : vector<32x256xf32>
    %40 = arith.mulf %34, %39 : vector<32x256xf32>
    %41 = arith.truncf %40 : vector<32x256xf32> to vector<32x256xbf16>
    %cst_17 = arith.constant dense<0.000000e+00> : vector<32x128xf32>
    %42 = tpu.matmul %41, %7, %cst_17 {dimension_numbers = #tpu.dot_dimension_numbers<[1], [0], [0], [1], [0, 0, 1, 1], [], []>} : vector<32x256xbf16>, vector<256x128xbf16>, vector<32x128xf32> -> vector<32x128xf32>
    %43 = vector.broadcast %8 : vector<1x128xf32> to vector<32x128xf32>
    %44 = arith.addf %42, %43 : vector<32x128xf32>
    %cst_18 = arith.constant 5.000000e-01 : f32
    %45 = vector.broadcast %cst_18 : f32 to vector<32x128xf32>
    %46 = arith.mulf %45, %44 : vector<32x128xf32>
    %47 = arith.addf %2, %46 : vector<32x128xf32>
    %c0_19 = arith.constant 0 : index
    %c640 = arith.constant 640 : index
    %48 = vector.load %arg6[%c0_19, %c640] : memref<1x4096xf32, #tpu.memory_space<vmem>>, vector<1x128xf32>
    %c0_20 = arith.constant 0 : index
    %c768 = arith.constant 768 : index
    %49 = vector.load %arg6[%c0_20, %c768] : memref<1x4096xf32, #tpu.memory_space<vmem>>, vector<1x128xf32>
    %cst_21 = arith.constant dense<0.000000e+00> : vector<32xf32>
    %50 = vector.multi_reduction <add>, %47, %cst_21 [1] : vector<32x128xf32> to vector<32xf32>
    %51 = vector.shape_cast %50 : vector<32xf32> to vector<32x1xf32>
    %cst_22 = arith.constant 1.280000e+02 : f32
    %52 = vector.broadcast %cst_22 : f32 to vector<32x1xf32>
    %53 = arith.divf %51, %52 : vector<32x1xf32>
    %54 = vector.broadcast %53 : vector<32x1xf32> to vector<32x128xf32>
    %55 = arith.subf %47, %54 : vector<32x128xf32>
    %56 = arith.mulf %55, %55 : vector<32x128xf32>
    %cst_23 = arith.constant dense<0.000000e+00> : vector<32xf32>
    %57 = vector.multi_reduction <add>, %56, %cst_23 [1] : vector<32x128xf32> to vector<32xf32>
    %58 = vector.shape_cast %57 : vector<32xf32> to vector<32x1xf32>
    %cst_24 = arith.constant 1.280000e+02 : f32
    %59 = vector.broadcast %cst_24 : f32 to vector<32x1xf32>
    %60 = arith.divf %58, %59 : vector<32x1xf32>
    %61 = vector.broadcast %53 : vector<32x1xf32> to vector<32x128xf32>
    %62 = arith.subf %47, %61 : vector<32x128xf32>
    %cst_25 = arith.constant 9.99999996E-13 : f32
    %63 = vector.broadcast %cst_25 : f32 to vector<32x1xf32>
    %64 = arith.addf %60, %63 : vector<32x1xf32>
    %65 = math.rsqrt %64 : vector<32x1xf32>
    %66 = vector.broadcast %65 : vector<32x1xf32> to vector<32x128xf32>
    %67 = arith.mulf %62, %66 : vector<32x128xf32>
    %68 = vector.broadcast %48 : vector<1x128xf32> to vector<32x128xf32>
    %69 = arith.mulf %67, %68 : vector<32x128xf32>
    %70 = vector.broadcast %49 : vector<1x128xf32> to vector<32x128xf32>
    %71 = arith.addf %69, %70 : vector<32x128xf32>
    %72 = arith.truncf %71 : vector<32x128xf32> to vector<32x128xbf16>
    %c0_26 = arith.constant 0 : index
    %c256_27 = arith.constant 256 : index
    %73 = vector.load %arg4[%c0_26, %c256_27] : memref<128x1408xbf16, #tpu.memory_space<vmem>>, vector<128x384xbf16>
    %cst_28 = arith.constant dense<0.000000e+00> : vector<32x384xf32>
    %74 = tpu.matmul %72, %73, %cst_28 {dimension_numbers = #tpu.dot_dimension_numbers<[1], [0], [0], [1], [0, 0, 1, 1], [], []>} : vector<32x128xbf16>, vector<128x384xbf16>, vector<32x384xf32> -> vector<32x384xf32>
    %c0_29 = arith.constant 0 : index
    %c896 = arith.constant 896 : index
    %75 = vector.load %arg6[%c0_29, %c896] : memref<1x4096xf32, #tpu.memory_space<vmem>>, vector<1x384xf32>
    %76 = vector.broadcast %75 : vector<1x384xf32> to vector<32x384xf32>
    %77 = arith.addf %74, %76 : vector<32x384xf32>
    %78 = vector.extract_strided_slice %77 {offsets = [0, 0], sizes = [32, 128], strides = [1, 1]} : vector<32x384xf32> to vector<32x128xf32>
    %c0_30 = arith.constant 0 : index
    %c1280 = arith.constant 1280 : index
    %79 = vector.load %arg6[%c0_30, %c1280] : memref<1x4096xf32, #tpu.memory_space<vmem>>, vector<1x128xf32>
    %80 = vector.broadcast %79 : vector<1x128xf32> to vector<32x128xf32>
    %81 = arith.addf %78, %80 : vector<32x128xf32>
    %82 = arith.truncf %81 : vector<32x128xf32> to vector<32x128xbf16>
    %c0_31 = arith.constant 0 : index
    %c1408 = arith.constant 1408 : index
    %83 = vector.load %arg6[%c0_31, %c1408] : memref<1x4096xf32, #tpu.memory_space<vmem>>, vector<1x128xf32>
    %84 = vector.broadcast %83 : vector<1x128xf32> to vector<32x128xf32>
    %85 = arith.addf %78, %84 : vector<32x128xf32>
    %86 = arith.truncf %85 : vector<32x128xf32> to vector<32x128xbf16>
    %87 = vector.extract_strided_slice %77 {offsets = [0, 128], sizes = [32, 128], strides = [1, 1]} : vector<32x384xf32> to vector<32x128xf32>
    %88 = arith.truncf %87 : vector<32x128xf32> to vector<32x128xbf16>
    %89 = vector.extract_strided_slice %77 {offsets = [0, 256], sizes = [32, 128], strides = [1, 1]} : vector<32x384xf32> to vector<32x128xf32>
    %90 = arith.truncf %89 : vector<32x128xf32> to vector<32x128xbf16>
    %c0_32 = arith.constant 0 : index
    %c640_33 = arith.constant 640 : index
    %91 = vector.load %arg4[%c0_32, %c640_33] : memref<128x1408xbf16, #tpu.memory_space<vmem>>, vector<128x128xbf16>
    %c0_34 = arith.constant 0 : index
    %c0_35 = arith.constant 0 : index
    %c0_36 = arith.constant 0 : index
    %92 = vector.load %arg3[%c0_34, %c0_35, %c0_36] : memref<1x1x32xi32, #tpu.memory_space<vmem>>, vector<1x1x32xi32>
    %93 = vector.shape_cast %92 : vector<1x1x32xi32> to vector<1x32xi32>
    %c0_i32 = arith.constant 0 : i32
    %94 = vector.broadcast %c0_i32 : i32 to vector<1x32xi32>
    %95 = arith.cmpi sgt, %93, %94 : vector<1x32xi32>
    %cst_37 = arith.constant -1.000000e+09 : f32
    %cst_38 = arith.constant 0.000000e+00 : f32
    %96 = vector.broadcast %cst_37 : f32 to vector<1x32xf32>
    %97 = vector.broadcast %cst_38 : f32 to vector<1x32xf32>
    %98 = arith.select %95, %96, %97 : vector<1x32xi1>, vector<1x32xf32>
    %c0_i32_39 = arith.constant 0 : i32
    %99 = vector.broadcast %c0_i32_39 : i32 to vector<1x32xi32>
    %100 = arith.cmpi sgt, %93, %99 : vector<1x32xi32>
    %cst_40 = arith.constant 0.000000e+00 : f32
    %cst_41 = arith.constant 1.000000e+00 : f32
    %101 = vector.broadcast %cst_40 : f32 to vector<1x32xf32>
    %102 = vector.broadcast %cst_41 : f32 to vector<1x32xf32>
    %103 = arith.select %100, %101, %102 : vector<1x32xi1>, vector<1x32xf32>
    %cst_42 = arith.constant 0.000000e+00 : f32
    %104 = vector.broadcast %cst_42 : f32 to vector<32x128xf32>
    %c0_43 = arith.constant 0 : index
    %c0_44 = arith.constant 0 : index
    %c0_45 = arith.constant 0 : index
    %105 = vector.load %arg2[%c0_43, %c0_44, %c0_45] : memref<4x128x32xbf16, #tpu.memory_space<vmem>>, vector<1x128x32xbf16>
    %106 = vector.shape_cast %105 : vector<1x128x32xbf16> to vector<128x32xbf16>
    %107 = vector.extract_strided_slice %82 {offsets = [0, 0], sizes = [32, 32], strides = [1, 1]} : vector<32x128xbf16> to vector<32x32xbf16>
    %108 = vector.extract_strided_slice %88 {offsets = [0, 0], sizes = [32, 32], strides = [1, 1]} : vector<32x128xbf16> to vector<32x32xbf16>
    %cst_46 = arith.constant dense<0.000000e+00> : vector<32x32xf32>
    %109 = tpu.matmul %107, %108, %cst_46 {dimension_numbers = #tpu.dot_dimension_numbers<[1], [1], [0], [0], [0, 0, 1, 0], [], []>} : vector<32x32xbf16>, vector<32x32xbf16>, vector<32x32xf32> -> vector<32x32xf32>
    %110 = vector.extract_strided_slice %86 {offsets = [0, 0], sizes = [32, 32], strides = [1, 1]} : vector<32x128xbf16> to vector<32x32xbf16>
    %cst_47 = arith.constant dense<0.000000e+00> : vector<32x128xf32>
    %111 = tpu.matmul %110, %106, %cst_47 {dimension_numbers = #tpu.dot_dimension_numbers<[1], [1], [0], [0], [0, 0, 1, 0], [], []>} : vector<32x32xbf16>, vector<128x32xbf16>, vector<32x128xf32> -> vector<32x128xf32>
    %c0_i32_48 = arith.constant 0 : i32
    %112 = tpu.dynamic_rotate %111 by %c0_i32_48 dim 1 {stride = 1 : si32, stride_dimension = 0 : si32} : vector<32x128xf32>, i32 -> vector<32x128xf32>
    %113 = vector.extract_strided_slice %112 {offsets = [0, 31], sizes = [32, 32], strides = [1, 1]} : vector<32x128xf32> to vector<32x32xf32>
    %114 = arith.addf %109, %113 : vector<32x32xf32>
    %cst_49 = arith.constant 0.176776692 : f32
    %115 = vector.broadcast %cst_49 : f32 to vector<32x32xf32>
    %116 = arith.mulf %114, %115 : vector<32x32xf32>
    %117 = vector.broadcast %98 : vector<1x32xf32> to vector<32x32xf32>
    %118 = arith.addf %116, %117 : vector<32x32xf32>
    %cst_50 = arith.constant dense<0xFF800000> : vector<32xf32>
    %119 = vector.multi_reduction <maximumf>, %118, %cst_50 [1] : vector<32x32xf32> to vector<32xf32>
    %120 = vector.shape_cast %119 : vector<32xf32> to vector<32x1xf32>
    %121 = vector.broadcast %120 : vector<32x1xf32> to vector<32x32xf32>
    %122 = arith.subf %118, %121 : vector<32x32xf32>
    %123 = math.exp %122 : vector<32x32xf32>
    %cst_51 = arith.constant dense<0.000000e+00> : vector<32xf32>
    %124 = vector.multi_reduction <add>, %123, %cst_51 [1] : vector<32x32xf32> to vector<32xf32>
    %125 = vector.shape_cast %124 : vector<32xf32> to vector<32x1xf32>
    %126 = tpu.reciprocal %125 {approx = true} : vector<32x1xf32> -> vector<32x1xf32>
    %127 = vector.broadcast %126 : vector<32x1xf32> to vector<32x32xf32>
    %128 = arith.mulf %123, %127 : vector<32x32xf32>
    %129 = vector.broadcast %103 : vector<1x32xf32> to vector<32x32xf32>
    %130 = arith.mulf %128, %129 : vector<32x32xf32>
    %131 = arith.truncf %130 : vector<32x32xf32> to vector<32x32xbf16>
    %132 = vector.extract_strided_slice %90 {offsets = [0, 0], sizes = [32, 32], strides = [1, 1]} : vector<32x128xbf16> to vector<32x32xbf16>
    %cst_52 = arith.constant dense<0.000000e+00> : vector<32x32xf32>
    %133 = tpu.matmul %131, %132, %cst_52 {dimension_numbers = #tpu.dot_dimension_numbers<[1], [0], [0], [1], [0, 0, 1, 1], [], []>} : vector<32x32xbf16>, vector<32x32xbf16>, vector<32x32xf32> -> vector<32x32xf32>
    %134 = arith.truncf %133 : vector<32x32xf32> to vector<32x32xbf16>
    %135 = vector.extract_strided_slice %91 {offsets = [0, 0], sizes = [32, 128], strides = [1, 1]} : vector<128x128xbf16> to vector<32x128xbf16>
    %cst_53 = arith.constant dense<0.000000e+00> : vector<32x128xf32>
    %136 = tpu.matmul %134, %135, %cst_53 {dimension_numbers = #tpu.dot_dimension_numbers<[1], [0], [0], [1], [0, 0, 1, 1], [], []>} : vector<32x32xbf16>, vector<32x128xbf16>, vector<32x128xf32> -> vector<32x128xf32>
    %137 = arith.addf %104, %136 : vector<32x128xf32>
    %c1 = arith.constant 1 : index
    %c0_54 = arith.constant 0 : index
    %c0_55 = arith.constant 0 : index
    %138 = vector.load %arg2[%c1, %c0_54, %c0_55] : memref<4x128x32xbf16, #tpu.memory_space<vmem>>, vector<1x128x32xbf16>
    %139 = vector.shape_cast %138 : vector<1x128x32xbf16> to vector<128x32xbf16>
    %140 = vector.extract_strided_slice %82 {offsets = [0, 32], sizes = [32, 32], strides = [1, 1]} : vector<32x128xbf16> to vector<32x32xbf16>
    %141 = vector.extract_strided_slice %88 {offsets = [0, 32], sizes = [32, 32], strides = [1, 1]} : vector<32x128xbf16> to vector<32x32xbf16>
    %cst_56 = arith.constant dense<0.000000e+00> : vector<32x32xf32>
    %142 = tpu.matmul %140, %141, %cst_56 {dimension_numbers = #tpu.dot_dimension_numbers<[1], [1], [0], [0], [0, 0, 1, 0], [], []>} : vector<32x32xbf16>, vector<32x32xbf16>, vector<32x32xf32> -> vector<32x32xf32>
    %143 = vector.extract_strided_slice %86 {offsets = [0, 32], sizes = [32, 32], strides = [1, 1]} : vector<32x128xbf16> to vector<32x32xbf16>
    %cst_57 = arith.constant dense<0.000000e+00> : vector<32x128xf32>
    %144 = tpu.matmul %143, %139, %cst_57 {dimension_numbers = #tpu.dot_dimension_numbers<[1], [1], [0], [0], [0, 0, 1, 0], [], []>} : vector<32x32xbf16>, vector<128x32xbf16>, vector<32x128xf32> -> vector<32x128xf32>
    %c0_i32_58 = arith.constant 0 : i32
    %145 = tpu.dynamic_rotate %144 by %c0_i32_58 dim 1 {stride = 1 : si32, stride_dimension = 0 : si32} : vector<32x128xf32>, i32 -> vector<32x128xf32>
    %146 = vector.extract_strided_slice %145 {offsets = [0, 31], sizes = [32, 32], strides = [1, 1]} : vector<32x128xf32> to vector<32x32xf32>
    %147 = arith.addf %142, %146 : vector<32x32xf32>
    %cst_59 = arith.constant 0.176776692 : f32
    %148 = vector.broadcast %cst_59 : f32 to vector<32x32xf32>
    %149 = arith.mulf %147, %148 : vector<32x32xf32>
    %150 = vector.broadcast %98 : vector<1x32xf32> to vector<32x32xf32>
    %151 = arith.addf %149, %150 : vector<32x32xf32>
    %cst_60 = arith.constant dense<0xFF800000> : vector<32xf32>
    %152 = vector.multi_reduction <maximumf>, %151, %cst_60 [1] : vector<32x32xf32> to vector<32xf32>
    %153 = vector.shape_cast %152 : vector<32xf32> to vector<32x1xf32>
    %154 = vector.broadcast %153 : vector<32x1xf32> to vector<32x32xf32>
    %155 = arith.subf %151, %154 : vector<32x32xf32>
    %156 = math.exp %155 : vector<32x32xf32>
    %cst_61 = arith.constant dense<0.000000e+00> : vector<32xf32>
    %157 = vector.multi_reduction <add>, %156, %cst_61 [1] : vector<32x32xf32> to vector<32xf32>
    %158 = vector.shape_cast %157 : vector<32xf32> to vector<32x1xf32>
    %159 = tpu.reciprocal %158 {approx = true} : vector<32x1xf32> -> vector<32x1xf32>
    %160 = vector.broadcast %159 : vector<32x1xf32> to vector<32x32xf32>
    %161 = arith.mulf %156, %160 : vector<32x32xf32>
    %162 = vector.broadcast %103 : vector<1x32xf32> to vector<32x32xf32>
    %163 = arith.mulf %161, %162 : vector<32x32xf32>
    %164 = arith.truncf %163 : vector<32x32xf32> to vector<32x32xbf16>
    %165 = vector.extract_strided_slice %90 {offsets = [0, 32], sizes = [32, 32], strides = [1, 1]} : vector<32x128xbf16> to vector<32x32xbf16>
    %cst_62 = arith.constant dense<0.000000e+00> : vector<32x32xf32>
    %166 = tpu.matmul %164, %165, %cst_62 {dimension_numbers = #tpu.dot_dimension_numbers<[1], [0], [0], [1], [0, 0, 1, 1], [], []>} : vector<32x32xbf16>, vector<32x32xbf16>, vector<32x32xf32> -> vector<32x32xf32>
    %167 = arith.truncf %166 : vector<32x32xf32> to vector<32x32xbf16>
    %168 = vector.extract_strided_slice %91 {offsets = [32, 0], sizes = [32, 128], strides = [1, 1]} : vector<128x128xbf16> to vector<32x128xbf16>
    %cst_63 = arith.constant dense<0.000000e+00> : vector<32x128xf32>
    %169 = tpu.matmul %167, %168, %cst_63 {dimension_numbers = #tpu.dot_dimension_numbers<[1], [0], [0], [1], [0, 0, 1, 1], [], []>} : vector<32x32xbf16>, vector<32x128xbf16>, vector<32x128xf32> -> vector<32x128xf32>
    %170 = arith.addf %137, %169 : vector<32x128xf32>
    %c2 = arith.constant 2 : index
    %c0_64 = arith.constant 0 : index
    %c0_65 = arith.constant 0 : index
    %171 = vector.load %arg2[%c2, %c0_64, %c0_65] : memref<4x128x32xbf16, #tpu.memory_space<vmem>>, vector<1x128x32xbf16>
    %172 = vector.shape_cast %171 : vector<1x128x32xbf16> to vector<128x32xbf16>
    %173 = vector.extract_strided_slice %82 {offsets = [0, 64], sizes = [32, 32], strides = [1, 1]} : vector<32x128xbf16> to vector<32x32xbf16>
    %174 = vector.extract_strided_slice %88 {offsets = [0, 64], sizes = [32, 32], strides = [1, 1]} : vector<32x128xbf16> to vector<32x32xbf16>
    %cst_66 = arith.constant dense<0.000000e+00> : vector<32x32xf32>
    %175 = tpu.matmul %173, %174, %cst_66 {dimension_numbers = #tpu.dot_dimension_numbers<[1], [1], [0], [0], [0, 0, 1, 0], [], []>} : vector<32x32xbf16>, vector<32x32xbf16>, vector<32x32xf32> -> vector<32x32xf32>
    %176 = vector.extract_strided_slice %86 {offsets = [0, 64], sizes = [32, 32], strides = [1, 1]} : vector<32x128xbf16> to vector<32x32xbf16>
    %cst_67 = arith.constant dense<0.000000e+00> : vector<32x128xf32>
    %177 = tpu.matmul %176, %172, %cst_67 {dimension_numbers = #tpu.dot_dimension_numbers<[1], [1], [0], [0], [0, 0, 1, 0], [], []>} : vector<32x32xbf16>, vector<128x32xbf16>, vector<32x128xf32> -> vector<32x128xf32>
    %c0_i32_68 = arith.constant 0 : i32
    %178 = tpu.dynamic_rotate %177 by %c0_i32_68 dim 1 {stride = 1 : si32, stride_dimension = 0 : si32} : vector<32x128xf32>, i32 -> vector<32x128xf32>
    %179 = vector.extract_strided_slice %178 {offsets = [0, 31], sizes = [32, 32], strides = [1, 1]} : vector<32x128xf32> to vector<32x32xf32>
    %180 = arith.addf %175, %179 : vector<32x32xf32>
    %cst_69 = arith.constant 0.176776692 : f32
    %181 = vector.broadcast %cst_69 : f32 to vector<32x32xf32>
    %182 = arith.mulf %180, %181 : vector<32x32xf32>
    %183 = vector.broadcast %98 : vector<1x32xf32> to vector<32x32xf32>
    %184 = arith.addf %182, %183 : vector<32x32xf32>
    %cst_70 = arith.constant dense<0xFF800000> : vector<32xf32>
    %185 = vector.multi_reduction <maximumf>, %184, %cst_70 [1] : vector<32x32xf32> to vector<32xf32>
    %186 = vector.shape_cast %185 : vector<32xf32> to vector<32x1xf32>
    %187 = vector.broadcast %186 : vector<32x1xf32> to vector<32x32xf32>
    %188 = arith.subf %184, %187 : vector<32x32xf32>
    %189 = math.exp %188 : vector<32x32xf32>
    %cst_71 = arith.constant dense<0.000000e+00> : vector<32xf32>
    %190 = vector.multi_reduction <add>, %189, %cst_71 [1] : vector<32x32xf32> to vector<32xf32>
    %191 = vector.shape_cast %190 : vector<32xf32> to vector<32x1xf32>
    %192 = tpu.reciprocal %191 {approx = true} : vector<32x1xf32> -> vector<32x1xf32>
    %193 = vector.broadcast %192 : vector<32x1xf32> to vector<32x32xf32>
    %194 = arith.mulf %189, %193 : vector<32x32xf32>
    %195 = vector.broadcast %103 : vector<1x32xf32> to vector<32x32xf32>
    %196 = arith.mulf %194, %195 : vector<32x32xf32>
    %197 = arith.truncf %196 : vector<32x32xf32> to vector<32x32xbf16>
    %198 = vector.extract_strided_slice %90 {offsets = [0, 64], sizes = [32, 32], strides = [1, 1]} : vector<32x128xbf16> to vector<32x32xbf16>
    %cst_72 = arith.constant dense<0.000000e+00> : vector<32x32xf32>
    %199 = tpu.matmul %197, %198, %cst_72 {dimension_numbers = #tpu.dot_dimension_numbers<[1], [0], [0], [1], [0, 0, 1, 1], [], []>} : vector<32x32xbf16>, vector<32x32xbf16>, vector<32x32xf32> -> vector<32x32xf32>
    %200 = arith.truncf %199 : vector<32x32xf32> to vector<32x32xbf16>
    %201 = vector.extract_strided_slice %91 {offsets = [64, 0], sizes = [32, 128], strides = [1, 1]} : vector<128x128xbf16> to vector<32x128xbf16>
    %cst_73 = arith.constant dense<0.000000e+00> : vector<32x128xf32>
    %202 = tpu.matmul %200, %201, %cst_73 {dimension_numbers = #tpu.dot_dimension_numbers<[1], [0], [0], [1], [0, 0, 1, 1], [], []>} : vector<32x32xbf16>, vector<32x128xbf16>, vector<32x128xf32> -> vector<32x128xf32>
    %203 = arith.addf %170, %202 : vector<32x128xf32>
    %c3 = arith.constant 3 : index
    %c0_74 = arith.constant 0 : index
    %c0_75 = arith.constant 0 : index
    %204 = vector.load %arg2[%c3, %c0_74, %c0_75] : memref<4x128x32xbf16, #tpu.memory_space<vmem>>, vector<1x128x32xbf16>
    %205 = vector.shape_cast %204 : vector<1x128x32xbf16> to vector<128x32xbf16>
    %206 = vector.extract_strided_slice %82 {offsets = [0, 96], sizes = [32, 32], strides = [1, 1]} : vector<32x128xbf16> to vector<32x32xbf16>
    %207 = vector.extract_strided_slice %88 {offsets = [0, 96], sizes = [32, 32], strides = [1, 1]} : vector<32x128xbf16> to vector<32x32xbf16>
    %cst_76 = arith.constant dense<0.000000e+00> : vector<32x32xf32>
    %208 = tpu.matmul %206, %207, %cst_76 {dimension_numbers = #tpu.dot_dimension_numbers<[1], [1], [0], [0], [0, 0, 1, 0], [], []>} : vector<32x32xbf16>, vector<32x32xbf16>, vector<32x32xf32> -> vector<32x32xf32>
    %209 = vector.extract_strided_slice %86 {offsets = [0, 96], sizes = [32, 32], strides = [1, 1]} : vector<32x128xbf16> to vector<32x32xbf16>
    %cst_77 = arith.constant dense<0.000000e+00> : vector<32x128xf32>
    %210 = tpu.matmul %209, %205, %cst_77 {dimension_numbers = #tpu.dot_dimension_numbers<[1], [1], [0], [0], [0, 0, 1, 0], [], []>} : vector<32x32xbf16>, vector<128x32xbf16>, vector<32x128xf32> -> vector<32x128xf32>
    %c0_i32_78 = arith.constant 0 : i32
    %211 = tpu.dynamic_rotate %210 by %c0_i32_78 dim 1 {stride = 1 : si32, stride_dimension = 0 : si32} : vector<32x128xf32>, i32 -> vector<32x128xf32>
    %212 = vector.extract_strided_slice %211 {offsets = [0, 31], sizes = [32, 32], strides = [1, 1]} : vector<32x128xf32> to vector<32x32xf32>
    %213 = arith.addf %208, %212 : vector<32x32xf32>
    %cst_79 = arith.constant 0.176776692 : f32
    %214 = vector.broadcast %cst_79 : f32 to vector<32x32xf32>
    %215 = arith.mulf %213, %214 : vector<32x32xf32>
    %216 = vector.broadcast %98 : vector<1x32xf32> to vector<32x32xf32>
    %217 = arith.addf %215, %216 : vector<32x32xf32>
    %cst_80 = arith.constant dense<0xFF800000> : vector<32xf32>
    %218 = vector.multi_reduction <maximumf>, %217, %cst_80 [1] : vector<32x32xf32> to vector<32xf32>
    %219 = vector.shape_cast %218 : vector<32xf32> to vector<32x1xf32>
    %220 = vector.broadcast %219 : vector<32x1xf32> to vector<32x32xf32>
    %221 = arith.subf %217, %220 : vector<32x32xf32>
    %222 = math.exp %221 : vector<32x32xf32>
    %cst_81 = arith.constant dense<0.000000e+00> : vector<32xf32>
    %223 = vector.multi_reduction <add>, %222, %cst_81 [1] : vector<32x32xf32> to vector<32xf32>
    %224 = vector.shape_cast %223 : vector<32xf32> to vector<32x1xf32>
    %225 = tpu.reciprocal %224 {approx = true} : vector<32x1xf32> -> vector<32x1xf32>
    %226 = vector.broadcast %225 : vector<32x1xf32> to vector<32x32xf32>
    %227 = arith.mulf %222, %226 : vector<32x32xf32>
    %228 = vector.broadcast %103 : vector<1x32xf32> to vector<32x32xf32>
    %229 = arith.mulf %227, %228 : vector<32x32xf32>
    %230 = arith.truncf %229 : vector<32x32xf32> to vector<32x32xbf16>
    %231 = vector.extract_strided_slice %90 {offsets = [0, 96], sizes = [32, 32], strides = [1, 1]} : vector<32x128xbf16> to vector<32x32xbf16>
    %cst_82 = arith.constant dense<0.000000e+00> : vector<32x32xf32>
    %232 = tpu.matmul %230, %231, %cst_82 {dimension_numbers = #tpu.dot_dimension_numbers<[1], [0], [0], [1], [0, 0, 1, 1], [], []>} : vector<32x32xbf16>, vector<32x32xbf16>, vector<32x32xf32> -> vector<32x32xf32>
    %233 = arith.truncf %232 : vector<32x32xf32> to vector<32x32xbf16>
    %234 = vector.extract_strided_slice %91 {offsets = [96, 0], sizes = [32, 128], strides = [1, 1]} : vector<128x128xbf16> to vector<32x128xbf16>
    %cst_83 = arith.constant dense<0.000000e+00> : vector<32x128xf32>
    %235 = tpu.matmul %233, %234, %cst_83 {dimension_numbers = #tpu.dot_dimension_numbers<[1], [0], [0], [1], [0, 0, 1, 1], [], []>} : vector<32x32xbf16>, vector<32x128xbf16>, vector<32x128xf32> -> vector<32x128xf32>
    %236 = arith.addf %203, %235 : vector<32x128xf32>
    %237 = arith.addf %47, %236 : vector<32x128xf32>
    %c0_84 = arith.constant 0 : index
    %c1536 = arith.constant 1536 : index
    %238 = vector.load %arg6[%c0_84, %c1536] : memref<1x4096xf32, #tpu.memory_space<vmem>>, vector<1x128xf32>
    %239 = vector.broadcast %238 : vector<1x128xf32> to vector<32x128xf32>
    %240 = arith.addf %237, %239 : vector<32x128xf32>
    %c0_85 = arith.constant 0 : index
    %c1664 = arith.constant 1664 : index
    %241 = vector.load %arg6[%c0_85, %c1664] : memref<1x4096xf32, #tpu.memory_space<vmem>>, vector<1x128xf32>
    %c0_86 = arith.constant 0 : index
    %c1792 = arith.constant 1792 : index
    %242 = vector.load %arg6[%c0_86, %c1792] : memref<1x4096xf32, #tpu.memory_space<vmem>>, vector<1x128xf32>
    %cst_87 = arith.constant dense<0.000000e+00> : vector<32xf32>
    %243 = vector.multi_reduction <add>, %240, %cst_87 [1] : vector<32x128xf32> to vector<32xf32>
    %244 = vector.shape_cast %243 : vector<32xf32> to vector<32x1xf32>
    %cst_88 = arith.constant 1.280000e+02 : f32
    %245 = vector.broadcast %cst_88 : f32 to vector<32x1xf32>
    %246 = arith.divf %244, %245 : vector<32x1xf32>
    %247 = vector.broadcast %246 : vector<32x1xf32> to vector<32x128xf32>
    %248 = arith.subf %240, %247 : vector<32x128xf32>
    %249 = arith.mulf %248, %248 : vector<32x128xf32>
    %cst_89 = arith.constant dense<0.000000e+00> : vector<32xf32>
    %250 = vector.multi_reduction <add>, %249, %cst_89 [1] : vector<32x128xf32> to vector<32xf32>
    %251 = vector.shape_cast %250 : vector<32xf32> to vector<32x1xf32>
    %cst_90 = arith.constant 1.280000e+02 : f32
    %252 = vector.broadcast %cst_90 : f32 to vector<32x1xf32>
    %253 = arith.divf %251, %252 : vector<32x1xf32>
    %254 = vector.broadcast %246 : vector<32x1xf32> to vector<32x128xf32>
    %255 = arith.subf %240, %254 : vector<32x128xf32>
    %cst_91 = arith.constant 9.99999996E-13 : f32
    %256 = vector.broadcast %cst_91 : f32 to vector<32x1xf32>
    %257 = arith.addf %253, %256 : vector<32x1xf32>
    %258 = math.rsqrt %257 : vector<32x1xf32>
    %259 = vector.broadcast %258 : vector<32x1xf32> to vector<32x128xf32>
    %260 = arith.mulf %255, %259 : vector<32x128xf32>
    %261 = vector.broadcast %241 : vector<1x128xf32> to vector<32x128xf32>
    %262 = arith.mulf %260, %261 : vector<32x128xf32>
    %263 = vector.broadcast %242 : vector<1x128xf32> to vector<32x128xf32>
    %264 = arith.addf %262, %263 : vector<32x128xf32>
    %265 = arith.truncf %264 : vector<32x128xf32> to vector<32x128xbf16>
    %c0_92 = arith.constant 0 : index
    %c768_93 = arith.constant 768 : index
    %266 = vector.load %arg4[%c0_92, %c768_93] : memref<128x1408xbf16, #tpu.memory_space<vmem>>, vector<128x256xbf16>
    %cst_94 = arith.constant dense<0.000000e+00> : vector<32x256xf32>
    %267 = tpu.matmul %265, %266, %cst_94 {dimension_numbers = #tpu.dot_dimension_numbers<[1], [0], [0], [1], [0, 0, 1, 1], [], []>} : vector<32x128xbf16>, vector<128x256xbf16>, vector<32x256xf32> -> vector<32x256xf32>
    %c0_95 = arith.constant 0 : index
    %c1920 = arith.constant 1920 : index
    %268 = vector.load %arg6[%c0_95, %c1920] : memref<1x4096xf32, #tpu.memory_space<vmem>>, vector<1x256xf32>
    %269 = vector.broadcast %268 : vector<1x256xf32> to vector<32x256xf32>
    %270 = arith.addf %267, %269 : vector<32x256xf32>
    %271 = vector.extract_strided_slice %270 {offsets = [0, 0], sizes = [32, 128], strides = [1, 1]} : vector<32x256xf32> to vector<32x128xf32>
    %272 = vector.extract_strided_slice %270 {offsets = [0, 128], sizes = [32, 128], strides = [1, 1]} : vector<32x256xf32> to vector<32x128xf32>
    %273 = arith.negf %272 : vector<32x128xf32>
    %274 = math.exp %273 : vector<32x128xf32>
    %cst_96 = arith.constant 1.000000e+00 : f32
    %275 = vector.broadcast %cst_96 : f32 to vector<32x128xf32>
    %276 = arith.addf %275, %274 : vector<32x128xf32>
    %277 = arith.divf %275, %276 : vector<32x128xf32>
    %278 = arith.mulf %271, %277 : vector<32x128xf32>
    %cst_97 = arith.constant 0.000000e+00 : f32
    %279 = vector.broadcast %cst_97 : f32 to vector<3x128xf32>
    %280 = tpu.concatenate %279, %278, %279 in 0 : vector<3x128xf32>, vector<32x128xf32>, vector<3x128xf32> -> vector<38x128xf32>
    %c0_98 = arith.constant 0 : index
    %c0_99 = arith.constant 0 : index
    %281 = vector.load %arg7[%c0_98, %c0_99] : memref<7x128xf32, #tpu.memory_space<vmem>>, vector<7x128xf32>
    %cst_100 = arith.constant 0.000000e+00 : f32
    %282 = vector.broadcast %cst_100 : f32 to vector<32x128xf32>
    %283 = vector.extract_strided_slice %280 {offsets = [0, 0], sizes = [32, 128], strides = [1, 1]} : vector<38x128xf32> to vector<32x128xf32>
    %284 = vector.extract_strided_slice %281 {offsets = [0, 0], sizes = [1, 128], strides = [1, 1]} : vector<7x128xf32> to vector<1x128xf32>
    %285 = vector.broadcast %284 : vector<1x128xf32> to vector<32x128xf32>
    %286 = arith.mulf %283, %285 : vector<32x128xf32>
    %287 = arith.addf %282, %286 : vector<32x128xf32>
    %288 = vector.extract_strided_slice %280 {offsets = [1, 0], sizes = [32, 128], strides = [1, 1]} : vector<38x128xf32> to vector<32x128xf32>
    %289 = vector.extract_strided_slice %281 {offsets = [1, 0], sizes = [1, 128], strides = [1, 1]} : vector<7x128xf32> to vector<1x128xf32>
    %290 = vector.broadcast %289 : vector<1x128xf32> to vector<32x128xf32>
    %291 = arith.mulf %288, %290 : vector<32x128xf32>
    %292 = arith.addf %287, %291 : vector<32x128xf32>
    %293 = vector.extract_strided_slice %280 {offsets = [2, 0], sizes = [32, 128], strides = [1, 1]} : vector<38x128xf32> to vector<32x128xf32>
    %294 = vector.extract_strided_slice %281 {offsets = [2, 0], sizes = [1, 128], strides = [1, 1]} : vector<7x128xf32> to vector<1x128xf32>
    %295 = vector.broadcast %294 : vector<1x128xf32> to vector<32x128xf32>
    %296 = arith.mulf %293, %295 : vector<32x128xf32>
    %297 = arith.addf %292, %296 : vector<32x128xf32>
    %298 = vector.extract_strided_slice %280 {offsets = [3, 0], sizes = [32, 128], strides = [1, 1]} : vector<38x128xf32> to vector<32x128xf32>
    %299 = vector.extract_strided_slice %281 {offsets = [3, 0], sizes = [1, 128], strides = [1, 1]} : vector<7x128xf32> to vector<1x128xf32>
    %300 = vector.broadcast %299 : vector<1x128xf32> to vector<32x128xf32>
    %301 = arith.mulf %298, %300 : vector<32x128xf32>
    %302 = arith.addf %297, %301 : vector<32x128xf32>
    %303 = vector.extract_strided_slice %280 {offsets = [4, 0], sizes = [32, 128], strides = [1, 1]} : vector<38x128xf32> to vector<32x128xf32>
    %304 = vector.extract_strided_slice %281 {offsets = [4, 0], sizes = [1, 128], strides = [1, 1]} : vector<7x128xf32> to vector<1x128xf32>
    %305 = vector.broadcast %304 : vector<1x128xf32> to vector<32x128xf32>
    %306 = arith.mulf %303, %305 : vector<32x128xf32>
    %307 = arith.addf %302, %306 : vector<32x128xf32>
    %308 = vector.extract_strided_slice %280 {offsets = [5, 0], sizes = [32, 128], strides = [1, 1]} : vector<38x128xf32> to vector<32x128xf32>
    %309 = vector.extract_strided_slice %281 {offsets = [5, 0], sizes = [1, 128], strides = [1, 1]} : vector<7x128xf32> to vector<1x128xf32>
    %310 = vector.broadcast %309 : vector<1x128xf32> to vector<32x128xf32>
    %311 = arith.mulf %308, %310 : vector<32x128xf32>
    %312 = arith.addf %307, %311 : vector<32x128xf32>
    %313 = vector.extract_strided_slice %280 {offsets = [6, 0], sizes = [32, 128], strides = [1, 1]} : vector<38x128xf32> to vector<32x128xf32>
    %314 = vector.extract_strided_slice %281 {offsets = [6, 0], sizes = [1, 128], strides = [1, 1]} : vector<7x128xf32> to vector<1x128xf32>
    %315 = vector.broadcast %314 : vector<1x128xf32> to vector<32x128xf32>
    %316 = arith.mulf %313, %315 : vector<32x128xf32>
    %317 = arith.addf %312, %316 : vector<32x128xf32>
    %c0_101 = arith.constant 0 : index
    %c2176 = arith.constant 2176 : index
    %318 = vector.load %arg6[%c0_101, %c2176] : memref<1x4096xf32, #tpu.memory_space<vmem>>, vector<1x128xf32>
    %319 = vector.broadcast %318 : vector<1x128xf32> to vector<32x128xf32>
    %320 = arith.addf %317, %319 : vector<32x128xf32>
    %c0_102 = arith.constant 0 : index
    %c2560 = arith.constant 2560 : index
    %321 = vector.load %arg6[%c0_102, %c2560] : memref<1x4096xf32, #tpu.memory_space<vmem>>, vector<1x128xf32>
    %322 = vector.broadcast %321 : vector<1x128xf32> to vector<32x128xf32>
    %323 = arith.subf %320, %322 : vector<32x128xf32>
    %c0_103 = arith.constant 0 : index
    %c2688 = arith.constant 2688 : index
    %324 = vector.load %arg6[%c0_103, %c2688] : memref<1x4096xf32, #tpu.memory_space<vmem>>, vector<1x128xf32>
    %cst_104 = arith.constant 9.99999974E-6 : f32
    %325 = vector.broadcast %cst_104 : f32 to vector<1x128xf32>
    %326 = arith.addf %324, %325 : vector<1x128xf32>
    %327 = math.rsqrt %326 : vector<1x128xf32>
    %328 = vector.broadcast %327 : vector<1x128xf32> to vector<32x128xf32>
    %329 = arith.mulf %323, %328 : vector<32x128xf32>
    %c0_105 = arith.constant 0 : index
    %c2304 = arith.constant 2304 : index
    %330 = vector.load %arg6[%c0_105, %c2304] : memref<1x4096xf32, #tpu.memory_space<vmem>>, vector<1x128xf32>
    %331 = vector.broadcast %330 : vector<1x128xf32> to vector<32x128xf32>
    %332 = arith.mulf %329, %331 : vector<32x128xf32>
    %c0_106 = arith.constant 0 : index
    %c2432 = arith.constant 2432 : index
    %333 = vector.load %arg6[%c0_106, %c2432] : memref<1x4096xf32, #tpu.memory_space<vmem>>, vector<1x128xf32>
    %334 = vector.broadcast %333 : vector<1x128xf32> to vector<32x128xf32>
    %335 = arith.addf %332, %334 : vector<32x128xf32>
    %336 = arith.negf %335 : vector<32x128xf32>
    %337 = math.exp %336 : vector<32x128xf32>
    %cst_107 = arith.constant 1.000000e+00 : f32
    %338 = vector.broadcast %cst_107 : f32 to vector<32x128xf32>
    %339 = arith.addf %338, %337 : vector<32x128xf32>
    %340 = arith.divf %338, %339 : vector<32x128xf32>
    %341 = arith.mulf %335, %340 : vector<32x128xf32>
    %342 = arith.truncf %341 : vector<32x128xf32> to vector<32x128xbf16>
    %c0_108 = arith.constant 0 : index
    %c1024 = arith.constant 1024 : index
    %343 = vector.load %arg4[%c0_108, %c1024] : memref<128x1408xbf16, #tpu.memory_space<vmem>>, vector<128x128xbf16>
    %cst_109 = arith.constant dense<0.000000e+00> : vector<32x128xf32>
    %344 = tpu.matmul %342, %343, %cst_109 {dimension_numbers = #tpu.dot_dimension_numbers<[1], [0], [0], [1], [0, 0, 1, 1], [], []>} : vector<32x128xbf16>, vector<128x128xbf16>, vector<32x128xf32> -> vector<32x128xf32>
    %c0_110 = arith.constant 0 : index
    %c2816 = arith.constant 2816 : index
    %345 = vector.load %arg6[%c0_110, %c2816] : memref<1x4096xf32, #tpu.memory_space<vmem>>, vector<1x128xf32>
    %346 = vector.broadcast %345 : vector<1x128xf32> to vector<32x128xf32>
    %347 = arith.addf %344, %346 : vector<32x128xf32>
    %348 = arith.addf %240, %347 : vector<32x128xf32>
    %c0_111 = arith.constant 0 : index
    %c2944 = arith.constant 2944 : index
    %349 = vector.load %arg6[%c0_111, %c2944] : memref<1x4096xf32, #tpu.memory_space<vmem>>, vector<1x128xf32>
    %c0_112 = arith.constant 0 : index
    %c3072 = arith.constant 3072 : index
    %350 = vector.load %arg6[%c0_112, %c3072] : memref<1x4096xf32, #tpu.memory_space<vmem>>, vector<1x128xf32>
    %c0_113 = arith.constant 0 : index
    %c1152 = arith.constant 1152 : index
    %351 = vector.load %arg4[%c0_113, %c1152] : memref<128x1408xbf16, #tpu.memory_space<vmem>>, vector<128x256xbf16>
    %c0_114 = arith.constant 0 : index
    %c3200 = arith.constant 3200 : index
    %352 = vector.load %arg6[%c0_114, %c3200] : memref<1x4096xf32, #tpu.memory_space<vmem>>, vector<1x256xf32>
    %c0_115 = arith.constant 0 : index
    %c128_116 = arith.constant 128 : index
    %353 = vector.load %arg5[%c0_115, %c128_116] : memref<256x256xbf16, #tpu.memory_space<vmem>>, vector<256x128xbf16>
    %c0_117 = arith.constant 0 : index
    %c3456 = arith.constant 3456 : index
    %354 = vector.load %arg6[%c0_117, %c3456] : memref<1x4096xf32, #tpu.memory_space<vmem>>, vector<1x128xf32>
    %cst_118 = arith.constant dense<0.000000e+00> : vector<32xf32>
    %355 = vector.multi_reduction <add>, %348, %cst_118 [1] : vector<32x128xf32> to vector<32xf32>
    %356 = vector.shape_cast %355 : vector<32xf32> to vector<32x1xf32>
    %cst_119 = arith.constant 1.280000e+02 : f32
    %357 = vector.broadcast %cst_119 : f32 to vector<32x1xf32>
    %358 = arith.divf %356, %357 : vector<32x1xf32>
    %359 = vector.broadcast %358 : vector<32x1xf32> to vector<32x128xf32>
    %360 = arith.subf %348, %359 : vector<32x128xf32>
    %361 = arith.mulf %360, %360 : vector<32x128xf32>
    %cst_120 = arith.constant dense<0.000000e+00> : vector<32xf32>
    %362 = vector.multi_reduction <add>, %361, %cst_120 [1] : vector<32x128xf32> to vector<32xf32>
    %363 = vector.shape_cast %362 : vector<32xf32> to vector<32x1xf32>
    %cst_121 = arith.constant 1.280000e+02 : f32
    %364 = vector.broadcast %cst_121 : f32 to vector<32x1xf32>
    %365 = arith.divf %363, %364 : vector<32x1xf32>
    %366 = vector.broadcast %358 : vector<32x1xf32> to vector<32x128xf32>
    %367 = arith.subf %348, %366 : vector<32x128xf32>
    %cst_122 = arith.constant 9.99999996E-13 : f32
    %368 = vector.broadcast %cst_122 : f32 to vector<32x1xf32>
    %369 = arith.addf %365, %368 : vector<32x1xf32>
    %370 = math.rsqrt %369 : vector<32x1xf32>
    %371 = vector.broadcast %370 : vector<32x1xf32> to vector<32x128xf32>
    %372 = arith.mulf %367, %371 : vector<32x128xf32>
    %373 = vector.broadcast %349 : vector<1x128xf32> to vector<32x128xf32>
    %374 = arith.mulf %372, %373 : vector<32x128xf32>
    %375 = vector.broadcast %350 : vector<1x128xf32> to vector<32x128xf32>
    %376 = arith.addf %374, %375 : vector<32x128xf32>
    %377 = arith.truncf %376 : vector<32x128xf32> to vector<32x128xbf16>
    %cst_123 = arith.constant dense<0.000000e+00> : vector<32x256xf32>
    %378 = tpu.matmul %377, %351, %cst_123 {dimension_numbers = #tpu.dot_dimension_numbers<[1], [0], [0], [1], [0, 0, 1, 1], [], []>} : vector<32x128xbf16>, vector<128x256xbf16>, vector<32x256xf32> -> vector<32x256xf32>
    %379 = vector.broadcast %352 : vector<1x256xf32> to vector<32x256xf32>
    %380 = arith.addf %378, %379 : vector<32x256xf32>
    %381 = arith.negf %380 : vector<32x256xf32>
    %382 = math.exp %381 : vector<32x256xf32>
    %cst_124 = arith.constant 1.000000e+00 : f32
    %383 = vector.broadcast %cst_124 : f32 to vector<32x256xf32>
    %384 = arith.addf %383, %382 : vector<32x256xf32>
    %385 = arith.divf %383, %384 : vector<32x256xf32>
    %386 = arith.mulf %380, %385 : vector<32x256xf32>
    %387 = arith.truncf %386 : vector<32x256xf32> to vector<32x256xbf16>
    %cst_125 = arith.constant dense<0.000000e+00> : vector<32x128xf32>
    %388 = tpu.matmul %387, %353, %cst_125 {dimension_numbers = #tpu.dot_dimension_numbers<[1], [0], [0], [1], [0, 0, 1, 1], [], []>} : vector<32x256xbf16>, vector<256x128xbf16>, vector<32x128xf32> -> vector<32x128xf32>
    %389 = vector.broadcast %354 : vector<1x128xf32> to vector<32x128xf32>
    %390 = arith.addf %388, %389 : vector<32x128xf32>
    %cst_126 = arith.constant 5.000000e-01 : f32
    %391 = vector.broadcast %cst_126 : f32 to vector<32x128xf32>
    %392 = arith.mulf %391, %390 : vector<32x128xf32>
    %393 = arith.addf %348, %392 : vector<32x128xf32>
    %c0_127 = arith.constant 0 : index
    %c3584 = arith.constant 3584 : index
    %394 = vector.load %arg6[%c0_127, %c3584] : memref<1x4096xf32, #tpu.memory_space<vmem>>, vector<1x128xf32>
    %c0_128 = arith.constant 0 : index
    %c3712 = arith.constant 3712 : index
    %395 = vector.load %arg6[%c0_128, %c3712] : memref<1x4096xf32, #tpu.memory_space<vmem>>, vector<1x128xf32>
    %cst_129 = arith.constant dense<0.000000e+00> : vector<32xf32>
    %396 = vector.multi_reduction <add>, %393, %cst_129 [1] : vector<32x128xf32> to vector<32xf32>
    %397 = vector.shape_cast %396 : vector<32xf32> to vector<32x1xf32>
    %cst_130 = arith.constant 1.280000e+02 : f32
    %398 = vector.broadcast %cst_130 : f32 to vector<32x1xf32>
    %399 = arith.divf %397, %398 : vector<32x1xf32>
    %400 = vector.broadcast %399 : vector<32x1xf32> to vector<32x128xf32>
    %401 = arith.subf %393, %400 : vector<32x128xf32>
    %402 = arith.mulf %401, %401 : vector<32x128xf32>
    %cst_131 = arith.constant dense<0.000000e+00> : vector<32xf32>
    %403 = vector.multi_reduction <add>, %402, %cst_131 [1] : vector<32x128xf32> to vector<32xf32>
    %404 = vector.shape_cast %403 : vector<32xf32> to vector<32x1xf32>
    %cst_132 = arith.constant 1.280000e+02 : f32
    %405 = vector.broadcast %cst_132 : f32 to vector<32x1xf32>
    %406 = arith.divf %404, %405 : vector<32x1xf32>
    %407 = vector.broadcast %399 : vector<32x1xf32> to vector<32x128xf32>
    %408 = arith.subf %393, %407 : vector<32x128xf32>
    %cst_133 = arith.constant 9.99999996E-13 : f32
    %409 = vector.broadcast %cst_133 : f32 to vector<32x1xf32>
    %410 = arith.addf %406, %409 : vector<32x1xf32>
    %411 = math.rsqrt %410 : vector<32x1xf32>
    %412 = vector.broadcast %411 : vector<32x1xf32> to vector<32x128xf32>
    %413 = arith.mulf %408, %412 : vector<32x128xf32>
    %414 = vector.broadcast %394 : vector<1x128xf32> to vector<32x128xf32>
    %415 = arith.mulf %413, %414 : vector<32x128xf32>
    %416 = vector.broadcast %395 : vector<1x128xf32> to vector<32x128xf32>
    %417 = arith.addf %415, %416 : vector<32x128xf32>
    %418 = arith.truncf %417 : vector<32x128xf32> to vector<32x128xbf16>
    %c0_134 = arith.constant 0 : index
    %c0_135 = arith.constant 0 : index
    %c0_136 = arith.constant 0 : index
    %419 = vector.load %arg8[%c0_134, %c0_135, %c0_136] : memref<1x32x128xbf16, #tpu.memory_space<vmem>>, vector<1x32x128xbf16>
    %420 = vector.shape_cast %419 : vector<1x32x128xbf16> to vector<32x128xbf16>
    %421 = vector.shape_cast %418 : vector<32x128xbf16> to vector<1x32x128xbf16>
    tpu.vector_store %arg8[%c0_134, %c0_135, %c0_136], %421 {strides = array<i32>} : memref<1x32x128xbf16, #tpu.memory_space<vmem>>, vector<1x32x128xbf16>,
    return
  }
  func.func @transform_0(%arg0: i32) -> (i32, i32, i32) {
    %c0_i32 = arith.constant 0 : i32
    %c0_i32_0 = arith.constant 0 : i32
    %c0_i32_1 = arith.constant 0 : i32
    return %arg0, %c0_i32, %c0_i32_0 : i32, i32, i32
  }
  func.func @transform_1(%arg0: i32) -> (i32, i32, i32) {
    %c0_i32 = arith.constant 0 : i32
    %c0_i32_0 = arith.constant 0 : i32
    %c0_i32_1 = arith.constant 0 : i32
    %c0_i32_2 = arith.constant 0 : i32
    return %c0_i32, %c0_i32_0, %c0_i32_1 : i32, i32, i32
  }
  func.func @transform_2(%arg0: i32) -> (i32, i32, i32) {
    %c0_i32 = arith.constant 0 : i32
    %c0_i32_0 = arith.constant 0 : i32
    %c0_i32_1 = arith.constant 0 : i32
    return %arg0, %c0_i32, %c0_i32_0 : i32, i32, i32
  }
  func.func @transform_3(%arg0: i32) -> (i32, i32) {
    %c0_i32 = arith.constant 0 : i32
    %c0_i32_0 = arith.constant 0 : i32
    %c0_i32_1 = arith.constant 0 : i32
    return %c0_i32, %c0_i32_0 : i32, i32
  }
  func.func @transform_4(%arg0: i32) -> (i32, i32) {
    %c0_i32 = arith.constant 0 : i32
    %c0_i32_0 = arith.constant 0 : i32
    %c0_i32_1 = arith.constant 0 : i32
    return %c0_i32, %c0_i32_0 : i32, i32
  }
  func.func @transform_5(%arg0: i32) -> (i32, i32) {
    %c0_i32 = arith.constant 0 : i32
    %c0_i32_0 = arith.constant 0 : i32
    %c0_i32_1 = arith.constant 0 : i32
    return %c0_i32, %c0_i32_0 : i32, i32
  }
  func.func @transform_6(%arg0: i32) -> (i32, i32) {
    %c0_i32 = arith.constant 0 : i32
    %c0_i32_0 = arith.constant 0 : i32
    %c0_i32_1 = arith.constant 0 : i32
    return %c0_i32, %c0_i32_0 : i32, i32
  }
  func.func @transform_7(%arg0: i32) -> (i32, i32, i32) {
    %c0_i32 = arith.constant 0 : i32
    %c0_i32_0 = arith.constant 0 : i32
    %c0_i32_1 = arith.constant 0 : i32
    return %arg0, %c0_i32, %c0_i32_0 : i32, i32, i32
  }
}

module attributes {stable_mosaic.version = 11 : i64} {
  func.func @_layer_kernel(%arg0: i32, %arg1: memref<1x32x128xbf16, #tpu.memory_space<vmem>>, %arg2: memref<4x128x32xbf16, #tpu.memory_space<vmem>>, %arg3: memref<1x1x32xi32, #tpu.memory_space<vmem>>, %arg4: memref<128x1408xbf16, #tpu.memory_space<vmem>>, %arg5: memref<256x256xbf16, #tpu.memory_space<vmem>>, %arg6: memref<1x4096xf32, #tpu.memory_space<vmem>>, %arg7: memref<7x128xf32, #tpu.memory_space<vmem>>, %arg8: memref<1x32x128xbf16, #tpu.memory_space<vmem>>) attributes {dimension_semantics = [#tpu.dimension_semantics<parallel>], iteration_bounds = array<i64: 2>, scalar_prefetch = 0 : i64, scratch_operands = 0 : i64, tpu.core_type = #tpu.core_type<tc>, window_params = [{transform_indices = @transform_0, window_bounds = array<i64: 1, 32, 128>}, {pipeline_mode = #tpu.pipeline_mode<synchronous>, transform_indices = @transform_1, window_bounds = array<i64: 4, 128, 32>}, {transform_indices = @transform_2, window_bounds = array<i64: 1, 1, 32>}, {pipeline_mode = #tpu.pipeline_mode<synchronous>, transform_indices = @transform_3, window_bounds = array<i64: 128, 1408>}, {pipeline_mode = #tpu.pipeline_mode<synchronous>, transform_indices = @transform_4, window_bounds = array<i64: 256, 256>}, {pipeline_mode = #tpu.pipeline_mode<synchronous>, transform_indices = @transform_5, window_bounds = array<i64: 1, 4096>}, {pipeline_mode = #tpu.pipeline_mode<synchronous>, transform_indices = @transform_6, window_bounds = array<i64: 7, 128>}, {transform_indices = @transform_7, window_bounds = array<i64: 1, 32, 128>}]} {
    %c0 = arith.constant 0 : index
    %c0_0 = arith.constant 0 : index
    %c0_1 = arith.constant 0 : index
    %0 = vector.load %arg1[%c0, %c0_0, %c0_1] : memref<1x32x128xbf16, #tpu.memory_space<vmem>>, vector<1x32x128xbf16>
    %1 = vector.shape_cast %0 : vector<1x32x128xbf16> to vector<32x128xbf16>
    %2 = arith.extf %1 : vector<32x128xbf16> to vector<32x128xf32>
    %c0_2 = arith.constant 0 : index
    %c0_3 = arith.constant 0 : index
    %3 = vector.load %arg6[%c0_2, %c0_3] : memref<1x4096xf32, #tpu.memory_space<vmem>>, vector<1x128xf32>
    %c0_4 = arith.constant 0 : index
    %c128 = arith.constant 128 : index
    %4 = vector.load %arg6[%c0_4, %c128] : memref<1x4096xf32, #tpu.memory_space<vmem>>, vector<1x128xf32>
    %c0_5 = arith.constant 0 : index
    %c0_6 = arith.constant 0 : index
    %5 = vector.load %arg4[%c0_5, %c0_6] : memref<128x1408xbf16, #tpu.memory_space<vmem>>, vector<128x256xbf16>
    %c0_7 = arith.constant 0 : index
    %c256 = arith.constant 256 : index
    %6 = vector.load %arg6[%c0_7, %c256] : memref<1x4096xf32, #tpu.memory_space<vmem>>, vector<1x256xf32>
    %c0_8 = arith.constant 0 : index
    %c0_9 = arith.constant 0 : index
    %7 = vector.load %arg5[%c0_8, %c0_9] : memref<256x256xbf16, #tpu.memory_space<vmem>>, vector<256x128xbf16>
    %c0_10 = arith.constant 0 : index
    %c512 = arith.constant 512 : index
    %8 = vector.load %arg6[%c0_10, %c512] : memref<1x4096xf32, #tpu.memory_space<vmem>>, vector<1x128xf32>
    %cst = arith.constant dense<0.000000e+00> : vector<32xf32>
    %9 = vector.multi_reduction <add>, %2, %cst [1] : vector<32x128xf32> to vector<32xf32>
    %10 = vector.shape_cast %9 : vector<32xf32> to vector<32x1xf32>
    %cst_11 = arith.constant 1.280000e+02 : f32
    %11 = vector.broadcast %cst_11 : f32 to vector<32x1xf32>
    %12 = arith.divf %10, %11 : vector<32x1xf32>
    %13 = vector.broadcast %12 : vector<32x1xf32> to vector<32x128xf32>
    %14 = arith.subf %2, %13 : vector<32x128xf32>
    %15 = arith.mulf %14, %14 : vector<32x128xf32>
    %cst_12 = arith.constant dense<0.000000e+00> : vector<32xf32>
    %16 = vector.multi_reduction <add>, %15, %cst_12 [1] : vector<32x128xf32> to vector<32xf32>
    %17 = vector.shape_cast %16 : vector<32xf32> to vector<32x1xf32>
    %cst_13 = arith.constant 1.280000e+02 : f32
    %18 = vector.broadcast %cst_13 : f32 to vector<32x1xf32>
    %19 = arith.divf %17, %18 : vector<32x1xf32>
    %20 = vector.broadcast %12 : vector<32x1xf32> to vector<32x128xf32>
    %21 = arith.subf %2, %20 : vector<32x128xf32>
    %cst_14 = arith.constant 9.99999996E-13 : f32
    %22 = vector.broadcast %cst_14 : f32 to vector<32x1xf32>
    %23 = arith.addf %19, %22 : vector<32x1xf32>
    %24 = math.rsqrt %23 : vector<32x1xf32>
    %25 = vector.broadcast %24 : vector<32x1xf32> to vector<32x128xf32>
    %26 = arith.mulf %21, %25 : vector<32x128xf32>
    %27 = vector.broadcast %3 : vector<1x128xf32> to vector<32x128xf32>
    %28 = arith.mulf %26, %27 : vector<32x128xf32>
    %29 = vector.broadcast %4 : vector<1x128xf32> to vector<32x128xf32>
    %30 = arith.addf %28, %29 : vector<32x128xf32>
    %31 = arith.truncf %30 : vector<32x128xf32> to vector<32x128xbf16>
    %cst_15 = arith.constant dense<0.000000e+00> : vector<32x256xf32>
    %32 = tpu.matmul %31, %5, %cst_15 {dimension_numbers = #tpu.dot_dimension_numbers<[1], [0], [0], [1], [0, 0, 1, 1], [], []>} : vector<32x128xbf16>, vector<128x256xbf16>, vector<32x256xf32> -> vector<32x256xf32>
    %33 = vector.broadcast %6 : vector<1x256xf32> to vector<32x256xf32>
    %34 = arith.addf %32, %33 : vector<32x256xf32>
    %35 = arith.negf %34 : vector<32x256xf32>
    %36 = math.exp %35 : vector<32x256xf32>
    %cst_16 = arith.constant 1.000000e+00 : f32
    %37 = vector.broadcast %cst_16 : f32 to vector<32x256xf32>
    %38 = arith.addf %37, %36 : vector<32x256xf32>
    %39 = arith.divf %37, %38 : vector<32x256xf32>
    %40 = arith.mulf %34, %39 : vector<32x256xf32>
    %41 = arith.truncf %40 : vector<32x256xf32> to vector<32x256xbf16>
    %cst_17 = arith.constant dense<0.000000e+00> : vector<32x128xf32>
    %42 = tpu.matmul %41, %7, %cst_17 {dimension_numbers = #tpu.dot_dimension_numbers<[1], [0], [0], [1], [0, 0, 1, 1], [], []>} : vector<32x256xbf16>, vector<256x128xbf16>, vector<32x128xf32> -> vector<32x128xf32>
    %43 = vector.broadcast %8 : vector<1x128xf32> to vector<32x128xf32>
    %44 = arith.addf %42, %43 : vector<32x128xf32>
    %cst_18 = arith.constant 5.000000e-01 : f32
    %45 = vector.broadcast %cst_18 : f32 to vector<32x128xf32>
    %46 = arith.mulf %45, %44 : vector<32x128xf32>
    %47 = arith.addf %2, %46 : vector<32x128xf32>
    %c0_19 = arith.constant 0 : index
    %c640 = arith.constant 640 : index
    %48 = vector.load %arg6[%c0_19, %c640] : memref<1x4096xf32, #tpu.memory_space<vmem>>, vector<1x128xf32>
    %c0_20 = arith.constant 0 : index
    %c768 = arith.constant 768 : index
    %49 = vector.load %arg6[%c0_20, %c768] : memref<1x4096xf32, #tpu.memory_space<vmem>>, vector<1x128xf32>
    %cst_21 = arith.constant dense<0.000000e+00> : vector<32xf32>
    %50 = vector.multi_reduction <add>, %47, %cst_21 [1] : vector<32x128xf32> to vector<32xf32>
    %51 = vector.shape_cast %50 : vector<32xf32> to vector<32x1xf32>
    %cst_22 = arith.constant 1.280000e+02 : f32
    %52 = vector.broadcast %cst_22 : f32 to vector<32x1xf32>
    %53 = arith.divf %51, %52 : vector<32x1xf32>
    %54 = vector.broadcast %53 : vector<32x1xf32> to vector<32x128xf32>
    %55 = arith.subf %47, %54 : vector<32x128xf32>
    %56 = arith.mulf %55, %55 : vector<32x128xf32>
    %cst_23 = arith.constant dense<0.000000e+00> : vector<32xf32>
    %57 = vector.multi_reduction <add>, %56, %cst_23 [1] : vector<32x128xf32> to vector<32xf32>
    %58 = vector.shape_cast %57 : vector<32xf32> to vector<32x1xf32>
    %cst_24 = arith.constant 1.280000e+02 : f32
    %59 = vector.broadcast %cst_24 : f32 to vector<32x1xf32>
    %60 = arith.divf %58, %59 : vector<32x1xf32>
    %61 = vector.broadcast %53 : vector<32x1xf32> to vector<32x128xf32>
    %62 = arith.subf %47, %61 : vector<32x128xf32>
    %cst_25 = arith.constant 9.99999996E-13 : f32
    %63 = vector.broadcast %cst_25 : f32 to vector<32x1xf32>
    %64 = arith.addf %60, %63 : vector<32x1xf32>
    %65 = math.rsqrt %64 : vector<32x1xf32>
    %66 = vector.broadcast %65 : vector<32x1xf32> to vector<32x128xf32>
    %67 = arith.mulf %62, %66 : vector<32x128xf32>
    %68 = vector.broadcast %48 : vector<1x128xf32> to vector<32x128xf32>
    %69 = arith.mulf %67, %68 : vector<32x128xf32>
    %70 = vector.broadcast %49 : vector<1x128xf32> to vector<32x128xf32>
    %71 = arith.addf %69, %70 : vector<32x128xf32>
    %72 = arith.truncf %71 : vector<32x128xf32> to vector<32x128xbf16>
    %c0_26 = arith.constant 0 : index
    %c256_27 = arith.constant 256 : index
    %73 = vector.load %arg4[%c0_26, %c256_27] : memref<128x1408xbf16, #tpu.memory_space<vmem>>, vector<128x384xbf16>
    %cst_28 = arith.constant dense<0.000000e+00> : vector<32x384xf32>
    %74 = tpu.matmul %72, %73, %cst_28 {dimension_numbers = #tpu.dot_dimension_numbers<[1], [0], [0], [1], [0, 0, 1, 1], [], []>} : vector<32x128xbf16>, vector<128x384xbf16>, vector<32x384xf32> -> vector<32x384xf32>
    %c0_29 = arith.constant 0 : index
    %c896 = arith.constant 896 : index
    %75 = vector.load %arg6[%c0_29, %c896] : memref<1x4096xf32, #tpu.memory_space<vmem>>, vector<1x384xf32>
    %76 = vector.broadcast %75 : vector<1x384xf32> to vector<32x384xf32>
    %77 = arith.addf %74, %76 : vector<32x384xf32>
    %78 = vector.extract_strided_slice %77 {offsets = [0, 0], sizes = [32, 128], strides = [1, 1]} : vector<32x384xf32> to vector<32x128xf32>
    %c0_30 = arith.constant 0 : index
    %c1280 = arith.constant 1280 : index
    %79 = vector.load %arg6[%c0_30, %c1280] : memref<1x4096xf32, #tpu.memory_space<vmem>>, vector<1x128xf32>
    %80 = vector.broadcast %79 : vector<1x128xf32> to vector<32x128xf32>
    %81 = arith.addf %78, %80 : vector<32x128xf32>
    %82 = arith.truncf %81 : vector<32x128xf32> to vector<32x128xbf16>
    %c0_31 = arith.constant 0 : index
    %c1408 = arith.constant 1408 : index
    %83 = vector.load %arg6[%c0_31, %c1408] : memref<1x4096xf32, #tpu.memory_space<vmem>>, vector<1x128xf32>
    %84 = vector.broadcast %83 : vector<1x128xf32> to vector<32x128xf32>
    %85 = arith.addf %78, %84 : vector<32x128xf32>
    %86 = arith.truncf %85 : vector<32x128xf32> to vector<32x128xbf16>
    %87 = vector.extract_strided_slice %77 {offsets = [0, 128], sizes = [32, 128], strides = [1, 1]} : vector<32x384xf32> to vector<32x128xf32>
    %88 = arith.truncf %87 : vector<32x128xf32> to vector<32x128xbf16>
    %89 = vector.extract_strided_slice %77 {offsets = [0, 256], sizes = [32, 128], strides = [1, 1]} : vector<32x384xf32> to vector<32x128xf32>
    %90 = arith.truncf %89 : vector<32x128xf32> to vector<32x128xbf16>
    %c0_32 = arith.constant 0 : index
    %c640_33 = arith.constant 640 : index
    %91 = vector.load %arg4[%c0_32, %c640_33] : memref<128x1408xbf16, #tpu.memory_space<vmem>>, vector<128x128xbf16>
    %c0_34 = arith.constant 0 : index
    %c0_35 = arith.constant 0 : index
    %c0_36 = arith.constant 0 : index
    %92 = vector.load %arg3[%c0_34, %c0_35, %c0_36] : memref<1x1x32xi32, #tpu.memory_space<vmem>>, vector<1x1x32xi32>
    %93 = vector.shape_cast %92 : vector<1x1x32xi32> to vector<1x32xi32>
    %c0_i32 = arith.constant 0 : i32
    %94 = vector.broadcast %c0_i32 : i32 to vector<1x32xi32>
    %95 = arith.cmpi sgt, %93, %94 : vector<1x32xi32>
    %cst_37 = arith.constant -1.000000e+09 : f32
    %cst_38 = arith.constant 0.000000e+00 : f32
    %96 = vector.broadcast %cst_37 : f32 to vector<1x32xf32>
    %97 = vector.broadcast %cst_38 : f32 to vector<1x32xf32>
    %98 = arith.select %95, %96, %97 : vector<1x32xi1>, vector<1x32xf32>
    %c0_i32_39 = arith.constant 0 : i32
    %99 = vector.broadcast %c0_i32_39 : i32 to vector<1x32xi32>
    %100 = arith.cmpi sgt, %93, %99 : vector<1x32xi32>
    %cst_40 = arith.constant 0.000000e+00 : f32
    %cst_41 = arith.constant 1.000000e+00 : f32
    %101 = vector.broadcast %cst_40 : f32 to vector<1x32xf32>
    %102 = vector.broadcast %cst_41 : f32 to vector<1x32xf32>
    %103 = arith.select %100, %101, %102 : vector<1x32xi1>, vector<1x32xf32>
    %cst_42 = arith.constant 0.000000e+00 : f32
    %104 = vector.broadcast %cst_42 : f32 to vector<32x128xf32>
    %c0_43 = arith.constant 0 : index
    %c0_44 = arith.constant 0 : index
    %c0_45 = arith.constant 0 : index
    %105 = vector.load %arg2[%c0_43, %c0_44, %c0_45] : memref<4x128x32xbf16, #tpu.memory_space<vmem>>, vector<1x128x32xbf16>
    %106 = vector.shape_cast %105 : vector<1x128x32xbf16> to vector<128x32xbf16>
    %107 = vector.extract_strided_slice %82 {offsets = [0, 0], sizes = [32, 32], strides = [1, 1]} : vector<32x128xbf16> to vector<32x32xbf16>
    %108 = vector.extract_strided_slice %88 {offsets = [0, 0], sizes = [32, 32], strides = [1, 1]} : vector<32x128xbf16> to vector<32x32xbf16>
    %cst_46 = arith.constant dense<0.000000e+00> : vector<32x32xf32>
    %109 = tpu.matmul %107, %108, %cst_46 {dimension_numbers = #tpu.dot_dimension_numbers<[1], [1], [0], [0], [0, 0, 1, 0], [], []>} : vector<32x32xbf16>, vector<32x32xbf16>, vector<32x32xf32> -> vector<32x32xf32>
    %110 = vector.extract_strided_slice %86 {offsets = [0, 0], sizes = [32, 32], strides = [1, 1]} : vector<32x128xbf16> to vector<32x32xbf16>
    %cst_47 = arith.constant dense<0.000000e+00> : vector<32x128xf32>
    %111 = tpu.matmul %110, %106, %cst_47 {dimension_numbers = #tpu.dot_dimension_numbers<[1], [1], [0], [0], [0, 0, 1, 0], [], []>} : vector<32x32xbf16>, vector<128x32xbf16>, vector<32x128xf32> -> vector<32x128xf32>
    %c0_i32_48 = arith.constant 0 : i32
    %112 = tpu.dynamic_rotate %111 by %c0_i32_48 dim 1 {stride = 1 : si32, stride_dimension = 0 : si32} : vector<32x128xf32>, i32 -> vector<32x128xf32>
    %113 = vector.extract_strided_slice %112 {offsets = [0, 31], sizes = [32, 32], strides = [1, 1]} : vector<32x128xf32> to vector<32x32xf32>
    %114 = arith.addf %109, %113 : vector<32x32xf32>
    %cst_49 = arith.constant 0.176776692 : f32
    %115 = vector.broadcast %cst_49 : f32 to vector<32x32xf32>
    %116 = arith.mulf %114, %115 : vector<32x32xf32>
    %117 = vector.broadcast %98 : vector<1x32xf32> to vector<32x32xf32>
    %118 = arith.addf %116, %117 : vector<32x32xf32>
    %cst_50 = arith.constant dense<0xFF800000> : vector<32xf32>
    %119 = vector.multi_reduction <maximumf>, %118, %cst_50 [1] : vector<32x32xf32> to vector<32xf32>
    %120 = vector.shape_cast %119 : vector<32xf32> to vector<32x1xf32>
    %121 = vector.broadcast %120 : vector<32x1xf32> to vector<32x32xf32>
    %122 = arith.subf %118, %121 : vector<32x32xf32>
    %123 = math.exp %122 : vector<32x32xf32>
    %cst_51 = arith.constant dense<0.000000e+00> : vector<32xf32>
    %124 = vector.multi_reduction <add>, %123, %cst_51 [1] : vector<32x32xf32> to vector<32xf32>
    %125 = vector.shape_cast %124 : vector<32xf32> to vector<32x1xf32>
    %126 = tpu.reciprocal %125 {approx = true} : vector<32x1xf32> -> vector<32x1xf32>
    %127 = vector.broadcast %126 : vector<32x1xf32> to vector<32x32xf32>
    %128 = arith.mulf %123, %127 : vector<32x32xf32>
    %129 = vector.broadcast %103 : vector<1x32xf32> to vector<32x32xf32>
    %130 = arith.mulf %128, %129 : vector<32x32xf32>
    %131 = arith.truncf %130 : vector<32x32xf32> to vector<32x32xbf16>
    %132 = vector.extract_strided_slice %90 {offsets = [0, 0], sizes = [32, 32], strides = [1, 1]} : vector<32x128xbf16> to vector<32x32xbf16>
    %cst_52 = arith.constant dense<0.000000e+00> : vector<32x32xf32>
    %133 = tpu.matmul %131, %132, %cst_52 {dimension_numbers = #tpu.dot_dimension_numbers<[1], [0], [0], [1], [0, 0, 1, 1], [], []>} : vector<32x32xbf16>, vector<32x32xbf16>, vector<32x32xf32> -> vector<32x32xf32>
    %134 = arith.truncf %133 : vector<32x32xf32> to vector<32x32xbf16>
    %135 = vector.extract_strided_slice %91 {offsets = [0, 0], sizes = [32, 128], strides = [1, 1]} : vector<128x128xbf16> to vector<32x128xbf16>
    %cst_53 = arith.constant dense<0.000000e+00> : vector<32x128xf32>
    %136 = tpu.matmul %134, %135, %cst_53 {dimension_numbers = #tpu.dot_dimension_numbers<[1], [0], [0], [1], [0, 0, 1, 1], [], []>} : vector<32x32xbf16>, vector<32x128xbf16>, vector<32x128xf32> -> vector<32x128xf32>
    %137 = arith.addf %104, %136 : vector<32x128xf32>
    %c1 = arith.constant 1 : index
    %c0_54 = arith.constant 0 : index
    %c0_55 = arith.constant 0 : index
    %138 = vector.load %arg2[%c1, %c0_54, %c0_55] : memref<4x128x32xbf16, #tpu.memory_space<vmem>>, vector<1x128x32xbf16>
    %139 = vector.shape_cast %138 : vector<1x128x32xbf16> to vector<128x32xbf16>
    %140 = vector.extract_strided_slice %82 {offsets = [0, 32], sizes = [32, 32], strides = [1, 1]} : vector<32x128xbf16> to vector<32x32xbf16>
    %141 = vector.extract_strided_slice %88 {offsets = [0, 32], sizes = [32, 32], strides = [1, 1]} : vector<32x128xbf16> to vector<32x32xbf16>
    %cst_56 = arith.constant dense<0.000000e+00> : vector<32x32xf32>
    %142 = tpu.matmul %140, %141, %cst_56 {dimension_numbers = #tpu.dot_dimension_numbers<[1], [1], [0], [0], [0, 0, 1, 0], [], []>} : vector<32x32xbf16>, vector<32x32xbf16>, vector<32x32xf32> -> vector<32x32xf32>
    %143 = vector.extract_strided_slice %86 {offsets = [0, 32], sizes = [32, 32], strides = [1, 1]} : vector<32x128xbf16> to vector<32x32xbf16>
    %cst_57 = arith.constant dense<0.000000e+00> : vector<32x128xf32>
    %144 = tpu.matmul %143, %139, %cst_57 {dimension_numbers = #tpu.dot_dimension_numbers<[1], [1], [0], [0], [0, 0, 1, 0], [], []>} : vector<32x32xbf16>, vector<128x32xbf16>, vector<32x128xf32> -> vector<32x128xf32>
    %c0_i32_58 = arith.constant 0 : i32
    %145 = tpu.dynamic_rotate %144 by %c0_i32_58 dim 1 {stride = 1 : si32, stride_dimension = 0 : si32} : vector<32x128xf32>, i32 -> vector<32x128xf32>
    %146 = vector.extract_strided_slice %145 {offsets = [0, 31], sizes = [32, 32], strides = [1, 1]} : vector<32x128xf32> to vector<32x32xf32>
    %147 = arith.addf %142, %146 : vector<32x32xf32>
    %cst_59 = arith.constant 0.176776692 : f32
    %148 = vector.broadcast %cst_59 : f32 to vector<32x32xf32>
    %149 = arith.mulf %147, %148 : vector<32x32xf32>
    %150 = vector.broadcast %98 : vector<1x32xf32> to vector<32x32xf32>
    %151 = arith.addf %149, %150 : vector<32x32xf32>
    %cst_60 = arith.constant dense<0xFF800000> : vector<32xf32>
    %152 = vector.multi_reduction <maximumf>, %151, %cst_60 [1] : vector<32x32xf32> to vector<32xf32>
    %153 = vector.shape_cast %152 : vector<32xf32> to vector<32x1xf32>
    %154 = vector.broadcast %153 : vector<32x1xf32> to vector<32x32xf32>
    %155 = arith.subf %151, %154 : vector<32x32xf32>
    %156 = math.exp %155 : vector<32x32xf32>
    %cst_61 = arith.constant dense<0.000000e+00> : vector<32xf32>
    %157 = vector.multi_reduction <add>, %156, %cst_61 [1] : vector<32x32xf32> to vector<32xf32>
    %158 = vector.shape_cast %157 : vector<32xf32> to vector<32x1xf32>
    %159 = tpu.reciprocal %158 {approx = true} : vector<32x1xf32> -> vector<32x1xf32>
    %160 = vector.broadcast %159 : vector<32x1xf32> to vector<32x32xf32>
    %161 = arith.mulf %156, %160 : vector<32x32xf32>
    %162 = vector.broadcast %103 : vector<1x32xf32> to vector<32x32xf32>
    %163 = arith.mulf %161, %162 : vector<32x32xf32>
    %164 = arith.truncf %163 : vector<32x32xf32> to vector<32x32xbf16>
    %165 = vector.extract_strided_slice %90 {offsets = [0, 32], sizes = [32, 32], strides = [1, 1]} : vector<32x128xbf16> to vector<32x32xbf16>
    %cst_62 = arith.constant dense<0.000000e+00> : vector<32x32xf32>
    %166 = tpu.matmul %164, %165, %cst_62 {dimension_numbers = #tpu.dot_dimension_numbers<[1], [0], [0], [1], [0, 0, 1, 1], [], []>} : vector<32x32xbf16>, vector<32x32xbf16>, vector<32x32xf32> -> vector<32x32xf32>
    %167 = arith.truncf %166 : vector<32x32xf32> to vector<32x32xbf16>
    %168 = vector.extract_strided_slice %91 {offsets = [32, 0], sizes = [32, 128], strides = [1, 1]} : vector<128x128xbf16> to vector<32x128xbf16>
    %cst_63 = arith.constant dense<0.000000e+00> : vector<32x128xf32>
    %169 = tpu.matmul %167, %168, %cst_63 {dimension_numbers = #tpu.dot_dimension_numbers<[1], [0], [0], [1], [0, 0, 1, 1], [], []>} : vector<32x32xbf16>, vector<32x128xbf16>, vector<32x128xf32> -> vector<32x128xf32>
    %170 = arith.addf %137, %169 : vector<32x128xf32>
    %c2 = arith.constant 2 : index
    %c0_64 = arith.constant 0 : index
    %c0_65 = arith.constant 0 : index
    %171 = vector.load %arg2[%c2, %c0_64, %c0_65] : memref<4x128x32xbf16, #tpu.memory_space<vmem>>, vector<1x128x32xbf16>
    %172 = vector.shape_cast %171 : vector<1x128x32xbf16> to vector<128x32xbf16>
    %173 = vector.extract_strided_slice %82 {offsets = [0, 64], sizes = [32, 32], strides = [1, 1]} : vector<32x128xbf16> to vector<32x32xbf16>
    %174 = vector.extract_strided_slice %88 {offsets = [0, 64], sizes = [32, 32], strides = [1, 1]} : vector<32x128xbf16> to vector<32x32xbf16>
    %cst_66 = arith.constant dense<0.000000e+00> : vector<32x32xf32>
    %175 = tpu.matmul %173, %174, %cst_66 {dimension_numbers = #tpu.dot_dimension_numbers<[1], [1], [0], [0], [0, 0, 1, 0], [], []>} : vector<32x32xbf16>, vector<32x32xbf16>, vector<32x32xf32> -> vector<32x32xf32>
    %176 = vector.extract_strided_slice %86 {offsets = [0, 64], sizes = [32, 32], strides = [1, 1]} : vector<32x128xbf16> to vector<32x32xbf16>
    %cst_67 = arith.constant dense<0.000000e+00> : vector<32x128xf32>
    %177 = tpu.matmul %176, %172, %cst_67 {dimension_numbers = #tpu.dot_dimension_numbers<[1], [1], [0], [0], [0, 0, 1, 0], [], []>} : vector<32x32xbf16>, vector<128x32xbf16>, vector<32x128xf32> -> vector<32x128xf32>
    %c0_i32_68 = arith.constant 0 : i32
    %178 = tpu.dynamic_rotate %177 by %c0_i32_68 dim 1 {stride = 1 : si32, stride_dimension = 0 : si32} : vector<32x128xf32>, i32 -> vector<32x128xf32>
    %179 = vector.extract_strided_slice %178 {offsets = [0, 31], sizes = [32, 32], strides = [1, 1]} : vector<32x128xf32> to vector<32x32xf32>
    %180 = arith.addf %175, %179 : vector<32x32xf32>
    %cst_69 = arith.constant 0.176776692 : f32
    %181 = vector.broadcast %cst_69 : f32 to vector<32x32xf32>
    %182 = arith.mulf %180, %181 : vector<32x32xf32>
    %183 = vector.broadcast %98 : vector<1x32xf32> to vector<32x32xf32>
    %184 = arith.addf %182, %183 : vector<32x32xf32>
    %cst_70 = arith.constant dense<0xFF800000> : vector<32xf32>
    %185 = vector.multi_reduction <maximumf>, %184, %cst_70 [1] : vector<32x32xf32> to vector<32xf32>
    %186 = vector.shape_cast %185 : vector<32xf32> to vector<32x1xf32>
    %187 = vector.broadcast %186 : vector<32x1xf32> to vector<32x32xf32>
    %188 = arith.subf %184, %187 : vector<32x32xf32>
    %189 = math.exp %188 : vector<32x32xf32>
    %cst_71 = arith.constant dense<0.000000e+00> : vector<32xf32>
    %190 = vector.multi_reduction <add>, %189, %cst_71 [1] : vector<32x32xf32> to vector<32xf32>
    %191 = vector.shape_cast %190 : vector<32xf32> to vector<32x1xf32>
    %192 = tpu.reciprocal %191 {approx = true} : vector<32x1xf32> -> vector<32x1xf32>
    %193 = vector.broadcast %192 : vector<32x1xf32> to vector<32x32xf32>
    %194 = arith.mulf %189, %193 : vector<32x32xf32>
    %195 = vector.broadcast %103 : vector<1x32xf32> to vector<32x32xf32>
    %196 = arith.mulf %194, %195 : vector<32x32xf32>
    %197 = arith.truncf %196 : vector<32x32xf32> to vector<32x32xbf16>
    %198 = vector.extract_strided_slice %90 {offsets = [0, 64], sizes = [32, 32], strides = [1, 1]} : vector<32x128xbf16> to vector<32x32xbf16>
    %cst_72 = arith.constant dense<0.000000e+00> : vector<32x32xf32>
    %199 = tpu.matmul %197, %198, %cst_72 {dimension_numbers = #tpu.dot_dimension_numbers<[1], [0], [0], [1], [0, 0, 1, 1], [], []>} : vector<32x32xbf16>, vector<32x32xbf16>, vector<32x32xf32> -> vector<32x32xf32>
    %200 = arith.truncf %199 : vector<32x32xf32> to vector<32x32xbf16>
    %201 = vector.extract_strided_slice %91 {offsets = [64, 0], sizes = [32, 128], strides = [1, 1]} : vector<128x128xbf16> to vector<32x128xbf16>
    %cst_73 = arith.constant dense<0.000000e+00> : vector<32x128xf32>
    %202 = tpu.matmul %200, %201, %cst_73 {dimension_numbers = #tpu.dot_dimension_numbers<[1], [0], [0], [1], [0, 0, 1, 1], [], []>} : vector<32x32xbf16>, vector<32x128xbf16>, vector<32x128xf32> -> vector<32x128xf32>
    %203 = arith.addf %170, %202 : vector<32x128xf32>
    %c3 = arith.constant 3 : index
    %c0_74 = arith.constant 0 : index
    %c0_75 = arith.constant 0 : index
    %204 = vector.load %arg2[%c3, %c0_74, %c0_75] : memref<4x128x32xbf16, #tpu.memory_space<vmem>>, vector<1x128x32xbf16>
    %205 = vector.shape_cast %204 : vector<1x128x32xbf16> to vector<128x32xbf16>
    %206 = vector.extract_strided_slice %82 {offsets = [0, 96], sizes = [32, 32], strides = [1, 1]} : vector<32x128xbf16> to vector<32x32xbf16>
    %207 = vector.extract_strided_slice %88 {offsets = [0, 96], sizes = [32, 32], strides = [1, 1]} : vector<32x128xbf16> to vector<32x32xbf16>
    %cst_76 = arith.constant dense<0.000000e+00> : vector<32x32xf32>
    %208 = tpu.matmul %206, %207, %cst_76 {dimension_numbers = #tpu.dot_dimension_numbers<[1], [1], [0], [0], [0, 0, 1, 0], [], []>} : vector<32x32xbf16>, vector<32x32xbf16>, vector<32x32xf32> -> vector<32x32xf32>
    %209 = vector.extract_strided_slice %86 {offsets = [0, 96], sizes = [32, 32], strides = [1, 1]} : vector<32x128xbf16> to vector<32x32xbf16>
    %cst_77 = arith.constant dense<0.000000e+00> : vector<32x128xf32>
    %210 = tpu.matmul %209, %205, %cst_77 {dimension_numbers = #tpu.dot_dimension_numbers<[1], [1], [0], [0], [0, 0, 1, 0], [], []>} : vector<32x32xbf16>, vector<128x32xbf16>, vector<32x128xf32> -> vector<32x128xf32>
    %c0_i32_78 = arith.constant 0 : i32
    %211 = tpu.dynamic_rotate %210 by %c0_i32_78 dim 1 {stride = 1 : si32, stride_dimension = 0 : si32} : vector<32x128xf32>, i32 -> vector<32x128xf32>
    %212 = vector.extract_strided_slice %211 {offsets = [0, 31], sizes = [32, 32], strides = [1, 1]} : vector<32x128xf32> to vector<32x32xf32>
    %213 = arith.addf %208, %212 : vector<32x32xf32>
    %cst_79 = arith.constant 0.176776692 : f32
    %214 = vector.broadcast %cst_79 : f32 to vector<32x32xf32>
    %215 = arith.mulf %213, %214 : vector<32x32xf32>
    %216 = vector.broadcast %98 : vector<1x32xf32> to vector<32x32xf32>
    %217 = arith.addf %215, %216 : vector<32x32xf32>
    %cst_80 = arith.constant dense<0xFF800000> : vector<32xf32>
    %218 = vector.multi_reduction <maximumf>, %217, %cst_80 [1] : vector<32x32xf32> to vector<32xf32>
    %219 = vector.shape_cast %218 : vector<32xf32> to vector<32x1xf32>
    %220 = vector.broadcast %219 : vector<32x1xf32> to vector<32x32xf32>
    %221 = arith.subf %217, %220 : vector<32x32xf32>
    %222 = math.exp %221 : vector<32x32xf32>
    %cst_81 = arith.constant dense<0.000000e+00> : vector<32xf32>
    %223 = vector.multi_reduction <add>, %222, %cst_81 [1] : vector<32x32xf32> to vector<32xf32>
    %224 = vector.shape_cast %223 : vector<32xf32> to vector<32x1xf32>
    %225 = tpu.reciprocal %224 {approx = true} : vector<32x1xf32> -> vector<32x1xf32>
    %226 = vector.broadcast %225 : vector<32x1xf32> to vector<32x32xf32>
    %227 = arith.mulf %222, %226 : vector<32x32xf32>
    %228 = vector.broadcast %103 : vector<1x32xf32> to vector<32x32xf32>
    %229 = arith.mulf %227, %228 : vector<32x32xf32>
    %230 = arith.truncf %229 : vector<32x32xf32> to vector<32x32xbf16>
    %231 = vector.extract_strided_slice %90 {offsets = [0, 96], sizes = [32, 32], strides = [1, 1]} : vector<32x128xbf16> to vector<32x32xbf16>
    %cst_82 = arith.constant dense<0.000000e+00> : vector<32x32xf32>
    %232 = tpu.matmul %230, %231, %cst_82 {dimension_numbers = #tpu.dot_dimension_numbers<[1], [0], [0], [1], [0, 0, 1, 1], [], []>} : vector<32x32xbf16>, vector<32x32xbf16>, vector<32x32xf32> -> vector<32x32xf32>
    %233 = arith.truncf %232 : vector<32x32xf32> to vector<32x32xbf16>
    %234 = vector.extract_strided_slice %91 {offsets = [96, 0], sizes = [32, 128], strides = [1, 1]} : vector<128x128xbf16> to vector<32x128xbf16>
    %cst_83 = arith.constant dense<0.000000e+00> : vector<32x128xf32>
    %235 = tpu.matmul %233, %234, %cst_83 {dimension_numbers = #tpu.dot_dimension_numbers<[1], [0], [0], [1], [0, 0, 1, 1], [], []>} : vector<32x32xbf16>, vector<32x128xbf16>, vector<32x128xf32> -> vector<32x128xf32>
    %236 = arith.addf %203, %235 : vector<32x128xf32>
    %237 = arith.addf %47, %236 : vector<32x128xf32>
    %c0_84 = arith.constant 0 : index
    %c1536 = arith.constant 1536 : index
    %238 = vector.load %arg6[%c0_84, %c1536] : memref<1x4096xf32, #tpu.memory_space<vmem>>, vector<1x128xf32>
    %239 = vector.broadcast %238 : vector<1x128xf32> to vector<32x128xf32>
    %240 = arith.addf %237, %239 : vector<32x128xf32>
    %c0_85 = arith.constant 0 : index
    %c1664 = arith.constant 1664 : index
    %241 = vector.load %arg6[%c0_85, %c1664] : memref<1x4096xf32, #tpu.memory_space<vmem>>, vector<1x128xf32>
    %c0_86 = arith.constant 0 : index
    %c1792 = arith.constant 1792 : index
    %242 = vector.load %arg6[%c0_86, %c1792] : memref<1x4096xf32, #tpu.memory_space<vmem>>, vector<1x128xf32>
    %cst_87 = arith.constant dense<0.000000e+00> : vector<32xf32>
    %243 = vector.multi_reduction <add>, %240, %cst_87 [1] : vector<32x128xf32> to vector<32xf32>
    %244 = vector.shape_cast %243 : vector<32xf32> to vector<32x1xf32>
    %cst_88 = arith.constant 1.280000e+02 : f32
    %245 = vector.broadcast %cst_88 : f32 to vector<32x1xf32>
    %246 = arith.divf %244, %245 : vector<32x1xf32>
    %247 = vector.broadcast %246 : vector<32x1xf32> to vector<32x128xf32>
    %248 = arith.subf %240, %247 : vector<32x128xf32>
    %249 = arith.mulf %248, %248 : vector<32x128xf32>
    %cst_89 = arith.constant dense<0.000000e+00> : vector<32xf32>
    %250 = vector.multi_reduction <add>, %249, %cst_89 [1] : vector<32x128xf32> to vector<32xf32>
    %251 = vector.shape_cast %250 : vector<32xf32> to vector<32x1xf32>
    %cst_90 = arith.constant 1.280000e+02 : f32
    %252 = vector.broadcast %cst_90 : f32 to vector<32x1xf32>
    %253 = arith.divf %251, %252 : vector<32x1xf32>
    %254 = vector.broadcast %246 : vector<32x1xf32> to vector<32x128xf32>
    %255 = arith.subf %240, %254 : vector<32x128xf32>
    %cst_91 = arith.constant 9.99999996E-13 : f32
    %256 = vector.broadcast %cst_91 : f32 to vector<32x1xf32>
    %257 = arith.addf %253, %256 : vector<32x1xf32>
    %258 = math.rsqrt %257 : vector<32x1xf32>
    %259 = vector.broadcast %258 : vector<32x1xf32> to vector<32x128xf32>
    %260 = arith.mulf %255, %259 : vector<32x128xf32>
    %261 = vector.broadcast %241 : vector<1x128xf32> to vector<32x128xf32>
    %262 = arith.mulf %260, %261 : vector<32x128xf32>
    %263 = vector.broadcast %242 : vector<1x128xf32> to vector<32x128xf32>
    %264 = arith.addf %262, %263 : vector<32x128xf32>
    %265 = arith.truncf %264 : vector<32x128xf32> to vector<32x128xbf16>
    %c0_92 = arith.constant 0 : index
    %c768_93 = arith.constant 768 : index
    %266 = vector.load %arg4[%c0_92, %c768_93] : memref<128x1408xbf16, #tpu.memory_space<vmem>>, vector<128x256xbf16>
    %cst_94 = arith.constant dense<0.000000e+00> : vector<32x256xf32>
    %267 = tpu.matmul %265, %266, %cst_94 {dimension_numbers = #tpu.dot_dimension_numbers<[1], [0], [0], [1], [0, 0, 1, 1], [], []>} : vector<32x128xbf16>, vector<128x256xbf16>, vector<32x256xf32> -> vector<32x256xf32>
    %c0_95 = arith.constant 0 : index
    %c1920 = arith.constant 1920 : index
    %268 = vector.load %arg6[%c0_95, %c1920] : memref<1x4096xf32, #tpu.memory_space<vmem>>, vector<1x256xf32>
    %269 = vector.broadcast %268 : vector<1x256xf32> to vector<32x256xf32>
    %270 = arith.addf %267, %269 : vector<32x256xf32>
    %271 = vector.extract_strided_slice %270 {offsets = [0, 0], sizes = [32, 128], strides = [1, 1]} : vector<32x256xf32> to vector<32x128xf32>
    %272 = vector.extract_strided_slice %270 {offsets = [0, 128], sizes = [32, 128], strides = [1, 1]} : vector<32x256xf32> to vector<32x128xf32>
    %273 = arith.negf %272 : vector<32x128xf32>
    %274 = math.exp %273 : vector<32x128xf32>
    %cst_96 = arith.constant 1.000000e+00 : f32
    %275 = vector.broadcast %cst_96 : f32 to vector<32x128xf32>
    %276 = arith.addf %275, %274 : vector<32x128xf32>
    %277 = arith.divf %275, %276 : vector<32x128xf32>
    %278 = arith.mulf %271, %277 : vector<32x128xf32>
    %cst_97 = arith.constant 0.000000e+00 : f32
    %279 = vector.broadcast %cst_97 : f32 to vector<3x128xf32>
    %280 = tpu.concatenate %279, %278, %279 in 0 : vector<3x128xf32>, vector<32x128xf32>, vector<3x128xf32> -> vector<38x128xf32>
    %c0_98 = arith.constant 0 : index
    %c0_99 = arith.constant 0 : index
    %281 = vector.load %arg7[%c0_98, %c0_99] : memref<7x128xf32, #tpu.memory_space<vmem>>, vector<7x128xf32>
    %cst_100 = arith.constant 0.000000e+00 : f32
    %282 = vector.broadcast %cst_100 : f32 to vector<32x128xf32>
    %283 = vector.extract_strided_slice %280 {offsets = [0, 0], sizes = [32, 128], strides = [1, 1]} : vector<38x128xf32> to vector<32x128xf32>
    %284 = vector.extract_strided_slice %281 {offsets = [0, 0], sizes = [1, 128], strides = [1, 1]} : vector<7x128xf32> to vector<1x128xf32>
    %285 = vector.broadcast %284 : vector<1x128xf32> to vector<32x128xf32>
    %286 = arith.mulf %283, %285 : vector<32x128xf32>
    %287 = arith.addf %282, %286 : vector<32x128xf32>
    %288 = vector.extract_strided_slice %280 {offsets = [1, 0], sizes = [32, 128], strides = [1, 1]} : vector<38x128xf32> to vector<32x128xf32>
    %289 = vector.extract_strided_slice %281 {offsets = [1, 0], sizes = [1, 128], strides = [1, 1]} : vector<7x128xf32> to vector<1x128xf32>
    %290 = vector.broadcast %289 : vector<1x128xf32> to vector<32x128xf32>
    %291 = arith.mulf %288, %290 : vector<32x128xf32>
    %292 = arith.addf %287, %291 : vector<32x128xf32>
    %293 = vector.extract_strided_slice %280 {offsets = [2, 0], sizes = [32, 128], strides = [1, 1]} : vector<38x128xf32> to vector<32x128xf32>
    %294 = vector.extract_strided_slice %281 {offsets = [2, 0], sizes = [1, 128], strides = [1, 1]} : vector<7x128xf32> to vector<1x128xf32>
    %295 = vector.broadcast %294 : vector<1x128xf32> to vector<32x128xf32>
    %296 = arith.mulf %293, %295 : vector<32x128xf32>
    %297 = arith.addf %292, %296 : vector<32x128xf32>
    %298 = vector.extract_strided_slice %280 {offsets = [3, 0], sizes = [32, 128], strides = [1, 1]} : vector<38x128xf32> to vector<32x128xf32>
    %299 = vector.extract_strided_slice %281 {offsets = [3, 0], sizes = [1, 128], strides = [1, 1]} : vector<7x128xf32> to vector<1x128xf32>
    %300 = vector.broadcast %299 : vector<1x128xf32> to vector<32x128xf32>
    %301 = arith.mulf %298, %300 : vector<32x128xf32>
    %302 = arith.addf %297, %301 : vector<32x128xf32>
    %303 = vector.extract_strided_slice %280 {offsets = [4, 0], sizes = [32, 128], strides = [1, 1]} : vector<38x128xf32> to vector<32x128xf32>
    %304 = vector.extract_strided_slice %281 {offsets = [4, 0], sizes = [1, 128], strides = [1, 1]} : vector<7x128xf32> to vector<1x128xf32>
    %305 = vector.broadcast %304 : vector<1x128xf32> to vector<32x128xf32>
    %306 = arith.mulf %303, %305 : vector<32x128xf32>
    %307 = arith.addf %302, %306 : vector<32x128xf32>
    %308 = vector.extract_strided_slice %280 {offsets = [5, 0], sizes = [32, 128], strides = [1, 1]} : vector<38x128xf32> to vector<32x128xf32>
    %309 = vector.extract_strided_slice %281 {offsets = [5, 0], sizes = [1, 128], strides = [1, 1]} : vector<7x128xf32> to vector<1x128xf32>
    %310 = vector.broadcast %309 : vector<1x128xf32> to vector<32x128xf32>
    %311 = arith.mulf %308, %310 : vector<32x128xf32>
    %312 = arith.addf %307, %311 : vector<32x128xf32>
    %313 = vector.extract_strided_slice %280 {offsets = [6, 0], sizes = [32, 128], strides = [1, 1]} : vector<38x128xf32> to vector<32x128xf32>
    %314 = vector.extract_strided_slice %281 {offsets = [6, 0], sizes = [1, 128], strides = [1, 1]} : vector<7x128xf32> to vector<1x128xf32>
    %315 = vector.broadcast %314 : vector<1x128xf32> to vector<32x128xf32>
    %316 = arith.mulf %313, %315 : vector<32x128xf32>
    %317 = arith.addf %312, %316 : vector<32x128xf32>
    %c0_101 = arith.constant 0 : index
    %c2176 = arith.constant 2176 : index
    %318 = vector.load %arg6[%c0_101, %c2176] : memref<1x4096xf32, #tpu.memory_space<vmem>>, vector<1x128xf32>
    %319 = vector.broadcast %318 : vector<1x128xf32> to vector<32x128xf32>
    %320 = arith.addf %317, %319 : vector<32x128xf32>
    %c0_102 = arith.constant 0 : index
    %c2560 = arith.constant 2560 : index
    %321 = vector.load %arg6[%c0_102, %c2560] : memref<1x4096xf32, #tpu.memory_space<vmem>>, vector<1x128xf32>
    %322 = vector.broadcast %321 : vector<1x128xf32> to vector<32x128xf32>
    %323 = arith.subf %320, %322 : vector<32x128xf32>
    %c0_103 = arith.constant 0 : index
    %c2688 = arith.constant 2688 : index
    %324 = vector.load %arg6[%c0_103, %c2688] : memref<1x4096xf32, #tpu.memory_space<vmem>>, vector<1x128xf32>
    %cst_104 = arith.constant 9.99999974E-6 : f32
    %325 = vector.broadcast %cst_104 : f32 to vector<1x128xf32>
    %326 = arith.addf %324, %325 : vector<1x128xf32>
    %327 = math.rsqrt %326 : vector<1x128xf32>
    %328 = vector.broadcast %327 : vector<1x128xf32> to vector<32x128xf32>
    %329 = arith.mulf %323, %328 : vector<32x128xf32>
    %c0_105 = arith.constant 0 : index
    %c2304 = arith.constant 2304 : index
    %330 = vector.load %arg6[%c0_105, %c2304] : memref<1x4096xf32, #tpu.memory_space<vmem>>, vector<1x128xf32>
    %331 = vector.broadcast %330 : vector<1x128xf32> to vector<32x128xf32>
    %332 = arith.mulf %329, %331 : vector<32x128xf32>
    %c0_106 = arith.constant 0 : index
    %c2432 = arith.constant 2432 : index
    %333 = vector.load %arg6[%c0_106, %c2432] : memref<1x4096xf32, #tpu.memory_space<vmem>>, vector<1x128xf32>
    %334 = vector.broadcast %333 : vector<1x128xf32> to vector<32x128xf32>
    %335 = arith.addf %332, %334 : vector<32x128xf32>
    %336 = arith.negf %335 : vector<32x128xf32>
    %337 = math.exp %336 : vector<32x128xf32>
    %cst_107 = arith.constant 1.000000e+00 : f32
    %338 = vector.broadcast %cst_107 : f32 to vector<32x128xf32>
    %339 = arith.addf %338, %337 : vector<32x128xf32>
    %340 = arith.divf %338, %339 : vector<32x128xf32>
    %341 = arith.mulf %335, %340 : vector<32x128xf32>
    %342 = arith.truncf %341 : vector<32x128xf32> to vector<32x128xbf16>
    %c0_108 = arith.constant 0 : index
    %c1024 = arith.constant 1024 : index
    %343 = vector.load %arg4[%c0_108, %c1024] : memref<128x1408xbf16, #tpu.memory_space<vmem>>, vector<128x128xbf16>
    %cst_109 = arith.constant dense<0.000000e+00> : vector<32x128xf32>
    %344 = tpu.matmul %342, %343, %cst_109 {dimension_numbers = #tpu.dot_dimension_numbers<[1], [0], [0], [1], [0, 0, 1, 1], [], []>} : vector<32x128xbf16>, vector<128x128xbf16>, vector<32x128xf32> -> vector<32x128xf32>
    %c0_110 = arith.constant 0 : index
    %c2816 = arith.constant 2816 : index
    %345 = vector.load %arg6[%c0_110, %c2816] : memref<1x4096xf32, #tpu.memory_space<vmem>>, vector<1x128xf32>
    %346 = vector.broadcast %345 : vector<1x128xf32> to vector<32x128xf32>
    %347 = arith.addf %344, %346 : vector<32x128xf32>
    %348 = arith.addf %240, %347 : vector<32x128xf32>
    %c0_111 = arith.constant 0 : index
    %c2944 = arith.constant 2944 : index
    %349 = vector.load %arg6[%c0_111, %c2944] : memref<1x4096xf32, #tpu.memory_space<vmem>>, vector<1x128xf32>
    %c0_112 = arith.constant 0 : index
    %c3072 = arith.constant 3072 : index
    %350 = vector.load %arg6[%c0_112, %c3072] : memref<1x4096xf32, #tpu.memory_space<vmem>>, vector<1x128xf32>
    %c0_113 = arith.constant 0 : index
    %c1152 = arith.constant 1152 : index
    %351 = vector.load %arg4[%c0_113, %c1152] : memref<128x1408xbf16, #tpu.memory_space<vmem>>, vector<128x256xbf16>
    %c0_114 = arith.constant 0 : index
    %c3200 = arith.constant 3200 : index
    %352 = vector.load %arg6[%c0_114, %c3200] : memref<1x4096xf32, #tpu.memory_space<vmem>>, vector<1x256xf32>
    %c0_115 = arith.constant 0 : index
    %c128_116 = arith.constant 128 : index
    %353 = vector.load %arg5[%c0_115, %c128_116] : memref<256x256xbf16, #tpu.memory_space<vmem>>, vector<256x128xbf16>
    %c0_117 = arith.constant 0 : index
    %c3456 = arith.constant 3456 : index
    %354 = vector.load %arg6[%c0_117, %c3456] : memref<1x4096xf32, #tpu.memory_space<vmem>>, vector<1x128xf32>
    %cst_118 = arith.constant dense<0.000000e+00> : vector<32xf32>
    %355 = vector.multi_reduction <add>, %348, %cst_118 [1] : vector<32x128xf32> to vector<32xf32>
    %356 = vector.shape_cast %355 : vector<32xf32> to vector<32x1xf32>
    %cst_119 = arith.constant 1.280000e+02 : f32
    %357 = vector.broadcast %cst_119 : f32 to vector<32x1xf32>
    %358 = arith.divf %356, %357 : vector<32x1xf32>
    %359 = vector.broadcast %358 : vector<32x1xf32> to vector<32x128xf32>
    %360 = arith.subf %348, %359 : vector<32x128xf32>
    %361 = arith.mulf %360, %360 : vector<32x128xf32>
    %cst_120 = arith.constant dense<0.000000e+00> : vector<32xf32>
    %362 = vector.multi_reduction <add>, %361, %cst_120 [1] : vector<32x128xf32> to vector<32xf32>
    %363 = vector.shape_cast %362 : vector<32xf32> to vector<32x1xf32>
    %cst_121 = arith.constant 1.280000e+02 : f32
    %364 = vector.broadcast %cst_121 : f32 to vector<32x1xf32>
    %365 = arith.divf %363, %364 : vector<32x1xf32>
    %366 = vector.broadcast %358 : vector<32x1xf32> to vector<32x128xf32>
    %367 = arith.subf %348, %366 : vector<32x128xf32>
    %cst_122 = arith.constant 9.99999996E-13 : f32
    %368 = vector.broadcast %cst_122 : f32 to vector<32x1xf32>
    %369 = arith.addf %365, %368 : vector<32x1xf32>
    %370 = math.rsqrt %369 : vector<32x1xf32>
    %371 = vector.broadcast %370 : vector<32x1xf32> to vector<32x128xf32>
    %372 = arith.mulf %367, %371 : vector<32x128xf32>
    %373 = vector.broadcast %349 : vector<1x128xf32> to vector<32x128xf32>
    %374 = arith.mulf %372, %373 : vector<32x128xf32>
    %375 = vector.broadcast %350 : vector<1x128xf32> to vector<32x128xf32>
    %376 = arith.addf %374, %375 : vector<32x128xf32>
    %377 = arith.truncf %376 : vector<32x128xf32> to vector<32x128xbf16>
    %cst_123 = arith.constant dense<0.000000e+00> : vector<32x256xf32>
    %378 = tpu.matmul %377, %351, %cst_123 {dimension_numbers = #tpu.dot_dimension_numbers<[1], [0], [0], [1], [0, 0, 1, 1], [], []>} : vector<32x128xbf16>, vector<128x256xbf16>, vector<32x256xf32> -> vector<32x256xf32>
    %379 = vector.broadcast %352 : vector<1x256xf32> to vector<32x256xf32>
    %380 = arith.addf %378, %379 : vector<32x256xf32>
    %381 = arith.negf %380 : vector<32x256xf32>
    %382 = math.exp %381 : vector<32x256xf32>
    %cst_124 = arith.constant 1.000000e+00 : f32
    %383 = vector.broadcast %cst_124 : f32 to vector<32x256xf32>
    %384 = arith.addf %383, %382 : vector<32x256xf32>
    %385 = arith.divf %383, %384 : vector<32x256xf32>
    %386 = arith.mulf %380, %385 : vector<32x256xf32>
    %387 = arith.truncf %386 : vector<32x256xf32> to vector<32x256xbf16>
    %cst_125 = arith.constant dense<0.000000e+00> : vector<32x128xf32>
    %388 = tpu.matmul %387, %353, %cst_125 {dimension_numbers = #tpu.dot_dimension_numbers<[1], [0], [0], [1], [0, 0, 1, 1], [], []>} : vector<32x256xbf16>, vector<256x128xbf16>, vector<32x128xf32> -> vector<32x128xf32>
    %389 = vector.broadcast %354 : vector<1x128xf32> to vector<32x128xf32>
    %390 = arith.addf %388, %389 : vector<32x128xf32>
    %cst_126 = arith.constant 5.000000e-01 : f32
    %391 = vector.broadcast %cst_126 : f32 to vector<32x128xf32>
    %392 = arith.mulf %391, %390 : vector<32x128xf32>
    %393 = arith.addf %348, %392 : vector<32x128xf32>
    %c0_127 = arith.constant 0 : index
    %c3584 = arith.constant 3584 : index
    %394 = vector.load %arg6[%c0_127, %c3584] : memref<1x4096xf32, #tpu.memory_space<vmem>>, vector<1x128xf32>
    %c0_128 = arith.constant 0 : index
    %c3712 = arith.constant 3712 : index
    %395 = vector.load %arg6[%c0_128, %c3712] : memref<1x4096xf32, #tpu.memory_space<vmem>>, vector<1x128xf32>
    %cst_129 = arith.constant dense<0.000000e+00> : vector<32xf32>
    %396 = vector.multi_reduction <add>, %393, %cst_129 [1] : vector<32x128xf32> to vector<32xf32>
    %397 = vector.shape_cast %396 : vector<32xf32> to vector<32x1xf32>
    %cst_130 = arith.constant 1.280000e+02 : f32
    %398 = vector.broadcast %cst_130 : f32 to vector<32x1xf32>
    %399 = arith.divf %397, %398 : vector<32x1xf32>
    %400 = vector.broadcast %399 : vector<32x1xf32> to vector<32x128xf32>
    %401 = arith.subf %393, %400 : vector<32x128xf32>
    %402 = arith.mulf %401, %401 : vector<32x128xf32>
    %cst_131 = arith.constant dense<0.000000e+00> : vector<32xf32>
    %403 = vector.multi_reduction <add>, %402, %cst_131 [1] : vector<32x128xf32> to vector<32xf32>
    %404 = vector.shape_cast %403 : vector<32xf32> to vector<32x1xf32>
    %cst_132 = arith.constant 1.280000e+02 : f32
    %405 = vector.broadcast %cst_132 : f32 to vector<32x1xf32>
    %406 = arith.divf %404, %405 : vector<32x1xf32>
    %407 = vector.broadcast %399 : vector<32x1xf32> to vector<32x128xf32>
    %408 = arith.subf %393, %407 : vector<32x128xf32>
    %cst_133 = arith.constant 9.99999996E-13 : f32
    %409 = vector.broadcast %cst_133 : f32 to vector<32x1xf32>
    %410 = arith.addf %406, %409 : vector<32x1xf32>
    %411 = math.rsqrt %410 : vector<32x1xf32>
    %412 = vector.broadcast %411 : vector<32x1xf32> to vector<32x128xf32>
    %413 = arith.mulf %408, %412 : vector<32x128xf32>
    %414 = vector.broadcast %394 : vector<1x128xf32> to vector<32x128xf32>
    %415 = arith.mulf %413, %414 : vector<32x128xf32>
    %416 = vector.broadcast %395 : vector<1x128xf32> to vector<32x128xf32>
    %417 = arith.addf %415, %416 : vector<32x128xf32>
    %c0_134 = arith.constant 0 : index
    %c3840 = arith.constant 3840 : index
    %418 = vector.load %arg6[%c0_134, %c3840] : memref<1x4096xf32, #tpu.memory_space<vmem>>, vector<1x128xf32>
    %c0_135 = arith.constant 0 : index
    %c3968 = arith.constant 3968 : index
    %419 = vector.load %arg6[%c0_135, %c3968] : memref<1x4096xf32, #tpu.memory_space<vmem>>, vector<1x128xf32>
    %cst_136 = arith.constant dense<0.000000e+00> : vector<32xf32>
    %420 = vector.multi_reduction <add>, %417, %cst_136 [1] : vector<32x128xf32> to vector<32xf32>
    %421 = vector.shape_cast %420 : vector<32xf32> to vector<32x1xf32>
    %cst_137 = arith.constant 1.280000e+02 : f32
    %422 = vector.broadcast %cst_137 : f32 to vector<32x1xf32>
    %423 = arith.divf %421, %422 : vector<32x1xf32>
    %424 = vector.broadcast %423 : vector<32x1xf32> to vector<32x128xf32>
    %425 = arith.subf %417, %424 : vector<32x128xf32>
    %426 = arith.mulf %425, %425 : vector<32x128xf32>
    %cst_138 = arith.constant dense<0.000000e+00> : vector<32xf32>
    %427 = vector.multi_reduction <add>, %426, %cst_138 [1] : vector<32x128xf32> to vector<32xf32>
    %428 = vector.shape_cast %427 : vector<32xf32> to vector<32x1xf32>
    %cst_139 = arith.constant 1.280000e+02 : f32
    %429 = vector.broadcast %cst_139 : f32 to vector<32x1xf32>
    %430 = arith.divf %428, %429 : vector<32x1xf32>
    %431 = vector.broadcast %423 : vector<32x1xf32> to vector<32x128xf32>
    %432 = arith.subf %417, %431 : vector<32x128xf32>
    %cst_140 = arith.constant 9.99999996E-13 : f32
    %433 = vector.broadcast %cst_140 : f32 to vector<32x1xf32>
    %434 = arith.addf %430, %433 : vector<32x1xf32>
    %435 = math.rsqrt %434 : vector<32x1xf32>
    %436 = vector.broadcast %435 : vector<32x1xf32> to vector<32x128xf32>
    %437 = arith.mulf %432, %436 : vector<32x128xf32>
    %438 = vector.broadcast %418 : vector<1x128xf32> to vector<32x128xf32>
    %439 = arith.mulf %437, %438 : vector<32x128xf32>
    %440 = vector.broadcast %419 : vector<1x128xf32> to vector<32x128xf32>
    %441 = arith.addf %439, %440 : vector<32x128xf32>
    %442 = arith.truncf %441 : vector<32x128xf32> to vector<32x128xbf16>
    %c0_141 = arith.constant 0 : index
    %c0_142 = arith.constant 0 : index
    %c0_143 = arith.constant 0 : index
    %443 = vector.load %arg8[%c0_141, %c0_142, %c0_143] : memref<1x32x128xbf16, #tpu.memory_space<vmem>>, vector<1x32x128xbf16>
    %444 = vector.shape_cast %443 : vector<1x32x128xbf16> to vector<32x128xbf16>
    %445 = vector.shape_cast %442 : vector<32x128xbf16> to vector<1x32x128xbf16>
    tpu.vector_store %arg8[%c0_141, %c0_142, %c0_143], %445 {strides = array<i32>} : memref<1x32x128xbf16, #tpu.memory_space<vmem>>, vector<1x32x128xbf16>,
    return
  }
  func.func @transform_0(%arg0: i32) -> (i32, i32, i32) {
    %c0_i32 = arith.constant 0 : i32
    %c0_i32_0 = arith.constant 0 : i32
    %c0_i32_1 = arith.constant 0 : i32
    return %arg0, %c0_i32, %c0_i32_0 : i32, i32, i32
  }
  func.func @transform_1(%arg0: i32) -> (i32, i32, i32) {
    %c0_i32 = arith.constant 0 : i32
    %c0_i32_0 = arith.constant 0 : i32
    %c0_i32_1 = arith.constant 0 : i32
    %c0_i32_2 = arith.constant 0 : i32
    return %c0_i32, %c0_i32_0, %c0_i32_1 : i32, i32, i32
  }
  func.func @transform_2(%arg0: i32) -> (i32, i32, i32) {
    %c0_i32 = arith.constant 0 : i32
    %c0_i32_0 = arith.constant 0 : i32
    %c0_i32_1 = arith.constant 0 : i32
    return %arg0, %c0_i32, %c0_i32_0 : i32, i32, i32
  }
  func.func @transform_3(%arg0: i32) -> (i32, i32) {
    %c0_i32 = arith.constant 0 : i32
    %c0_i32_0 = arith.constant 0 : i32
    %c0_i32_1 = arith.constant 0 : i32
    return %c0_i32, %c0_i32_0 : i32, i32
  }
  func.func @transform_4(%arg0: i32) -> (i32, i32) {
    %c0_i32 = arith.constant 0 : i32
    %c0_i32_0 = arith.constant 0 : i32
    %c0_i32_1 = arith.constant 0 : i32
    return %c0_i32, %c0_i32_0 : i32, i32
  }
  func.func @transform_5(%arg0: i32) -> (i32, i32) {
    %c0_i32 = arith.constant 0 : i32
    %c0_i32_0 = arith.constant 0 : i32
    %c0_i32_1 = arith.constant 0 : i32
    return %c0_i32, %c0_i32_0 : i32, i32
  }
  func.func @transform_6(%arg0: i32) -> (i32, i32) {
    %c0_i32 = arith.constant 0 : i32
    %c0_i32_0 = arith.constant 0 : i32
    %c0_i32_1 = arith.constant 0 : i32
    return %c0_i32, %c0_i32_0 : i32, i32
  }
  func.func @transform_7(%arg0: i32) -> (i32, i32, i32) {
    %c0_i32 = arith.constant 0 : i32
    %c0_i32_0 = arith.constant 0 : i32
    %c0_i32_1 = arith.constant 0 : i32
    return %arg0, %c0_i32, %c0_i32_0 : i32, i32, i32
  }
}

</mosaic_0001>

<bundles_post_ra>
// kernel: conformer_chunk_encoder_forward.3
= control target key start
LH: loop header
LB: loop body
LE: loop exit
PB: predicated region body
PF: predicated region fallthrough
CT: control target
= control target key end

     0   :  { %s342_s1 = inlined_call_operand.vmem [shape: bf16[128,128], index: 1, kind: input, shape index: {}]   ;;  %s343_s2 = inlined_call_operand.vmem [shape: f32[1,128], index: 2, kind: input, shape index: {}]   ;;  %s344_s0 = inlined_call_operand.vmem [shape: bf16[64,128], index: 0, kind: input, shape index: {}]   ;;  %s345_s3 = inlined_call_operand.vmem [shape: bf16[64,128], index: 3, kind: output, shape index: {}]  }
   0x1   :  { %v222_v0 = vld [vmem:[%s342_s1 + $0x38] sm:$0xff]  ;;  %v221_v1 = vld [vmem:[%s342_s1 + $0x30] sm:$0xff]  ;;  %v220_v2 = vld [vmem:[%s342_s1 + $0x28] sm:$0xff] }
   0x2   :  { %114 = vmatpush.bf16.msra.mxu0 %v222_v0  ;;  %246 = vmatpush.bf16.msra.mxu1 %v222_v0  ;;  %v219_v3 = vld [vmem:[%s342_s1 + $0x20] sm:$0xff]  ;;  %v218_v4 = vld [vmem:[%s342_s1 + $0x18] sm:$0xff]  ;;  %v217_v5 = vld [vmem:[%s342_s1 + $0x10] sm:$0xff] }
   0x3   :  { %247 = vmatpush.bf16.msra.mxu2 %v222_v0  ;;  %248 = vmatpush.bf16.msra.mxu3 %v222_v0  ;;  %v216_v6 = vld [vmem:[%s342_s1 + $0x8] sm:$0xff]  ;;  %v215_v7 = vld [vmem:[%s342_s1] sm:$0xff]  ;;  %v213_v10 = vld [vmem:[%s344_s0 + $0x10] sm:$0xff] }
   0x4   :  { %v211_v8 = vld [vmem:[%s344_s0] sm:$0xff]  ;;  %v212_v9 = vld [vmem:[%s344_s0 + $0x8] sm:$0xff]  ;;  %v214_v11 = vld [vmem:[%s344_s0 + $0x18] sm:$0xff] }
   0x5   :  { %v270_v14 = vld [vmem:[%s343_s2] ss:$0 sm:$0xff] }
   0x6   :  { %115 = vmatpush.bf16.msra.mxu0 %v221_v1  ;;  %249 = vmatpush.bf16.msra.mxu1 %v221_v1 }
   0x7   :  { %250 = vmatpush.bf16.msra.mxu2 %v221_v1  ;;  %251 = vmatpush.bf16.msra.mxu3 %v221_v1 }
   0xa   :  { %116 = vmatpush.bf16.msra.mxu0 %v220_v2  ;;  %252 = vmatpush.bf16.msra.mxu1 %v220_v2 }
   0xb   :  { %253 = vmatpush.bf16.msra.mxu2 %v220_v2  ;;  %254 = vmatpush.bf16.msra.mxu3 %v220_v2 }
   0xe   :  { %117 = vmatpush.bf16.msra.mxu0 %v219_v3  ;;  %255 = vmatpush.bf16.msra.mxu1 %v219_v3 }
   0xf   :  { %256 = vmatpush.bf16.msra.mxu2 %v219_v3  ;;  %257 = vmatpush.bf16.msra.mxu3 %v219_v3 }
  0x12   :  { %118 = vmatpush.bf16.msra.mxu0 %v218_v4  ;;  %258 = vmatpush.bf16.msra.mxu1 %v218_v4 }
  0x13   :  { %259 = vmatpush.bf16.msra.mxu2 %v218_v4  ;;  %260 = vmatpush.bf16.msra.mxu3 %v218_v4 }
  0x16   :  { %119 = vmatpush.bf16.msra.mxu0 %v217_v5  ;;  %261 = vmatpush.bf16.msra.mxu1 %v217_v5 }
  0x17   :  { %262 = vmatpush.bf16.msra.mxu2 %v217_v5  ;;  %263 = vmatpush.bf16.msra.mxu3 %v217_v5 }
  0x1a   :  { %120 = vmatpush.bf16.msra.mxu0 %v216_v6  ;;  %264 = vmatpush.bf16.msra.mxu1 %v216_v6 }
  0x1b   :  { %265 = vmatpush.bf16.msra.mxu2 %v216_v6  ;;  %266 = vmatpush.bf16.msra.mxu3 %v216_v6 }
  0x1e   :  { %121 = vmatpush.bf16.msra.mxu0 %v215_v7  ;;  %267 = vmatpush.bf16.msra.mxu1 %v215_v7 }
  0x1f   :  { %268 = vmatpush.bf16.msra.mxu2 %v215_v7  ;;  %269 = vmatpush.bf16.msra.mxu3 %v215_v7 }
  0x21   :  { %122 = vmatmul.bf16.vlgmr.msra.gmra.mxu0 %v211_v8  ;;  %127 = vmatmul.bf16.vlgmr.msra.gmra.mxu1 %v212_v9 }
  0x22   :  { %132 = vmatmul.bf16.vlgmr.msra.gmra.mxu2 %v213_v10  ;;  %137 = vmatmul.bf16.vlgmr.msra.gmra.mxu3 %v214_v11 }
  0x9e   :  { %v123_v12 = vpop.f32.mrf.mxu0  ;;  %v128_v13 = vpop.f32.mrf.mxu1 }
  0x9f   :  { %v124_v19 = vadd.f32 %v270_v14, %v123_v12  ;;  %v129_v20 = vadd.f32 %v270_v14, %v128_v13 }
  0xa5   :  { %v133_v15 = vpop.f32.mrf.mxu2  ;;  %v138_v16 = vpop.f32.mrf.mxu3 }
  0xa6   :  { %v125_v17 = vpop.f32.mrf.mxu0  ;;  %v130_v18 = vpop.f32.mrf.mxu1  ;;  %v134_v27 = vadd.f32 %v270_v14, %v133_v15  ;;  %v139_v28 = vadd.f32 %v270_v14, %v138_v16 }
  0xa7   :  { %v126_v21 = vadd.f32 %v270_v14, %v125_v17  ;;  %v131_v22 = vadd.f32 %v270_v14, %v130_v18 }
  0xa9   :  { %v226_v23 = vpack.c.bf16 %v126_v21, %v124_v19  ;;  %v231_v24 = vpack.c.bf16 %v131_v22, %v129_v20 }
  0xab   :  { %227 = vst [vmem:[%s345_s3] sm:$0xff] %v226_v23  }
  0xac   :  { %243 = vst [vmem:[%s345_s3 + $0x8] sm:$0xff] %v231_v24  }
  0xad   :  { %v135_v25 = vpop.f32.mrf.mxu2  ;;  %v140_v26 = vpop.f32.mrf.mxu3 }
  0xae   :  { %v136_v29 = vadd.f32 %v270_v14, %v135_v25  ;;  %v141_v30 = vadd.f32 %v270_v14, %v140_v26 }
  0xb0   :  { %v236_v31 = vpack.c.bf16 %v136_v29, %v134_v27  ;;  %v241_v32 = vpack.c.bf16 %v141_v30, %v139_v28 }
  0xb2   :  { %244 = vst [vmem:[%s345_s3 + $0x10] sm:$0xff] %v236_v31  }
  0xb3   :  { %245 = vst [vmem:[%s345_s3 + $0x18] sm:$0xff] %v241_v32  }

// kernel: conformer_chunk_encoder_forward.4
= control target key start
LH: loop header
LB: loop body
LE: loop exit
PB: predicated region body
PF: predicated region fallthrough
CT: control target
= control target key end

     0   :  { %s5241_s24 = smov 0   ;;  %s7303_s0 = inlined_call_operand.vmem [shape: bf16[2,32,128], index: 0, kind: input, shape index: {}]   ;;  %s7304_s1 = inlined_call_operand.vmem [shape: bf16[4,128,32], index: 1, kind: input, shape index: {}]   ;;  %s7305_s2 = inlined_call_operand.vmem [shape: s32[2,1,32], index: 2, kind: input, shape index: {}]   ;;  %s7306_s3 = inlined_call_operand.vmem [shape: bf16[128,1408], index: 3, kind: input, shape index: {}]   ;;  %s7307_s4 = inlined_call_operand.vmem [shape: bf16[256,256], index: 4, kind: input, shape index: {}]   ;;  %s7308_s5 = inlined_call_operand.vmem [shape: f32[1,4096], index: 5, kind: input, shape index: {}]   ;;  %s7309_s6 = inlined_call_operand.vmem [shape: f32[7,128], index: 6, kind: input, shape index: {}]   ;;  %s7310_s7 = inlined_call_operand.vmem [shape: bf16[2,32,128], index: 7, kind: output, shape index: {}]  }
   0x1 LB: > { %s4038_s25 = sadd.s32 4294967295, %s5188_s24   ;;  %p4042_p0 = scmp.ge.s32.totalorder %s5188_s24, 1  ;;  %s5188_s24 = sphi %s5241_s24, %s17_s24  }
   0x2   : > { %p245_p1 = scmp.lt.s32.totalorder %s5188_s24, 3 }
   0x4   : > { %p246_p2 = pnand %p4042_p0, %p245_p1 }
   0x5   : > { %p280_p3 = scmp.lt.s32.totalorder (!%p246_p2), %s4038_s25, 1  ;;  %s5191_s28 = smov (!%p246_p2), 96  }
   0x6   : > { %249 = sbr.rel (%p246_p2) target bundleno = 4764 (0x129c), region = 48  ;;  %s5192_s22 = smov (!%p246_p2), 256  }
   0x7   : > { %s5193_s23 = smov (!%p246_p2), 264   ;;  %s5194_s27 = smov (!%p246_p2), 97  }
   0x8   : > { %s5196_s30 = smov (!%p246_p2), 280   ;;  %s5198_s11 = smov (!%p246_p2), 64  }
   0x9   : > { %s5200_s21 = smov (!%p246_p2), 32  }
   0xb   : > { %s7344_s25 = smov (!%p280_p3, %s4038_s25), 1  ;;  %v5190_v6 = vmov 128.0   ;;  %v4105_v29 = vld [vmem:[%s7306_s3 + $0x268] sm:$0xf]  ;;  %v4778_v30 = vld [vmem:[%s7306_s3 + $0x290] sm:$0xf0] }
   0xc   : > { %s4761_s26 = sshll.u32 %s7344_s25, 4  ;;  %4978 = vrcp.f32 %v5190_v6  ;;  %v4777_v31 = vld [vmem:[%s7306_s3 + $0x26c] sm:$0xf]  ;;  %v4106_v32 = vor.u32 %v4778_v30, %v4105_v29  ;;  %v4107_v33 = vld [vmem:[%s7306_s3 + $0x294] sm:$0xf0]  ;;  %s287_s10 = scalar_lea.vmem %s7305_s2, %s7344_s25 }
   0xd   : > { %s284_s29 = scalar_lea.vmem %s7303_s0, %s4761_s26  ;;  %v4110_v34 = vor.u32 %v4777_v31, %v4107_v33  ;;  %v4097_v35 = vld [vmem:[%s7306_s3 + $0x210] sm:$0xf]  ;;  %v4776_v36 = vld [vmem:[%s7306_s3 + $0x238] sm:$0xf0]  ;;  %v4775_v37 = vld [vmem:[%s7306_s3 + $0x214] sm:$0xf]  ;;  %s292_s15 = scalar_lea.vmem %s7310_s7, %s4761_s26 }
   0xe   : > { %v4933_v0 = vld [vmem:[%s284_s29 + $0x8] sm:$0xff]   ;;  %v4916_v1 = vld [vmem:[%s284_s29] sm:$0xff]   ;;  %542 = vmatpush.bf16.msra.mxu0 %v4106_v32  ;;  %v4098_v38 = vor.u32 %v4776_v36, %v4097_v35  ;;  %v4089_v41 = vld [vmem:[%s7306_s3 + $0x1b8] sm:$0xf]  ;;  %s5195_s29 = smov 272  }
   0xf   : > { %v5257_v2 = vunpack.c.l.bf16 %v4933_v0  ;;  %v5259_v3 = vunpack.c.l.bf16 %v4916_v1  ;;  %v5263_v4 = vunpack.c.h.bf16 %v4933_v0  ;;  %v5265_v5 = vunpack.c.h.bf16 %v4916_v1  ;;  %561 = vmatpush.bf16.msra.mxu1 %v4110_v34  ;;  %v4099_v39 = vld [vmem:[%s7306_s3 + $0x23c] sm:$0xf0]  ;;  %v4774_v42 = vld [vmem:[%s7306_s3 + $0x1e0] sm:$0xf0]  ;;  %v4773_v43 = vld [vmem:[%s7306_s3 + $0x1bc] sm:$0xf] }
  0x10   : > { %v4102_v40 = vor.u32 %v4775_v37, %v4099_v39  ;;  %v4090_v44 = vor.u32 %v4774_v42, %v4089_v41  ;;  %v4091_v45 = vld [vmem:[%s7306_s3 + $0x1e4] sm:$0xf0]  ;;  %v4081_v47 = vld [vmem:[%s7306_s3 + $0x160] sm:$0xf]  ;;  %v4772_v48 = vld [vmem:[%s7306_s3 + $0x188] sm:$0xf0] }
  0x11   : > { %358 = vadd.xlane.f32.xlu1 %v5257_v2  ;;  %354 = vadd.xlane.f32.xlu0 %v5259_v3  ;;  %v4094_v46 = vor.u32 %v4773_v43, %v4091_v45  ;;  %v4771_v49 = vld [vmem:[%s7306_s3 + $0x164] sm:$0xf]  ;;  %v4082_v50 = vor.u32 %v4772_v48, %v4081_v47  ;;  %v4083_v51 = vld [vmem:[%s7306_s3 + $0x18c] sm:$0xf0]  ;;  %v4073_v53 = vld [vmem:[%s7306_s3 + $0x108] sm:$0xf] }
  0x12   : > { %v4979_v7 = vpop.eup %4978  ;;  %543 = vmatpush.bf16.msra.mxu0 %v4098_v38  ;;  %v4086_v52 = vor.u32 %v4771_v49, %v4083_v51  ;;  %v4770_v54 = vld [vmem:[%s7306_s3 + $0x130] sm:$0xf0]  ;;  %v4769_v55 = vld [vmem:[%s7306_s3 + $0x10c] sm:$0xf]  ;;  %v4075_v57 = vld [vmem:[%s7306_s3 + $0x134] sm:$0xf0] }
  0x13   : > { %v363_v8 = vmul.f32 128.0, %v4979_v7  ;;  %vm367_vm0 = vweird.f32 %v4979_v7  ;;  %562 = vmatpush.bf16.msra.mxu1 %v4102_v40  ;;  %v4074_v56 = vor.u32 %v4770_v54, %v4073_v53  ;;  %v4078_v58 = vor.u32 %v4769_v55, %v4075_v57  ;;  %v4065_v59 = vld [vmem:[%s7306_s3 + $0xb0] sm:$0xf]  ;;  %v4768_v60 = vld [vmem:[%s7306_s3 + $0xd8] sm:$0xf0] }
  0x14   : > { %v4767_v61 = vld [vmem:[%s7306_s3 + $0xb4] sm:$0xf]  ;;  %v4066_v62 = vor.u32 %v4768_v60, %v4065_v59  ;;  %v4067_v63 = vld [vmem:[%s7306_s3 + $0xdc] sm:$0xf0]  ;;  %v4057_v1 = vld [vmem:[%s7306_s3 + $0x58] sm:$0xf] }
  0x15   : > { %v364_v9 = vsub.f32 1.0, %v363_v8  ;;  %v4070_v0 = vor.u32 %v4767_v61, %v4067_v63  ;;  %v4766_v6 = vld [vmem:[%s7306_s3 + $0x80] sm:$0xf0]  ;;  %v4958_v54 = vld [vmem:[%s7308_s5] ss:$0 sm:$0xff] }
  0x16   : > { %544 = vmatpush.bf16.msra.mxu0 %v4090_v44  ;;  %v4058_v8 = vor.u32 %v4766_v6, %v4057_v1  ;;  %v4959_v61 = vld [vmem:[%s7308_s5 + $0x1] ss:$0 sm:$0xff] }
  0x17   : > { %v365_v10 = vmul.f32 %v4979_v7, %v364_v9  ;;  %563 = vmatpush.bf16.msra.mxu1 %v4094_v46  ;;  %v4059_v9 = vld [vmem:[%s7306_s3 + $0x84] sm:$0xf0] }
  0x19   : > { %360 = vadd.xlane.f32.xlu1 %v5263_v4  ;;  %356 = vadd.xlane.f32.xlu0 %v5265_v5  ;;  %v366_v11 = vadd.f32 %v4979_v7, %v365_v10  ;;  %v4049_v10 = vld [vmem:[%s7306_s3] sm:$0xf] }
  0x1a   : > { %545 = vmatpush.bf16.msra.mxu0 %v4082_v50 }
  0x1b   : > { %v5269_v12 = vsel %vm367_vm0, %v4979_v7, %v366_v11  ;;  %564 = vmatpush.bf16.msra.mxu1 %v4086_v52  ;;  %v4765_v7 = vld [vmem:[%s7306_s3 + $0x5c] sm:$0xf]  ;;  %v4764_v11 = vld [vmem:[%s7306_s3 + $0x28] sm:$0xf0] }
  0x1e   : > { %546 = vmatpush.bf16.msra.mxu0 %v4074_v56 }
  0x1f   : > { %565 = vmatpush.bf16.msra.mxu1 %v4078_v58 }
  0x22   : > { %547 = vmatpush.bf16.msra.mxu0 %v4066_v62 }
  0x23   : > { %566 = vmatpush.bf16.msra.mxu1 %v4070_v0 }
  0x26   : > { %548 = vmatpush.bf16.msra.mxu0 %v4058_v8 }
  0x84   : > { %v359_v13 = vpop.xlane.xlu1 %358  ;;  %v355_v14 = vpop.xlane.xlu0 %354 }
  0x85   : > { %v371_v15 = vmul.f32 %v5269_v12, %v359_v13  ;;  %v369_v16 = vmul.f32 %v5269_v12, %v355_v14  ;;  %v4062_v13 = vor.u32 %v4765_v7, %v4059_v9  ;;  %v4763_v14 = vld [vmem:[%s7306_s3 + $0x4] sm:$0xf] }
  0x87   : > { %v5274_v17 = vsub.f32 %v5257_v2, %v371_v15  ;;  %v5277_v18 = vsub.f32 %v5259_v3, %v369_v16  ;;  %v4051_v15 = vld [vmem:[%s7306_s3 + $0x2c] sm:$0xf0]  ;;  %567 = vmatpush.bf16.msra.mxu1 %v4062_v13 }
  0x89   : > { %v379_v19 = vmul.f32 %v5274_v17, %v5274_v17  ;;  %v377_v20 = vmul.f32 %v5277_v18, %v5277_v18 }
  0x8b   : > { %385 = vadd.xlane.f32.xlu0 %v379_v19  ;;  %381 = vadd.xlane.f32.xlu2 %v377_v20 }
  0x8c   : > { %v361_v21 = vpop.xlane.xlu1 %360  ;;  %v357_v22 = vpop.xlane.xlu0 %356 }
  0x8d   : > { %v372_v23 = vmul.f32 %v5269_v12, %v361_v21  ;;  %v370_v24 = vmul.f32 %v5269_v12, %v357_v22  ;;  %v4050_v21 = vor.u32 %v4764_v11, %v4049_v10  ;;  %v4054_v22 = vor.u32 %v4763_v14, %v4051_v15 }
  0x8f   : > { %v5286_v25 = vsub.f32 %v5263_v4, %v372_v23  ;;  %v5289_v26 = vsub.f32 %v5265_v5, %v370_v24  ;;  %549 = vmatpush.bf16.msra.mxu0 %v4050_v21  ;;  %568 = vmatpush.bf16.msra.mxu1 %v4054_v22  ;;  %v4794_v21 = vld [vmem:[%s7307_s4 + $0xf4] sm:$0xf0] }
  0x91   : > { %v380_v27 = vmul.f32 %v5286_v25, %v5286_v25  ;;  %v378_v28 = vmul.f32 %v5289_v26, %v5289_v26 }
  0x93   : > { %387 = vadd.xlane.f32.xlu1 %v380_v27  ;;  %383 = vadd.xlane.f32.xlu2 %v378_v28 }
  0xfe   : > { %v382_v16 = vpop.xlane.xlu2 %381  ;;  %v386_v20 = vpop.xlane.xlu0 %385 }
  0xff   : > { %v389_v19 = vmul.f32 %v382_v16, %v5269_v12  ;;  %v391_v24 = vmul.f32 %v386_v20, %v5269_v12  ;;  %v4786_v20 = vld [vmem:[%s7307_s4 + $0x74] sm:$0xf0] }
 0x101   : > { %v393_v23 = vadd.f32 1e-12, %v389_v19  ;;  %v395_v27 = vadd.f32 1e-12, %v391_v24  ;;  %v4149_v19 = vld [vmem:[%s7307_s4 + $0x70] sm:$0xf] }
 0x102   : > { %v4785_v24 = vld [vmem:[%s7307_s4 + $0x64] sm:$0xf0] }
 0x103   : > { %4980 = vrsqrt.f32 %v393_v23  ;;  %vm403_vm2 = vweird.f32 %v393_v23  ;;  %vm423_vm9 = vweird.f32 %v395_v27 }
 0x104   : > { %4982 = vrsqrt.f32 %v395_v27 }
 0x106   : > { %v388_v28 = vpop.xlane.xlu1 %387  ;;  %v384_v29 = vpop.xlane.xlu2 %383 }
 0x107   : > { %v392_v30 = vmul.f32 %v388_v28, %v5269_v12  ;;  %v390_v31 = vmul.f32 %v384_v29, %v5269_v12  ;;  %v4793_v29 = vld [vmem:[%s7307_s4 + $0xe4] sm:$0xf0] }
 0x109   : > { %v4981_v32 = vpop.eup %4980  ;;  %v396_v33 = vadd.f32 1e-12, %v392_v30  ;;  %v394_v34 = vadd.f32 1e-12, %v390_v31  ;;  %v4141_v31 = vld [vmem:[%s7307_s4 + $0x50] sm:$0xf] }
 0x10a   : > { %v398_v35 = vmul.f32 %v4981_v32, %v393_v23  ;;  %v4983_v38 = vpop.eup %4982  ;;  %vm404_vm1 = vweird.f32 %v4981_v32  ;;  %v4145_v23 = vld [vmem:[%s7307_s4 + $0x60] sm:$0xf] }
 0x10b   : > { %4984 = vrsqrt.f32 %v396_v33  ;;  %v418_v44 = vmul.f32 %v4983_v38, %v395_v27  ;;  %vm405_vm3 = vmor %vm403_vm2, %vm404_vm1  ;;  %vm413_vm5 = vweird.f32 %v394_v34  ;;  %vm433_vm7 = vweird.f32 %v396_v33  ;;  %v4177_v27 = vld [vmem:[%s7307_s4 + $0xe0] sm:$0xf] }
 0x10c   : > { %v399_v36 = vmul.f32 %v4981_v32, %v398_v35  ;;  %4986 = vrsqrt.f32 %v394_v34  ;;  %vm424_vm10 = vweird.f32 %v4983_v38  ;;  %v4146_v28 = vor.u32 %v4785_v24, %v4145_v23  ;;  %v4792_v35 = vld [vmem:[%s7307_s4 + $0xd4] sm:$0xf0] }
 0x10d   : > { %v419_v48 = vmul.f32 %v4983_v38, %v418_v44  ;;  %vm425_vm12 = vmor %vm423_vm9, %vm424_vm10  ;;  %v4178_v30 = vor.u32 %v4793_v29, %v4177_v27 }
 0x10e   : > { %v400_v37 = vmul.f32 0.5, %v399_v36 }
 0x10f   : > { %v420_v55 = vmul.f32 0.5, %v419_v48  ;;  %v4165_v48 = vld [vmem:[%s7307_s4 + $0xb0] sm:$0xf] }
 0x110   : > { %v401_v39 = vsub.f32 1.5, %v400_v37  ;;  %v320_v37 = vld [vmem:[%s7308_s5 + $0x2] sm:$0x3] }
 0x111   : > { %v4985_v40 = vpop.eup %4984  ;;  %v421_v62 = vsub.f32 1.5, %v420_v55  ;;  %v5456_v44 = vperm.slane %v320_v37, 0 }
 0x112   : > { %v4987_v41 = vpop.eup %4986  ;;  %v428_v42 = vmul.f32 %v4985_v40, %v396_v33  ;;  %v402_v43 = vmul.f32 %v4981_v32, %v401_v39  ;;  %vm434_vm8 = vweird.f32 %v4985_v40  ;;  %v4173_v33 = vld [vmem:[%s7307_s4 + $0xd0] sm:$0xf]  ;;  %v4783_v39 = vld [vmem:[%s7307_s4 + $0x44] sm:$0xf0] }
 0x113   : > { %v408_v45 = vmul.f32 %v4987_v41, %v394_v34  ;;  %vm414_vm4 = vweird.f32 %v4987_v41  ;;  %vm435_vm11 = vmor %vm433_vm7, %vm434_vm8  ;;  %v422_v6 = vmul.f32 %v4983_v38, %v421_v62  ;;  %v4174_v36 = vor.u32 %v4792_v35, %v4173_v33 }
 0x114   : > { %v429_v46 = vmul.f32 %v4985_v40, %v428_v42  ;;  %v406_v50 = vsel %vm405_vm3, %v4981_v32, %v402_v43  ;;  %vm415_vm6 = vmor %vm413_vm5, %vm414_vm4  ;;  %v4784_v32 = vld [vmem:[%s7307_s4 + $0x54] sm:$0xf0]  ;;  %v4791_v42 = vld [vmem:[%s7307_s4 + $0xc4] sm:$0xf0] }
 0x115   : > { %v409_v47 = vmul.f32 %v4987_v41, %v408_v45  ;;  %v437_v53 = vmul.f32 %v406_v50, %v5277_v18  ;;  %v4142_v34 = vor.u32 %v4784_v32, %v4141_v31  ;;  %v5458_v45 = vperm.slane %v320_v37, 1  ;;  %v4790_v50 = vld [vmem:[%s7307_s4 + $0xb4] sm:$0xf0] }
 0x116   : > { %v430_v51 = vmul.f32 0.5, %v429_v46  ;;  %v4133_v46 = vld [vmem:[%s7307_s4 + $0x30] sm:$0xf] }
 0x117   : > { %v410_v49 = vmul.f32 0.5, %v409_v47  ;;  %v444_v60 = vmul.f32 %v4958_v54, %v437_v53  ;;  %v4782_v47 = vld [vmem:[%s7307_s4 + $0x34] sm:$0xf0] }
 0x118   : > { %v431_v57 = vsub.f32 1.5, %v430_v51  ;;  %v4166_v51 = vor.u32 %v4790_v50, %v4165_v48 }
 0x119   : > { %v411_v52 = vsub.f32 1.5, %v410_v49  ;;  %v451_v0 = vadd.f32 %v4959_v61, %v444_v60  ;;  %v4134_v49 = vor.u32 %v4782_v47, %v4133_v46  ;;  %v4789_v60 = vld [vmem:[%s7307_s4 + $0xa4] sm:$0xf0] }
 0x11a   : > { %v432_v63 = vmul.f32 %v4985_v40, %v431_v57  ;;  %v4781_v57 = vld [vmem:[%s7307_s4 + $0x24] sm:$0xf0] }
 0x11b   : > { %v412_v56 = vmul.f32 %v4987_v41, %v411_v52 }
 0x11c   : > { %v436_v8 = vsel %vm435_vm11, %v4985_v40, %v432_v63  ;;  %v4169_v40 = vld [vmem:[%s7307_s4 + $0xc0] sm:$0xf]  ;;  %v4125_v63 = vld [vmem:[%s7307_s4 + $0x10] sm:$0xf] }
 0x11d   : > { %v416_v58 = vsel %vm415_vm6, %v4987_v41, %v412_v56  ;;  %v440_v9 = vmul.f32 %v436_v8, %v5286_v25  ;;  %v4181_v25 = vld [vmem:[%s7307_s4 + $0xf0] sm:$0xf]  ;;  %v4170_v43 = vor.u32 %v4791_v42, %v4169_v40  ;;  %v4129_v56 = vld [vmem:[%s7307_s4 + $0x20] sm:$0xf] }
 0x11e   : > { %v438_v59 = vmul.f32 %v416_v58, %v5289_v26  ;;  %v426_v26 = vsel %vm425_vm12, %v4983_v38, %v422_v6  ;;  %v4182_v22 = vor.u32 %v4794_v21, %v4181_v25  ;;  %v4137_v38 = vld [vmem:[%s7307_s4 + $0x40] sm:$0xf] }
 0x11f   : > { %v439_v10 = vmul.f32 %v426_v26, %v5274_v17  ;;  %v447_v11 = vmul.f32 %v4958_v54, %v440_v9  ;;  %v4150_v17 = vor.u32 %v4786_v20, %v4149_v19  ;;  %v4138_v41 = vor.u32 %v4783_v39, %v4137_v38  ;;  %v4161_v58 = vld [vmem:[%s7307_s4 + $0xa0] sm:$0xf]  ;;  %v4787_v19 = vld [vmem:[%s7307_s4 + $0x84] sm:$0xf0] }
 0x120   : > { %v445_v18 = vmul.f32 %v4958_v54, %v438_v59  ;;  %862 = vmatpush.bf16.msra.mxu3 %v4182_v22  ;;  %v4130_v59 = vor.u32 %v4781_v57, %v4129_v56 }
 0x121   : > { %v446_v13 = vmul.f32 %v4958_v54, %v439_v10  ;;  %v454_v14 = vadd.f32 %v4959_v61, %v447_v11  ;;  %843 = vmatpush.bf16.msra.mxu2 %v4150_v17 }
 0x122   : > { %v452_v1 = vadd.f32 %v4959_v61, %v445_v18  ;;  %v4162_v18 = vor.u32 %v4789_v60, %v4161_v58 }
 0x123   : > { %v453_v15 = vadd.f32 %v4959_v61, %v446_v13  ;;  %v4121_v13 = vld [vmem:[%s7307_s4] sm:$0xf] }
 0x124   : > { %v455_v7 = vpack.c.bf16 %v452_v1, %v451_v0  ;;  %863 = vmatpush.bf16.msra.mxu3 %v4178_v30  ;;  %v4780_v0 = vld [vmem:[%s7307_s4 + $0x14] sm:$0xf0]  ;;  %v4157_v1 = vld [vmem:[%s7307_s4 + $0x90] sm:$0xf] }
 0x125   : > { %v456_v16 = vpack.c.bf16 %v454_v14, %v453_v15  ;;  %844 = vmatpush.bf16.msra.mxu2 %v4146_v28  ;;  %v4126_v6 = vor.u32 %v4780_v0, %v4125_v63  ;;  %v4779_v14 = vld [vmem:[%s7307_s4 + $0x4] sm:$0xf0]  ;;  %v4153_v15 = vld [vmem:[%s7307_s4 + $0x80] sm:$0xf] }
 0x126   : > { %550 = vmatmul.bf16.vlgmr.msra.gmra.mxu0 %v455_v7  ;;  %569 = vmatmul.bf16.vlgmr.msra.gmra.mxu1 %v455_v7  ;;  %v4788_v7 = vld [vmem:[%s7307_s4 + $0x94] sm:$0xf0]  ;;  %v4154_v17 = vor.u32 %v4787_v19, %v4153_v15 }
 0x127   : > { %v4158_v8 = vor.u32 %v4788_v7, %v4157_v1 }
 0x128   : > { %864 = vmatpush.bf16.msra.mxu3 %v4174_v36 }
 0x129   : > { %845 = vmatpush.bf16.msra.mxu2 %v4142_v34 }
 0x12c   : > { %865 = vmatpush.bf16.msra.mxu3 %v4170_v43 }
 0x12d   : > { %846 = vmatpush.bf16.msra.mxu2 %v4138_v41 }
 0x130   : > { %866 = vmatpush.bf16.msra.mxu3 %v4166_v51 }
 0x131   : > { %847 = vmatpush.bf16.msra.mxu2 %v4134_v49 }
 0x134   : > { %867 = vmatpush.bf16.msra.mxu3 %v4162_v18 }
 0x135   : > { %848 = vmatpush.bf16.msra.mxu2 %v4130_v59 }
 0x136   : > { %555 = vmatmul.bf16.gmra.mxu0 %v456_v16  ;;  %574 = vmatmul.bf16.gmra.mxu1 %v456_v16  ;;  %v4122_v16 = vor.u32 %v4779_v14, %v4121_v13 }
 0x138   : > { %868 = vmatpush.bf16.msra.mxu3 %v4158_v8 }
 0x139   : > { %849 = vmatpush.bf16.msra.mxu2 %v4126_v6 }
 0x13c   : > { %869 = vmatpush.bf16.msra.mxu3 %v4154_v17 }
 0x13d   : > { %850 = vmatpush.bf16.msra.mxu2 %v4122_v16 }
 0x1a3   : > { %v551_v52 = vpop.f32.mrf.mxu0  ;;  %v570_v53 = vpop.f32.mrf.mxu1 }
 0x1a4   : > { %v5473_v54 = vadd.f32 %v551_v52, %v5456_v44  ;;  %v5476_v55 = vadd.f32 %v570_v53, %v5458_v45 }
 0x1a6   : > { %v4111_v61 = vmul.f32 -1.442695, %v5473_v54  ;;  %v4112_v62 = vmul.f32 -1.442695, %v5476_v55 }
 0x1a8   : > { %4988 = vpow2.f32 %v4111_v61 }
 0x1a9   : > { %4990 = vpow2.f32 %v4112_v62 }
 0x1ab   : > { %v553_v26 = vpop.f32.mrf.mxu0  ;;  %v572_v9 = vpop.f32.mrf.mxu1 }
 0x1ac   : > { %v5505_v10 = vadd.f32 %v553_v26, %v5456_v44  ;;  %v5508_v11 = vadd.f32 %v572_v9, %v5458_v45 }
 0x1ae   : > { %v4989_v20 = vpop.eup %4988  ;;  %v4113_v25 = vmul.f32 -1.442695, %v5505_v10  ;;  %v4114_v23 = vmul.f32 -1.442695, %v5508_v11 }
 0x1af   : > { %v4991_v21 = vpop.eup %4990  ;;  %v604_v22 = vadd.f32 1.0, %v4989_v20 }
 0x1b0   : > { %v5524_v24 = vadd.f32 1.0, %v4991_v21  ;;  %4992 = vpow2.f32 %v4113_v25 }
 0x1b1   : > { %4994 = vrcp.f32 %v604_v22  ;;  %v621_v53 = vand.u32 2147483647, %v604_v22  ;;  %v623_v59 = vand.u32 2147483648, %v604_v22  ;;  %vm617_vm14 = vweird.f32 %v604_v22 }
 0x1b2   : > { %4996 = vrcp.f32 %v5524_v24  ;;  %vm632_vm15 = vweird.f32 %v5524_v24  ;;  %v636_v18 = vand.u32 2147483647, %v5524_v24 }
 0x1b3   : > { %4998 = vpow2.f32 %v4114_v23  ;;  %v556_v27 = vpop.f32.mrf.mxu0  ;;  %v575_v28 = vpop.f32.mrf.mxu1  ;;  %vm5575_vm1 = vcmp.eq.f32.partialorder %v621_v53, 8.507059e+37  ;;  %v624_v26 = vor.u32 1.1754944e-38, %v623_v59 }
 0x1b4   : > { %v5528_v29 = vadd.f32 %v556_v27, %v5456_v44  ;;  %v5531_v30 = vadd.f32 %v575_v28, %v5458_v45  ;;  %vm637_vm9 = vcmp.eq.f32.partialorder %v636_v18, 8.507059e+37 }
 0x1b6   : > { %v4993_v31 = vpop.eup %4992  ;;  %v4115_v32 = vmul.f32 -1.442695, %v5528_v29  ;;  %v4116_v33 = vmul.f32 -1.442695, %v5531_v30 }
 0x1b7   : > { %v5535_v34 = vpop.eup %4994  ;;  %v5537_v35 = vadd.f32 1.0, %v4993_v31 }
 0x1b8   : > { %v5539_v36 = vpop.eup %4996  ;;  %v613_v37 = vmul.f32 %v5535_v34, %v604_v22  ;;  %5000 = vpow2.f32 %v4115_v32  ;;  %vm618_vm13 = vweird.f32 %v5535_v34 }
 0x1b9   : > { %v4999_v38 = vpop.eup %4998  ;;  %v628_v39 = vmul.f32 %v5539_v36, %v5524_v24  ;;  %5002 = vrcp.f32 %v5537_v35  ;;  %v651_v63 = vand.u32 2147483647, %v5537_v35  ;;  %v653_v6 = vand.u32 2147483648, %v5537_v35  ;;  %vm5571_vm0 = vmor %vm617_vm14, %vm618_vm13 }
 0x1ba   : > { %v614_v40 = vsub.f32 1.0, %v613_v37  ;;  %v5545_v41 = vadd.f32 1.0, %v4999_v38  ;;  %5004 = vpow2.f32 %v4116_v33  ;;  %vm633_vm2 = vweird.f32 %v5539_v36 }
 0x1bb   : > { %v558_v42 = vpop.f32.mrf.mxu0  ;;  %v577_v43 = vpop.f32.mrf.mxu1  ;;  %v629_v49 = vsub.f32 1.0, %v628_v39  ;;  %vm647_vm3 = vweird.f32 %v5537_v35  ;;  %vm5591_vm5 = vcmp.eq.f32.partialorder %v651_v63, 8.507059e+37  ;;  %v654_v22 = vor.u32 1.1754944e-38, %v653_v6  ;;  %vm5600_vm6 = vmor %vm632_vm15, %vm633_vm2 }
 0x1bc   : > { %5006 = vrcp.f32 %v5545_v41  ;;  %v5549_v46 = vadd.f32 %v558_v42, %v5456_v44  ;;  %v5552_v47 = vadd.f32 %v577_v43, %v5458_v45  ;;  %v615_v48 = vmul.f32 %v5535_v34, %v614_v40 }
 0x1bd   : > { %v638_v44 = vand.u32 2147483648, %v5524_v24  ;;  %v630_v61 = vmul.f32 %v5539_v36, %v629_v49  ;;  %v668_v23 = vand.u32 2147483648, %v5545_v41  ;;  %v666_v24 = vand.u32 2147483647, %v5545_v41 }
 0x1be   : > { %v5001_v50 = vpop.eup %5000  ;;  %v4117_v51 = vmul.f32 -1.442695, %v5549_v46  ;;  %v4118_v57 = vmul.f32 -1.442695, %v5552_v47  ;;  %v616_v60 = vadd.f32 %v5535_v34, %v615_v48  ;;  %vm662_vm10 = vweird.f32 %v5545_v41 }
 0x1bf   : > { %v5003_v52 = vpop.eup %5002  ;;  %v5556_v56 = vadd.f32 1.0, %v5001_v50  ;;  %v639_v9 = vor.u32 1.1754944e-38, %v638_v44  ;;  %v631_v15 = vadd.f32 %v5539_v36, %v630_v61  ;;  %v669_v50 = vor.u32 1.1754944e-38, %v668_v23 }
 0x1c0   : > { %v5005_v58 = vpop.eup %5004  ;;  %5008 = vpow2.f32 %v4117_v51  ;;  %v643_v45 = vmul.f32 %v5003_v52, %v5537_v35  ;;  %v620_v14 = vsel %vm5571_vm0, %v5535_v34, %v616_v60  ;;  %vm648_vm4 = vweird.f32 %v5003_v52 }
 0x1c1   : > { %5010 = vrcp.f32 %v5556_v56  ;;  %v5568_v0 = vadd.f32 1.0, %v5005_v58  ;;  %v625_v27 = vsel %vm5575_vm1, %v624_v26, %v620_v14  ;;  %v635_v37 = vsel %vm5600_vm6, %v5539_v36, %v631_v15  ;;  %vm649_vm7 = vmor %vm647_vm3, %vm648_vm4 }
 0x1c2   : > { %v5007_v62 = vpop.eup %5006  ;;  %5012 = vpow2.f32 %v4118_v57  ;;  %v644_v1 = vsub.f32 1.0, %v643_v45  ;;  %v732_v48 = vmul.f32 %v625_v27, %v5473_v54  ;;  %v640_v35 = vsel %vm637_vm9, %v639_v9, %v635_v37 }
 0x1c3   : > { %v658_v13 = vmul.f32 %v5007_v62, %v5545_v41  ;;  %5014 = vrcp.f32 %v5568_v0  ;;  %vm663_vm8 = vweird.f32 %v5007_v62  ;;  %vm667_vm12 = vcmp.eq.f32.partialorder %v666_v24, 8.507059e+37 }
 0x1c4   : > { %v645_v19 = vmul.f32 %v5003_v52, %v644_v1  ;;  %vm664_vm11 = vmor %vm662_vm10, %vm663_vm8  ;;  %v681_v54 = vand.u32 2147483647, %v5556_v56  ;;  %v733_v41 = vmul.f32 %v640_v35, %v5476_v55  ;;  %v683_v44 = vand.u32 2147483648, %v5556_v56 }
 0x1c5   : > { %v659_v20 = vsub.f32 1.0, %v658_v13  ;;  %vm677_vm14 = vweird.f32 %v5556_v56  ;;  %vm692_vm3 = vweird.f32 %v5568_v0  ;;  %v696_v15 = vand.u32 2147483647, %v5568_v0 }
 0x1c6   : > { %v5009_v16 = vpop.eup %5008  ;;  %v646_v32 = vadd.f32 %v5003_v52, %v645_v19  ;;  %vm5636_vm15 = vcmp.eq.f32.partialorder %v681_v54, 8.507059e+37  ;;  %v684_v6 = vor.u32 1.1754944e-38, %v683_v44  ;;  %v4269_v19 = vld [vmem:[%s7306_s3 + $0x270] sm:$0xf] }
 0x1c7   : > { %v5587_v25 = vpop.eup %5010  ;;  %v5589_v17 = vadd.f32 1.0, %v5009_v16  ;;  %v660_v33 = vmul.f32 %v5007_v62, %v659_v20  ;;  %vm697_vm9 = vcmp.eq.f32.partialorder %v696_v15, 8.507059e+37 }
 0x1c8   : > { %v673_v31 = vmul.f32 %v5587_v25, %v5556_v56  ;;  %v5013_v34 = vpop.eup %5012  ;;  %v650_v40 = vsel %vm649_vm7, %v5003_v52, %v646_v32  ;;  %vm678_vm13 = vweird.f32 %v5587_v25  ;;  %v698_v56 = vand.u32 2147483648, %v5568_v0 }
 0x1c9   : > { %5016 = vrcp.f32 %v5589_v17  ;;  %v5614_v39 = vadd.f32 1.0, %v5013_v34  ;;  %v661_v42 = vadd.f32 %v5007_v62, %v660_v33  ;;  %v5616_v43 = vpop.eup %5014  ;;  %v655_v36 = vsel %vm5591_vm5, %v654_v22, %v650_v40  ;;  %vm5644_vm1 = vmor %vm677_vm14, %vm678_vm13 }
 0x1ca   : > { %v674_v38 = vsub.f32 1.0, %v673_v31  ;;  %v688_v49 = vmul.f32 %v5616_v43, %v5568_v0  ;;  %v734_v52 = vmul.f32 %v655_v36, %v5505_v10  ;;  %vm693_vm0 = vweird.f32 %v5616_v43 }
 0x1cb   : > { %5018 = vrcp.f32 %v5614_v39  ;;  %v665_v53 = vsel %vm664_vm11, %v5007_v62, %v661_v42  ;;  %v711_v13 = vand.u32 2147483647, %v5589_v17  ;;  %vm5655_vm4 = vmor %vm692_vm3, %vm693_vm0  ;;  %vm707_vm5 = vweird.f32 %v5589_v17 }
 0x1cc   : > { %v675_v51 = vmul.f32 %v5587_v25, %v674_v38  ;;  %v689_v57 = vsub.f32 1.0, %v688_v49  ;;  %v670_v58 = vsel %vm667_vm12, %v669_v50, %v665_v53  ;;  %v740_v45 = vpack.c.bf16 %v734_v52, %v732_v48 }
 0x1cd   : > { %v735_v60 = vmul.f32 %v670_v58, %v5508_v11  ;;  %v713_v11 = vand.u32 2147483648, %v5589_v17  ;;  %v728_v22 = vand.u32 2147483648, %v5614_v39  ;;  %v726_v0 = vand.u32 2147483647, %v5614_v39 }
 0x1ce   : > { %v690_v61 = vmul.f32 %v5616_v43, %v689_v57  ;;  %v676_v10 = vadd.f32 %v5587_v25, %v675_v51  ;;  %851 = vmatmul.bf16.vlgmr.msra.gmra.mxu2 %v740_v45  ;;  %v699_v28 = vor.u32 1.1754944e-38, %v698_v56  ;;  %vm712_vm8 = vcmp.eq.f32.partialorder %v711_v13, 8.507059e+37 }
 0x1cf   : > { %v5017_v59 = vpop.eup %5016  ;;  %v741_v62 = vpack.c.bf16 %v735_v60, %v733_v41  ;;  %v714_v21 = vor.u32 1.1754944e-38, %v713_v11  ;;  %vm722_vm10 = vweird.f32 %v5614_v39  ;;  %v729_v37 = vor.u32 1.1754944e-38, %v728_v22 }
 0x1d0   : > { %v703_v18 = vmul.f32 %v5017_v59, %v5589_v17  ;;  %v691_v7 = vadd.f32 %v5616_v43, %v690_v61  ;;  %vm708_vm2 = vweird.f32 %v5017_v59  ;;  %v680_v14 = vsel %vm5644_vm1, %v5587_v25, %v676_v10 }
 0x1d1   : > { %v5019_v63 = vpop.eup %5018  ;;  %870 = vmatmul.bf16.vlgmr.msra.gmra.mxu3 %v741_v62  ;;  %vm709_vm6 = vmor %vm707_vm5, %vm708_vm2  ;;  %v685_v27 = vsel %vm5636_vm15, %v684_v6, %v680_v14  ;;  %vm727_vm12 = vcmp.eq.f32.partialorder %v726_v0, 8.507059e+37  ;;  %v4818_v0 = vld [vmem:[%s7306_s3 + $0x2a0] sm:$0xf0]  ;;  %vm1330_vm0 = vcmask 261120  }
 0x1d2   : > { %v704_v1 = vsub.f32 1.0, %v703_v18  ;;  %v718_v8 = vmul.f32 %v5019_v63, %v5614_v39  ;;  %v695_v23 = vsel %vm5655_vm4, %v5616_v43, %v691_v7  ;;  %vm723_vm7 = vweird.f32 %v5019_v63  ;;  %v4960_v39 = vld [vmem:[%s7308_s5 + $0x4] ss:$0 sm:$0xff] }
 0x1d3   : > { %v700_v33 = vsel %vm697_vm9, %v699_v28, %v695_v23  ;;  %vm724_vm11 = vmor %vm722_vm10, %vm723_vm7  ;;  %v736_v24 = vmul.f32 %v685_v27, %v5528_v29  ;;  %v4271_v23 = vld [vmem:[%s7306_s3 + $0x29c] sm:$0xf0] }
 0x1d4   : > { %v705_v9 = vmul.f32 %v5017_v59, %v704_v1  ;;  %v719_v16 = vsub.f32 1.0, %v718_v8  ;;  %v737_v42 = vmul.f32 %v700_v33, %v5531_v30 }
 0x1d6   : > { %v706_v20 = vadd.f32 %v5017_v59, %v705_v9  ;;  %v720_v25 = vmul.f32 %v5019_v63, %v719_v16 }
 0x1d8   : > { %v710_v31 = vsel %vm709_vm6, %v5017_v59, %v706_v20  ;;  %v721_v32 = vadd.f32 %v5019_v63, %v720_v25  ;;  %v4817_v20 = vld [vmem:[%s7306_s3 + $0x298] sm:$0xf0]  ;;  %v4277_v25 = vld [vmem:[%s7306_s3 + $0x278] sm:$0xf] }
 0x1d9   : > { %v715_v17 = vsel %vm712_vm8, %v714_v21, %v710_v31  ;;  %v4816_v21 = vld [vmem:[%s7306_s3 + $0x274] sm:$0xf]  ;;  %v4270_v22 = vor.u32 %v4817_v20, %v4269_v19  ;;  %v4278_v28 = vor.u32 %v4818_v0, %v4277_v25  ;;  %v4257_v31 = vld [vmem:[%s7306_s3 + $0x218] sm:$0xf]  ;;  %v4199_v0 = vld [vmem:[%s7306_s3 + $0x8c] sm:$0xf0] }
 0x1da   : > { %v738_v34 = vmul.f32 %v715_v17, %v5549_v46  ;;  %v725_v38 = vsel %vm724_vm11, %v5019_v63, %v721_v32  ;;  %v4274_v27 = vor.u32 %v4816_v21, %v4271_v23  ;;  %v4814_v17 = vld [vmem:[%s7306_s3 + $0x240] sm:$0xf0]  ;;  %v4813_v32 = vld [vmem:[%s7306_s3 + $0x21c] sm:$0xf]  ;;  %v4197_v21 = vld [vmem:[%s7306_s3 + $0x60] sm:$0xf] }
 0x1db   : > { %v730_v40 = vsel %vm727_vm12, %v729_v37, %v725_v38  ;;  %1155 = vmatpush.bf16.msrb.mxu0 %v4270_v22  ;;  %1193 = vmatpush.bf16.msrb.mxu2 %v4278_v28  ;;  %v4258_v33 = vor.u32 %v4814_v17, %v4257_v31  ;;  %v4265_v37 = vld [vmem:[%s7306_s3 + $0x220] sm:$0xf]  ;;  %v4799_v22 = vld [vmem:[%s7306_s3 + $0x88] sm:$0xf0]  ;;  %v4798_v23 = vld [vmem:[%s7306_s3 + $0x64] sm:$0xf] }
 0x1dc   : > { %v742_v43 = vpack.c.bf16 %v738_v34, %v736_v24  ;;  %v739_v48 = vmul.f32 %v730_v40, %v5552_v47  ;;  %1174 = vmatpush.bf16.msrb.mxu1 %v4274_v27  ;;  %v4259_v34 = vld [vmem:[%s7306_s3 + $0x244] sm:$0xf0]  ;;  %v4815_v24 = vld [vmem:[%s7306_s3 + $0x248] sm:$0xf0]  ;;  %v4198_v25 = vor.u32 %v4799_v22, %v4197_v21  ;;  %v4800_v28 = vld [vmem:[%s7306_s3 + $0x90] sm:$0xf0]  ;;  %v4202_v31 = vor.u32 %v4798_v23, %v4199_v0 }
 0x1dd   : > { %v4262_v38 = vor.u32 %v4813_v32, %v4259_v34  ;;  %v4266_v40 = vor.u32 %v4815_v24, %v4265_v37  ;;  %v4205_v27 = vld [vmem:[%s7306_s3 + $0x68] sm:$0xf]  ;;  %v4796_v37 = vld [vmem:[%s7306_s3 + $0x30] sm:$0xf0]  ;;  %v4795_v24 = vld [vmem:[%s7306_s3 + $0xc] sm:$0xf] }
 0x1de   : > { %v743_v36 = vpack.c.bf16 %v739_v48, %v737_v42  ;;  %856 = vmatmul.bf16.gmra.mxu2 %v742_v43  ;;  %v4245_v42 = vld [vmem:[%s7306_s3 + $0x1c0] sm:$0xf]  ;;  %v4811_v43 = vld [vmem:[%s7306_s3 + $0x1e8] sm:$0xf0]  ;;  %v4810_v48 = vld [vmem:[%s7306_s3 + $0x1c4] sm:$0xf]  ;;  %v4206_v17 = vor.u32 %v4800_v28, %v4205_v27 }
 0x1df   : > { %1156 = vmatpush.bf16.msrb.mxu0 %v4258_v33  ;;  %1194 = vmatpush.bf16.msrb.mxu2 %v4266_v40  ;;  %v4185_v34 = vld [vmem:[%s7306_s3 + $0x8] sm:$0xf]  ;;  %v4187_v40 = vld [vmem:[%s7306_s3 + $0x34] sm:$0xf0] }
 0x1e0   : > { %1175 = vmatpush.bf16.msrb.mxu1 %v4262_v38  ;;  %v4186_v38 = vor.u32 %v4796_v37, %v4185_v34 }
 0x1e1   : > { %875 = vmatmul.bf16.gmra.mxu3 %v743_v36  ;;  %v4246_v36 = vor.u32 %v4811_v43, %v4245_v42  ;;  %v4193_v42 = vld [vmem:[%s7306_s3 + $0x10] sm:$0xf]  ;;  %v4797_v43 = vld [vmem:[%s7306_s3 + $0x38] sm:$0xf0] }
 0x1e3   : > { %1157 = vmatpush.bf16.msrb.mxu0 %v4246_v36 }
 0x251   : > { %v852_v46 = vpop.f32.mrf.mxu2 }
 0x252   : > { %v853_v35 = vadd.f32 %v4960_v39, %v852_v46  ;;  %v4253_v46 = vld [vmem:[%s7306_s3 + $0x1c8] sm:$0xf] }
 0x254   : > { %v871_v49 = vpop.f32.mrf.mxu3 }
 0x255   : > { %v872_v50 = vadd.f32 %v871_v49, %v853_v35  ;;  %v4812_v35 = vld [vmem:[%s7306_s3 + $0x1f0] sm:$0xf0] }
 0x257   : > { %v881_v29 = vmul.f32 0.5, %v872_v50  ;;  %v4254_v50 = vor.u32 %v4812_v35, %v4253_v46  ;;  %v4194_v46 = vor.u32 %v4797_v43, %v4193_v42 }
 0x259   : > { %v5676_v51 = vadd.f32 %v5259_v3, %v881_v29  ;;  %v854_v52 = vpop.f32.mrf.mxu2  ;;  %1195 = vmatpush.bf16.msrb.mxu2 %v4254_v50  ;;  %v4233_v29 = vld [vmem:[%s7306_s3 + $0x168] sm:$0xf] }
 0x25a   : > { %v855_v30 = vadd.f32 %v4960_v39, %v854_v52  ;;  %v4808_v52 = vld [vmem:[%s7306_s3 + $0x190] sm:$0xf0] }
 0x25b   : > { %891 = vadd.xlane.f32.xlu2 %v5676_v51 }
 0x25c   : > { %v873_v47 = vpop.f32.mrf.mxu3 }
 0x25d   : > { %v874_v53 = vadd.f32 %v873_v47, %v855_v30  ;;  %v4807_v30 = vld [vmem:[%s7306_s3 + $0x16c] sm:$0xf]  ;;  %v4234_v47 = vor.u32 %v4808_v52, %v4233_v29 }
 0x25f   : > { %v882_v54 = vmul.f32 0.5, %v874_v53  ;;  %v4235_v53 = vld [vmem:[%s7306_s3 + $0x194] sm:$0xf0]  ;;  %1158 = vmatpush.bf16.msrb.mxu0 %v4234_v47 }
 0x261   : > { %v5680_v57 = vadd.f32 %v5265_v5, %v882_v54  ;;  %v857_v58 = vpop.f32.mrf.mxu2  ;;  %v4241_v54 = vld [vmem:[%s7306_s3 + $0x170] sm:$0xf] }
 0x262   : > { %v858_v59 = vadd.f32 %v4960_v39, %v857_v58  ;;  %v4809_v58 = vld [vmem:[%s7306_s3 + $0x198] sm:$0xf0] }
 0x263   : > { %893 = vadd.xlane.f32.xlu0 %v5680_v57 }
 0x264   : > { %v876_v41 = vpop.f32.mrf.mxu3 }
 0x265   : > { %v877_v44 = vadd.f32 %v876_v41, %v858_v59  ;;  %v4238_v59 = vor.u32 %v4807_v30, %v4235_v53  ;;  %v4242_v41 = vor.u32 %v4809_v58, %v4241_v54 }
 0x267   : > { %v883_v45 = vmul.f32 0.5, %v877_v44  ;;  %1196 = vmatpush.bf16.msrb.mxu2 %v4242_v41  ;;  %v4221_v44 = vld [vmem:[%s7306_s3 + $0x110] sm:$0xf] }
 0x269   : > { %v5684_v3 = vadd.f32 %v5257_v2, %v883_v45  ;;  %v859_v60 = vpop.f32.mrf.mxu2  ;;  %v4805_v45 = vld [vmem:[%s7306_s3 + $0x138] sm:$0xf0] }
 0x26a   : > { %v860_v61 = vadd.f32 %v4960_v39, %v859_v60  ;;  %v4247_v39 = vld [vmem:[%s7306_s3 + $0x1ec] sm:$0xf0]  ;;  %v4804_v60 = vld [vmem:[%s7306_s3 + $0x114] sm:$0xf] }
 0x26b   : > { %895 = vadd.xlane.f32.xlu1 %v5684_v3  ;;  %v4250_v49 = vor.u32 %v4810_v48, %v4247_v39  ;;  %v4190_v39 = vor.u32 %v4795_v24, %v4187_v40  ;;  %v4831_v24 = vld [vmem:[%s7304_s1 + $0x20] sm:$0xff] }
 0x26c   : > { %v878_v18 = vpop.f32.mrf.mxu3  ;;  %v1350_v43 = vsel %vm1330_vm0, %v4831_v24, 0 }
 0x26d   : > { %v879_v10 = vadd.f32 %v878_v18, %v860_v61  ;;  %1176 = vmatpush.bf16.msrb.mxu1 %v4250_v49  ;;  %v4222_v61 = vor.u32 %v4805_v45, %v4221_v44  ;;  %v4223_v18 = vld [vmem:[%s7306_s3 + $0x13c] sm:$0xf0] }
 0x26f   : > { %v884_v62 = vmul.f32 0.5, %v879_v10  ;;  %v4229_v10 = vld [vmem:[%s7306_s3 + $0x118] sm:$0xf]  ;;  %1159 = vmatpush.bf16.msrb.mxu0 %v4222_v61 }
 0x271   : > { %v5688_v5 = vadd.f32 %v5263_v4, %v884_v62  ;;  %1177 = vmatpush.bf16.msrb.mxu1 %v4238_v59  ;;  %v4806_v62 = vld [vmem:[%s7306_s3 + $0x140] sm:$0xf0] }
 0x273   : > { %897 = vadd.xlane.f32.xlu2 %v5688_v5 }
 0x2ce   : > { %v892_v63 = vpop.xlane.xlu2 %891 }
 0x2cf   : > { %v899_v55 = vmul.f32 %v892_v63, %v5269_v12  ;;  %v4226_v63 = vor.u32 %v4804_v60, %v4223_v18  ;;  %v4834_v60 = vld [vmem:[%s7304_s1 + $0x38] sm:$0xff] }
 0x2d1   : > { %v5693_v1 = vsub.f32 %v5676_v51, %v899_v55  ;;  %v4230_v55 = vor.u32 %v4806_v62, %v4229_v10  ;;  %1178 = vmatpush.bf16.msrb.mxu1 %v4226_v63  ;;  %v1359_v10 = vsel %vm1330_vm0, %v4834_v60, 0 }
 0x2d2   : > { %1361 = vmatpush.bf16.xpose.msrb.mxu3 %v1359_v10  ;;  %v4963_v10 = vld [vmem:[%s7308_s5 + $0xa] ss:$0 sm:$0xff] }
 0x2d3   : > { %v907_v2 = vmul.f32 %v5693_v1, %v5693_v1  ;;  %1197 = vmatpush.bf16.msrb.mxu2 %v4230_v55 }
 0x2d5   : > { %911 = vadd.xlane.f32.xlu0 %v907_v2 }
 0x2d6   : > { %v894_v11 = vpop.xlane.xlu0 %893 }
 0x2d7   : > { %v900_v6 = vmul.f32 %v894_v11, %v5269_v12 }
 0x2d9   : > { %v5699_v7 = vsub.f32 %v5680_v57, %v900_v6  ;;  %v4209_v6 = vld [vmem:[%s7306_s3 + $0xb8] sm:$0xf] }
 0x2db   : > { %v908_v4 = vmul.f32 %v5699_v7, %v5699_v7 }
 0x2dd   : > { %913 = vadd.xlane.f32.xlu1 %v908_v4  ;;  %v4802_v4 = vld [vmem:[%s7306_s3 + $0xe0] sm:$0xf0] }
 0x2de   : > { %v896_v8 = vpop.xlane.xlu1 %895 }
 0x2df   : > { %v901_v26 = vmul.f32 %v896_v8, %v5269_v12  ;;  %v4801_v8 = vld [vmem:[%s7306_s3 + $0xbc] sm:$0xf] }
 0x2e1   : > { %v5705_v56 = vsub.f32 %v5684_v3, %v901_v26  ;;  %v4210_v26 = vor.u32 %v4802_v4, %v4209_v6  ;;  %v4833_v4 = vld [vmem:[%s7304_s1 + $0x30] sm:$0xff] }
 0x2e3   : > { %v909_v9 = vmul.f32 %v5705_v56, %v5705_v56  ;;  %1160 = vmatpush.bf16.msrb.mxu0 %v4210_v26 }
 0x2e5   : > { %915 = vadd.xlane.f32.xlu2 %v909_v9  ;;  %v4211_v9 = vld [vmem:[%s7306_s3 + $0xe4] sm:$0xf0] }
 0x2e6   : > { %v898_v13 = vpop.xlane.xlu2 %897  ;;  %v4214_v19 = vor.u32 %v4801_v8, %v4211_v9 }
 0x2e7   : > { %v902_v14 = vmul.f32 %v898_v13, %v5269_v12  ;;  %v4217_v13 = vld [vmem:[%s7306_s3 + $0xc0] sm:$0xf]  ;;  %1161 = vmatpush.bf16.msrb.mxu0 %v4198_v25 }
 0x2e8   : > { %1179 = vmatpush.bf16.msrb.mxu1 %v4214_v19 }
 0x2e9   : > { %v5711_v15 = vsub.f32 %v5688_v5, %v902_v14  ;;  %v4803_v14 = vld [vmem:[%s7306_s3 + $0xe8] sm:$0xf0] }
 0x2ea   : > { %v4218_v20 = vor.u32 %v4803_v14, %v4217_v13  ;;  %v4962_v13 = vld [vmem:[%s7308_s5 + $0x6] ss:$0 sm:$0xff] }
 0x2eb   : > { %v910_v16 = vmul.f32 %v5711_v15, %v5711_v15  ;;  %1162 = vmatpush.bf16.msrb.mxu0 %v4186_v38 }
 0x2ec   : > { %1198 = vmatpush.bf16.msrb.mxu2 %v4218_v20  ;;  %1180 = vmatpush.bf16.msrb.mxu1 %v4202_v31 }
 0x2ed   : > { %917 = vadd.xlane.f32.xlu0 %v910_v16 }
 0x2f0   : > { %1199 = vmatpush.bf16.msrb.mxu2 %v4206_v17  ;;  %1181 = vmatpush.bf16.msrb.mxu1 %v4190_v39 }
 0x2f4   : > { %1200 = vmatpush.bf16.msrb.mxu2 %v4194_v46 }
 0x348   : > { %v912_v2 = vpop.xlane.xlu0 %911 }
 0x349   : > { %v919_v11 = vmul.f32 %v912_v2, %v5269_v12  ;;  %v4961_v2 = vld [vmem:[%s7308_s5 + $0x5] ss:$0 sm:$0xff] }
 0x34b   : > { %v923_v16 = vadd.f32 1e-12, %v919_v11 }
 0x34d   : > { %5020 = vrsqrt.f32 %v923_v16  ;;  %vm933_vm14 = vweird.f32 %v923_v16 }
 0x350   : > { %v914_v32 = vpop.xlane.xlu1 %913 }
 0x351   : > { %v920_v33 = vmul.f32 %v914_v32, %v5269_v12 }
 0x353   : > { %v5021_v48 = vpop.eup %5020  ;;  %v924_v36 = vadd.f32 1e-12, %v920_v33 }
 0x354   : > { %v928_v35 = vmul.f32 %v5021_v48, %v923_v16  ;;  %vm934_vm13 = vweird.f32 %v5021_v48  ;;  %v1356_v16 = vsel %vm1330_vm0, %v4833_v4, 0 }
 0x355   : > { %5022 = vrsqrt.f32 %v924_v36  ;;  %vm935_vm15 = vmor %vm933_vm14, %vm934_vm13  ;;  %vm943_vm2 = vweird.f32 %v924_v36  ;;  %1362 = vmatpush.bf16.xpose.msrb.mxu3 %v1356_v16 }
 0x356   : > { %v929_v49 = vmul.f32 %v5021_v48, %v928_v35 }
 0x358   : > { %v930_v50 = vmul.f32 0.5, %v929_v49  ;;  %v916_v29 = vpop.xlane.xlu2 %915 }
 0x359   : > { %v921_v52 = vmul.f32 %v916_v29, %v5269_v12 }
 0x35a   : > { %v931_v30 = vsub.f32 1.5, %v930_v50  ;;  %v4828_v50 = vld [vmem:[%s7304_s1 + $0x8] sm:$0xff] }
 0x35b   : > { %v5023_v47 = vpop.eup %5022  ;;  %v925_v53 = vadd.f32 1e-12, %v921_v52  ;;  %v1341_v29 = vsel %vm1330_vm0, %v4828_v50, 0  ;;  %v4827_v52 = vld [vmem:[%s7304_s1] sm:$0xff] }
 0x35c   : > { %v932_v54 = vmul.f32 %v5021_v48, %v931_v30  ;;  %v938_v58 = vmul.f32 %v5023_v47, %v924_v36  ;;  %vm944_vm1 = vweird.f32 %v5023_v47  ;;  %v1338_v30 = vsel %vm1330_vm0, %v4827_v52, 0 }
 0x35d   : > { %5024 = vrsqrt.f32 %v925_v53  ;;  %vm945_vm3 = vmor %vm943_vm2, %vm944_vm1  ;;  %vm953_vm5 = vweird.f32 %v925_v53 }
 0x35e   : > { %v939_v59 = vmul.f32 %v5023_v47, %v938_v58  ;;  %v936_v41 = vsel %vm935_vm15, %v5021_v48, %v932_v54 }
 0x35f   : > { %v967_v63 = vmul.f32 %v936_v41, %v5693_v1  ;;  %v4964_v41 = vld [vmem:[%s7308_s5 + $0xb] ss:$0 sm:$0xff] }
 0x360   : > { %v940_v44 = vmul.f32 0.5, %v939_v59  ;;  %v918_v45 = vpop.xlane.xlu0 %917 }
 0x361   : > { %v922_v61 = vmul.f32 %v918_v45, %v5269_v12  ;;  %v974_v1 = vmul.f32 %v4961_v2, %v967_v63 }
 0x362   : > { %v941_v18 = vsub.f32 1.5, %v940_v44 }
 0x363   : > { %v5025_v62 = vpop.eup %5024  ;;  %v926_v55 = vadd.f32 1e-12, %v922_v61  ;;  %v981_v22 = vadd.f32 %v4962_v13, %v974_v1 }
 0x364   : > { %v942_v11 = vmul.f32 %v5023_v47, %v941_v18  ;;  %v948_v6 = vmul.f32 %v5025_v62, %v925_v53  ;;  %vm954_vm4 = vweird.f32 %v5025_v62 }
 0x365   : > { %5026 = vrsqrt.f32 %v926_v55  ;;  %vm955_vm6 = vmor %vm953_vm5, %vm954_vm4  ;;  %vm963_vm8 = vweird.f32 %v926_v55 }
 0x366   : > { %v946_v8 = vsel %vm945_vm3, %v5023_v47, %v942_v11  ;;  %v949_v26 = vmul.f32 %v5025_v62, %v948_v6  ;;  %v1019_v47 = vld [vmem:[%s7308_s5 + $0x7] sm:$0x7] }
 0x367   : > { %v968_v9 = vmul.f32 %v946_v8, %v5699_v7  ;;  %v4832_v7 = vld [vmem:[%s7304_s1 + $0x28] sm:$0xff]  ;;  %v1021_v53 = vperm.slane %v1019_v47, 0  ;;  %v1022_v16 = vperm.slane %v1019_v47, 1 }
 0x368   : > { %v950_v14 = vmul.f32 0.5, %v949_v26  ;;  %v1353_v32 = vsel %vm1330_vm0, %v4832_v7, 0 }
 0x369   : > { %v975_v19 = vmul.f32 %v4961_v2, %v968_v9  ;;  %1363 = vmatpush.bf16.xpose.msrb.mxu3 %v1353_v32 }
 0x36a   : > { %v951_v20 = vsub.f32 1.5, %v950_v14 }
 0x36b   : > { %v5027_v21 = vpop.eup %5026  ;;  %v982_v23 = vadd.f32 %v4962_v13, %v975_v19 }
 0x36c   : > { %v952_v25 = vmul.f32 %v5025_v62, %v951_v20  ;;  %v958_v0 = vmul.f32 %v5027_v21, %v926_v55  ;;  %vm964_vm7 = vweird.f32 %v5027_v21 }
 0x36d   : > { %v985_v27 = vpack.c.bf16 %v982_v23, %v981_v22  ;;  %vm965_vm9 = vmor %vm963_vm8, %vm964_vm7 }
 0x36e   : > { %v959_v28 = vmul.f32 %v5027_v21, %v958_v0  ;;  %v956_v31 = vsel %vm955_vm6, %v5025_v62, %v952_v25 }
 0x36f   : > { %1163 = vmatmul.bf16.vlgmr.msrb.gmra.mxu0 %v985_v27  ;;  %1182 = vmatmul.bf16.vlgmr.msrb.gmra.mxu1 %v985_v27  ;;  %v969_v34 = vmul.f32 %v956_v31, %v5705_v56  ;;  %v4830_v56 = vld [vmem:[%s7304_s1 + $0x18] sm:$0xff] }
 0x370   : > { %v960_v17 = vmul.f32 0.5, %v959_v28  ;;  %1201 = vmatmul.bf16.vlgmr.msrb.gmra.mxu2 %v985_v27  ;;  %v1347_v35 = vsel %vm1330_vm0, %v4830_v56, 0 }
 0x371   : > { %v976_v42 = vmul.f32 %v4961_v2, %v969_v34  ;;  %1364 = vmatpush.bf16.xpose.msrb.mxu3 %v1350_v43  ;;  %v1023_v34 = vperm.slane %v1019_v47, 2 }
 0x372   : > { %v961_v33 = vsub.f32 1.5, %v960_v17 }
 0x373   : > { %v983_v36 = vadd.f32 %v4962_v13, %v976_v42 }
 0x374   : > { %v962_v37 = vmul.f32 %v5027_v21, %v961_v33 }
 0x376   : > { %v966_v38 = vsel %vm965_vm9, %v5027_v21, %v962_v37 }
 0x377   : > { %v970_v40 = vmul.f32 %v966_v38, %v5711_v15  ;;  %v4829_v15 = vld [vmem:[%s7304_s1 + $0x10] sm:$0xff] }
 0x378   : > { %v1344_v49 = vsel %vm1330_vm0, %v4829_v15, 0 }
 0x379   : > { %v977_v48 = vmul.f32 %v4961_v2, %v970_v40  ;;  %1365 = vmatpush.bf16.xpose.msrb.mxu3 %v1347_v35 }
 0x37b   : > { %v984_v39 = vadd.f32 %v4962_v13, %v977_v48 }
 0x37d   : > { %v986_v46 = vpack.c.bf16 %v984_v39, %v983_v36 }
 0x37f   : > { %1168 = vmatmul.bf16.gmra.mxu0 %v986_v46  ;;  %1187 = vmatmul.bf16.gmra.mxu1 %v986_v46 }
 0x380   : > { %1206 = vmatmul.bf16.gmra.mxu2 %v986_v46 }
 0x381   : > { %1366 = vmatpush.bf16.xpose.msrb.mxu3 %v1344_v49 }
 0x389   : > { %1367 = vmatpush.bf16.xpose.msrb.mxu3 %v1341_v29 }
 0x391   : > { %1368 = vmatpush.bf16.xpose.msrb.mxu3 %v1338_v30 }
 0x3ec   : > { %v1164_v54 = vpop.f32.mrf.mxu0  ;;  %v1183_v58 = vpop.f32.mrf.mxu1 }
 0x3ed   : > { %v1165_v59 = vadd.f32 %v1164_v54, %v1021_v53  ;;  %v1184_v33 = vadd.f32 %v1183_v58, %v1022_v16 }
 0x3ef   : > { %v1228_v44 = vadd.f32 %v4964_v41, %v1165_v59  ;;  %v1216_v11 = vadd.f32 %v4963_v10, %v1165_v59  ;;  %v1236_v46 = vpack.c.bf16 %v1184_v33, %v1184_v33 }
 0x3f1   : > { %v1232_v62 = vpack.c.bf16 %v1228_v44, %v1228_v44  ;;  %v1220_v14 = vpack.c.bf16 %v1216_v11, %v1216_v11  ;;  %v4842_v44 = vld [vmem:[%s7304_s1 + $0x78] sm:$0xff] }
 0x3f3   : > { %v1202_v45 = vpop.f32.mrf.mxu2  ;;  %v1284_v6 = vunpack.c.l.b16 %v1232_v62  ;;  %v1399_v22 = vunpack.c.l.b16 %v1220_v14 }
 0x3f4   : > { %v1166_v60 = vpop.f32.mrf.mxu0  ;;  %v1185_v61 = vpop.f32.mrf.mxu1  ;;  %v1203_v30 = vadd.f32 %v1202_v45, %v1023_v34  ;;  %v1409_v45 = vunpack.c.l.b16 %v1236_v46 }
 0x3f5   : > { %v1167_v18 = vadd.f32 %v1166_v60, %v1021_v53  ;;  %v1186_v0 = vadd.f32 %v1185_v61, %v1022_v16 }
 0x3f6   : > { %v1240_v62 = vpack.c.bf16 %v1203_v30, %v1203_v30 }
 0x3f7   : > { %v1229_v63 = vadd.f32 %v4964_v41, %v1167_v18  ;;  %v1217_v55 = vadd.f32 %v4963_v10, %v1167_v18  ;;  %v1237_v42 = vpack.c.bf16 %v1186_v0, %v1186_v0  ;;  %v4837_v0 = vld [vmem:[%s7304_s1 + $0x50] sm:$0xff] }
 0x3f9   : > { %v1233_v2 = vpack.c.bf16 %v1229_v63, %v1229_v63  ;;  %v1221_v1 = vpack.c.bf16 %v1217_v55, %v1217_v55  ;;  %v1410_v54 = vunpack.c.l.b16 %v1237_v42 }
 0x3fb   : > { %v1285_v4 = vunpack.c.l.b16 %v1233_v2  ;;  %v1204_v8 = vpop.f32.mrf.mxu2  ;;  %v1400_v20 = vunpack.c.l.b16 %v1221_v1  ;;  %v5940_v2 = vpack.c.b16 %v1410_v54, %v1409_v45 }
 0x3fc   : > { %v1169_v26 = vpop.f32.mrf.mxu0  ;;  %v1188_v9 = vpop.f32.mrf.mxu1  ;;  %v1205_v35 = vadd.f32 %v1204_v8, %v1023_v34  ;;  %v4841_v8 = vld [vmem:[%s7304_s1 + $0x70] sm:$0xff] }
 0x3fd   : > { %v5914_v13 = vpack.c.b16 %v1285_v4, %v1284_v6  ;;  %v1170_v19 = vadd.f32 %v1169_v26, %v1021_v53  ;;  %v1189_v21 = vadd.f32 %v1188_v9, %v1022_v16  ;;  %v5920_v28 = vpack.c.b16 %v1400_v20, %v1399_v22 }
 0x3fe   : > { %v1241_v60 = vpack.c.bf16 %v1205_v35, %v1205_v35  ;;  %v1530_v9 = vunpack.c.l.b16 %v1240_v62  ;;  %v1438_v1 = vsel %vm1330_vm0, %v5940_v2, 0 }
 0x3ff   : > { %1582 = vrot.lane.b32.xlu1 %v5914_v13, %s5191_s28  ;;  %4311 = vmatmul.msk.bf16.vlgmr.msrb.gmra.mxu3 %vm1330_vm0, %v5914_v13  ;;  %v1230_v23 = vadd.f32 %v4964_v41, %v1170_v19  ;;  %v1238_v31 = vpack.c.bf16 %v1189_v21, %v1189_v21  ;;  %v1218_v48 = vadd.f32 %v4963_v10, %v1170_v19  ;;  %v4840_v19 = vld [vmem:[%s7304_s1 + $0x68] sm:$0xff]  ;;  %v4839_v21 = vld [vmem:[%s7304_s1 + $0x60] sm:$0xff] }
 0x400   : > { %v1531_v6 = vunpack.c.l.b16 %v1241_v60  ;;  %v1648_v20 = vsel %vm1330_vm0, %v4840_v19, 0  ;;  %v1645_v22 = vsel %vm1330_vm0, %v4839_v21, 0 }
 0x401   : > { %v1234_v37 = vpack.c.bf16 %v1230_v23, %v1230_v23  ;;  %v1411_v36 = vunpack.c.l.b16 %v1238_v31  ;;  %v1222_v58 = vpack.c.bf16 %v1218_v48, %v1218_v48  ;;  %v4838_v23 = vld [vmem:[%s7304_s1 + $0x58] sm:$0xff] }
 0x402   : > { %v5955_v14 = vpack.c.b16 %v1531_v6, %v1530_v9 }
 0x403   : > { %v1207_v25 = vpop.f32.mrf.mxu2  ;;  %v1286_v15 = vunpack.c.l.b16 %v1234_v37  ;;  %v1401_v11 = vunpack.c.l.b16 %v1222_v58 }
 0x404   : > { %v1171_v7 = vpop.f32.mrf.mxu0  ;;  %v1190_v27 = vpop.f32.mrf.mxu1  ;;  %v1208_v43 = vadd.f32 %v1207_v25, %v1023_v34  ;;  %v1642_v25 = vsel %vm1330_vm0, %v4838_v23, 0 }
 0x405   : > { %v1172_v17 = vadd.f32 %v1171_v7, %v1021_v53  ;;  %v1191_v32 = vadd.f32 %v1190_v27, %v1022_v16  ;;  %v1651_v16 = vsel %vm1330_vm0, %v4841_v8, 0  ;;  %v1639_v7 = vsel %vm1330_vm0, %v4837_v0, 0  ;;  %v4836_v27 = vld [vmem:[%s7304_s1 + $0x48] sm:$0xff] }
 0x406   : > { %v1242_v47 = vpack.c.bf16 %v1208_v43, %v1208_v43  ;;  %v1636_v31 = vsel %vm1330_vm0, %v4836_v27, 0 }
 0x407   : > { %v1219_v24 = vadd.f32 %v4963_v10, %v1172_v17  ;;  %v1231_v38 = vadd.f32 %v4964_v41, %v1172_v17  ;;  %v1239_v40 = vpack.c.bf16 %v1191_v32, %v1191_v32  ;;  %1690 = vrot.lane.b32.xlu1 %v5920_v28, %s5191_s28  ;;  %v1654_v10 = vsel %vm1330_vm0, %v4842_v44, 0  ;;  %v4835_v17 = vld [vmem:[%s7304_s1 + $0x40] sm:$0xff] }
 0x408   : > { %v1532_v63 = vunpack.c.l.b16 %v1242_v47  ;;  %1656 = vmatpush.bf16.xpose.msra.mxu2 %v1654_v10  ;;  %v1633_v32 = vsel %vm1330_vm0, %v4835_v17, 0 }
 0x409   : > { %v1235_v39 = vpack.c.bf16 %v1231_v38, %v1231_v38  ;;  %v1412_v56 = vunpack.c.l.b16 %v1239_v40  ;;  %v1223_v49 = vpack.c.bf16 %v1219_v24, %v1219_v24 }
 0x40b   : > { %v1287_v50 = vunpack.c.l.b16 %v1235_v39  ;;  %v5924_v29 = vpack.c.b16 %v1412_v56, %v1411_v36  ;;  %v1209_v52 = vpop.f32.mrf.mxu2  ;;  %v1402_v18 = vunpack.c.l.b16 %v1223_v49 }
 0x40c   : > { %v1210_v53 = vadd.f32 %v1209_v52, %v1023_v34  ;;  %v5197_v52 = vmov 0.0  }
 0x40d   : > { %v5926_v59 = vpack.c.b16 %v1287_v50, %v1286_v15  ;;  %1696 = vrot.lane.b32.xlu0 %v5924_v29, %s5191_s28  ;;  %v1441_v41 = vsel %vm1330_vm0, %v5924_v29, 0  ;;  %v5947_v26 = vpack.c.b16 %v1402_v18, %v1401_v11  ;;  %v6008_v50 = vld [vmem:[%s287_s10] sm:$0x1] }
 0x40e   : > { %v1243_v61 = vpack.c.bf16 %v1210_v53, %v1210_v53  ;;  %1449 = vmatpush.bf16.xpose.msra.mxu0 %v1441_v41  ;;  %vm1261_vm10 = vcmp.gt.s32.totalorder %v6008_v50, 0 }
 0x40f   : > { %1584 = vrot.lane.b32.xlu2 %v5926_v59, %s5191_s28  ;;  %4312 = vmatmul.msk.bf16.gmra.mxu3 %vm1330_vm0, %v5926_v59  ;;  %v1262_v30 = vsel %vm1261_vm10, -1e+09, %v5197_v52 }
 0x410   : > { %v1533_v55 = vunpack.c.l.b16 %v1243_v61  ;;  %1657 = vmatpush.bf16.xpose.msra.mxu2 %v1651_v16  ;;  %v6013_v54 = vperm.slane %v1262_v30, 0 }
 0x412   : > { %v5942_v4 = vpack.c.b16 %v1533_v55, %v1532_v63 }
 0x414   : > { %1550 = vmatpush.bf16.msra.mxu1 %v5942_v4  ;;  %4935 = vmatpush.bf16.msra.mxu3 %v5942_v4 }
 0x415   : > { %1692 = vrot.lane.b32.xlu0 %v5947_v26, %s5191_s28 }
 0x416   : > { %1450 = vmatpush.bf16.xpose.msra.mxu0 %v1438_v1 }
 0x417   : > { %1694 = vrot.lane.b32.xlu2 %v5940_v2, %s5191_s28 }
 0x418   : > { %1551 = vmatpush.bf16.msra.mxu1 %v5955_v14  ;;  %4936 = vmatpush.bf16.msra.mxu3 %v5955_v14 }
 0x419   : > { %1658 = vmatpush.bf16.xpose.msra.mxu2 %v1648_v20 }
 0x41d   : > { %4313 = vmatmul.msk.bf16.vlgmr.msra.gmra.mxu0 %vm1330_vm0, %v5920_v28 }
 0x421   : > { %1659 = vmatpush.bf16.xpose.msra.mxu2 %v1645_v22 }
 0x429   : > { %1660 = vmatpush.bf16.xpose.msra.mxu2 %v1642_v25 }
 0x42d   : > { %4314 = vmatmul.msk.bf16.gmra.mxu0 %vm1330_vm0, %v5947_v26 }
 0x431   : > { %1661 = vmatpush.bf16.xpose.msra.mxu2 %v1639_v7 }
 0x439   : > { %1662 = vmatpush.bf16.xpose.msra.mxu2 %v1636_v31 }
 0x441   : > { %1663 = vmatpush.bf16.xpose.msra.mxu2 %v1633_v32 }
 0x469   : > { %v1585_v34 = vpop.permute.xlu2 %1584 }
 0x471   : > { %v1583_v33 = vpop.permute.xlu1 %1582  ;;  %v1695_v40 = vpop.permute.xlu2 %1694 }
 0x472   : > { %4365 = vmatmul.msk.bf16.vlgmr.msra.gmra.mxu2 %vm1330_vm0, %v1583_v33  ;;  %v1721_v42 = vsel %vm1330_vm0, %v1695_v40, 0 }
 0x479   : > { %v1691_v48 = vpop.permute.xlu1 %1690 }
 0x47f   : > { %v1697_v37 = vpop.permute.xlu0 %1696 }
 0x480   : > { %v1724_v24 = vsel %vm1330_vm0, %v1697_v37, 0 }
 0x481   : > { %1732 = vmatpush.bf16.xpose.msrb.mxu0 %v1724_v24  ;;  %4937 = vmatpush.bf16.xpose.msrb.mxu2 %v1724_v24 }
 0x482   : > { %v1370_v38 = vpop.f32.mrf.mxu3  ;;  %4366 = vmatmul.msk.bf16.gmra.mxu2 %vm1330_vm0, %v1585_v34 }
 0x483   : > { %1381 = vrot.lane.b32.xlu2 %v1370_v38, %s5192_s22 }
 0x487   : > { %v1693_v36 = vpop.permute.xlu0 %1692 }
 0x489   : > { %1733 = vmatpush.bf16.xpose.msrb.mxu0 %v1721_v42  ;;  %4938 = vmatpush.bf16.xpose.msrb.mxu2 %v1721_v42 }
 0x48a   : > { %v1372_v43 = vpop.f32.mrf.mxu3 }
 0x48b   : > { %1385 = vrot.lane.b32.xlu1 %v1372_v43, %s5193_s23 }
 0x490   : > { %4367 = vmatmul.msk.bf16.vlgmr.msrb.gmra.mxu0 %vm1330_vm0, %v1691_v48 }
 0x492   : > { %4368 = vmatmul.msk.bf16.vlgmr.msrb.gmra.mxu2 %vm1330_vm0, %v1693_v36 }
 0x49a   : > { %v1452_v47 = vpop.f32.mrf.mxu0 }
 0x4a2   : > { %v1454_v63 = vpop.f32.mrf.mxu0 }
 0x4aa   : > { %v6023_v9 = vpop.f32.mrf.mxu0 }
 0x4b2   : > { %v6025_v1 = vpop.f32.mrf.mxu0 }
 0x4dd   : > { %v1382_v39 = vpop.permute.xlu2 %1381 }
 0x4de   : > { %1419 = vrot.lane.b32.xlu1 %v1382_v39, %s5194_s27 }
 0x4f5   : > { %v1665_v56 = vpop.f32.mrf.mxu2 }
 0x4f6   : > { %1676 = vrot.lane.b32.xlu0 %v1665_v56, %s5192_s22 }
 0x4fd   : > { %v1386_v46 = vpop.permute.xlu1 %1385  ;;  %v1667_v35 = vpop.f32.mrf.mxu2 }
 0x4fe   : > { %1680 = vrot.lane.b32.xlu2 %v1667_v35, %s5193_s23  ;;  %1421 = vrot.lane.b32.xlu0 %v1386_v46, %s5194_s27 }
 0x505   : > { %v1670_v15 = vpop.f32.mrf.mxu2 }
 0x506   : > { %1684 = vrot.lane.b32.xlu2 %v1670_v15, %s5195_s29 }
 0x50d   : > { %v1672_v49 = vpop.f32.mrf.mxu2  ;;  %v1735_v16 = vpop.f32.mrf.mxu0 }
 0x50e   : > { %1688 = vrot.lane.b32.xlu1 %v1672_v49, %s5196_s30 }
 0x515   : > { %v1737_v19 = vpop.f32.mrf.mxu0  ;;  %v1740_v31 = vpop.f32.mrf.mxu2 }
 0x51d   : > { %v1742_v24 = vpop.f32.mrf.mxu2 }
 0x550   : > { %v1420_v53 = vpop.permute.xlu1 %1419 }
 0x551   : > { %v1453_v58 = vadd.f32 %v1452_v47, %v1420_v53 }
 0x553   : > { %v1462_v41 = vmul.f32 0.17677669, %v1453_v58 }
 0x555   : > { %v1469_v44 = vadd.f32 %v6013_v54, %v1462_v41 }
 0x557   : > { %v1473_v60 = vsel %vm1330_vm0, %v1469_v44, -inf }
 0x558   : > { %1474 = vmax.xlane.f32.xlu1 %v1473_v60  ;;  %v1681_v61 = vpop.permute.xlu2 %1680 }
 0x559   : > { %1704 = vrot.lane.b32.xlu2 %v1681_v61, %s5194_s27 }
 0x560   : > { %v1685_v45 = vpop.permute.xlu2 %1684 }
 0x561   : > { %1706 = vrot.lane.b32.xlu2 %v1685_v45, %s5194_s27 }
 0x568   : > { %v1677_v18 = vpop.permute.xlu0 %1676 }
 0x569   : > { %1702 = vrot.lane.b32.xlu0 %v1677_v18, %s5194_s27  ;;  %v1375_v18 = vpop.f32.mrf.mxu3 }
 0x570   : > { %v1422_v62 = vpop.permute.xlu0 %1421 }
 0x571   : > { %v1455_v55 = vadd.f32 %v1454_v63, %v1422_v62 }
 0x573   : > { %v1463_v11 = vmul.f32 0.17677669, %v1455_v55 }
 0x575   : > { %v1470_v6 = vadd.f32 %v6013_v54, %v1463_v11 }
 0x577   : > { %v1476_v8 = vsel %vm1330_vm0, %v1470_v6, -inf }
 0x580   : > { %v1689_v10 = vpop.permute.xlu1 %1688 }
 0x581   : > { %1708 = vrot.lane.b32.xlu2 %v1689_v10, %s5194_s27 }
 0x593   : > { %1477 = vmax.xlane.f32.xlu0 %v1476_v8 }
 0x5b3   : > { %v1705_v20 = vpop.permute.xlu2 %1704 }
 0x5b4   : > { %v1738_v21 = vadd.f32 %v1737_v19, %v1705_v20 }
 0x5b6   : > { %v1746_v22 = vmul.f32 0.17677669, %v1738_v21 }
 0x5b8   : > { %v1750_v23 = vadd.f32 %v1746_v22, %v6013_v54 }
 0x5ba   : > { %v1756_v25 = vsel %vm1330_vm0, %v1750_v23, -inf }
 0x5bb   : > { %1757 = vmax.xlane.f32.xlu1 %v1756_v25  ;;  %v1707_v17 = vpop.permute.xlu2 %1706 }
 0x5bc   : > { %v1741_v32 = vadd.f32 %v1740_v31, %v1707_v17  ;;  %v1377_v31 = vpop.f32.mrf.mxu3 }
 0x5be   : > { %v1747_v34 = vmul.f32 0.17677669, %v1741_v32  ;;  %v5199_v32 = vmov 1.0  }
 0x5c0   : > { %v1751_v42 = vadd.f32 %v1747_v34, %v6013_v54  ;;  %v1263_v34 = vsel %vm1261_vm10, 0.0, %v5199_v32 }
 0x5c2   : > { %v1759_v56 = vsel %vm1330_vm0, %v1751_v42, -inf }
 0x5cb   : > { %v1475_v0 = vpop.xlane.xlu1 %1474 }
 0x5cc   : > { %v1485_v7 = vsub.f32 %v1469_v44, %v1475_v0 }
 0x5ce   : > { %v1489_v27 = vmul.f32 1.442695, %v1485_v7 }
 0x5d0   : > { %5028 = vpow2.f32 %v1489_v27 }
 0x5d6   : > { %v6029_v33 = vpop.eup %5028 }
 0x5d7   : > { %v1497_v37 = vsel %vm1330_vm0, %v6029_v33, 0.0 }
 0x5d8   : > { %1498 = vadd.xlane.f32.xlu0 %v1497_v37  ;;  %v6068_v37 = vperm.slane %v1263_v34, 0 }
 0x5db   : > { %v1709_v38 = vpop.permute.xlu2 %1708  ;;  %v1703_v40 = vpop.permute.xlu0 %1702 }
 0x5dc   : > { %v1743_v43 = vadd.f32 %v1742_v24, %v1709_v38  ;;  %v1736_v48 = vadd.f32 %v1735_v16, %v1703_v40 }
 0x5de   : > { %v1748_v36 = vmul.f32 0.17677669, %v1743_v43  ;;  %v1745_v39 = vmul.f32 0.17677669, %v1736_v48 }
 0x5e0   : > { %1760 = vmax.xlane.f32.xlu0 %v1759_v56  ;;  %v1752_v46 = vadd.f32 %v1748_v36, %v6013_v54  ;;  %v1749_v35 = vadd.f32 %v1745_v39, %v6013_v54 }
 0x5e2   : > { %v1762_v15 = vsel %vm1330_vm0, %v1752_v46, -inf  ;;  %v1753_v49 = vsel %vm1330_vm0, %v1749_v35, -inf }
 0x5e3   : > { %1763 = vmax.xlane.f32.xlu1 %v1762_v15  ;;  %1754 = vmax.xlane.f32.xlu2 %v1753_v49 }
 0x606   : > { %v1478_v52 = vpop.xlane.xlu0 %1477 }
 0x607   : > { %v1486_v30 = vsub.f32 %v1470_v6, %v1478_v52 }
 0x609   : > { %v1491_v47 = vmul.f32 1.442695, %v1486_v30 }
 0x60b   : > { %5030 = vpow2.f32 %v1491_v47 }
 0x611   : > { %v5031_v53 = vpop.eup %5030 }
 0x612   : > { %v1500_v58 = vsel %vm1330_vm0, %v5031_v53, 0.0 }
 0x613   : > { %1501 = vadd.xlane.f32.xlu1 %v1500_v58  ;;  %v4850_v58 = vld [vmem:[%s7304_s1 + $0xb8] sm:$0xff] }
 0x62c   : > { %1805 = vrot.lane.b32.xlu1 %v5942_v4, %s5191_s28 }
 0x62e   : > { %v1758_v41 = vpop.xlane.xlu1 %1757 }
 0x62f   : > { %v1766_v44 = vsub.f32 %v1750_v23, %v1758_v41 }
 0x631   : > { %v1771_v60 = vmul.f32 1.442695, %v1766_v44 }
 0x633   : > { %5032 = vpow2.f32 %v1771_v60  ;;  %v1999_v60 = vsel %vm1330_vm0, %v4850_v58, 0 }
 0x634   : > { %2041 = vrot.lane.b32.xlu1 %v5924_v29, %s5198_s11 }
 0x639   : > { %v6044_v61 = vpop.eup %5032 }
 0x63a   : > { %v1780_v45 = vsel %vm1330_vm0, %v6044_v61, 0.0 }
 0x63b   : > { %1781 = vadd.xlane.f32.xlu2 %v1780_v45 }
 0x63c   : > { %2035 = vrot.lane.b32.xlu1 %v5920_v28, %s5198_s11 }
 0x644   : > { %1389 = vrot.lane.b32.xlu1 %v1375_v18, %s5195_s29 }
 0x64b   : > { %v1499_v10 = vpop.xlane.xlu0 %1498 }
 0x653   : > { %v1761_v62 = vpop.xlane.xlu0 %1760 }
 0x654   : > { %v1767_v63 = vsub.f32 %v1751_v42, %v1761_v62 }
 0x656   : > { %v1773_v55 = vmul.f32 1.442695, %v1767_v63  ;;  %v1764_v11 = vpop.xlane.xlu1 %1763  ;;  %v1755_v6 = vpop.xlane.xlu2 %1754  ;;  %v4849_v63 = vld [vmem:[%s7304_s1 + $0xb0] sm:$0xff] }
 0x657   : > { %v1768_v8 = vsub.f32 %v1752_v46, %v1764_v11  ;;  %v1765_v16 = vsub.f32 %v1749_v35, %v1755_v6 }
 0x658   : > { %5034 = vpow2.f32 %v1773_v55  ;;  %v1996_v55 = vsel %vm1330_vm0, %v4849_v63, 0 }
 0x659   : > { %v1769_v19 = vmul.f32 1.442695, %v1765_v16  ;;  %v1775_v20 = vmul.f32 1.442695, %v1768_v8  ;;  %v4387_v16 = vld [vmem:[%s7306_s3 + $0x6c] sm:$0xf] }
 0x65b   : > { %5036 = vpow2.f32 %v1769_v19  ;;  %v4820_v19 = vld [vmem:[%s7306_s3 + $0x94] sm:$0xf0] }
 0x65c   : > { %5038 = vpow2.f32 %v1775_v20  ;;  %v4848_v20 = vld [vmem:[%s7304_s1 + $0xa8] sm:$0xff] }
 0x65d   : > { %5040 = vrcp.f32 %v1499_v10 }
 0x65e   : > { %v6051_v21 = vpop.eup %5034 }
 0x65f   : > { %v1783_v22 = vsel %vm1330_vm0, %v6051_v21, 0.0 }
 0x660   : > { %1784 = vadd.xlane.f32.xlu2 %v1783_v22  ;;  %v4388_v22 = vor.u32 %v4820_v19, %v4387_v16 }
 0x661   : > { %v5037_v23 = vpop.eup %5036 }
 0x662   : > { %v1777_v25 = vsel %vm1330_vm0, %v5037_v23, 0.0  ;;  %v5039_v0 = vpop.eup %5038  ;;  %1897 = vmatpush.bf16.msra.mxu0 %v4388_v22 }
 0x663   : > { %1778 = vadd.xlane.f32.xlu0 %v1777_v25  ;;  %v1786_v7 = vsel %vm1330_vm0, %v5039_v0, 0.0  ;;  %v5041_v17 = vpop.eup %5040 }
 0x664   : > { %v1513_v24 = vmul.f32 %v5041_v17, %v6029_v33  ;;  %v4819_v17 = vld [vmem:[%s7306_s3 + $0x3c] sm:$0xf0] }
 0x666   : > { %v1520_v42 = vmul.f32 %v6068_v37, %v1513_v24  ;;  %v4847_v24 = vld [vmem:[%s7304_s1 + $0xa0] sm:$0xff] }
 0x668   : > { %1787 = vadd.xlane.f32.xlu2 %v1786_v7 }
 0x677   : > { %1803 = vrot.lane.b32.xlu0 %v5955_v14, %s5191_s28 }
 0x67f   : > { %1929 = vrot.lane.b32.xlu0 %v5926_v59, %s5198_s11 }
 0x680   : > { %1927 = vrot.lane.b32.xlu2 %v5914_v13, %s5198_s11 }
 0x686   : > { %v1502_v27 = vpop.xlane.xlu1 %1501 }
 0x687   : > { %5042 = vrcp.f32 %v1502_v27  ;;  %2039 = vrot.lane.b32.xlu0 %v5940_v2, %s5198_s11 }
 0x688   : > { %1393 = vrot.lane.b32.xlu2 %v1377_v31, %s5196_s30  ;;  %v4383_v31 = vld [vmem:[%s7306_s3 + $0x14] sm:$0xf] }
 0x689   : > { %v4384_v34 = vor.u32 %v4819_v17, %v4383_v31 }
 0x68b   : > { %1898 = vmatpush.bf16.msra.mxu0 %v4384_v34 }
 0x68d   : > { %v5043_v38 = vpop.eup %5042 }
 0x68e   : > { %v1514_v40 = vmul.f32 %v5043_v38, %v5031_v53  ;;  %v1990_v38 = vsel %vm1330_vm0, %v4847_v24, 0 }
 0x68f   : > { %2037 = vrot.lane.b32.xlu0 %v5947_v26, %s5198_s11 }
 0x690   : > { %v1521_v43 = vmul.f32 %v6068_v37, %v1514_v40  ;;  %v4846_v40 = vld [vmem:[%s7304_s1 + $0x98] sm:$0xff] }
 0x692   : > { %v1524_v48 = vpack.c.bf16 %v1521_v43, %v1520_v42  ;;  %v1987_v42 = vsel %vm1330_vm0, %v4846_v40, 0  ;;  %v4845_v43 = vld [vmem:[%s7304_s1 + $0x90] sm:$0xff] }
 0x694   : > { %4315 = vmatmul.msk.bf16.vlgmr.msra.gmra.mxu1 %vm1330_vm0, %v1524_v48 }
 0x69e   : > { %v1806_v36 = vpop.permute.xlu1 %1805 }
 0x69f   : > { %1821 = vmatpush.bf16.msrb.mxu1 %v1806_v36  ;;  %v1984_v36 = vsel %vm1330_vm0, %v4845_v43, 0 }
 0x6a6   : > { %v2042_v50 = vpop.permute.xlu1 %2041 }
 0x6a7   : > { %v2069_v39 = vsel %vm1330_vm0, %v2042_v50, 0 }
 0x6a8   : > { %2077 = vmatpush.bf16.xpose.msra.mxu2 %v2069_v39  ;;  %v4844_v39 = vld [vmem:[%s7304_s1 + $0x88] sm:$0xff] }
 0x6ae   : > { %v2036_v56 = vpop.permute.xlu1 %2035  ;;  %v1782_v46 = vpop.xlane.xlu2 %1781 }
 0x6b6   : > { %v1390_v33 = vpop.permute.xlu1 %1389 }
 0x6b7   : > { %1423 = vrot.lane.b32.xlu0 %v1390_v33, %s5194_s27  ;;  %v1981_v33 = vsel %vm1330_vm0, %v4844_v39, 0 }
 0x6d3   : > { %v1785_v35 = vpop.xlane.xlu2 %1784 }
 0x6d6   : > { %v1779_v15 = vpop.xlane.xlu0 %1778 }
 0x6d7   : > { %5044 = vrcp.f32 %v1779_v15 }
 0x6d8   : > { %5046 = vrcp.f32 %v1782_v46 }
 0x6db   : > { %v1788_v49 = vpop.xlane.xlu2 %1787 }
 0x6dc   : > { %5048 = vrcp.f32 %v1788_v49 }
 0x6dd   : > { %v5045_v52 = vpop.eup %5044  ;;  %5050 = vrcp.f32 %v1785_v35  ;;  %v4843_v35 = vld [vmem:[%s7304_s1 + $0x80] sm:$0xff] }
 0x6de   : > { %v5047_v30 = vpop.eup %5046  ;;  %v1793_v53 = vmul.f32 %v5045_v52, %v5037_v23  ;;  %v1978_v15 = vsel %vm1330_vm0, %v4843_v35, 0 }
 0x6df   : > { %v1794_v41 = vmul.f32 %v5047_v30, %v6044_v61 }
 0x6e0   : > { %v1797_v44 = vmul.f32 %v1793_v53, %v6068_v37 }
 0x6e1   : > { %v1798_v45 = vmul.f32 %v1794_v41, %v6068_v37 }
 0x6e2   : > { %v5049_v61 = vpop.eup %5048 }
 0x6e3   : > { %v6078_v47 = vpop.permute.xlu2 %1927  ;;  %v1801_v62 = vpack.c.bf16 %v1798_v45, %v1797_v44  ;;  %v5051_v6 = vpop.eup %5050  ;;  %v1796_v8 = vmul.f32 %v5049_v61, %v5039_v0  ;;  %v1993_v0 = vsel %vm1330_vm0, %v4848_v20, 0 }
 0x6e4   : > { %v1795_v23 = vmul.f32 %v5051_v6, %v6051_v21 }
 0x6e5   : > { %v1800_v25 = vmul.f32 %v1796_v8, %v6068_v37 }
 0x6e6   : > { %v1799_v27 = vmul.f32 %v1795_v23, %v6068_v37 }
 0x6e8   : > { %v1802_v21 = vpack.c.bf16 %v1800_v25, %v1799_v27 }
 0x6e9   : > { %v1804_v18 = vpop.permute.xlu0 %1803 }
 0x6ea   : > { %1822 = vmatpush.bf16.msrb.mxu1 %v1804_v18 }
 0x6eb   : > { %v1394_v10 = vpop.permute.xlu2 %1393 }
 0x6ec   : > { %1425 = vrot.lane.b32.xlu1 %v1394_v10, %s5194_s27 }
 0x6ed   : > { %4369 = vmatmul.msk.bf16.vlgmr.msrb.gmra.mxu1 %vm1330_vm0, %v1801_v62 }
 0x6ee   : > { %2001 = vmatpush.bf16.xpose.msra.mxu1 %v1999_v60 }
 0x6f1   : > { %v1930_v11 = vpop.permute.xlu0 %1929 }
 0x6f6   : > { %2002 = vmatpush.bf16.xpose.msra.mxu1 %v1996_v55 }
 0x6f9   : > { %v2040_v7 = vpop.permute.xlu0 %2039 }
 0x6fa   : > { %v2066_v32 = vsel %vm1330_vm0, %v2040_v7, 0 }
 0x6fb   : > { %2078 = vmatpush.bf16.xpose.msra.mxu2 %v2066_v32 }
 0x6fd   : > { %4370 = vmatmul.msk.bf16.gmra.mxu1 %vm1330_vm0, %v1802_v21 }
 0x6fe   : > { %2003 = vmatpush.bf16.xpose.msra.mxu1 %v1993_v0 }
 0x701   : > { %v2038_v50 = vpop.permute.xlu0 %2037 }
 0x702   : > { %4441 = vmatmul.msk.bf16.vlgmr.msra.gmra.mxu2 %vm1330_vm0, %v2036_v56 }
 0x706   : > { %2004 = vmatpush.bf16.xpose.msra.mxu1 %v1990_v38 }
 0x70e   : > { %2005 = vmatpush.bf16.xpose.msra.mxu1 %v1987_v42 }
 0x711   : > { %v1553_v48 = vpop.f32.mrf.mxu1 }
 0x712   : > { %4442 = vmatmul.msk.bf16.gmra.mxu2 %vm1330_vm0, %v2038_v50 }
 0x716   : > { %2006 = vmatpush.bf16.xpose.msra.mxu1 %v1984_v36 }
 0x719   : > { %v1555_v56 = vpop.f32.mrf.mxu1 }
 0x71a   : > { %v1563_v46 = vpack.c.bf16 %v1555_v56, %v1553_v48 }
 0x71c   : > { %4389 = vmatmul.msk.bf16.vlgmr.msra.gmra.mxu0 %vm1330_vm0, %v1563_v46 }
 0x71e   : > { %2007 = vmatpush.bf16.xpose.msra.mxu1 %v1981_v33 }
 0x726   : > { %2008 = vmatpush.bf16.xpose.msra.mxu1 %v1978_v15 }
 0x729   : > { %v1424_v18 = vpop.permute.xlu0 %1423 }
 0x72a   : > { %v1458_v10 = vadd.f32 %v6023_v9, %v1424_v18 }
 0x72c   : > { %v1464_v62 = vmul.f32 0.17677669, %v1458_v10 }
 0x72d   : > { %4439 = vmatmul.msk.bf16.vlgmr.msra.gmra.mxu1 %vm1330_vm0, %v6078_v47 }
 0x72e   : > { %v1471_v55 = vadd.f32 %v6013_v54, %v1464_v62 }
 0x730   : > { %v1479_v6 = vsel %vm1330_vm0, %v1471_v55, -inf }
 0x73d   : > { %4440 = vmatmul.msk.bf16.gmra.mxu1 %vm1330_vm0, %v1930_v11 }
 0x75e   : > { %v1426_v63 = vpop.permute.xlu1 %1425 }
 0x75f   : > { %v1460_v61 = vadd.f32 %v6025_v1, %v1426_v63 }
 0x761   : > { %v1465_v11 = vmul.f32 0.17677669, %v1460_v61  ;;  %v4858_v61 = vld [vmem:[%s7304_s1 + $0xf8] sm:$0xff] }
 0x763   : > { %v1472_v8 = vadd.f32 %v6013_v54, %v1465_v11  ;;  %v4377_v11 = vld [vmem:[%s7306_s3 + $0x11c] sm:$0xf] }
 0x765   : > { %v1482_v16 = vsel %vm1330_vm0, %v1472_v8, -inf }
 0x76a   : > { %v6140_v49 = vpop.f32.mrf.mxu1 }
 0x772   : > { %v6142_v52 = vpop.f32.mrf.mxu1 }
 0x773   : > { %v1834_v30 = vpack.c.bf16 %v6142_v52, %v6140_v49 }
 0x77a   : > { %v6146_v53 = vpop.f32.mrf.mxu1 }
 0x782   : > { %v6148_v58 = vpop.f32.mrf.mxu1 }
 0x783   : > { %v1835_v41 = vpack.c.bf16 %v6148_v58, %v6146_v53 }
 0x785   : > { %v2080_v32 = vpop.f32.mrf.mxu2 }
 0x78d   : > { %v2082_v48 = vpop.f32.mrf.mxu2 }
 0x795   : > { %v2085_v46 = vpop.f32.mrf.mxu2 }
 0x79d   : > { %v2087_v18 = vpop.f32.mrf.mxu2 }
 0x7aa   : > { %v2010_v44 = vpop.f32.mrf.mxu1 }
 0x7ab   : > { %2021 = vrot.lane.b32.xlu2 %v2010_v44, %s5192_s22 }
 0x7b2   : > { %v2012_v47 = vpop.f32.mrf.mxu1 }
 0x7b3   : > { %2025 = vrot.lane.b32.xlu0 %v2012_v47, %s5193_s23 }
 0x7ba   : > { %v2015_v60 = vpop.f32.mrf.mxu1 }
 0x7bb   : > { %2029 = vrot.lane.b32.xlu1 %v2015_v60, %s5195_s29 }
 0x7c2   : > { %v2017_v45 = vpop.f32.mrf.mxu1 }
 0x7c3   : > { %2033 = vrot.lane.b32.xlu2 %v2017_v45, %s5196_s30 }
 0x7dd   : > { %1480 = vmax.xlane.f32.xlu0 %v1479_v6  ;;  %v4822_v6 = vld [vmem:[%s7306_s3 + $0x144] sm:$0xf0] }
 0x7e5   : > { %1483 = vmax.xlane.f32.xlu1 %v1482_v16  ;;  %v4378_v16 = vor.u32 %v4822_v6, %v4377_v11 }
 0x7e7   : > { %1860 = vmatpush.bf16.msrb.mxu3 %v4378_v16 }
 0x805   : > { %v2022_v19 = vpop.permute.xlu2 %2021 }
 0x806   : > { %2047 = vrot.lane.b32.xlu2 %v2022_v19, %s5194_s27  ;;  %v4373_v19 = vld [vmem:[%s7306_s3 + $0xc4] sm:$0xf] }
 0x81d   : > { %v2034_v1 = vpop.permute.xlu2 %2033 }
 0x825   : > { %v2026_v20 = vpop.permute.xlu0 %2025 }
 0x826   : > { %2049 = vrot.lane.b32.xlu2 %v2026_v20, %s5194_s27  ;;  %v4821_v20 = vld [vmem:[%s7306_s3 + $0xec] sm:$0xf0] }
 0x82d   : > { %v2030_v9 = vpop.permute.xlu1 %2029 }
 0x82e   : > { %2051 = vrot.lane.b32.xlu2 %v2030_v9, %s5194_s27  ;;  %v4374_v9 = vor.u32 %v4821_v20, %v4373_v19 }
 0x830   : > { %1861 = vmatpush.bf16.msrb.mxu3 %v4374_v9 }
 0x836   : > { %2053 = vrot.lane.b32.xlu2 %v2034_v1, %s5194_s27  ;;  %v4856_v1 = vld [vmem:[%s7304_s1 + $0xe8] sm:$0xff] }
 0x850   : > { %v1481_v22 = vpop.xlane.xlu0 %1480 }
 0x851   : > { %v1487_v23 = vsub.f32 %v1471_v55, %v1481_v22  ;;  %v2311_v55 = vsel %vm1330_vm0, %v4858_v61, 0  ;;  %v2305_v22 = vsel %vm1330_vm0, %v4856_v1, 0 }
 0x852   : > { %2313 = vmatpush.bf16.xpose.msrb.mxu2 %v2311_v55 }
 0x853   : > { %v1493_v25 = vmul.f32 1.442695, %v1487_v23 }
 0x855   : > { %5052 = vpow2.f32 %v1493_v25  ;;  %v4855_v25 = vld [vmem:[%s7304_s1 + $0xe0] sm:$0xff] }
 0x858   : > { %v1484_v0 = vpop.xlane.xlu1 %1483 }
 0x859   : > { %v1488_v7 = vsub.f32 %v1472_v8, %v1484_v0 }
 0x85b   : > { %v6166_v27 = vpop.eup %5052  ;;  %v1495_v31 = vmul.f32 1.442695, %v1488_v7  ;;  %v2302_v7 = vsel %vm1330_vm0, %v4855_v25, 0 }
 0x85c   : > { %v1503_v17 = vsel %vm1330_vm0, %v6166_v27, 0.0 }
 0x85d   : > { %5054 = vpow2.f32 %v1495_v31  ;;  %1504 = vadd.xlane.f32.xlu1 %v1503_v17 }
 0x860   : > { %v2048_v34 = vpop.permute.xlu2 %2047 }
 0x861   : > { %v2081_v21 = vadd.f32 %v2080_v32, %v2048_v34 }
 0x863   : > { %v5055_v24 = vpop.eup %5054  ;;  %v2090_v38 = vmul.f32 0.17677669, %v2081_v21 }
 0x864   : > { %v1506_v40 = vsel %vm1330_vm0, %v5055_v24, 0.0 }
 0x865   : > { %1507 = vadd.xlane.f32.xlu0 %v1506_v40  ;;  %v2094_v42 = vadd.f32 %v2090_v38, %v6013_v54 }
 0x867   : > { %v2098_v43 = vsel %vm1330_vm0, %v2094_v42, -inf }
 0x868   : > { %2099 = vmax.xlane.f32.xlu2 %v2098_v43  ;;  %v4854_v43 = vld [vmem:[%s7304_s1 + $0xd8] sm:$0xff] }
 0x880   : > { %v2050_v36 = vpop.permute.xlu2 %2049 }
 0x881   : > { %v2083_v50 = vadd.f32 %v2082_v48, %v2050_v36 }
 0x883   : > { %v2091_v39 = vmul.f32 0.17677669, %v2083_v50  ;;  %v2299_v50 = vsel %vm1330_vm0, %v4854_v43, 0 }
 0x885   : > { %v6174_v56 = vadd.f32 %v2091_v39, %v6013_v54 }
 0x887   : > { %v2101_v33 = vsel %vm1330_vm0, %v6174_v56, -inf }
 0x888   : > { %v2052_v35 = vpop.permute.xlu2 %2051  ;;  %2102 = vmax.xlane.f32.xlu0 %v2101_v33 }
 0x889   : > { %v2086_v15 = vadd.f32 %v2085_v46, %v2052_v35  ;;  %v4852_v46 = vld [vmem:[%s7304_s1 + $0xc8] sm:$0xff] }
 0x88a   : > { %v2293_v35 = vsel %vm1330_vm0, %v4852_v46, 0  ;;  %v4451_v46 = vld [vmem:[%s7306_s3 + $0x1cc] sm:$0xf] }
 0x88b   : > { %v2092_v44 = vmul.f32 0.17677669, %v2086_v15  ;;  %v4851_v15 = vld [vmem:[%s7304_s1 + $0xc0] sm:$0xff] }
 0x88d   : > { %v6179_v47 = vadd.f32 %v2092_v44, %v6013_v54  ;;  %v2290_v44 = vsel %vm1330_vm0, %v4851_v15, 0 }
 0x88f   : > { %v2104_v60 = vsel %vm1330_vm0, %v6179_v47, -inf }
 0x890   : > { %2105 = vmax.xlane.f32.xlu1 %v2104_v60  ;;  %v2054_v45 = vpop.permute.xlu2 %2053 }
 0x891   : > { %v2088_v10 = vadd.f32 %v2087_v18, %v2054_v45 }
 0x893   : > { %v2093_v62 = vmul.f32 0.17677669, %v2088_v10 }
 0x895   : > { %v6188_v63 = vadd.f32 %v2093_v62, %v6013_v54 }
 0x89c   : > { %2241 = vrot.lane.b32.xlu0 %v5926_v59, %s5200_s21  ;;  %v2107_v59 = vsel %vm1330_vm0, %v6188_v63, -inf }
 0x8a9   : > { %2239 = vrot.lane.b32.xlu1 %v5914_v13, %s5200_s21  ;;  %v4857_v13 = vld [vmem:[%s7304_s1 + $0xf0] sm:$0xff] }
 0x8aa   : > { %v2308_v8 = vsel %vm1330_vm0, %v4857_v13, 0 }
 0x8ab   : > { %2314 = vmatpush.bf16.xpose.msrb.mxu2 %v2308_v8 }
 0x8b3   : > { %2315 = vmatpush.bf16.xpose.msrb.mxu2 %v2305_v22 }
 0x8bb   : > { %2316 = vmatpush.bf16.xpose.msrb.mxu2 %v2302_v7 }
 0x8c3   : > { %2317 = vmatpush.bf16.xpose.msrb.mxu2 %v2299_v50 }
 0x8c6   : > { %2108 = vmax.xlane.f32.xlu0 %v2107_v59 }
 0x8d0   : > { %v1505_v23 = vpop.xlane.xlu1 %1504 }
 0x8d1   : > { %5056 = vrcp.f32 %v1505_v23 }
 0x8d7   : > { %v5057_v31 = vpop.eup %5056 }
 0x8d8   : > { %v1508_v0 = vpop.xlane.xlu0 %1507  ;;  %v1515_v34 = vmul.f32 %v5057_v31, %v6166_v27 }
 0x8d9   : > { %5058 = vrcp.f32 %v1508_v0 }
 0x8da   : > { %2150 = vrot.lane.b32.xlu0 %v5942_v4, %s5198_s11  ;;  %v1522_v48 = vmul.f32 %v6068_v37, %v1515_v34 }
 0x8db   : > { %v2100_v17 = vpop.xlane.xlu2 %2099 }
 0x8dc   : > { %v2110_v32 = vsub.f32 %v2094_v42, %v2100_v17 }
 0x8de   : > { %v2114_v21 = vmul.f32 1.442695, %v2110_v32 }
 0x8df   : > { %v5059_v38 = vpop.eup %5058 }
 0x8e0   : > { %v1516_v40 = vmul.f32 %v5059_v38, %v5055_v24  ;;  %5060 = vpow2.f32 %v2114_v21  ;;  %v4853_v24 = vld [vmem:[%s7304_s1 + $0xd0] sm:$0xff] }
 0x8e1   : > { %v2296_v33 = vsel %vm1330_vm0, %v4853_v24, 0 }
 0x8e2   : > { %v1523_v36 = vmul.f32 %v6068_v37, %v1516_v40  ;;  %2318 = vmatpush.bf16.xpose.msrb.mxu2 %v2296_v33 }
 0x8e4   : > { %v1525_v39 = vpack.c.bf16 %v1523_v36, %v1522_v48 }
 0x8e6   : > { %v5061_v42 = vpop.eup %5060  ;;  %4316 = vmatmul.msk.bf16.vlgmr.msra.gmra.mxu3 %vm1330_vm0, %v1525_v39 }
 0x8e7   : > { %v2122_v27 = vsel %vm1330_vm0, %v5061_v42, 0.0 }
 0x8e8   : > { %2123 = vadd.xlane.f32.xlu2 %v2122_v27 }
 0x8ea   : > { %2319 = vmatpush.bf16.xpose.msrb.mxu2 %v2293_v35  ;;  %v4824_v35 = vld [vmem:[%s7306_s3 + $0x1f4] sm:$0xf0] }
 0x8eb   : > { %v4452_v15 = vor.u32 %v4824_v35, %v4451_v46 }
 0x8ed   : > { %2205 = vmatpush.bf16.msrb.mxu0 %v4452_v15 }
 0x8f2   : > { %2320 = vmatpush.bf16.xpose.msrb.mxu2 %v2290_v44 }
 0x8f6   : > { %4379 = vmatmul.msk.bf16.vlgmr.msrb.gmra.mxu3 %vm1330_vm0, %v1834_v30 }
 0x8fb   : > { %v2103_v60 = vpop.xlane.xlu0 %2102 }
 0x8fc   : > { %v2111_v45 = vsub.f32 %v6174_v56, %v2103_v60  ;;  %v4447_v60 = vld [vmem:[%s7306_s3 + $0x174] sm:$0xf] }
 0x8fe   : > { %v2116_v18 = vmul.f32 1.442695, %v2111_v45  ;;  %v4823_v45 = vld [vmem:[%s7306_s3 + $0x19c] sm:$0xf0] }
 0x900   : > { %5062 = vpow2.f32 %v2116_v18  ;;  %2148 = vrot.lane.b32.xlu2 %v5955_v14, %s5198_s11  ;;  %v4448_v18 = vor.u32 %v4823_v45, %v4447_v60 }
 0x902   : > { %2206 = vmatpush.bf16.msrb.mxu0 %v4448_v18 }
 0x903   : > { %v2106_v10 = vpop.xlane.xlu1 %2105 }
 0x904   : > { %v2112_v62 = vsub.f32 %v6179_v47, %v2106_v10 }
 0x906   : > { %v5063_v61 = vpop.eup %5062  ;;  %v2118_v55 = vmul.f32 1.442695, %v2112_v62  ;;  %4380 = vmatmul.msk.bf16.gmra.mxu3 %vm1330_vm0, %v1835_v41 }
 0x907   : > { %v2125_v49 = vsel %vm1330_vm0, %v5063_v61, 0.0 }
 0x908   : > { %5064 = vpow2.f32 %v2118_v55  ;;  %2126 = vadd.xlane.f32.xlu1 %v2125_v49 }
 0x90e   : > { %v5065_v52 = vpop.eup %5064  ;;  %v2242_v53 = vpop.permute.xlu0 %2241 }
 0x90f   : > { %v2128_v30 = vsel %vm1330_vm0, %v5065_v52, 0.0 }
 0x910   : > { %2129 = vadd.xlane.f32.xlu0 %v2128_v30 }
 0x91b   : > { %v2240_v56 = vpop.permute.xlu1 %2239 }
 0x91c   : > { %4503 = vmatmul.msk.bf16.vlgmr.msrb.gmra.mxu2 %vm1330_vm0, %v2240_v56 }
 0x921   : > { %2353 = vrot.lane.b32.xlu1 %v5924_v29, %s5200_s21 }
 0x924   : > { %2351 = vrot.lane.b32.xlu0 %v5940_v2, %s5200_s21 }
 0x929   : > { %2347 = vrot.lane.b32.xlu1 %v5920_v28, %s5200_s21 }
 0x92c   : > { %4504 = vmatmul.msk.bf16.gmra.mxu2 %vm1330_vm0, %v2242_v53 }
 0x939   : > { %v2109_v58 = vpop.xlane.xlu0 %2108 }
 0x93a   : > { %v2113_v41 = vsub.f32 %v6188_v63, %v2109_v58 }
 0x93c   : > { %v2120_v47 = vmul.f32 1.442695, %v2113_v41 }
 0x93e   : > { %5066 = vpow2.f32 %v2120_v47 }
 0x944   : > { %v5067_v59 = vpop.eup %5066 }
 0x945   : > { %v2131_v13 = vsel %vm1330_vm0, %v5067_v59, 0.0 }
 0x946   : > { %2132 = vadd.xlane.f32.xlu2 %v2131_v13  ;;  %v1900_v13 = vpop.f32.mrf.mxu0 }
 0x94c   : > { %v2151_v11 = vpop.permute.xlu0 %2150 }
 0x94d   : > { %2166 = vmatpush.bf16.msra.mxu3 %v2151_v11 }
 0x95b   : > { %v2124_v29 = vpop.xlane.xlu2 %2123 }
 0x95c   : > { %5068 = vrcp.f32 %v2124_v29  ;;  %v1902_v29 = vpop.f32.mrf.mxu0 }
 0x95e   : > { %2349 = vrot.lane.b32.xlu2 %v5947_v26, %s5200_s21 }
 0x962   : > { %v5069_v16 = vpop.eup %5068 }
 0x963   : > { %v2149_v2 = vpop.permute.xlu2 %2148  ;;  %v2138_v19 = vmul.f32 %v5069_v16, %v5061_v42 }
 0x964   : > { %2167 = vmatpush.bf16.msra.mxu3 %v2149_v2 }
 0x965   : > { %v2142_v1 = vmul.f32 %v2138_v19, %v6068_v37 }
 0x969   : > { %v1558_v28 = vpop.f32.mrf.mxu3 }
 0x971   : > { %v1560_v6 = vpop.f32.mrf.mxu3 }
 0x972   : > { %v1564_v8 = vpack.c.bf16 %v1560_v6, %v1558_v28 }
 0x974   : > { %4390 = vmatmul.msk.bf16.gmra.mxu0 %vm1330_vm0, %v1564_v8 }
 0x979   : > { %v1863_v24 = vpop.f32.mrf.mxu3 }
 0x97b   : > { %v2127_v63 = vpop.xlane.xlu1 %2126 }
 0x97c   : > { %5070 = vrcp.f32 %v2127_v63 }
 0x981   : > { %v1865_v44 = vpop.f32.mrf.mxu3 }
 0x982   : > { %v5071_v20 = vpop.eup %5070 }
 0x983   : > { %v2139_v9 = vmul.f32 %v5071_v20, %v5063_v61  ;;  %v2130_v26 = vpop.xlane.xlu0 %2129 }
 0x984   : > { %5072 = vrcp.f32 %v2130_v26 }
 0x985   : > { %v2143_v22 = vmul.f32 %v2139_v9, %v6068_v37 }
 0x987   : > { %v2146_v23 = vpack.c.bf16 %v2143_v22, %v2142_v1 }
 0x989   : > { %4443 = vmatmul.msk.bf16.vlgmr.msra.gmra.mxu3 %vm1330_vm0, %v2146_v23  ;;  %v1868_v10 = vpop.f32.mrf.mxu3 }
 0x98a   : > { %v5073_v40 = vpop.eup %5072 }
 0x98b   : > { %v2140_v43 = vmul.f32 %v5073_v40, %v5065_v52 }
 0x98d   : > { %v2144_v50 = vmul.f32 %v2140_v43, %v6068_v37 }
 0x991   : > { %v6296_v62 = vpop.f32.mrf.mxu3 }
 0x993   : > { %v2354_v25 = vpop.permute.xlu1 %2353 }
 0x994   : > { %v2381_v0 = vsel %vm1330_vm0, %v2354_v25, 0 }
 0x995   : > { %2389 = vmatpush.bf16.xpose.msrb.mxu3 %v2381_v0 }
 0x996   : > { %v2352_v7 = vpop.permute.xlu0 %2351 }
 0x997   : > { %v2378_v31 = vsel %vm1330_vm0, %v2352_v7, 0 }
 0x99b   : > { %v2348_v27 = vpop.permute.xlu1 %2347 }
 0x99d   : > { %2390 = vmatpush.bf16.xpose.msrb.mxu3 %v2378_v31 }
 0x99f   : > { %v2322_v17 = vpop.f32.mrf.mxu2 }
 0x9a0   : > { %2333 = vrot.lane.b32.xlu0 %v2322_v17, %s5192_s22  ;;  %v1901_v17 = vadd.f32 %v1900_v13, %v1863_v24 }
 0x9a7   : > { %v2324_v32 = vpop.f32.mrf.mxu2 }
 0x9a8   : > { %2337 = vrot.lane.b32.xlu1 %v2324_v32, %s5193_s23 }
 0x9af   : > { %v2327_v34 = vpop.f32.mrf.mxu2 }
 0x9b0   : > { %2341 = vrot.lane.b32.xlu0 %v2327_v34, %s5195_s29 }
 0x9b7   : > { %v2329_v21 = vpop.f32.mrf.mxu2 }
 0x9b8   : > { %2345 = vrot.lane.b32.xlu1 %v2329_v21, %s5196_s30 }
 0x9b9   : > { %v2133_v38 = vpop.xlane.xlu2 %2132 }
 0x9ba   : > { %5074 = vrcp.f32 %v2133_v38  ;;  %v1903_v38 = vadd.f32 %v1902_v29, %v1865_v44  ;;  %v4515_v29 = vld [vmem:[%s7306_s3 + $0x27c] sm:$0xf] }
 0x9c0   : > { %v5075_v48 = vpop.eup %5074 }
 0x9c1   : > { %v2141_v36 = vmul.f32 %v5075_v48, %v5067_v59  ;;  %v2350_v33 = vpop.permute.xlu2 %2349 }
 0x9c3   : > { %v2145_v39 = vmul.f32 %v2141_v36, %v6068_v37 }
 0x9c5   : > { %v2147_v42 = vpack.c.bf16 %v2145_v39, %v2144_v50 }
 0x9c7   : > { %4444 = vmatmul.msk.bf16.gmra.mxu3 %vm1330_vm0, %v2147_v42 }
 0x9d7   : > { %4505 = vmatmul.msk.bf16.vlgmr.msrb.gmra.mxu3 %vm1330_vm0, %v2348_v27 }
 0x9e7   : > { %4506 = vmatmul.msk.bf16.gmra.mxu3 %vm1330_vm0, %v2350_v33 }
 0x9f1   : > { %v1905_v63 = vpop.f32.mrf.mxu0 }
 0x9f2   : > { %v1906_v24 = vadd.f32 %v1905_v63, %v1868_v10 }
 0x9f9   : > { %v6307_v23 = vpop.f32.mrf.mxu0 }
 0xa0c   : > { %v2169_v61 = vpop.f32.mrf.mxu3 }
 0xa12   : > { %v2334_v55 = vpop.permute.xlu0 %2333 }
 0xa13   : > { %2359 = vrot.lane.b32.xlu0 %v2334_v55, %s5194_s27 }
 0xa14   : > { %v2171_v49 = vpop.f32.mrf.mxu3 }
 0xa15   : > { %v2179_v52 = vpack.c.bf16 %v2171_v49, %v2169_v61 }
 0xa17   : > { %4453 = vmatmul.msk.bf16.vlgmr.msrb.gmra.mxu0 %vm1330_vm0, %v2179_v52 }
 0xa1a   : > { %v2338_v30 = vpop.permute.xlu1 %2337 }
 0xa1b   : > { %2361 = vrot.lane.b32.xlu1 %v2338_v30, %s5194_s27 }
 0xa22   : > { %v2342_v56 = vpop.permute.xlu0 %2341 }
 0xa23   : > { %2363 = vrot.lane.b32.xlu2 %v2342_v56, %s5194_s27 }
 0xa2a   : > { %v2346_v53 = vpop.permute.xlu1 %2345 }
 0xa2b   : > { %2365 = vrot.lane.b32.xlu0 %v2346_v53, %s5194_s27 }
 0xa4a   : > { %v2174_v58 = vpop.f32.mrf.mxu3 }
 0xa52   : > { %v2176_v41 = vpop.f32.mrf.mxu3 }
 0xa53   : > { %v2180_v47 = vpack.c.bf16 %v2176_v41, %v2174_v58 }
 0xa55   : > { %4454 = vmatmul.msk.bf16.gmra.mxu0 %vm1330_vm0, %v2180_v47 }
 0xa5a   : > { %v2392_v59 = vpop.f32.mrf.mxu3 }
 0xa62   : > { %v2394_v11 = vpop.f32.mrf.mxu3 }
 0xa6a   : > { %v2397_v2 = vpop.f32.mrf.mxu3 }
 0xa72   : > { %v2399_v43 = vpop.f32.mrf.mxu3 }
 0xa7d   : > { %v2364_v28 = vpop.permute.xlu2 %2363 }
 0xa7e   : > { %v2398_v6 = vadd.f32 %v2397_v2, %v2364_v28  ;;  %v4826_v2 = vld [vmem:[%s7306_s3 + $0x2a4] sm:$0xf0]  ;;  %v4511_v28 = vld [vmem:[%s7306_s3 + $0x224] sm:$0xf] }
 0xa80   : > { %v2404_v8 = vmul.f32 0.17677669, %v2398_v6  ;;  %v4516_v6 = vor.u32 %v4826_v2, %v4515_v29 }
 0xa82   : > { %v2408_v16 = vadd.f32 %v2404_v8, %v6013_v54  ;;  %2517 = vmatpush.bf16.msrb.mxu1 %v4516_v6  ;;  %v4577_v6 = vld [vmem:[%s7306_s3 + $0x280] sm:$0xf] }
 0xa84   : > { %v2416_v19 = vsel %vm1330_vm0, %v2408_v16, -inf }
 0xa85   : > { %v2360_v20 = vpop.permute.xlu0 %2359  ;;  %2417 = vmax.xlane.f32.xlu0 %v2416_v19 }
 0xa86   : > { %v2393_v9 = vadd.f32 %v2392_v59, %v2360_v20 }
 0xa88   : > { %v2402_v1 = vmul.f32 0.17677669, %v2393_v9 }
 0xa8a   : > { %v2406_v22 = vadd.f32 %v2402_v1, %v6013_v54 }
 0xa8c   : > { %v2410_v26 = vsel %vm1330_vm0, %v2406_v22, -inf }
 0xa8d   : > { %2411 = vmax.xlane.f32.xlu1 %v2410_v26  ;;  %v2362_v25 = vpop.permute.xlu1 %2361 }
 0xa8e   : > { %v2395_v0 = vadd.f32 %v2394_v11, %v2362_v25 }
 0xa90   : > { %v2403_v7 = vmul.f32 0.17677669, %v2395_v0 }
 0xa92   : > { %v2407_v31 = vadd.f32 %v2403_v7, %v6013_v54 }
 0xa94   : > { %v2208_v32 = vpop.f32.mrf.mxu0  ;;  %v2413_v34 = vsel %vm1330_vm0, %v2407_v31, -inf }
 0xa95   : > { %v6312_v21 = vadd.f32 %v2208_v32, %v1901_v17  ;;  %2414 = vmax.xlane.f32.xlu2 %v2413_v34 }
 0xa9c   : > { %v2210_v40 = vpop.f32.mrf.mxu0 }
 0xa9d   : > { %v6314_v48 = vadd.f32 %v2210_v40, %v1903_v38  ;;  %v2366_v36 = vpop.permute.xlu0 %2365 }
 0xa9e   : > { %v2400_v50 = vadd.f32 %v2399_v43, %v2366_v36 }
 0xaa0   : > { %v2405_v39 = vmul.f32 0.17677669, %v2400_v50 }
 0xaa2   : > { %v2409_v42 = vadd.f32 %v2405_v39, %v6013_v54 }
 0xaa4   : > { %v2419_v27 = vsel %vm1330_vm0, %v2409_v42, -inf }
 0xaa5   : > { %2420 = vmax.xlane.f32.xlu1 %v2419_v27 }
 0xabe   : > { %2462 = vrot.lane.b32.xlu1 %v5942_v4, %s5200_s21 }
 0xad2   : > { %v2213_v33 = vpop.f32.mrf.mxu0 }
 0xad3   : > { %v6320_v46 = vadd.f32 %v2213_v33, %v1906_v24 }
 0xada   : > { %v2215_v36 = vpop.f32.mrf.mxu0 }
 0xaf8   : > { %v2418_v60 = vpop.xlane.xlu0 %2417 }
 0xaf9   : > { %v2424_v55 = vsub.f32 %v2408_v16, %v2418_v60 }
 0xafb   : > { %v2430_v52 = vmul.f32 1.442695, %v2424_v55 }
 0xb00   : > { %v2412_v35 = vpop.xlane.xlu1 %2411 }
 0xb01   : > { %v2422_v15 = vsub.f32 %v2406_v22, %v2412_v35 }
 0xb03   : > { %v2426_v44 = vmul.f32 1.442695, %v2422_v15 }
 0xb05   : > { %5076 = vpow2.f32 %v2426_v44 }
 0xb08   : > { %v2415_v45 = vpop.xlane.xlu2 %2414 }
 0xb09   : > { %v2423_v18 = vsub.f32 %v2407_v31, %v2415_v45 }
 0xb0b   : > { %v5077_v61 = vpop.eup %5076  ;;  %v2428_v54 = vmul.f32 1.442695, %v2423_v18 }
 0xb0c   : > { %v2434_v49 = vsel %vm1330_vm0, %v5077_v61, 0.0 }
 0xb0d   : > { %5078 = vpow2.f32 %v2428_v54  ;;  %2435 = vadd.xlane.f32.xlu2 %v2434_v49 }
 0xb0e   : > { %5080 = vpow2.f32 %v2430_v52 }
 0xb13   : > { %v5079_v4 = vpop.eup %5078 }
 0xb14   : > { %v2437_v10 = vsel %vm1330_vm0, %v5079_v4, 0.0  ;;  %v5081_v56 = vpop.eup %5080 }
 0xb15   : > { %2438 = vadd.xlane.f32.xlu0 %v2437_v10  ;;  %v2440_v41 = vsel %vm1330_vm0, %v5081_v56, 0.0 }
 0xb18   : > { %v2421_v30 = vpop.xlane.xlu1 %2420 }
 0xb19   : > { %v2425_v53 = vsub.f32 %v2409_v42, %v2421_v30 }
 0xb1b   : > { %v2432_v58 = vmul.f32 1.442695, %v2425_v53 }
 0xb1d   : > { %5082 = vpow2.f32 %v2432_v58  ;;  %2441 = vadd.xlane.f32.xlu0 %v2440_v41 }
 0xb23   : > { %v5083_v47 = vpop.eup %5082 }
 0xb24   : > { %v2443_v59 = vsel %vm1330_vm0, %v5083_v47, 0.0 }
 0xb25   : > { %2460 = vrot.lane.b32.xlu2 %v5955_v14, %s5200_s21  ;;  %2444 = vadd.xlane.f32.xlu0 %v2443_v59  ;;  %v4825_v14 = vld [vmem:[%s7306_s3 + $0x24c] sm:$0xf0] }
 0xb26   : > { %v4512_v16 = vor.u32 %v4825_v14, %v4511_v28  ;;  %v4874_v14 = vld [vmem:[%s7306_s3 + $0x2a8] sm:$0xf0] }
 0xb28   : > { %2518 = vmatpush.bf16.msrb.mxu1 %v4512_v16  ;;  %v4579_v16 = vld [vmem:[%s7306_s3 + $0x2ac] sm:$0xf0] }
 0xb30   : > { %v2463_v13 = vpop.permute.xlu1 %2462 }
 0xb31   : > { %2478 = vmatpush.bf16.msra.mxu0 %v2463_v13 }
 0xb80   : > { %v2436_v11 = vpop.xlane.xlu2 %2435 }
 0xb81   : > { %5084 = vrcp.f32 %v2436_v11 }
 0xb87   : > { %v5085_v19 = vpop.eup %5084 }
 0xb88   : > { %v2439_v8 = vpop.xlane.xlu0 %2438  ;;  %v2461_v63 = vpop.permute.xlu2 %2460  ;;  %v2450_v20 = vmul.f32 %v5085_v19, %v5077_v61 }
 0xb89   : > { %5086 = vrcp.f32 %v2439_v8  ;;  %2479 = vmatpush.bf16.msra.mxu0 %v2461_v63  ;;  %v4873_v8 = vld [vmem:[%s7306_s3 + $0x284] sm:$0xf]  ;;  %v4578_v63 = vor.u32 %v4874_v14, %v4577_v6 }
 0xb8a   : > { %v2454_v26 = vmul.f32 %v2450_v20, %v6068_v37  ;;  %v4582_v19 = vor.u32 %v4873_v8, %v4579_v16  ;;  %v4569_v20 = vld [vmem:[%s7306_s3 + $0x228] sm:$0xf] }
 0xb8b   : > { %2746 = vmatpush.bf16.msra.mxu3 %v4578_v63 }
 0xb8d   : > { %2765 = vmatpush.bf16.msrb.mxu0 %v4582_v19 }
 0xb8f   : > { %v5087_v9 = vpop.eup %5086 }
 0xb90   : > { %v2451_v1 = vmul.f32 %v5087_v9, %v5079_v4  ;;  %v2442_v22 = vpop.xlane.xlu0 %2441  ;;  %v4872_v9 = vld [vmem:[%s7306_s3 + $0x250] sm:$0xf0] }
 0xb91   : > { %5088 = vrcp.f32 %v2442_v22  ;;  %v4570_v22 = vor.u32 %v4872_v9, %v4569_v20 }
 0xb92   : > { %v2455_v25 = vmul.f32 %v2451_v1, %v6068_v37  ;;  %v4871_v1 = vld [vmem:[%s7306_s3 + $0x22c] sm:$0xf] }
 0xb93   : > { %2747 = vmatpush.bf16.msra.mxu3 %v4570_v22 }
 0xb94   : > { %v2458_v0 = vpack.c.bf16 %v2455_v25, %v2454_v26  ;;  %v4571_v26 = vld [vmem:[%s7306_s3 + $0x254] sm:$0xf0] }
 0xb95   : > { %v4574_v25 = vor.u32 %v4871_v1, %v4571_v26 }
 0xb96   : > { %4507 = vmatmul.msk.bf16.vlgmr.msra.gmra.mxu0 %vm1330_vm0, %v2458_v0  ;;  %v4561_v0 = vld [vmem:[%s7306_s3 + $0x1d0] sm:$0xf] }
 0xb97   : > { %v5089_v31 = vpop.eup %5088  ;;  %2766 = vmatpush.bf16.msrb.mxu0 %v4574_v25 }
 0xb98   : > { %v2445_v7 = vpop.xlane.xlu0 %2444  ;;  %v2452_v17 = vmul.f32 %v5089_v31, %v5081_v56  ;;  %v4869_v31 = vld [vmem:[%s7306_s3 + $0x1d4] sm:$0xf] }
 0xb99   : > { %5090 = vrcp.f32 %v2445_v7  ;;  %v4870_v7 = vld [vmem:[%s7306_s3 + $0x1f8] sm:$0xf0] }
 0xb9a   : > { %v2456_v38 = vmul.f32 %v2452_v17, %v6068_v37  ;;  %v4562_v17 = vor.u32 %v4870_v7, %v4561_v0 }
 0xb9c   : > { %2748 = vmatpush.bf16.msra.mxu3 %v4562_v17 }
 0xb9f   : > { %v5091_v32 = vpop.eup %5090 }
 0xba0   : > { %v2453_v34 = vmul.f32 %v5091_v32, %v5083_v47  ;;  %v4563_v32 = vld [vmem:[%s7306_s3 + $0x1fc] sm:$0xf0] }
 0xba2   : > { %v2457_v40 = vmul.f32 %v2453_v34, %v6068_v37  ;;  %v4965_v37 = vld [vmem:[%s7308_s5 + $0xc] ss:$0 sm:$0xff]  ;;  %v4566_v34 = vor.u32 %v4869_v31, %v4563_v32 }
 0xba4   : > { %v2459_v43 = vpack.c.bf16 %v2457_v40, %v2456_v38  ;;  %2767 = vmatpush.bf16.msrb.mxu0 %v4566_v34  ;;  %v4553_v38 = vld [vmem:[%s7306_s3 + $0x178] sm:$0xf]  ;;  %v4868_v40 = vld [vmem:[%s7306_s3 + $0x1a0] sm:$0xf0] }
 0xba6   : > { %4508 = vmatmul.msk.bf16.gmra.mxu0 %vm1330_vm0, %v2459_v43  ;;  %v4867_v43 = vld [vmem:[%s7306_s3 + $0x17c] sm:$0xf] }
 0xc13   : > { %v2481_v50 = vpop.f32.mrf.mxu0 }
 0xc1b   : > { %v2483_v39 = vpop.f32.mrf.mxu0 }
 0xc1c   : > { %v2491_v42 = vpack.c.bf16 %v2483_v39, %v2481_v50  ;;  %v4555_v50 = vld [vmem:[%s7306_s3 + $0x1a4] sm:$0xf0] }
 0xc1d   : > { %v4558_v39 = vor.u32 %v4867_v43, %v4555_v50 }
 0xc1e   : > { %4517 = vmatmul.msk.bf16.vlgmr.msrb.gmra.mxu1 %vm1330_vm0, %v2491_v42  ;;  %v4545_v42 = vld [vmem:[%s7306_s3 + $0x120] sm:$0xf] }
 0xc1f   : > { %2768 = vmatpush.bf16.msrb.mxu0 %v4558_v39 }
 0xc23   : > { %v2486_v27 = vpop.f32.mrf.mxu0 }
 0xc2b   : > { %v2488_v24 = vpop.f32.mrf.mxu0 }
 0xc2c   : > { %v2492_v33 = vpack.c.bf16 %v2488_v24, %v2486_v27  ;;  %v4866_v27 = vld [vmem:[%s7306_s3 + $0x148] sm:$0xf0]  ;;  %v4865_v24 = vld [vmem:[%s7306_s3 + $0x124] sm:$0xf] }
 0xc2e   : > { %4518 = vmatmul.msk.bf16.gmra.mxu1 %vm1330_vm0, %v2492_v33  ;;  %v4546_v33 = vor.u32 %v4866_v27, %v4545_v42 }
 0xc9b   : > { %v2520_v35 = vpop.f32.mrf.mxu1 }
 0xc9c   : > { %v2530_v15 = vadd.f32 %v2520_v35, %v6312_v21  ;;  %v4547_v35 = vld [vmem:[%s7306_s3 + $0x14c] sm:$0xf0] }
 0xc9e   : > { %v2534_v44 = vadd.f32 %v2530_v15, %v5676_v51  ;;  %v1908_v51 = vadd.f32 %v6307_v23, %v6296_v62  ;;  %v4550_v15 = vor.u32 %v4865_v24, %v4547_v35  ;;  %v4967_v24 = vld [vmem:[%s7308_s5 + $0xe] ss:$0 sm:$0xff] }
 0xca0   : > { %v6353_v60 = vadd.f32 %v4965_v37, %v2534_v44  ;;  %v2221_v4 = vadd.f32 %v2215_v36, %v1908_v51  ;;  %v4554_v36 = vor.u32 %v4868_v40, %v4553_v38  ;;  %2769 = vmatpush.bf16.msrb.mxu0 %v4550_v15  ;;  %v4537_v44 = vld [vmem:[%s7306_s3 + $0xc8] sm:$0xf]  ;;  %v4966_v40 = vld [vmem:[%s7308_s5 + $0xd] ss:$0 sm:$0xff] }
 0xca2   : > { %2548 = vadd.xlane.f32.xlu0 %v6353_v60  ;;  %2749 = vmatpush.bf16.msra.mxu3 %v4554_v36 }
 0xca3   : > { %v2522_v45 = vpop.f32.mrf.mxu1 }
 0xca4   : > { %v2531_v18 = vadd.f32 %v2522_v45, %v6314_v48  ;;  %v4864_v45 = vld [vmem:[%s7306_s3 + $0xf0] sm:$0xf0] }
 0xca6   : > { %v2535_v61 = vadd.f32 %v2531_v18, %v5680_v57  ;;  %2750 = vmatpush.bf16.msra.mxu3 %v4546_v33  ;;  %v4863_v18 = vld [vmem:[%s7306_s3 + $0xcc] sm:$0xf] }
 0xca8   : > { %v6358_v55 = vadd.f32 %v4965_v37, %v2535_v61 }
 0xcaa   : > { %2550 = vadd.xlane.f32.xlu2 %v6358_v55 }
 0xcab   : > { %v2525_v21 = vpop.f32.mrf.mxu1 }
 0xcac   : > { %v2532_v54 = vadd.f32 %v2525_v21, %v6320_v46  ;;  %v4538_v21 = vor.u32 %v4864_v45, %v4537_v44 }
 0xcae   : > { %v2536_v49 = vadd.f32 %v2532_v54, %v5684_v3  ;;  %v4539_v54 = vld [vmem:[%s7306_s3 + $0xf4] sm:$0xf0]  ;;  %2751 = vmatpush.bf16.msra.mxu3 %v4538_v21 }
 0xcb0   : > { %v6365_v52 = vadd.f32 %v4965_v37, %v2536_v49  ;;  %v4542_v49 = vor.u32 %v4863_v18, %v4539_v54 }
 0xcb2   : > { %2552 = vadd.xlane.f32.xlu1 %v6365_v52  ;;  %2770 = vmatpush.bf16.msrb.mxu0 %v4542_v49 }
 0xcb3   : > { %v2527_v48 = vpop.f32.mrf.mxu1 }
 0xcb4   : > { %v2533_v10 = vadd.f32 %v2527_v48, %v2221_v4  ;;  %v4529_v4 = vld [vmem:[%s7306_s3 + $0x70] sm:$0xf]  ;;  %v4862_v48 = vld [vmem:[%s7306_s3 + $0x98] sm:$0xf0] }
 0xcb6   : > { %v2537_v57 = vadd.f32 %v2533_v10, %v5688_v5  ;;  %v4861_v10 = vld [vmem:[%s7306_s3 + $0x74] sm:$0xf] }
 0xcb8   : > { %v6369_v30 = vadd.f32 %v4965_v37, %v2537_v57  ;;  %v4530_v57 = vor.u32 %v4862_v48, %v4529_v4 }
 0xcba   : > { %2554 = vadd.xlane.f32.xlu0 %v6369_v30  ;;  %2752 = vmatpush.bf16.msra.mxu3 %v4530_v57 }
 0xd15   : > { %v2549_v56 = vpop.xlane.xlu0 %2548 }
 0xd16   : > { %v2556_v46 = vmul.f32 %v2549_v56, %v5269_v12  ;;  %v4531_v56 = vld [vmem:[%s7306_s3 + $0x9c] sm:$0xf0] }
 0xd18   : > { %v6374_v3 = vsub.f32 %v6353_v60, %v2556_v46  ;;  %v4534_v46 = vor.u32 %v4861_v10, %v4531_v56 }
 0xd1a   : > { %v2564_v62 = vmul.f32 %v6374_v3, %v6374_v3  ;;  %2771 = vmatpush.bf16.msrb.mxu0 %v4534_v46 }
 0xd1c   : > { %2568 = vadd.xlane.f32.xlu0 %v2564_v62 }
 0xd1d   : > { %v2551_v23 = vpop.xlane.xlu2 %2550 }
 0xd1e   : > { %v2557_v53 = vmul.f32 %v2551_v23, %v5269_v12  ;;  %v4521_v23 = vld [vmem:[%s7306_s3 + $0x18] sm:$0xf] }
 0xd20   : > { %v6380_v58 = vsub.f32 %v6358_v55, %v2557_v53  ;;  %v4860_v53 = vld [vmem:[%s7306_s3 + $0x40] sm:$0xf0] }
 0xd22   : > { %v2565_v5 = vmul.f32 %v6380_v58, %v6380_v58 }
 0xd24   : > { %2570 = vadd.xlane.f32.xlu0 %v2565_v5  ;;  %v4859_v5 = vld [vmem:[%s7306_s3 + $0x1c] sm:$0xf] }
 0xd25   : > { %v2553_v41 = vpop.xlane.xlu1 %2552 }
 0xd26   : > { %v2558_v47 = vmul.f32 %v2553_v41, %v5269_v12 }
 0xd28   : > { %v6386_v59 = vsub.f32 %v6365_v52, %v2558_v47  ;;  %v4522_v47 = vor.u32 %v4860_v53, %v4521_v23  ;;  %v2660_v53 = vld [vmem:[%s7308_s5 + $0xf] sm:$0x3] }
 0xd2a   : > { %v2566_v13 = vmul.f32 %v6386_v59, %v6386_v59  ;;  %2753 = vmatpush.bf16.msra.mxu3 %v4522_v47 }
 0xd2c   : > { %2572 = vadd.xlane.f32.xlu0 %v2566_v13  ;;  %v4523_v13 = vld [vmem:[%s7306_s3 + $0x44] sm:$0xf0] }
 0xd2d   : > { %v2555_v11 = vpop.xlane.xlu0 %2554 }
 0xd2e   : > { %v2559_v29 = vmul.f32 %v2555_v11, %v5269_v12  ;;  %v4526_v11 = vor.u32 %v4859_v5, %v4523_v13  ;;  %v2663_v5 = vperm.slane %v2660_v53, 1 }
 0xd30   : > { %v6392_v2 = vsub.f32 %v6369_v30, %v2559_v29  ;;  %2772 = vmatpush.bf16.msrb.mxu0 %v4526_v11 }
 0xd32   : > { %v2567_v28 = vmul.f32 %v6392_v2, %v6392_v2 }
 0xd34   : > { %2574 = vadd.xlane.f32.xlu0 %v2567_v28 }
 0xd8f   : > { %v2569_v37 = vpop.xlane.xlu0 %2568 }
 0xd90   : > { %v2576_v61 = vmul.f32 %v2569_v37, %v5269_v12 }
 0xd92   : > { %v2580_v51 = vadd.f32 1e-12, %v2576_v61 }
 0xd94   : > { %5092 = vrsqrt.f32 %v2580_v51  ;;  %vm2590_vm12 = vweird.f32 %v2580_v51 }
 0xd97   : > { %v2571_v62 = vpop.xlane.xlu0 %2570 }
 0xd98   : > { %v2577_v41 = vmul.f32 %v2571_v62, %v5269_v12 }
 0xd9a   : > { %v5093_v29 = vpop.eup %5092  ;;  %v2581_v28 = vadd.f32 1e-12, %v2577_v41 }
 0xd9b   : > { %v2585_v6 = vmul.f32 %v5093_v29, %v2580_v51  ;;  %vm2591_vm11 = vweird.f32 %v5093_v29 }
 0xd9c   : > { %5094 = vrsqrt.f32 %v2581_v28  ;;  %vm2592_vm13 = vmor %vm2590_vm12, %vm2591_vm11  ;;  %vm2600_vm15 = vweird.f32 %v2581_v28  ;;  %vm2868_vm11 = vcmask 1042432  }
 0xd9d   : > { %v2586_v14 = vmul.f32 %v5093_v29, %v2585_v6 }
 0xd9f   : > { %v2587_v8 = vmul.f32 0.5, %v2586_v14  ;;  %v2573_v63 = vpop.xlane.xlu0 %2572 }
 0xda0   : > { %v2578_v16 = vmul.f32 %v2573_v63, %v5269_v12 }
 0xda1   : > { %v2588_v19 = vsub.f32 1.5, %v2587_v8 }
 0xda2   : > { %v5095_v20 = vpop.eup %5094  ;;  %v2582_v9 = vadd.f32 1e-12, %v2578_v16 }
 0xda3   : > { %v2589_v1 = vmul.f32 %v5093_v29, %v2588_v19  ;;  %v2595_v22 = vmul.f32 %v5095_v20, %v2581_v28  ;;  %vm2601_vm14 = vweird.f32 %v5095_v20 }
 0xda4   : > { %5096 = vrsqrt.f32 %v2582_v9  ;;  %vm2602_vm0 = vmor %vm2600_vm15, %vm2601_vm14  ;;  %vm2610_vm2 = vweird.f32 %v2582_v9 }
 0xda5   : > { %v2596_v26 = vmul.f32 %v5095_v20, %v2595_v22  ;;  %v2593_v25 = vsel %vm2592_vm13, %v5093_v29, %v2589_v1  ;;  %v3082_v22 = vld [vmem:[%s7308_s5 + $0x15] sm:$0x1] }
 0xda6   : > { %v2624_v34 = vmul.f32 %v2593_v25, %v6374_v3  ;;  %v6512_v25 = vperm.slane %v2660_v53, 0 }
 0xda7   : > { %v2597_v0 = vmul.f32 0.5, %v2596_v26  ;;  %v2575_v7 = vpop.xlane.xlu0 %2574 }
 0xda8   : > { %v2579_v31 = vmul.f32 %v2575_v7, %v5269_v12  ;;  %v2631_v27 = vmul.f32 %v4966_v40, %v2624_v34  ;;  %v6514_v34 = vadd.f32 1e-05, %v3082_v22 }
 0xda9   : > { %v2598_v17 = vsub.f32 1.5, %v2597_v0 }
 0xdaa   : > { %v5097_v32 = vpop.eup %5096  ;;  %v2583_v38 = vadd.f32 1e-12, %v2579_v31  ;;  %v2638_v37 = vadd.f32 %v4967_v24, %v2631_v27 }
 0xdab   : > { %v2599_v43 = vmul.f32 %v5095_v20, %v2598_v17  ;;  %v2605_v36 = vmul.f32 %v5097_v32, %v2582_v9  ;;  %vm2611_vm1 = vweird.f32 %v5097_v32 }
 0xdac   : > { %5098 = vrsqrt.f32 %v2583_v38  ;;  %vm2612_vm3 = vmor %vm2610_vm2, %vm2611_vm1  ;;  %vm2620_vm5 = vweird.f32 %v2583_v38  ;;  %vm2933_vm2 = vcmask 1045504  }
 0xdad   : > { %v2603_v50 = vsel %vm2602_vm0, %v5095_v20, %v2599_v43  ;;  %v2606_v39 = vmul.f32 %v5097_v32, %v2605_v36  ;;  %vm2904_vm0 = vcmask 1046528  }
 0xdae   : > { %v2625_v42 = vmul.f32 %v2603_v50, %v6380_v58 }
 0xdaf   : > { %v2607_v3 = vmul.f32 0.5, %v2606_v39 }
 0xdb0   : > { %v2632_v33 = vmul.f32 %v4966_v40, %v2625_v42 }
 0xdb1   : > { %v2608_v35 = vsub.f32 1.5, %v2607_v3 }
 0xdb2   : > { %v5099_v15 = vpop.eup %5098  ;;  %v2639_v44 = vadd.f32 %v4967_v24, %v2632_v33 }
 0xdb3   : > { %v2609_v45 = vmul.f32 %v5097_v32, %v2608_v35  ;;  %v2615_v18 = vmul.f32 %v5099_v15, %v2583_v38  ;;  %vm2621_vm4 = vweird.f32 %v5099_v15 }
 0xdb4   : > { %v2642_v61 = vpack.c.bf16 %v2639_v44, %v2638_v37  ;;  %vm2622_vm6 = vmor %vm2620_vm5, %vm2621_vm4  ;;  %vm2962_vm4 = vcmask 1044480   ;;  %vm2991_vm5 = vcmask 1043456  }
 0xdb5   : > { %v2616_v21 = vmul.f32 %v5099_v15, %v2615_v18  ;;  %v2613_v58 = vsel %vm2612_vm3, %v5097_v32, %v2609_v45 }
 0xdb6   : > { %2754 = vmatmul.bf16.vlgmr.msra.gmra.mxu3 %v2642_v61  ;;  %2773 = vmatmul.bf16.vlgmr.msrb.gmra.mxu0 %v2642_v61  ;;  %v2626_v51 = vmul.f32 %v2613_v58, %v6386_v59 }
 0xdb7   : > { %v2617_v54 = vmul.f32 0.5, %v2616_v21 }
 0xdb8   : > { %v2633_v57 = vmul.f32 %v4966_v40, %v2626_v51 }
 0xdb9   : > { %v2618_v49 = vsub.f32 1.5, %v2617_v54 }
 0xdba   : > { %v2640_v46 = vadd.f32 %v4967_v24, %v2633_v57 }
 0xdbb   : > { %v2619_v4 = vmul.f32 %v5099_v15, %v2618_v49 }
 0xdbd   : > { %v2623_v48 = vsel %vm2622_vm6, %v5099_v15, %v2619_v4  ;;  %v2883_v15 = vld [vmem:[%s7309_s6] sm:$0x7f] }
 0xdbe   : > { %v2627_v10 = vmul.f32 %v2623_v48, %v6392_v2  ;;  %v6524_v21 = vperm.slane %v2883_v15, 0  ;;  %v6526_v58 = vperm.slane %v2883_v15, 1  ;;  %v6528_v54 = vperm.slane %v2883_v15, 2 }
 0xdbf   : > { %v6532_v51 = vperm.slane %v2883_v15, 3  ;;  %v6534_v4 = vperm.slane %v2883_v15, 4 }
 0xdc0   : > { %v2634_v56 = vmul.f32 %v4966_v40, %v2627_v10 }
 0xdc2   : > { %v2641_v62 = vadd.f32 %v4967_v24, %v2634_v56  ;;  %v6537_v56 = vperm.slane %v2883_v15, 5 }
 0xdc4   : > { %v2643_v23 = vpack.c.bf16 %v2641_v62, %v2640_v46 }
 0xdc6   : > { %2759 = vmatmul.bf16.gmra.mxu3 %v2643_v23  ;;  %2778 = vmatmul.bf16.gmra.mxu0 %v2643_v23 }
 0xe33   : > { %v2774_v41 = vpop.f32.mrf.mxu0 }
 0xe34   : > { %v2775_v59 = vadd.f32 %v2774_v41, %v2663_v5 }
 0xe36   : > { %v4583_v47 = vmul.f32 -1.442695, %v2775_v59 }
 0xe38   : > { %5100 = vpow2.f32 %v4583_v47  ;;  %v6544_v47 = vperm.slane %v2883_v15, 6 }
 0xe39   : > { %v2755_v13 = vpop.f32.mrf.mxu3 }
 0xe3a   : > { %v2756_v39 = vadd.f32 %v2755_v13, %v6512_v25 }
 0xe3b   : > { %v2776_v11 = vpop.f32.mrf.mxu0 }
 0xe3c   : > { %v2777_v29 = vadd.f32 %v2776_v11, %v2663_v5 }
 0xe3e   : > { %v5101_v2 = vpop.eup %5100  ;;  %v4584_v28 = vmul.f32 -1.442695, %v2777_v29 }
 0xe3f   : > { %v2796_v6 = vadd.f32 1.0, %v5101_v2 }
 0xe40   : > { %5102 = vpow2.f32 %v4584_v28 }
 0xe41   : > { %5104 = vrcp.f32 %v2796_v6  ;;  %v2757_v8 = vpop.f32.mrf.mxu3  ;;  %v2809_v0 = vand.u32 2147483647, %v2796_v6  ;;  %v2811_v7 = vand.u32 2147483648, %v2796_v6  ;;  %vm2805_vm8 = vweird.f32 %v2796_v6 }
 0xe42   : > { %v2758_v46 = vadd.f32 %v2757_v8, %v6512_v25 }
 0xe43   : > { %v2779_v14 = vpop.f32.mrf.mxu0  ;;  %v2812_v42 = vor.u32 1.1754944e-38, %v2811_v7  ;;  %vm2810_vm10 = vcmp.eq.f32.partialorder %v2809_v0, 8.507059e+37 }
 0xe44   : > { %v2780_v63 = vadd.f32 %v2779_v14, %v2663_v5 }
 0xe46   : > { %v5103_v16 = vpop.eup %5102  ;;  %v4585_v19 = vmul.f32 -1.442695, %v2780_v63 }
 0xe47   : > { %v5105_v20 = vpop.eup %5104  ;;  %v2797_v9 = vadd.f32 1.0, %v5103_v16 }
 0xe48   : > { %v2801_v1 = vmul.f32 %v5105_v20, %v2796_v6  ;;  %5106 = vpow2.f32 %v4585_v19  ;;  %vm2806_vm7 = vweird.f32 %v5105_v20 }
 0xe49   : > { %5108 = vrcp.f32 %v2797_v9  ;;  %v2760_v43 = vpop.f32.mrf.mxu3  ;;  %vm2807_vm9 = vmor %vm2805_vm8, %vm2806_vm7  ;;  %v2826_v44 = vand.u32 2147483648, %v2797_v9  ;;  %v2824_v61 = vand.u32 2147483647, %v2797_v9  ;;  %vm2820_vm13 = vweird.f32 %v2797_v9 }
 0xe4a   : > { %v2802_v26 = vsub.f32 1.0, %v2801_v1  ;;  %5110 = vrsqrt.f32 %v6514_v34  ;;  %v6547_v11 = vadd.f32 %v2760_v43, %v6512_v25 }
 0xe4b   : > { %v2781_v31 = vpop.f32.mrf.mxu0  ;;  %v2827_v62 = vor.u32 1.1754944e-38, %v2826_v44  ;;  %vm2825_vm15 = vcmp.eq.f32.partialorder %v2824_v61, 8.507059e+37 }
 0xe4c   : > { %v2803_v17 = vmul.f32 %v5105_v20, %v2802_v26  ;;  %v2782_v32 = vadd.f32 %v2781_v31, %v2663_v5 }
 0xe4e   : > { %v5107_v38 = vpop.eup %5106  ;;  %v2804_v40 = vadd.f32 %v5105_v20, %v2803_v17  ;;  %v4586_v36 = vmul.f32 -1.442695, %v2782_v32 }
 0xe4f   : > { %v5109_v50 = vpop.eup %5108  ;;  %v6517_v27 = vadd.f32 1.0, %v5107_v38 }
 0xe50   : > { %v2808_v24 = vsel %vm2807_vm9, %v5105_v20, %v2804_v40  ;;  %v2816_v3 = vmul.f32 %v5109_v50, %v2797_v9  ;;  %5112 = vpow2.f32 %v4586_v36  ;;  %vm2821_vm12 = vweird.f32 %v5109_v50  ;;  %v6530_v49 = vpop.eup %5110 }
 0xe51   : > { %v2813_v33 = vsel %vm2810_vm10, %v2812_v42, %v2808_v24  ;;  %5114 = vrcp.f32 %v6517_v27  ;;  %vm2822_vm14 = vmor %vm2820_vm13, %vm2821_vm12  ;;  %v2839_v5 = vand.u32 2147483647, %v6517_v27  ;;  %v2841_v41 = vand.u32 2147483648, %v6517_v27  ;;  %v2762_v59 = vpop.f32.mrf.mxu3 }
 0xe52   : > { %v2860_v35 = vmul.f32 %v2813_v33, %v2756_v39  ;;  %v2817_v37 = vsub.f32 1.0, %v2816_v3  ;;  %vm2835_vm1 = vweird.f32 %v6517_v27  ;;  %v3085_v6 = vmul.f32 %v6530_v49, %v6514_v34 }
 0xe53   : > { %v6564_v16 = vadd.f32 %v2762_v59, %v6512_v25  ;;  %vm6573_vm3 = vcmp.eq.f32.partialorder %v2839_v5, 8.507059e+37  ;;  %v2842_v22 = vor.u32 1.1754944e-38, %v2841_v41  ;;  %vm3048_vm9 = vcmask 1041408  }
 0xe54   : > { %v2869_v45 = vrot.slane %v2860_v35, 5  ;;  %v2818_v18 = vmul.f32 %v5109_v50, %v2817_v37  ;;  %v3086_v32 = vmul.f32 %v6530_v49, %v3085_v6 }
 0xe56   : > { %v2819_v48 = vadd.f32 %v5109_v50, %v2818_v18  ;;  %v5113_v10 = vpop.eup %5112  ;;  %v2881_v57 = vsel %vm2868_vm11, 0.0, %v2869_v45  ;;  %v4882_v18 = vld [vmem:[%s7306_s3 + $0x2b0] sm:$0xf0]  ;;  %v6616_v61 = vmul.f32 0.5, %v3086_v32 }
 0xe57   : > { %v6540_v23 = vpop.eup %5114  ;;  %v2894_v29 = vmul.f32 %v6526_v58, %v2881_v57  ;;  %v2923_v2 = vmul.f32 %v6528_v54, %v2881_v57  ;;  %v6557_v14 = vmul.f32 %v6532_v51, %v2881_v57  ;;  %v6561_v63 = vadd.f32 1.0, %v5113_v10 }
 0xe58   : > { %v2823_v53 = vsel %vm2822_vm14, %v5109_v50, %v2819_v48  ;;  %v2831_v8 = vmul.f32 %v6540_v23, %v6517_v27  ;;  %v6567_v19 = vmul.f32 %v6534_v4, %v2881_v57  ;;  %v6570_v20 = vmul.f32 %v6537_v56, %v2881_v57  ;;  %v4881_v27 = vld [vmem:[%s7306_s3 + $0x258] sm:$0xf0] }
 0xe59   : > { %v2828_v13 = vsel %vm2825_vm15, %v2827_v62, %v2823_v53  ;;  %v2885_v26 = vmul.f32 %v6524_v21, %v2881_v57  ;;  %v6579_v0 = vmul.f32 %v6544_v47, %v2881_v57  ;;  %5116 = vrcp.f32 %v6561_v63  ;;  %v4617_v53 = vld [vmem:[%s7306_s3 + $0x230] sm:$0xf] }
 0xe5a   : > { %v6551_v28 = vmul.f32 %v2828_v13, %v2758_v46  ;;  %v2832_v25 = vsub.f32 1.0, %v2831_v8  ;;  %v2905_v7 = vrot.slane %v2894_v29, 1  ;;  %v2934_v31 = vrot.slane %v2923_v2, 2  ;;  %v4613_v29 = vld [vmem:[%s7306_s3 + $0x1d8] sm:$0xf] }
 0xe5b   : > { %v2963_v38 = vrot.slane %v6557_v14, 3  ;;  %v2992_v50 = vrot.slane %v6567_v19, 4  ;;  %v3020_v39 = vrot.slane %v6570_v20, 5  ;;  %vm2836_vm6 = vweird.f32 %v6540_v23  ;;  %v4880_v2 = vld [vmem:[%s7306_s3 + $0x200] sm:$0xf0] }
 0xe5c   : > { %v2870_v9 = vrot.slane %v6551_v28, 5  ;;  %v2833_v42 = vmul.f32 %v6540_v23, %v2832_v25  ;;  %v3049_v24 = vrot.slane %v6579_v0, 6  ;;  %v2854_v35 = vand.u32 2147483647, %v6561_v63  ;;  %vm2837_vm8 = vmor %vm2835_vm1, %vm2836_vm6  ;;  %v6664_v19 = vld [vmem:[%s7306_s3 + $0x180] sm:$0xf] }
 0xe5d   : > { %vm2850_vm7 = vweird.f32 %v6561_v63  ;;  %v2856_v44 = vand.u32 2147483648, %v6561_v63  ;;  %vm3090_vm14 = vweird.f32 %v6514_v34  ;;  %vm3091_vm15 = vweird.f32 %v6530_v49  ;;  %v4593_v34 = vld [vmem:[%s7306_s3 + $0x20] sm:$0xf] }
 0xe5e   : > { %v2871_v17 = vsel %vm2868_vm11, %v2869_v45, %v2870_v9  ;;  %v2834_v37 = vadd.f32 %v6540_v23, %v2833_v42  ;;  %v4621_v45 = vld [vmem:[%s7306_s3 + $0x288] sm:$0xf]  ;;  %vm6654_vm10 = vcmp.eq.f32.partialorder %v2854_v35, 8.507059e+37  ;;  %v4618_v35 = vor.u32 %v4881_v27, %v4617_v53 }
 0xe5f   : > { %v6588_v40 = vmul.f32 %v6526_v58, %v2871_v17  ;;  %v6591_v43 = vmul.f32 %v6528_v54, %v2871_v17  ;;  %v6594_v36 = vmul.f32 %v6532_v51, %v2871_v17  ;;  %v6605_v15 = vmul.f32 %v6534_v4, %v2871_v17  ;;  %v6618_v48 = vpop.eup %5116 }
 0xe60   : > { %v6622_v57 = vmul.f32 %v6537_v56, %v2871_v17  ;;  %v6625_v46 = vmul.f32 %v6544_v47, %v2871_v17  ;;  %v6638_v5 = vmul.f32 %v6524_v21, %v2871_v17  ;;  %v2838_v41 = vsel %vm2837_vm8, %v6540_v23, %v2834_v37  ;;  %v6681_v17 = vld [vmem:[%s7306_s3 + $0x150] sm:$0xf0]  ;;  %v6696_v37 = vld [vmem:[%s7306_s3 + $0xf8] sm:$0xf0] }
 0xe61   : > { %v2906_v3 = vrot.slane %v6588_v40, 1  ;;  %v2935_v33 = vrot.slane %v6591_v43, 2  ;;  %v2964_v10 = vrot.slane %v6594_v36, 3  ;;  %v2846_v59 = vmul.f32 %v6618_v48, %v6561_v63  ;;  %v6736_v63 = vld [vmem:[%s7306_s3 + $0xa0] sm:$0xf0] }
 0xe62   : > { %v2843_v23 = vsel %vm6573_vm3, %v2842_v22, %v2838_v41  ;;  %v4622_v8 = vor.u32 %v4882_v18, %v4621_v45  ;;  %v2993_v1 = vrot.slane %v6605_v15, 4  ;;  %v3021_v32 = vrot.slane %v6622_v57, 5  ;;  %v6691_v15 = vld [vmem:[%s7306_s3 + $0xd0] sm:$0xf] }
 0xe63   : > { %v2907_v62 = vsel %vm2904_vm0, %v2905_v7, %v2906_v3  ;;  %v2936_v14 = vsel %vm2933_vm2, %v2934_v31, %v2935_v33  ;;  %v2862_v22 = vmul.f32 %v2843_v23, %v6547_v11  ;;  %v2847_v25 = vsub.f32 1.0, %v2846_v59  ;;  %v6676_v31 = vld [vmem:[%s7306_s3 + $0x128] sm:$0xf] }
 0xe64   : > { %v2918_v13 = vadd.f32 %v2907_v62, %v2885_v26  ;;  %v6669_v26 = vld [vmem:[%s7306_s3 + $0x1a8] sm:$0xf0]  ;;  %v3050_v42 = vrot.slane %v6625_v46, 6  ;;  %v2965_v11 = vsel %vm2962_vm4, %v2963_v38, %v2964_v10  ;;  %3267 = vmatpush.bf16.msra.mxu1 %v4622_v8  ;;  %vm2851_vm12 = vweird.f32 %v6618_v48 }
 0xe65   : > { %v2872_v45 = vrot.slane %v2862_v22, 5  ;;  %v2848_v18 = vmul.f32 %v6618_v48, %v2847_v25  ;;  %v2857_v41 = vor.u32 1.1754944e-38, %v2856_v44  ;;  %v4614_v38 = vor.u32 %v4880_v2, %v4613_v29  ;;  %vm2852_vm13 = vmor %vm2850_vm7, %vm2851_vm12 }
 0xe66   : > { %v2947_v7 = vadd.f32 %v2936_v14, %v2918_v13  ;;  %v4610_v53 = vor.u32 %v6669_v26, %v6664_v19  ;;  %v4606_v59 = vor.u32 %v6681_v17, %v6676_v31  ;;  %v4602_v23 = vor.u32 %v6696_v37, %v6691_v15  ;;  %v6731_v26 = vld [vmem:[%s7306_s3 + $0x78] sm:$0xf]  ;;  %v4969_v31 = vld [vmem:[%s7308_s5 + $0x14] ss:$0 sm:$0xff] }
 0xe67   : > { %v2873_v13 = vsel %vm2868_vm11, %v2870_v9, %v2872_v45  ;;  %v2849_v27 = vadd.f32 %v6618_v48, %v2848_v18  ;;  %v2994_v14 = vsel %vm2991_vm5, %v2992_v50, %v2993_v1  ;;  %v3022_v18 = vsel %vm2868_vm11, %v3020_v39, %v3021_v32 }
 0xe68   : > { %v2976_v62 = vadd.f32 %v2965_v11, %v2947_v7  ;;  %v2896_v44 = vmul.f32 %v6526_v58, %v2873_v13  ;;  %v2925_v29 = vmul.f32 %v6528_v54, %v2873_v13  ;;  %v6714_v2 = vmul.f32 %v6532_v51, %v2873_v13  ;;  %3268 = vmatpush.bf16.msra.mxu1 %v4618_v35 }
 0xe69   : > { %v6719_v9 = vmul.f32 %v6534_v4, %v2873_v13  ;;  %v6722_v8 = vmul.f32 %v6537_v56, %v2873_v13  ;;  %v6725_v50 = vmul.f32 %v6544_v47, %v2873_v13  ;;  %v2853_v19 = vsel %vm2852_vm13, %v6618_v48, %v2849_v27 }
 0xe6a   : > { %v3005_v28 = vadd.f32 %v2994_v14, %v2976_v62  ;;  %v2908_v22 = vrot.slane %v2896_v44, 1  ;;  %v2937_v25 = vrot.slane %v2925_v29, 2  ;;  %v2966_v7 = vrot.slane %v6714_v2, 3 }
 0xe6b   : > { %v2858_v11 = vsel %vm6654_vm10, %v2857_v41, %v2853_v19  ;;  %v2995_v35 = vrot.slane %v6719_v9, 4  ;;  %v3088_v62 = vsub.f32 1.5, %v6616_v61  ;;  %v3051_v20 = vsel %vm3048_vm9, %v3049_v24, %v3050_v42 }
 0xe6c   : > { %v2863_v48 = vmul.f32 %v2858_v11, %v6564_v16  ;;  %v2909_v6 = vsel %vm2904_vm0, %v2906_v3, %v2908_v22  ;;  %3269 = vmatpush.bf16.msra.mxu1 %v4614_v38  ;;  %v4598_v16 = vor.u32 %v6736_v63, %v6731_v26  ;;  %v3033_v41 = vadd.f32 %v3022_v18, %v3005_v28 }
 0xe6d   : > { %v2887_v39 = vmul.f32 %v6524_v21, %v2873_v13  ;;  %v3023_v61 = vrot.slane %v6722_v8, 5  ;;  %v2919_v40 = vadd.f32 %v2909_v6, %v6638_v5  ;;  %v3052_v3 = vrot.slane %v6725_v50, 6 }
 0xe6e   : > { %v2874_v27 = vrot.slane %v2863_v48, 5  ;;  %v2938_v38 = vsel %vm2933_vm2, %v2935_v33, %v2937_v25  ;;  %v2967_v14 = vsel %vm2962_vm4, %v2964_v10, %v2966_v7  ;;  %v2996_v0 = vsel %vm2991_vm5, %v2993_v1, %v2995_v35 }
 0xe6f   : > { %v3062_v44 = vadd.f32 %v3051_v20, %v3033_v41  ;;  %v3089_v5 = vmul.f32 %v6530_v49, %v3088_v62  ;;  %v2948_v36 = vadd.f32 %v2938_v38, %v2919_v40  ;;  %v3053_v57 = vsel %vm3048_vm9, %v3050_v42, %v3052_v3 }
 0xe70   : > { %v2875_v24 = vsel %vm2868_vm11, %v2872_v45, %v2874_v27  ;;  %v2882_v13 = vsel %vm2868_vm11, %v2874_v27, 0.0  ;;  %3270 = vmatpush.bf16.msra.mxu1 %v4610_v53 }
 0xe71   : > { %v2897_v29 = vmul.f32 %v6526_v58, %v2875_v24  ;;  %v2898_v43 = vmul.f32 %v6526_v58, %v2882_v13  ;;  %v2926_v33 = vmul.f32 %v6528_v54, %v2875_v24  ;;  %v2927_v10 = vmul.f32 %v6528_v54, %v2882_v13 }
 0xe72   : > { %v2955_v2 = vmul.f32 %v6532_v51, %v2875_v24  ;;  %v2956_v1 = vmul.f32 %v6532_v51, %v2882_v13  ;;  %v2984_v45 = vmul.f32 %v6534_v4, %v2875_v24  ;;  %v2985_v48 = vmul.f32 %v6534_v4, %v2882_v13  ;;  %v4968_v51 = vld [vmem:[%s7308_s5 + $0x11] ss:$0 sm:$0xff] }
 0xe73   : > { %v2910_v28 = vrot.slane %v2897_v29, 1  ;;  %v2912_v19 = vrot.slane %v2898_v43, 1  ;;  %v2939_v11 = vrot.slane %v2926_v33, 2  ;;  %v2888_v18 = vmul.f32 %v6524_v21, %v2875_v24 }
 0xe74   : > { %v2941_v58 = vrot.slane %v2927_v10, 2  ;;  %v2968_v62 = vrot.slane %v2955_v2, 3  ;;  %v2970_v6 = vrot.slane %v2956_v1, 3  ;;  %v2997_v20 = vrot.slane %v2984_v45, 4  ;;  %3271 = vmatpush.bf16.msra.mxu1 %v4606_v59  ;;  %v4875_v10 = vld [vmem:[%s7306_s3 + $0x48] sm:$0xf0] }
 0xe75   : > { %v2911_v53 = vsel %vm2904_vm0, %v2908_v22, %v2910_v28  ;;  %v2913_v54 = vsel %vm2904_vm0, %v2910_v28, %v2912_v19  ;;  %v2940_v41 = vsel %vm2933_vm2, %v2937_v25, %v2939_v11  ;;  %v2999_v40 = vrot.slane %v2985_v48, 4  ;;  %vm6807_vm0 = vmor %vm3090_vm14, %vm3091_vm15  ;;  %v4970_v19 = vld [vmem:[%s7308_s5 + $0x12] ss:$0 sm:$0xff] }
 0xe76   : > { %v2920_v4 = vadd.f32 %v2911_v53, %v2887_v39  ;;  %v2921_v21 = vadd.f32 %v2913_v54, %v2888_v18  ;;  %v2942_v27 = vsel %vm2933_vm2, %v2939_v11, %v2941_v58  ;;  %v2969_v22 = vsel %vm2962_vm4, %v2966_v7, %v2968_v62 }
 0xe77   : > { %v2971_v38 = vsel %vm2962_vm4, %v2968_v62, %v2970_v6  ;;  %v3013_v25 = vmul.f32 %v6537_v56, %v2875_v24  ;;  %v3014_v29 = vmul.f32 %v6537_v56, %v2882_v13  ;;  %v3041_v39 = vmul.f32 %v6544_v47, %v2875_v24 }
 0xe78   : > { %v2949_v59 = vadd.f32 %v2940_v41, %v2920_v4  ;;  %v2950_v7 = vadd.f32 %v2942_v27, %v2921_v21  ;;  %v3042_v43 = vmul.f32 %v6544_v47, %v2882_v13  ;;  %3272 = vmatpush.bf16.msra.mxu1 %v4602_v23  ;;  %v2977_v2 = vadd.f32 %v2967_v14, %v2948_v36 }
 0xe79   : > { %v3025_v33 = vrot.slane %v3013_v25, 5  ;;  %v3027_v56 = vrot.slane %v3014_v29, 5  ;;  %v3070_v1 = vadd.f32 %v4968_v51, %v3062_v44  ;;  %v3000_v24 = vsel %vm2991_vm5, %v2997_v20, %v2999_v40 }
 0xe7a   : > { %v2979_v45 = vadd.f32 %v2971_v38, %v2950_v7  ;;  %v3054_v47 = vrot.slane %v3041_v39, 6  ;;  %v3093_v13 = vsel %vm6807_vm0, %v6530_v49, %v3089_v5  ;;  %v3056_v15 = vrot.slane %v3042_v43, 6  ;;  %v4971_v5 = vld [vmem:[%s7308_s5 + $0x13] ss:$0 sm:$0xff] }
 0xe7b   : > { %v3006_v37 = vadd.f32 %v2996_v0, %v2977_v2  ;;  %v3078_v23 = vsub.f32 %v3070_v1, %v4969_v31  ;;  %v3095_v28 = vperm.slane %v3093_v13, 0  ;;  %v4594_v48 = vor.u32 %v4875_v10, %v4593_v34 }
 0xe7c   : > { %v3008_v11 = vadd.f32 %v3000_v24, %v2979_v45  ;;  %v3024_v14 = vsel %vm2868_vm11, %v3021_v32, %v3023_v61  ;;  %v2978_v44 = vadd.f32 %v2969_v22, %v2949_v59  ;;  %v3028_v36 = vsel %vm2868_vm11, %v3025_v33, %v3027_v56  ;;  %3273 = vmatpush.bf16.msra.mxu1 %v4598_v16 }
 0xe7d   : > { %v3034_v49 = vadd.f32 %v3024_v14, %v3006_v37  ;;  %v3097_v0 = vmul.f32 %v3095_v28, %v3078_v23  ;;  %v2998_v18 = vsel %vm2991_vm5, %v2995_v35, %v2997_v20  ;;  %v3026_v16 = vsel %vm2868_vm11, %v3023_v61, %v3025_v33 }
 0xe7e   : > { %v3007_v32 = vadd.f32 %v2998_v18, %v2978_v44  ;;  %v3036_v58 = vadd.f32 %v3028_v36, %v3008_v11  ;;  %v3057_v62 = vsel %vm3048_vm9, %v3054_v47, %v3056_v15  ;;  %v3055_v46 = vsel %vm3048_vm9, %v3052_v3, %v3054_v47 }
 0xe7f   : > { %v3063_v26 = vadd.f32 %v3053_v57, %v3034_v49  ;;  %v3105_v63 = vmul.f32 %v4970_v19, %v3097_v0 }
 0xe80   : > { %v3035_v6 = vadd.f32 %v3026_v16, %v3007_v32  ;;  %v3065_v9 = vadd.f32 %v3057_v62, %v3036_v58  ;;  %3274 = vmatpush.bf16.msra.mxu1 %v4594_v48 }
 0xe81   : > { %v3071_v35 = vadd.f32 %v4968_v51, %v3063_v26  ;;  %v6853_v53 = vadd.f32 %v4971_v5, %v3105_v63 }
 0xe82   : > { %v3064_v42 = vadd.f32 %v3055_v46, %v3035_v6  ;;  %v3073_v54 = vadd.f32 %v4968_v51, %v3065_v9 }
 0xe83   : > { %v3079_v41 = vsub.f32 %v3071_v35, %v4969_v31  ;;  %v4587_v20 = vmul.f32 -1.442695, %v6853_v53 }
 0xe84   : > { %v3072_v8 = vadd.f32 %v4968_v51, %v3064_v42  ;;  %v3081_v4 = vsub.f32 %v3073_v54, %v4969_v31 }
 0xe85   : > { %v3098_v61 = vmul.f32 %v3095_v28, %v3079_v41  ;;  %5118 = vpow2.f32 %v4587_v20 }
 0xe86   : > { %v3080_v21 = vsub.f32 %v3072_v8, %v4969_v31  ;;  %v3100_v27 = vmul.f32 %v3095_v28, %v3081_v4 }
 0xe87   : > { %v3106_v40 = vmul.f32 %v4970_v19, %v3098_v61 }
 0xe88   : > { %v3099_v22 = vmul.f32 %v3095_v28, %v3080_v21  ;;  %v3108_v38 = vmul.f32 %v4970_v19, %v3100_v27 }
 0xe89   : > { %v3114_v25 = vadd.f32 %v4971_v5, %v3106_v40 }
 0xe8a   : > { %v3107_v29 = vmul.f32 %v4970_v19, %v3099_v22  ;;  %v6859_v17 = vadd.f32 %v4971_v5, %v3108_v38 }
 0xe8b   : > { %v5119_v50 = vpop.eup %5118  ;;  %v4588_v3 = vmul.f32 -1.442695, %v3114_v25 }
 0xe8c   : > { %v3129_v59 = vadd.f32 1.0, %v5119_v50  ;;  %v6861_v7 = vadd.f32 %v4971_v5, %v3107_v29  ;;  %v4590_v39 = vmul.f32 -1.442695, %v6859_v17  ;;  %v4972_v50 = vld [vmem:[%s7308_s5 + $0x16] ss:$0 sm:$0xff] }
 0xe8d   : > { %5120 = vpow2.f32 %v4588_v3 }
 0xe8e   : > { %5122 = vrcp.f32 %v3129_v59  ;;  %v4589_v51 = vmul.f32 -1.442695, %v6861_v7  ;;  %v3142_v37 = vand.u32 2147483647, %v3129_v59  ;;  %v3144_v23 = vand.u32 2147483648, %v3129_v59 }
 0xe8f   : > { %5124 = vpow2.f32 %v4590_v39  ;;  %vm3138_vm1 = vweird.f32 %v3129_v59 }
 0xe90   : > { %5126 = vpow2.f32 %v4589_v51  ;;  %vm3143_vm4 = vcmp.eq.f32.partialorder %v3142_v37, 8.507059e+37  ;;  %v3145_v5 = vor.u32 1.1754944e-38, %v3144_v23 }
 0xe93   : > { %v5121_v31 = vpop.eup %5120 }
 0xe94   : > { %v5123_v43 = vpop.eup %5122  ;;  %v3130_v33 = vadd.f32 1.0, %v5121_v31 }
 0xe95   : > { %v5125_v56 = vpop.eup %5124  ;;  %v3134_v34 = vmul.f32 %v5123_v43, %v3129_v59  ;;  %vm3139_vm11 = vweird.f32 %v5123_v43 }
 0xe96   : > { %5128 = vrcp.f32 %v3130_v33  ;;  %v5127_v10 = vpop.eup %5126  ;;  %v3132_v1 = vadd.f32 1.0, %v5125_v56  ;;  %vm3140_vm2 = vmor %vm3138_vm1, %vm3139_vm11  ;;  %v3157_v48 = vand.u32 2147483647, %v3130_v33  ;;  %v3159_v14 = vand.u32 2147483648, %v3130_v33 }
 0xe97   : > { %v3135_v2 = vsub.f32 1.0, %v3134_v34  ;;  %v3131_v45 = vadd.f32 1.0, %v5127_v10  ;;  %vm3153_vm5 = vweird.f32 %v3130_v33 }
 0xe98   : > { %5130 = vrcp.f32 %v3132_v1  ;;  %v3160_v26 = vor.u32 1.1754944e-38, %v3159_v14  ;;  %vm3158_vm7 = vcmp.eq.f32.partialorder %v3157_v48, 8.507059e+37  ;;  %vm3183_vm10 = vweird.f32 %v3132_v1  ;;  %v4681_v48 = vld [vmem:[%s7306_s3 + $0x28c] sm:$0xf]  ;;  %v4898_v14 = vld [vmem:[%s7306_s3 + $0x2b4] sm:$0xf0] }
 0xe99   : > { %v3136_v24 = vmul.f32 %v5123_v43, %v3135_v2  ;;  %5132 = vrcp.f32 %v3131_v45  ;;  %v3174_v41 = vand.u32 2147483648, %v3131_v45  ;;  %v3189_v20 = vand.u32 2147483648, %v3132_v1 }
 0xe9a   : > { %vm3168_vm12 = vweird.f32 %v3131_v45  ;;  %v3172_v8 = vand.u32 2147483647, %v3131_v45  ;;  %v3187_v4 = vand.u32 2147483647, %v3132_v1 }
 0xe9b   : > { %v3137_v13 = vadd.f32 %v5123_v43, %v3136_v24  ;;  %v3190_v27 = vor.u32 1.1754944e-38, %v3189_v20  ;;  %v4659_v20 = vld [vmem:[%s7306_s3 + $0x1b0] sm:$0xf0] }
 0xe9c   : > { %v5129_v47 = vpop.eup %5128  ;;  %vm3173_vm15 = vcmp.eq.f32.partialorder %v3172_v8, 8.507059e+37  ;;  %vm3188_vm0 = vcmp.eq.f32.partialorder %v3187_v4, 8.507059e+37  ;;  %v4649_v4 = vld [vmem:[%s7306_s3 + $0x12c] sm:$0xf] }
 0xe9d   : > { %v3149_v15 = vmul.f32 %v5129_v47, %v3130_v33  ;;  %v3141_v36 = vsel %vm3140_vm2, %v5123_v43, %v3137_v13  ;;  %vm3154_vm3 = vweird.f32 %v5129_v47 }
 0xe9e   : > { %v5131_v28 = vpop.eup %5130  ;;  %v3146_v58 = vsel %vm3143_vm4, %v3145_v5, %v3141_v36  ;;  %vm3155_vm6 = vmor %vm3153_vm5, %vm3154_vm3  ;;  %v4682_v36 = vor.u32 %v4898_v14, %v4681_v48  ;;  %v4673_v5 = vld [vmem:[%s7306_s3 + $0x234] sm:$0xf] }
 0xe9f   : > { %v3150_v19 = vsub.f32 1.0, %v3149_v15  ;;  %v5133_v11 = vpop.eup %5132  ;;  %v3179_v44 = vmul.f32 %v5131_v28, %v3132_v1  ;;  %v3193_v62 = vmul.f32 %v3146_v58, %v6853_v53  ;;  %vm3184_vm8 = vweird.f32 %v5131_v28  ;;  %v4675_v58 = vld [vmem:[%s7306_s3 + $0x260] sm:$0xf0] }
 0xea0   : > { %v3164_v0 = vmul.f32 %v5133_v11, %v3131_v45  ;;  %vm3169_vm9 = vweird.f32 %v5133_v11  ;;  %vm3185_vm13 = vmor %vm3183_vm10, %vm3184_vm8  ;;  %v3175_v53 = vor.u32 1.1754944e-38, %v3174_v41  ;;  %3523 = vmatpush.bf16.msra.mxu2 %v4682_v36 }
 0xea1   : > { %v3151_v49 = vmul.f32 %v5129_v47, %v3150_v19  ;;  %v3180_v32 = vsub.f32 1.0, %v3179_v44  ;;  %vm3170_vm14 = vmor %vm3168_vm12, %vm3169_vm9  ;;  %v4897_v44 = vld [vmem:[%s7306_s3 + $0x290] sm:$0xf] }
 0xea2   : > { %v3165_v57 = vsub.f32 1.0, %v3164_v0 }
 0xea3   : > { %v3152_v18 = vadd.f32 %v5129_v47, %v3151_v49  ;;  %v3181_v35 = vmul.f32 %v5131_v28, %v3180_v32  ;;  %v4683_v49 = vld [vmem:[%s7306_s3 + $0x2b8] sm:$0xf0] }
 0xea4   : > { %v3166_v9 = vmul.f32 %v5133_v11, %v3165_v57  ;;  %v4686_v0 = vor.u32 %v4897_v44, %v4683_v49  ;;  %v4895_v57 = vld [vmem:[%s7306_s3 + $0x238] sm:$0xf] }
 0xea5   : > { %v3156_v63 = vsel %vm3155_vm6, %v5129_v47, %v3152_v18  ;;  %v3182_v54 = vadd.f32 %v5131_v28, %v3181_v35  ;;  %v4896_v18 = vld [vmem:[%s7306_s3 + $0x25c] sm:$0xf0] }
 0xea6   : > { %v3161_v16 = vsel %vm3158_vm7, %v3160_v26, %v3156_v63  ;;  %v3167_v42 = vadd.f32 %v5133_v11, %v3166_v9  ;;  %3542 = vmatpush.bf16.msrb.mxu3 %v4686_v0  ;;  %v4674_v32 = vor.u32 %v4896_v18, %v4673_v5  ;;  %v4678_v26 = vor.u32 %v4895_v57, %v4675_v58  ;;  %v4665_v63 = vld [vmem:[%s7306_s3 + $0x1dc] sm:$0xf]  ;;  %v4667_v9 = vld [vmem:[%s7306_s3 + $0x208] sm:$0xf0] }
 0xea7   : > { %v3194_v6 = vmul.f32 %v3161_v16, %v3114_v25  ;;  %v3186_v21 = vsel %vm3185_vm13, %v5131_v28, %v3182_v54  ;;  %v4894_v16 = vld [vmem:[%s7306_s3 + $0x204] sm:$0xf0] }
 0xea8   : > { %v3171_v61 = vsel %vm3170_vm14, %v5133_v11, %v3167_v42  ;;  %v3191_v22 = vsel %vm3188_vm0, %v3190_v27, %v3186_v21  ;;  %3524 = vmatpush.bf16.msra.mxu2 %v4674_v32  ;;  %v4892_v42 = vld [vmem:[%s7306_s3 + $0x1ac] sm:$0xf0]  ;;  %v4891_v54 = vld [vmem:[%s7306_s3 + $0x188] sm:$0xf]  ;;  %v4651_v27 = vld [vmem:[%s7306_s3 + $0x158] sm:$0xf0] }
 0xea9   : > { %v3197_v46 = vpack.c.bf16 %v3194_v6, %v3193_v62  ;;  %v3176_v40 = vsel %vm3173_vm15, %v3175_v53, %v3171_v61  ;;  %v3196_v25 = vmul.f32 %v3191_v22, %v6859_v17  ;;  %v4893_v62 = vld [vmem:[%s7306_s3 + $0x1e0] sm:$0xf]  ;;  %v4666_v6 = vor.u32 %v4894_v16, %v4665_v63  ;;  %v4890_v61 = vld [vmem:[%s7306_s3 + $0x154] sm:$0xf0]  ;;  %v4889_v21 = vld [vmem:[%s7306_s3 + $0x130] sm:$0xf] }
 0xeaa   : > { %v3195_v38 = vmul.f32 %v3176_v40, %v6861_v7  ;;  %3543 = vmatpush.bf16.msrb.mxu3 %v4678_v26  ;;  %v4670_v35 = vor.u32 %v4893_v62, %v4667_v9  ;;  %v4662_v8 = vor.u32 %v4891_v54, %v4659_v20  ;;  %v4650_v53 = vor.u32 %v4890_v61, %v4649_v4  ;;  %v4641_v22 = vld [vmem:[%s7306_s3 + $0xd4] sm:$0xf] }
 0xeab   : > { %3275 = vmatmul.bf16.vlgmr.msra.gmra.mxu1 %v3197_v46  ;;  %v4657_v46 = vld [vmem:[%s7306_s3 + $0x184] sm:$0xf]  ;;  %v4654_v40 = vor.u32 %v4889_v21, %v4651_v27  ;;  %v4974_v21 = vld [vmem:[%s7308_s5 + $0x18] ss:$0 sm:$0xff] }
 0xeac   : > { %v3198_v29 = vpack.c.bf16 %v3196_v25, %v3195_v38  ;;  %3525 = vmatpush.bf16.msra.mxu2 %v4666_v6  ;;  %v4658_v41 = vor.u32 %v4892_v42, %v4657_v46  ;;  %v4888_v38 = vld [vmem:[%s7306_s3 + $0xfc] sm:$0xf0]  ;;  %v4887_v25 = vld [vmem:[%s7306_s3 + $0xd8] sm:$0xf]  ;;  %v4973_v42 = vld [vmem:[%s7308_s5 + $0x17] ss:$0 sm:$0xff] }
 0xeae   : > { %3544 = vmatpush.bf16.msrb.mxu3 %v4670_v35 }
 0xeb0   : > { %3526 = vmatpush.bf16.msra.mxu2 %v4658_v41 }
 0xeb2   : > { %3545 = vmatpush.bf16.msrb.mxu3 %v4662_v8 }
 0xeb4   : > { %3527 = vmatpush.bf16.msra.mxu2 %v4650_v53 }
 0xeb6   : > { %3546 = vmatpush.bf16.msrb.mxu3 %v4654_v40 }
 0xebb   : > { %3280 = vmatmul.bf16.gmra.mxu1 %v3198_v29  ;;  %v4642_v29 = vor.u32 %v4888_v38, %v4641_v22 }
 0xebd   : > { %3528 = vmatpush.bf16.msra.mxu2 %v4642_v29 }
 0xf28   : > { %v3276_v3 = vpop.f32.mrf.mxu1 }
 0xf29   : > { %v3277_v59 = vadd.f32 %v4972_v50, %v3276_v3 }
 0xf2b   : > { %v6872_v39 = vadd.f32 %v3277_v59, %v6353_v60  ;;  %v4633_v59 = vld [vmem:[%s7306_s3 + $0x7c] sm:$0xf] }
 0xf2d   : > { %3342 = vadd.xlane.f32.xlu2 %v6872_v39 }
 0xf30   : > { %v3278_v51 = vpop.f32.mrf.mxu1 }
 0xf31   : > { %v3279_v31 = vadd.f32 %v4972_v50, %v3278_v51  ;;  %v4886_v51 = vld [vmem:[%s7306_s3 + $0xa4] sm:$0xf0] }
 0xf33   : > { %v6876_v43 = vadd.f32 %v3279_v31, %v6358_v55  ;;  %v4885_v31 = vld [vmem:[%s7306_s3 + $0x80] sm:$0xf] }
 0xf35   : > { %3344 = vadd.xlane.f32.xlu1 %v6876_v43 }
 0xf38   : > { %v3281_v17 = vpop.f32.mrf.mxu1 }
 0xf39   : > { %v3282_v7 = vadd.f32 %v4972_v50, %v3281_v17  ;;  %v4634_v17 = vor.u32 %v4886_v51, %v4633_v59 }
 0xf3b   : > { %v6880_v33 = vadd.f32 %v3282_v7, %v6365_v52  ;;  %v4635_v7 = vld [vmem:[%s7306_s3 + $0xa8] sm:$0xf0]  ;;  %3529 = vmatpush.bf16.msra.mxu2 %v4634_v17 }
 0xf3d   : > { %3346 = vadd.xlane.f32.xlu0 %v6880_v33 }
 0xf40   : > { %v3283_v56 = vpop.f32.mrf.mxu1 }
 0xf41   : > { %v3284_v34 = vadd.f32 %v4972_v50, %v3283_v56  ;;  %v4643_v50 = vld [vmem:[%s7306_s3 + $0x100] sm:$0xf0] }
 0xf42   : > { %v4646_v3 = vor.u32 %v4887_v25, %v4643_v50 }
 0xf43   : > { %v6884_v60 = vadd.f32 %v3284_v34, %v6369_v30  ;;  %v4638_v34 = vor.u32 %v4885_v31, %v4635_v7 }
 0xf44   : > { %3547 = vmatpush.bf16.msrb.mxu3 %v4646_v3 }
 0xf45   : > { %3348 = vadd.xlane.f32.xlu2 %v6884_v60 }
 0xf48   : > { %3548 = vmatpush.bf16.msrb.mxu3 %v4638_v34 }
 0xfa0   : > { %v3343_v10 = vpop.xlane.xlu2 %3342 }
 0xfa1   : > { %v3350_v55 = vmul.f32 %v3343_v10, %v5269_v12 }
 0xfa3   : > { %v6889_v2 = vsub.f32 %v6872_v39, %v3350_v55  ;;  %v4625_v55 = vld [vmem:[%s7306_s3 + $0x24] sm:$0xf] }
 0xfa5   : > { %v3358_v1 = vmul.f32 %v6889_v2, %v6889_v2 }
 0xfa7   : > { %3362 = vadd.xlane.f32.xlu1 %v3358_v1  ;;  %v4884_v1 = vld [vmem:[%s7306_s3 + $0x4c] sm:$0xf0] }
 0xfa8   : > { %v3345_v52 = vpop.xlane.xlu1 %3344 }
 0xfa9   : > { %v3351_v45 = vmul.f32 %v3345_v52, %v5269_v12  ;;  %v4883_v52 = vld [vmem:[%s7306_s3 + $0x28] sm:$0xf] }
 0xfab   : > { %v6895_v24 = vsub.f32 %v6876_v43, %v3351_v45 }
 0xfad   : > { %v3359_v30 = vmul.f32 %v6895_v24, %v6895_v24 }
 0xfaf   : > { %3364 = vadd.xlane.f32.xlu0 %v3359_v30  ;;  %v4626_v30 = vor.u32 %v4884_v1, %v4625_v55 }
 0xfb0   : > { %v3347_v47 = vpop.xlane.xlu0 %3346 }
 0xfb1   : > { %v3352_v13 = vmul.f32 %v3347_v47, %v5269_v12  ;;  %v4627_v47 = vld [vmem:[%s7306_s3 + $0x50] sm:$0xf0]  ;;  %3530 = vmatpush.bf16.msra.mxu2 %v4626_v30 }
 0xfb2   : > { %v4757_v30 = vld [vmem:[%s7307_s4 + $0xf4] sm:$0xf] }
 0xfb3   : > { %v6901_v15 = vsub.f32 %v6880_v33, %v3352_v13  ;;  %v4630_v13 = vor.u32 %v4883_v52, %v4627_v47  ;;  %v4914_v47 = vld [vmem:[%s7307_s4 + $0xf8] sm:$0xf0] }
 0xfb5   : > { %v3360_v37 = vmul.f32 %v6901_v15, %v6901_v15  ;;  %3549 = vmatpush.bf16.msrb.mxu3 %v4630_v13  ;;  %v4758_v13 = vor.u32 %v4914_v47, %v4757_v30  ;;  %v4697_v30 = vld [vmem:[%s7307_s4 + $0x4] sm:$0xf] }
 0xfb7   : > { %3366 = vadd.xlane.f32.xlu2 %v3360_v37  ;;  %3843 = vmatpush.bf16.msrb.mxu1 %v4758_v13 }
 0xfb8   : > { %v3349_v23 = vpop.xlane.xlu2 %3348 }
 0xfb9   : > { %v3353_v28 = vmul.f32 %v3349_v23, %v5269_v12 }
 0xfbb   : > { %v6907_v19 = vsub.f32 %v6884_v60, %v3353_v28 }
 0xfbd   : > { %v3361_v11 = vmul.f32 %v6907_v19, %v6907_v19 }
 0xfbf   : > { %3368 = vadd.xlane.f32.xlu1 %v3361_v11 }
0x101a   : > { %v3363_v56 = vpop.xlane.xlu1 %3362 }
0x101b   : > { %v3370_v10 = vmul.f32 %v3363_v56, %v5269_v12 }
0x101d   : > { %v3374_v45 = vadd.f32 1e-12, %v3370_v10 }
0x101f   : > { %5134 = vrsqrt.f32 %v3374_v45  ;;  %vm3384_vm1 = vweird.f32 %v3374_v45 }
0x1022   : > { %v3365_v37 = vpop.xlane.xlu0 %3364 }
0x1023   : > { %v3371_v23 = vmul.f32 %v3365_v37, %v5269_v12  ;;  %v4721_v37 = vld [vmem:[%s7307_s4 + $0x64] sm:$0xf] }
0x1025   : > { %v5135_v28 = vpop.eup %5134  ;;  %v3375_v11 = vadd.f32 1e-12, %v3371_v23  ;;  %v4905_v23 = vld [vmem:[%s7307_s4 + $0x68] sm:$0xf0] }
0x1026   : > { %v3379_v48 = vmul.f32 %v5135_v28, %v3374_v45  ;;  %vm3385_vm11 = vweird.f32 %v5135_v28  ;;  %v4725_v45 = vld [vmem:[%s7307_s4 + $0x74] sm:$0xf] }
0x1027   : > { %5136 = vrsqrt.f32 %v3375_v11  ;;  %vm3386_vm2 = vmor %vm3384_vm1, %vm3385_vm11  ;;  %vm3394_vm4 = vweird.f32 %v3375_v11 }
0x1028   : > { %v3380_v14 = vmul.f32 %v5135_v28, %v3379_v48  ;;  %v4913_v48 = vld [vmem:[%s7307_s4 + $0xe8] sm:$0xf0] }
0x102a   : > { %v3381_v44 = vmul.f32 0.5, %v3380_v14  ;;  %v3367_v36 = vpop.xlane.xlu2 %3366 }
0x102b   : > { %v3372_v49 = vmul.f32 %v3367_v36, %v5269_v12  ;;  %v4904_v36 = vld [vmem:[%s7307_s4 + $0x58] sm:$0xf0] }
0x102c   : > { %v3382_v0 = vsub.f32 1.5, %v3381_v44  ;;  %v4717_v44 = vld [vmem:[%s7307_s4 + $0x54] sm:$0xf] }
0x102d   : > { %v5137_v5 = vpop.eup %5136  ;;  %v3376_v18 = vadd.f32 1e-12, %v3372_v49  ;;  %v4749_v49 = vld [vmem:[%s7307_s4 + $0xd4] sm:$0xf] }
0x102e   : > { %v3383_v57 = vmul.f32 %v5135_v28, %v3382_v0  ;;  %v3389_v32 = vmul.f32 %v5137_v5, %v3375_v11  ;;  %vm3395_vm3 = vweird.f32 %v5137_v5  ;;  %v4722_v11 = vor.u32 %v4905_v23, %v4721_v37  ;;  %v4729_v23 = vld [vmem:[%s7307_s4 + $0x84] sm:$0xf] }
0x102f   : > { %5138 = vrsqrt.f32 %v3376_v18  ;;  %vm3396_vm5 = vmor %vm3394_vm4, %vm3395_vm3  ;;  %vm3404_vm7 = vweird.f32 %v3376_v18  ;;  %v4718_v0 = vor.u32 %v4904_v36, %v4717_v44 }
0x1030   : > { %v3390_v58 = vmul.f32 %v5137_v5, %v3389_v32  ;;  %v3387_v26 = vsel %vm3386_vm2, %v5135_v28, %v3383_v57  ;;  %v4753_v28 = vld [vmem:[%s7307_s4 + $0xe4] sm:$0xf]  ;;  %v3308_v57 = vld [vmem:[%s7308_s5 + $0x19] sm:$0x3] }
0x1031   : > { %v3418_v35 = vmul.f32 %v3387_v26, %v6889_v2  ;;  %v4754_v14 = vor.u32 %v4913_v48, %v4753_v28  ;;  %v7060_v32 = vperm.slane %v3308_v57, 0  ;;  %v4713_v26 = vld [vmem:[%s7307_s4 + $0x44] sm:$0xf]  ;;  %v4907_v28 = vld [vmem:[%s7307_s4 + $0x88] sm:$0xf0] }
0x1032   : > { %v3391_v63 = vmul.f32 0.5, %v3390_v58  ;;  %v3369_v16 = vpop.xlane.xlu1 %3368  ;;  %v7062_v58 = vperm.slane %v3308_v57, 1 }
0x1033   : > { %v3373_v62 = vmul.f32 %v3369_v16, %v5269_v12  ;;  %v3425_v61 = vmul.f32 %v4973_v42, %v3418_v35  ;;  %3844 = vmatpush.bf16.msrb.mxu1 %v4754_v14  ;;  %v4745_v16 = vld [vmem:[%s7307_s4 + $0xc4] sm:$0xf]  ;;  %v4730_v14 = vor.u32 %v4907_v28, %v4729_v23 }
0x1034   : > { %v3392_v6 = vsub.f32 1.5, %v3391_v63  ;;  %v4903_v63 = vld [vmem:[%s7307_s4 + $0x48] sm:$0xf0] }
0x1035   : > { %v5139_v9 = vpop.eup %5138  ;;  %v3377_v46 = vadd.f32 1e-12, %v3373_v62  ;;  %v3432_v22 = vadd.f32 %v4974_v21, %v3425_v61  ;;  %v4714_v62 = vor.u32 %v4903_v63, %v4713_v26 }
0x1036   : > { %v3393_v54 = vmul.f32 %v5137_v5, %v3392_v6  ;;  %v3399_v41 = vmul.f32 %v5139_v9, %v3376_v18  ;;  %vm3405_vm6 = vweird.f32 %v5139_v9  ;;  %v4911_v6 = vld [vmem:[%s7307_s4 + $0xc8] sm:$0xf0] }
0x1037   : > { %5140 = vrsqrt.f32 %v3377_v46  ;;  %vm3406_vm8 = vmor %vm3404_vm7, %vm3405_vm6  ;;  %vm3414_vm10 = vweird.f32 %v3377_v46 }
0x1038   : > { %v3397_v20 = vsel %vm3396_vm5, %v5137_v5, %v3393_v54  ;;  %v3400_v8 = vmul.f32 %v5139_v9, %v3399_v41  ;;  %v4912_v5 = vld [vmem:[%s7307_s4 + $0xd8] sm:$0xf0]  ;;  %v4709_v41 = vld [vmem:[%s7307_s4 + $0x34] sm:$0xf] }
0x1039   : > { %v3419_v4 = vmul.f32 %v3397_v20, %v6895_v24  ;;  %v4750_v18 = vor.u32 %v4912_v5, %v4749_v49  ;;  %v4902_v20 = vld [vmem:[%s7307_s4 + $0x38] sm:$0xf0] }
0x103a   : > { %v3401_v2 = vmul.f32 0.5, %v3400_v8  ;;  %v4741_v8 = vld [vmem:[%s7307_s4 + $0xb4] sm:$0xf] }
0x103b   : > { %v3426_v53 = vmul.f32 %v4973_v42, %v3419_v4  ;;  %3845 = vmatpush.bf16.msrb.mxu1 %v4750_v18 }
0x103c   : > { %v3402_v27 = vsub.f32 1.5, %v3401_v2  ;;  %v4910_v2 = vld [vmem:[%s7307_s4 + $0xb8] sm:$0xf0] }
0x103d   : > { %v5141_v40 = vpop.eup %5140  ;;  %v3433_v38 = vadd.f32 %v4974_v21, %v3426_v53  ;;  %v4742_v53 = vor.u32 %v4910_v2, %v4741_v8 }
0x103e   : > { %v3403_v25 = vmul.f32 %v5139_v9, %v3402_v27  ;;  %v3409_v29 = vmul.f32 %v5141_v40, %v3377_v46  ;;  %vm3415_vm9 = vweird.f32 %v5141_v40  ;;  %v4746_v46 = vor.u32 %v4911_v6, %v4745_v16  ;;  %v4705_v27 = vld [vmem:[%s7307_s4 + $0x24] sm:$0xf] }
0x103f   : > { %v3436_v50 = vpack.c.bf16 %v3433_v38, %v3432_v22  ;;  %vm3416_vm12 = vmor %vm3414_vm10, %vm3415_vm9  ;;  %v4737_v22 = vld [vmem:[%s7307_s4 + $0xa4] sm:$0xf] }
0x1040   : > { %v3410_v3 = vmul.f32 %v5141_v40, %v3409_v29  ;;  %v3407_v24 = vsel %vm3406_vm8, %v5139_v9, %v3403_v25  ;;  %3846 = vmatpush.bf16.msrb.mxu1 %v4746_v46  ;;  %v4909_v25 = vld [vmem:[%s7307_s4 + $0xa8] sm:$0xf0] }
0x1041   : > { %3531 = vmatmul.bf16.vlgmr.msra.gmra.mxu2 %v3436_v50  ;;  %3550 = vmatmul.bf16.vlgmr.msrb.gmra.mxu3 %v3436_v50  ;;  %v3420_v31 = vmul.f32 %v3407_v24, %v6901_v15  ;;  %v4906_v15 = vld [vmem:[%s7307_s4 + $0x78] sm:$0xf0] }
0x1042   : > { %v3411_v59 = vmul.f32 0.5, %v3410_v3  ;;  %v4738_v3 = vor.u32 %v4909_v25, %v4737_v22 }
0x1043   : > { %v3427_v34 = vmul.f32 %v4973_v42, %v3420_v31  ;;  %v4900_v31 = vld [vmem:[%s7307_s4 + $0x18] sm:$0xf0] }
0x1044   : > { %v3412_v51 = vsub.f32 1.5, %v3411_v59  ;;  %3847 = vmatpush.bf16.msrb.mxu1 %v4742_v53 }
0x1045   : > { %v3434_v55 = vadd.f32 %v4974_v21, %v3427_v34 }
0x1046   : > { %v3413_v17 = vmul.f32 %v5141_v40, %v3412_v51  ;;  %v4701_v51 = vld [vmem:[%s7307_s4 + $0x14] sm:$0xf] }
0x1047   : > { %v4702_v34 = vor.u32 %v4900_v31, %v4701_v51 }
0x1048   : > { %v3417_v7 = vsel %vm3416_vm12, %v5141_v40, %v3413_v17  ;;  %v4901_v40 = vld [vmem:[%s7307_s4 + $0x28] sm:$0xf0]  ;;  %3848 = vmatpush.bf16.msrb.mxu1 %v4738_v3  ;;  %v4733_v17 = vld [vmem:[%s7307_s4 + $0x94] sm:$0xf] }
0x1049   : > { %v3421_v56 = vmul.f32 %v3417_v7, %v6907_v19  ;;  %v4726_v19 = vor.u32 %v4906_v15, %v4725_v45  ;;  %v4706_v38 = vor.u32 %v4901_v40, %v4705_v27 }
0x104b   : > { %v3428_v10 = vmul.f32 %v4973_v42, %v3421_v56  ;;  %3824 = vmatpush.bf16.msra.mxu0 %v4726_v19  ;;  %v4899_v19 = vld [vmem:[%s7307_s4 + $0x8] sm:$0xf0] }
0x104c   : > { %v4698_v37 = vor.u32 %v4899_v19, %v4697_v30 }
0x104d   : > { %v3435_v1 = vadd.f32 %v4974_v21, %v3428_v10  ;;  %v4710_v21 = vor.u32 %v4902_v20, %v4709_v41  ;;  %v4908_v10 = vld [vmem:[%s7307_s4 + $0x98] sm:$0xf0] }
0x104e   : > { %v4734_v45 = vor.u32 %v4908_v10, %v4733_v17 }
0x104f   : > { %v3437_v52 = vpack.c.bf16 %v3435_v1, %v3434_v55  ;;  %3825 = vmatpush.bf16.msra.mxu0 %v4722_v11 }
0x1050   : > { %3849 = vmatpush.bf16.msrb.mxu1 %v4734_v45 }
0x1051   : > { %3536 = vmatmul.bf16.gmra.mxu2 %v3437_v52  ;;  %3555 = vmatmul.bf16.gmra.mxu3 %v3437_v52 }
0x1053   : > { %3826 = vmatpush.bf16.msra.mxu0 %v4718_v0 }
0x1054   : > { %3850 = vmatpush.bf16.msrb.mxu1 %v4730_v14 }
0x1057   : > { %3827 = vmatpush.bf16.msra.mxu0 %v4714_v62 }
0x105b   : > { %3828 = vmatpush.bf16.msra.mxu0 %v4710_v21 }
0x105f   : > { %3829 = vmatpush.bf16.msra.mxu0 %v4706_v38 }
0x1063   : > { %3830 = vmatpush.bf16.msra.mxu0 %v4702_v34 }
0x1067   : > { %3831 = vmatpush.bf16.msra.mxu0 %v4698_v37 }
0x10c4   : > { %v3532_v9 = vpop.f32.mrf.mxu2  ;;  %v3551_v35 = vpop.f32.mrf.mxu3 }
0x10c5   : > { %v7077_v42 = vadd.f32 %v3532_v9, %v7060_v32  ;;  %v7080_v54 = vadd.f32 %v3551_v35, %v7062_v58 }
0x10c7   : > { %v4687_v4 = vmul.f32 -1.442695, %v7077_v42  ;;  %v4688_v61 = vmul.f32 -1.442695, %v7080_v54 }
0x10c9   : > { %5142 = vpow2.f32 %v4687_v4 }
0x10ca   : > { %5144 = vpow2.f32 %v4688_v61 }
0x10cc   : > { %v3534_v29 = vpop.f32.mrf.mxu2  ;;  %v3553_v50 = vpop.f32.mrf.mxu3 }
0x10cd   : > { %v7109_v24 = vadd.f32 %v3534_v29, %v7060_v32  ;;  %v7112_v59 = vadd.f32 %v3553_v50, %v7062_v58 }
0x10cf   : > { %v5143_v7 = vpop.eup %5142  ;;  %v4689_v56 = vmul.f32 -1.442695, %v7109_v24  ;;  %v4690_v52 = vmul.f32 -1.442695, %v7112_v59 }
0x10d0   : > { %v5145_v55 = vpop.eup %5144  ;;  %v7127_v1 = vadd.f32 1.0, %v5143_v7 }
0x10d1   : > { %v7130_v15 = vadd.f32 1.0, %v5145_v55  ;;  %5146 = vpow2.f32 %v4689_v56 }
0x10d2   : > { %5148 = vrcp.f32 %v7127_v1  ;;  %v3602_v46 = vand.u32 2147483647, %v7127_v1  ;;  %vm3598_vm13 = vweird.f32 %v7127_v1  ;;  %v3604_v20 = vand.u32 2147483648, %v7127_v1 }
0x10d3   : > { %5150 = vrcp.f32 %v7130_v15  ;;  %vm3613_vm14 = vweird.f32 %v7130_v15  ;;  %v3617_v27 = vand.u32 2147483647, %v7130_v15  ;;  %v3619_v40 = vand.u32 2147483648, %v7130_v15 }
0x10d4   : > { %5152 = vpow2.f32 %v4690_v52  ;;  %v3537_v47 = vpop.f32.mrf.mxu2  ;;  %v3556_v13 = vpop.f32.mrf.mxu3  ;;  %vm7179_vm0 = vcmp.eq.f32.partialorder %v3602_v46, 8.507059e+37  ;;  %v3605_v31 = vor.u32 1.1754944e-38, %v3604_v20 }
0x10d5   : > { %v7147_v11 = vadd.f32 %v3537_v47, %v7060_v32  ;;  %v7150_v48 = vadd.f32 %v3556_v13, %v7062_v58  ;;  %vm3618_vm8 = vcmp.eq.f32.partialorder %v3617_v27, 8.507059e+37 }
0x10d7   : > { %v5147_v44 = vpop.eup %5146  ;;  %v4691_v36 = vmul.f32 -1.442695, %v7147_v11  ;;  %v4692_v5 = vmul.f32 -1.442695, %v7150_v48 }
0x10d8   : > { %v5149_v49 = vpop.eup %5148  ;;  %v7153_v0 = vadd.f32 1.0, %v5147_v44 }
0x10d9   : > { %v7156_v18 = vpop.eup %5150  ;;  %v3594_v57 = vmul.f32 %v5149_v49, %v7127_v1  ;;  %5154 = vpow2.f32 %v4691_v36  ;;  %vm3599_vm15 = vweird.f32 %v5149_v49 }
0x10da   : > { %v5153_v26 = vpop.eup %5152  ;;  %v3609_v63 = vmul.f32 %v7156_v18, %v7130_v15  ;;  %5156 = vrcp.f32 %v7153_v0  ;;  %v3634_v29 = vand.u32 2147483648, %v7153_v0  ;;  %vm7190_vm11 = vmor %vm3598_vm13, %vm3599_vm15  ;;  %vm3614_vm1 = vweird.f32 %v7156_v18 }
0x10db   : > { %v3595_v16 = vsub.f32 1.0, %v3594_v57  ;;  %v7162_v62 = vadd.f32 1.0, %v5153_v26  ;;  %5158 = vpow2.f32 %v4692_v5  ;;  %vm3628_vm2 = vweird.f32 %v7153_v0  ;;  %vm7211_vm4 = vmor %vm3613_vm14, %vm3614_vm1 }
0x10dc   : > { %v3610_v6 = vsub.f32 1.0, %v3609_v63  ;;  %v3539_v9 = vpop.f32.mrf.mxu2  ;;  %v3558_v4 = vpop.f32.mrf.mxu3  ;;  %v3635_v1 = vor.u32 1.1754944e-38, %v3634_v29  ;;  %v3620_v15 = vor.u32 1.1754944e-38, %v3619_v40 }
0x10dd   : > { %v3596_v35 = vmul.f32 %v5149_v49, %v3595_v16  ;;  %5160 = vrcp.f32 %v7162_v62  ;;  %v7170_v8 = vadd.f32 %v3539_v9, %v7060_v32  ;;  %v7186_v50 = vadd.f32 %v3558_v4, %v7062_v58 }
0x10de   : > { %v3611_v2 = vmul.f32 %v7156_v18, %v3610_v6  ;;  %v3632_v58 = vand.u32 2147483647, %v7153_v0  ;;  %v3647_v45 = vand.u32 2147483647, %v7162_v62  ;;  %v3649_v37 = vand.u32 2147483648, %v7162_v62 }
0x10df   : > { %v5155_v41 = vpop.eup %5154  ;;  %v3597_v21 = vadd.f32 %v5149_v49, %v3596_v35  ;;  %v4693_v38 = vmul.f32 -1.442695, %v7170_v8  ;;  %v4694_v30 = vmul.f32 -1.442695, %v7186_v50  ;;  %vm3643_vm9 = vweird.f32 %v7162_v62 }
0x10e0   : > { %v5157_v61 = vpop.eup %5156  ;;  %v7173_v53 = vadd.f32 1.0, %v5155_v41  ;;  %v3612_v56 = vadd.f32 %v7156_v18, %v3611_v2  ;;  %vm3633_vm7 = vcmp.eq.f32.partialorder %v3632_v58, 8.507059e+37  ;;  %v3650_v63 = vor.u32 1.1754944e-38, %v3649_v37 }
0x10e1   : > { %v3624_v22 = vmul.f32 %v5157_v61, %v7153_v0  ;;  %v5159_v25 = vpop.eup %5158  ;;  %v3601_v7 = vsel %vm7190_vm11, %v5149_v49, %v3597_v21  ;;  %vm3629_vm3 = vweird.f32 %v5157_v61  ;;  %vm3648_vm12 = vcmp.eq.f32.partialorder %v3647_v45, 8.507059e+37 }
0x10e2   : > { %5162 = vrcp.f32 %v7173_v53  ;;  %v7201_v55 = vadd.f32 1.0, %v5159_v25  ;;  %v3606_v19 = vsel %vm7179_vm0, %v3605_v31, %v3601_v7  ;;  %v3616_v28 = vsel %vm7211_vm4, %v7156_v18, %v3612_v56  ;;  %vm3630_vm5 = vmor %vm3628_vm2, %vm3629_vm3 }
0x10e3   : > { %v5161_v3 = vpop.eup %5160  ;;  %v3625_v17 = vsub.f32 1.0, %v3624_v22  ;;  %5164 = vpow2.f32 %v4693_v38  ;;  %v3713_v18 = vmul.f32 %v3606_v19, %v7077_v42  ;;  %v3621_v26 = vsel %vm3618_vm8, %v3620_v15, %v3616_v28 }
0x10e4   : > { %v3639_v34 = vmul.f32 %v5161_v3, %v7162_v62  ;;  %5166 = vrcp.f32 %v7201_v55  ;;  %vm3644_vm6 = vweird.f32 %v5161_v3  ;;  %v3714_v4 = vmul.f32 %v3621_v26, %v7080_v54 }
0x10e5   : > { %v3626_v10 = vmul.f32 %v5157_v61, %v3625_v17  ;;  %5168 = vpow2.f32 %v4694_v30  ;;  %vm3645_vm10 = vmor %vm3643_vm9, %vm3644_vm6  ;;  %v3662_v54 = vand.u32 2147483647, %v7173_v53  ;;  %vm3658_vm14 = vweird.f32 %v7173_v53 }
0x10e6   : > { %v3640_v52 = vsub.f32 1.0, %v3639_v34  ;;  %v3664_v38 = vand.u32 2147483648, %v7173_v53  ;;  %vm3673_vm2 = vweird.f32 %v7201_v55  ;;  %v3677_v34 = vand.u32 2147483647, %v7201_v55 }
0x10e7   : > { %v3627_v13 = vadd.f32 %v5157_v61, %v3626_v10  ;;  %vm7245_vm0 = vcmp.eq.f32.partialorder %v3662_v54, 8.507059e+37  ;;  %v3679_v10 = vand.u32 2147483648, %v7201_v55 }
0x10e8   : > { %v7217_v23 = vpop.eup %5162  ;;  %v3641_v14 = vmul.f32 %v5161_v3, %v3640_v52  ;;  %v3665_v58 = vor.u32 1.1754944e-38, %v3664_v38  ;;  %vm3678_vm8 = vcmp.eq.f32.partialorder %v3677_v34, 8.507059e+37 }
0x10e9   : > { %v3631_v44 = vsel %vm3630_vm5, %v5157_v61, %v3627_v13  ;;  %v3654_v36 = vmul.f32 %v7217_v23, %v7173_v53  ;;  %v5165_v57 = vpop.eup %5164  ;;  %vm3659_vm13 = vweird.f32 %v7217_v23  ;;  %v3680_v28 = vor.u32 1.1754944e-38, %v3679_v10 }
0x10ea   : > { %v3636_v49 = vsel %vm3633_vm7, %v3635_v1, %v3631_v44  ;;  %v3642_v5 = vadd.f32 %v5161_v3, %v3641_v14  ;;  %v3591_v9 = vadd.f32 1.0, %v5165_v57  ;;  %v5167_v35 = vpop.eup %5166  ;;  %vm7238_vm15 = vmor %vm3658_vm14, %vm3659_vm13 }
0x10eb   : > { %v3715_v0 = vmul.f32 %v3636_v49, %v7109_v24  ;;  %v3655_v6 = vsub.f32 1.0, %v3654_v36  ;;  %v5169_v20 = vpop.eup %5168  ;;  %v3669_v61 = vmul.f32 %v5167_v35, %v7201_v55  ;;  %vm3674_vm11 = vweird.f32 %v5167_v35 }
0x10ec   : > { %v3646_v16 = vsel %vm3645_vm10, %v5161_v3, %v3642_v5  ;;  %5170 = vrcp.f32 %v3591_v9  ;;  %v3592_v21 = vadd.f32 1.0, %v5169_v20  ;;  %v3692_v29 = vand.u32 2147483647, %v3591_v9  ;;  %vm7252_vm3 = vmor %vm3673_vm2, %vm3674_vm11 }
0x10ed   : > { %v3721_v46 = vpack.c.bf16 %v3715_v0, %v3713_v18  ;;  %v3651_v41 = vsel %vm3648_vm12, %v3650_v63, %v3646_v16  ;;  %v3656_v24 = vmul.f32 %v7217_v23, %v3655_v6  ;;  %v3670_v2 = vsub.f32 1.0, %v3669_v61 }
0x10ee   : > { %v3716_v62 = vmul.f32 %v3651_v41, %v7112_v59  ;;  %5172 = vrcp.f32 %v3592_v21  ;;  %v3694_v17 = vand.u32 2147483648, %v3591_v9  ;;  %vm3688_vm4 = vweird.f32 %v3591_v9 }
0x10ef   : > { %3832 = vmatmul.bf16.vlgmr.msra.gmra.mxu0 %v3721_v46  ;;  %v3657_v40 = vadd.f32 %v7217_v23, %v3656_v24  ;;  %v3671_v22 = vmul.f32 %v5167_v35, %v3670_v2  ;;  %vm3693_vm5 = vcmp.eq.f32.partialorder %v3692_v29, 8.507059e+37  ;;  %v3707_v47 = vand.u32 2147483647, %v3592_v21 }
0x10f0   : > { %v3722_v42 = vpack.c.bf16 %v3716_v62, %v3714_v4  ;;  %v3695_v19 = vor.u32 1.1754944e-38, %v3694_v17  ;;  %v3709_v13 = vand.u32 2147483648, %v3592_v21  ;;  %vm3703_vm9 = vweird.f32 %v3592_v21 }
0x10f1   : > { %v3661_v51 = vsel %vm7238_vm15, %v7217_v23, %v3657_v40  ;;  %v3672_v7 = vadd.f32 %v5167_v35, %v3671_v22  ;;  %vm3708_vm12 = vcmp.eq.f32.partialorder %v3707_v47, 8.507059e+37 }
0x10f2   : > { %3851 = vmatmul.bf16.vlgmr.msrb.gmra.mxu1 %v3722_v42  ;;  %v5171_v27 = vpop.eup %5170  ;;  %v3666_v30 = vsel %vm7245_vm0, %v3665_v58, %v3661_v51  ;;  %v3710_v5 = vor.u32 1.1754944e-38, %v3709_v13 }
0x10f3   : > { %v3684_v59 = vmul.f32 %v5171_v27, %v3591_v9  ;;  %vm3689_vm1 = vweird.f32 %v5171_v27  ;;  %v3676_v37 = vsel %vm7252_vm3, %v5167_v35, %v3672_v7  ;;  %v3717_v15 = vmul.f32 %v3666_v30, %v7147_v11  ;;  %v4975_v11 = vld [vmem:[%s7308_s5 + $0x1b] ss:$0 sm:$0xff] }
0x10f4   : > { %v5173_v3 = vpop.eup %5172  ;;  %vm3690_vm6 = vmor %vm3688_vm4, %vm3689_vm1  ;;  %v3681_v49 = vsel %vm3678_vm8, %v3680_v28, %v3676_v37 }
0x10f5   : > { %v3685_v32 = vsub.f32 1.0, %v3684_v59  ;;  %v3699_v53 = vmul.f32 %v5173_v3, %v3592_v21  ;;  %vm3704_vm7 = vweird.f32 %v5173_v3  ;;  %v3718_v0 = vmul.f32 %v3681_v49, %v7150_v48 }
0x10f6   : > { %vm3705_vm10 = vmor %vm3703_vm9, %vm3704_vm7 }
0x10f7   : > { %v3686_v56 = vmul.f32 %v5171_v27, %v3685_v32  ;;  %v3700_v45 = vsub.f32 1.0, %v3699_v53 }
0x10f9   : > { %v3687_v52 = vadd.f32 %v5171_v27, %v3686_v56  ;;  %v3701_v55 = vmul.f32 %v5173_v3, %v3700_v45 }
0x10fb   : > { %v3691_v23 = vsel %vm3690_vm6, %v5171_v27, %v3687_v52  ;;  %v3702_v36 = vadd.f32 %v5173_v3, %v3701_v55 }
0x10fc   : > { %v3696_v14 = vsel %vm3693_vm5, %v3695_v19, %v3691_v23 }
0x10fd   : > { %v3719_v44 = vmul.f32 %v3696_v14, %v7170_v8  ;;  %v3706_v57 = vsel %vm3705_vm10, %v5173_v3, %v3702_v36 }
0x10fe   : > { %v3711_v26 = vsel %vm3708_vm12, %v3710_v5, %v3706_v57 }
0x10ff   : > { %v3723_v18 = vpack.c.bf16 %v3719_v44, %v3717_v15  ;;  %v3720_v63 = vmul.f32 %v3711_v26, %v7186_v50 }
0x1101   : > { %3837 = vmatmul.bf16.gmra.mxu0 %v3723_v18  ;;  %v3724_v16 = vpack.c.bf16 %v3720_v63, %v3718_v0 }
0x1103   : > { %3856 = vmatmul.bf16.gmra.mxu1 %v3724_v16  ;;  %v4976_v16 = vld [vmem:[%s7308_s5 + $0x1c] ss:$0 sm:$0xff] }
0x116c   : > { %v3833_v8 = vpop.f32.mrf.mxu0 }
0x116d   : > { %v3834_v6 = vadd.f32 %v4975_v11, %v3833_v8 }
0x116f   : > { %v3852_v9 = vpop.f32.mrf.mxu1 }
0x1170   : > { %v3853_v35 = vadd.f32 %v3852_v9, %v3834_v6 }
0x1172   : > { %v3862_v46 = vmul.f32 0.5, %v3853_v35 }
0x1174   : > { %v3835_v41 = vpop.f32.mrf.mxu0  ;;  %v3866_v20 = vadd.f32 %v3862_v46, %v6872_v39  ;;  %v4977_v46 = vld [vmem:[%s7308_s5 + $0x1d] ss:$0 sm:$0xff] }
0x1175   : > { %v3836_v4 = vadd.f32 %v4975_v11, %v3835_v41 }
0x1176   : > { %3872 = vadd.xlane.f32.xlu0 %v3866_v20 }
0x1177   : > { %v3854_v48 = vpop.f32.mrf.mxu1 }
0x1178   : > { %v3855_v62 = vadd.f32 %v3854_v48, %v3836_v4 }
0x117a   : > { %v3863_v50 = vmul.f32 0.5, %v3855_v62 }
0x117c   : > { %v3867_v61 = vadd.f32 %v3863_v50, %v6876_v43 }
0x117e   : > { %3874 = vadd.xlane.f32.xlu2 %v3867_v61  ;;  %v3838_v42 = vpop.f32.mrf.mxu0 }
0x117f   : > { %v3839_v24 = vadd.f32 %v4975_v11, %v3838_v42 }
0x1180   : > { %v3857_v21 = vpop.f32.mrf.mxu1 }
0x1181   : > { %v3858_v2 = vadd.f32 %v3857_v21, %v3839_v24 }
0x1183   : > { %v3864_v27 = vmul.f32 0.5, %v3858_v2 }
0x1185   : > { %v3868_v22 = vadd.f32 %v3864_v27, %v6880_v33 }
0x1186   : > { %v3840_v40 = vpop.f32.mrf.mxu0 }
0x1187   : > { %v3841_v54 = vadd.f32 %v4975_v11, %v3840_v40  ;;  %3876 = vadd.xlane.f32.xlu1 %v3868_v22 }
0x1188   : > { %v3859_v59 = vpop.f32.mrf.mxu1 }
0x1189   : > { %v3860_v39 = vadd.f32 %v3859_v59, %v3841_v54 }
0x118b   : > { %v3865_v38 = vmul.f32 0.5, %v3860_v39 }
0x118d   : > { %v3869_v25 = vadd.f32 %v3865_v38, %v6884_v60 }
0x118f   : > { %3878 = vadd.xlane.f32.xlu0 %v3869_v25 }
0x11e9   : > { %v3873_v32 = vpop.xlane.xlu0 %3872 }
0x11ea   : > { %v3880_v43 = vmul.f32 %v3873_v32, %v5269_v12 }
0x11ec   : > { %v3884_v29 = vsub.f32 %v3866_v20, %v3880_v43 }
0x11ee   : > { %v3888_v3 = vmul.f32 %v3884_v29, %v3884_v29 }
0x11f0   : > { %3892 = vadd.xlane.f32.xlu2 %v3888_v3 }
0x11f1   : > { %v3875_v51 = vpop.xlane.xlu2 %3874 }
0x11f2   : > { %v3881_v31 = vmul.f32 %v3875_v51, %v5269_v12 }
0x11f4   : > { %v3885_v17 = vsub.f32 %v3867_v61, %v3881_v31 }
0x11f6   : > { %v3889_v7 = vmul.f32 %v3885_v17, %v3885_v17 }
0x11f8   : > { %3894 = vadd.xlane.f32.xlu1 %v3889_v7 }
0x11fa   : > { %v3877_v33 = vpop.xlane.xlu1 %3876 }
0x11fb   : > { %v3882_v56 = vmul.f32 %v3877_v33, %v5269_v12 }
0x11fd   : > { %v7274_v53 = vsub.f32 %v3868_v22, %v3882_v56 }
0x11ff   : > { %v3890_v60 = vmul.f32 %v7274_v53, %v7274_v53 }
0x1201   : > { %3896 = vadd.xlane.f32.xlu0 %v3890_v60 }
0x1202   : > { %v3879_v58 = vpop.xlane.xlu0 %3878 }
0x1203   : > { %v3883_v34 = vmul.f32 %v3879_v58, %v5269_v12 }
0x1205   : > { %v7279_v10 = vsub.f32 %v3869_v25, %v3883_v34 }
0x1207   : > { %v3891_v1 = vmul.f32 %v7279_v10, %v7279_v10 }
0x1209   : > { %3898 = vadd.xlane.f32.xlu2 %v3891_v1 }
0x1263   : > { %v3893_v52 = vpop.xlane.xlu2 %3892 }
0x1264   : > { %v3900_v45 = vmul.f32 %v3893_v52, %v5269_v12 }
0x1266   : > { %v3904_v30 = vadd.f32 1e-12, %v3900_v45 }
0x1268   : > { %5174 = vrsqrt.f32 %v3904_v30  ;;  %vm3914_vm14 = vweird.f32 %v3904_v30 }
0x126b   : > { %v3895_v19 = vpop.xlane.xlu1 %3894 }
0x126c   : > { %v3901_v47 = vmul.f32 %v3895_v19, %v5269_v12 }
0x126e   : > { %v5175_v13 = vpop.eup %5174  ;;  %v3905_v37 = vadd.f32 1e-12, %v3901_v47 }
0x126f   : > { %v3909_v23 = vmul.f32 %v5175_v13, %v3904_v30  ;;  %vm3915_vm13 = vweird.f32 %v5175_v13 }
0x1270   : > { %5176 = vrsqrt.f32 %v3905_v37  ;;  %vm3916_vm15 = vmor %vm3914_vm14, %vm3915_vm13  ;;  %vm3924_vm11 = vweird.f32 %v3905_v37 }
0x1271   : > { %v3910_v55 = vmul.f32 %v5175_v13, %v3909_v23 }
0x1273   : > { %v3911_v28 = vmul.f32 0.5, %v3910_v55 }
0x1274   : > { %v3897_v49 = vpop.xlane.xlu0 %3896 }
0x1275   : > { %v3912_v14 = vsub.f32 1.5, %v3911_v28  ;;  %v3902_v57 = vmul.f32 %v3897_v49, %v5269_v12 }
0x1276   : > { %v5177_v15 = vpop.eup %5176 }
0x1277   : > { %v3913_v44 = vmul.f32 %v5175_v13, %v3912_v14  ;;  %v3919_v36 = vmul.f32 %v5177_v15, %v3905_v37  ;;  %v3906_v0 = vadd.f32 1e-12, %v3902_v57  ;;  %vm3925_vm0 = vweird.f32 %v5177_v15 }
0x1278   : > { %vm3926_vm1 = vmor %vm3924_vm11, %vm3925_vm0 }
0x1279   : > { %v3920_v5 = vmul.f32 %v5177_v15, %v3919_v36  ;;  %v3917_v18 = vsel %vm3916_vm15, %v5175_v13, %v3913_v44  ;;  %5178 = vrsqrt.f32 %v3906_v0  ;;  %vm3934_vm3 = vweird.f32 %v3906_v0 }
0x127a   : > { %v3948_v11 = vmul.f32 %v3917_v18, %v3884_v29 }
0x127b   : > { %v3921_v26 = vmul.f32 0.5, %v3920_v5 }
0x127c   : > { %v3899_v6 = vpop.xlane.xlu2 %3898  ;;  %v3955_v41 = vmul.f32 %v4976_v16, %v3948_v11 }
0x127d   : > { %v3922_v63 = vsub.f32 1.5, %v3921_v26  ;;  %v3903_v35 = vmul.f32 %v3899_v6, %v5269_v12 }
0x127e   : > { %v3962_v61 = vadd.f32 %v4977_v46, %v3955_v41 }
0x127f   : > { %v3923_v8 = vmul.f32 %v5177_v15, %v3922_v63  ;;  %v5179_v4 = vpop.eup %5178  ;;  %v3907_v48 = vadd.f32 1e-12, %v3903_v35 }
0x1280   : > { %v3929_v50 = vmul.f32 %v5179_v4, %v3906_v0  ;;  %vm3935_vm2 = vweird.f32 %v5179_v4 }
0x1281   : > { %v3927_v9 = vsel %vm3926_vm1, %v5177_v15, %v3923_v8  ;;  %5180 = vrsqrt.f32 %v3907_v48  ;;  %vm3936_vm4 = vmor %vm3934_vm3, %vm3935_vm2  ;;  %vm3944_vm6 = vweird.f32 %v3907_v48 }
0x1282   : > { %v3949_v20 = vmul.f32 %v3927_v9, %v3885_v17  ;;  %v3930_v24 = vmul.f32 %v5179_v4, %v3929_v50 }
0x1284   : > { %v3956_v62 = vmul.f32 %v4976_v16, %v3949_v20  ;;  %v3931_v21 = vmul.f32 0.5, %v3930_v24 }
0x1286   : > { %v3963_v42 = vadd.f32 %v4977_v46, %v3956_v62  ;;  %v3932_v2 = vsub.f32 1.5, %v3931_v21 }
0x1287   : > { %v5181_v27 = vpop.eup %5180 }
0x1288   : > { %v4926_v12 = vpack.c.bf16 %v3963_v42, %v3962_v61  ;;  %v3933_v40 = vmul.f32 %v5179_v4, %v3932_v2  ;;  %v3939_v54 = vmul.f32 %v5181_v27, %v3907_v48  ;;  %vm3945_vm5 = vweird.f32 %v5181_v27 }
0x1289   : > { %vm3946_vm7 = vmor %vm3944_vm6, %vm3945_vm5 }
0x128a   : > { %4927 = vst [vmem:[%s292_s15] sm:$0xff] %v4926_v12   ;;  %v3940_v22 = vmul.f32 %v5181_v27, %v3939_v54  ;;  %v3937_v59 = vsel %vm3936_vm4, %v5179_v4, %v3933_v40 }
0x128b   : > { %v3950_v25 = vmul.f32 %v3937_v59, %v7274_v53 }
0x128c   : > { %v3941_v39 = vmul.f32 0.5, %v3940_v22 }
0x128d   : > { %v3957_v29 = vmul.f32 %v4976_v16, %v3950_v25 }
0x128e   : > { %v3942_v38 = vsub.f32 1.5, %v3941_v39 }
0x128f   : > { %v3964_v31 = vadd.f32 %v4977_v46, %v3957_v29 }
0x1290   : > { %v3943_v32 = vmul.f32 %v5181_v27, %v3942_v38 }
0x1292   : > { %v3947_v43 = vsel %vm3946_vm7, %v5181_v27, %v3943_v32 }
0x1293   : > { %v3951_v3 = vmul.f32 %v3947_v43, %v7279_v10 }
0x1295   : > { %v3958_v51 = vmul.f32 %v4976_v16, %v3951_v3 }
0x1297   : > { %v3965_v17 = vadd.f32 %v4977_v46, %v3958_v51 }
0x1299   : > { %v4931_v7 = vpack.c.bf16 %v3965_v17, %v3964_v31 }
0x129b   : > { %4934 = vst [vmem:[%s292_s15 + $0x8] sm:$0xff] %v4931_v7  }
0x129c PF: > { %s17_s24 = sadd.s32 1, %s5188_s24  }
0x129d   : > { %p14_p4 = scmp.ge.s32.totalorder %s17_s24, 4  }
0x129f   :  { %16 = sbr.rel (!%p14_p4) target bundleno = 1 (0x1), region = 84 }

// kernel: conformer_chunk_encoder_forward.5
= control target key start
LH: loop header
LB: loop body
LE: loop exit
PB: predicated region body
PF: predicated region fallthrough
CT: control target
= control target key end

     0   :  { %s5347_s24 = smov 0   ;;  %s7433_s0 = inlined_call_operand.vmem [shape: bf16[2,32,128], index: 0, kind: input, shape index: {}]   ;;  %s7434_s1 = inlined_call_operand.vmem [shape: bf16[4,128,32], index: 1, kind: input, shape index: {}]   ;;  %s7435_s2 = inlined_call_operand.vmem [shape: s32[2,1,32], index: 2, kind: input, shape index: {}]   ;;  %s7436_s3 = inlined_call_operand.vmem [shape: bf16[128,1408], index: 3, kind: input, shape index: {}]   ;;  %s7437_s4 = inlined_call_operand.vmem [shape: bf16[256,256], index: 4, kind: input, shape index: {}]   ;;  %s7438_s5 = inlined_call_operand.vmem [shape: f32[1,4096], index: 5, kind: input, shape index: {}]   ;;  %s7439_s6 = inlined_call_operand.vmem [shape: f32[7,128], index: 6, kind: input, shape index: {}]   ;;  %s7440_s7 = inlined_call_operand.vmem [shape: bf16[2,32,128], index: 7, kind: output, shape index: {}]  }
   0x1 LB: > { %s4134_s25 = sadd.s32 4294967295, %s5294_s24   ;;  %p4138_p0 = scmp.ge.s32.totalorder %s5294_s24, 1  ;;  %s5294_s24 = sphi %s5347_s24, %s17_s24  }
   0x2   : > { %p245_p1 = scmp.lt.s32.totalorder %s5294_s24, 3 }
   0x4   : > { %p246_p2 = pnand %p4138_p0, %p245_p1 }
   0x5   : > { %p280_p3 = scmp.lt.s32.totalorder (!%p246_p2), %s4134_s25, 1  ;;  %s5297_s28 = smov (!%p246_p2), 96  }
   0x6   : > { %249 = sbr.rel (%p246_p2) target bundleno = 5030 (0x13a6), region = 48  ;;  %s5298_s22 = smov (!%p246_p2), 256  }
   0x7   : > { %s5299_s23 = smov (!%p246_p2), 264   ;;  %s5300_s27 = smov (!%p246_p2), 97  }
   0x8   : > { %s5302_s30 = smov (!%p246_p2), 280   ;;  %s5304_s11 = smov (!%p246_p2), 64  }
   0x9   : > { %s5306_s21 = smov (!%p246_p2), 32  }
   0xb   : > { %s7474_s25 = smov (!%p280_p3, %s4134_s25), 1  ;;  %v5296_v6 = vmov 128.0   ;;  %v4201_v29 = vld [vmem:[%s7436_s3 + $0x268] sm:$0xf]  ;;  %v4874_v30 = vld [vmem:[%s7436_s3 + $0x290] sm:$0xf0] }
   0xc   : > { %s4857_s26 = sshll.u32 %s7474_s25, 4  ;;  %5076 = vrcp.f32 %v5296_v6  ;;  %v4873_v31 = vld [vmem:[%s7436_s3 + $0x26c] sm:$0xf]  ;;  %v4202_v32 = vor.u32 %v4874_v30, %v4201_v29  ;;  %v4203_v33 = vld [vmem:[%s7436_s3 + $0x294] sm:$0xf0]  ;;  %s287_s10 = scalar_lea.vmem %s7435_s2, %s7474_s25 }
   0xd   : > { %s284_s29 = scalar_lea.vmem %s7433_s0, %s4857_s26  ;;  %v4206_v34 = vor.u32 %v4873_v31, %v4203_v33  ;;  %v4193_v35 = vld [vmem:[%s7436_s3 + $0x210] sm:$0xf]  ;;  %v4872_v36 = vld [vmem:[%s7436_s3 + $0x238] sm:$0xf0]  ;;  %v4871_v37 = vld [vmem:[%s7436_s3 + $0x214] sm:$0xf] }
   0xe   : > { %v5029_v0 = vld [vmem:[%s284_s29 + $0x8] sm:$0xff]   ;;  %v5012_v1 = vld [vmem:[%s284_s29] sm:$0xff]   ;;  %542 = vmatpush.bf16.msra.mxu0 %v4202_v32  ;;  %v4194_v38 = vor.u32 %v4872_v36, %v4193_v35  ;;  %v4185_v41 = vld [vmem:[%s7436_s3 + $0x1b8] sm:$0xf]  ;;  %s5301_s29 = smov 272  }
   0xf   : > { %v5363_v2 = vunpack.c.l.bf16 %v5029_v0  ;;  %v5365_v3 = vunpack.c.l.bf16 %v5012_v1  ;;  %v5369_v4 = vunpack.c.h.bf16 %v5029_v0  ;;  %v5371_v5 = vunpack.c.h.bf16 %v5012_v1  ;;  %561 = vmatpush.bf16.msra.mxu1 %v4206_v34  ;;  %v4195_v39 = vld [vmem:[%s7436_s3 + $0x23c] sm:$0xf0]  ;;  %v4870_v42 = vld [vmem:[%s7436_s3 + $0x1e0] sm:$0xf0]  ;;  %v4869_v43 = vld [vmem:[%s7436_s3 + $0x1bc] sm:$0xf] }
  0x10   : > { %v4198_v40 = vor.u32 %v4871_v37, %v4195_v39  ;;  %v4186_v44 = vor.u32 %v4870_v42, %v4185_v41  ;;  %v4187_v45 = vld [vmem:[%s7436_s3 + $0x1e4] sm:$0xf0]  ;;  %v4177_v47 = vld [vmem:[%s7436_s3 + $0x160] sm:$0xf]  ;;  %v4868_v48 = vld [vmem:[%s7436_s3 + $0x188] sm:$0xf0] }
  0x11   : > { %358 = vadd.xlane.f32.xlu1 %v5363_v2  ;;  %354 = vadd.xlane.f32.xlu0 %v5365_v3  ;;  %v4190_v46 = vor.u32 %v4869_v43, %v4187_v45  ;;  %v4867_v49 = vld [vmem:[%s7436_s3 + $0x164] sm:$0xf]  ;;  %v4178_v50 = vor.u32 %v4868_v48, %v4177_v47  ;;  %v4179_v51 = vld [vmem:[%s7436_s3 + $0x18c] sm:$0xf0]  ;;  %v4169_v53 = vld [vmem:[%s7436_s3 + $0x108] sm:$0xf] }
  0x12   : > { %v5077_v7 = vpop.eup %5076  ;;  %543 = vmatpush.bf16.msra.mxu0 %v4194_v38  ;;  %v4182_v52 = vor.u32 %v4867_v49, %v4179_v51  ;;  %v4866_v54 = vld [vmem:[%s7436_s3 + $0x130] sm:$0xf0]  ;;  %v4865_v55 = vld [vmem:[%s7436_s3 + $0x10c] sm:$0xf]  ;;  %v4171_v57 = vld [vmem:[%s7436_s3 + $0x134] sm:$0xf0] }
  0x13   : > { %v363_v8 = vmul.f32 128.0, %v5077_v7  ;;  %vm367_vm0 = vweird.f32 %v5077_v7  ;;  %562 = vmatpush.bf16.msra.mxu1 %v4198_v40  ;;  %v4170_v56 = vor.u32 %v4866_v54, %v4169_v53  ;;  %v4174_v58 = vor.u32 %v4865_v55, %v4171_v57  ;;  %v4161_v59 = vld [vmem:[%s7436_s3 + $0xb0] sm:$0xf]  ;;  %v4864_v60 = vld [vmem:[%s7436_s3 + $0xd8] sm:$0xf0] }
  0x14   : > { %v4863_v61 = vld [vmem:[%s7436_s3 + $0xb4] sm:$0xf]  ;;  %v4162_v62 = vor.u32 %v4864_v60, %v4161_v59  ;;  %v4163_v63 = vld [vmem:[%s7436_s3 + $0xdc] sm:$0xf0]  ;;  %v4153_v1 = vld [vmem:[%s7436_s3 + $0x58] sm:$0xf] }
  0x15   : > { %v364_v9 = vsub.f32 1.0, %v363_v8  ;;  %v4166_v0 = vor.u32 %v4863_v61, %v4163_v63  ;;  %v4862_v6 = vld [vmem:[%s7436_s3 + $0x80] sm:$0xf0]  ;;  %v5054_v54 = vld [vmem:[%s7438_s5] ss:$0 sm:$0xff] }
  0x16   : > { %544 = vmatpush.bf16.msra.mxu0 %v4186_v44  ;;  %v4154_v8 = vor.u32 %v4862_v6, %v4153_v1  ;;  %v5055_v61 = vld [vmem:[%s7438_s5 + $0x1] ss:$0 sm:$0xff] }
  0x17   : > { %v365_v10 = vmul.f32 %v5077_v7, %v364_v9  ;;  %563 = vmatpush.bf16.msra.mxu1 %v4190_v46  ;;  %v4155_v9 = vld [vmem:[%s7436_s3 + $0x84] sm:$0xf0] }
  0x19   : > { %360 = vadd.xlane.f32.xlu1 %v5369_v4  ;;  %356 = vadd.xlane.f32.xlu0 %v5371_v5  ;;  %v366_v11 = vadd.f32 %v5077_v7, %v365_v10  ;;  %v4145_v10 = vld [vmem:[%s7436_s3] sm:$0xf] }
  0x1a   : > { %545 = vmatpush.bf16.msra.mxu0 %v4178_v50 }
  0x1b   : > { %v5375_v12 = vsel %vm367_vm0, %v5077_v7, %v366_v11  ;;  %564 = vmatpush.bf16.msra.mxu1 %v4182_v52  ;;  %v4861_v7 = vld [vmem:[%s7436_s3 + $0x5c] sm:$0xf]  ;;  %v4860_v11 = vld [vmem:[%s7436_s3 + $0x28] sm:$0xf0] }
  0x1e   : > { %546 = vmatpush.bf16.msra.mxu0 %v4170_v56 }
  0x1f   : > { %565 = vmatpush.bf16.msra.mxu1 %v4174_v58 }
  0x22   : > { %547 = vmatpush.bf16.msra.mxu0 %v4162_v62 }
  0x23   : > { %566 = vmatpush.bf16.msra.mxu1 %v4166_v0 }
  0x26   : > { %548 = vmatpush.bf16.msra.mxu0 %v4154_v8 }
  0x84   : > { %v359_v13 = vpop.xlane.xlu1 %358  ;;  %v355_v14 = vpop.xlane.xlu0 %354 }
  0x85   : > { %v371_v15 = vmul.f32 %v5375_v12, %v359_v13  ;;  %v369_v16 = vmul.f32 %v5375_v12, %v355_v14  ;;  %v4158_v13 = vor.u32 %v4861_v7, %v4155_v9  ;;  %v4859_v14 = vld [vmem:[%s7436_s3 + $0x4] sm:$0xf] }
  0x87   : > { %v5380_v17 = vsub.f32 %v5363_v2, %v371_v15  ;;  %v5383_v18 = vsub.f32 %v5365_v3, %v369_v16  ;;  %v4147_v15 = vld [vmem:[%s7436_s3 + $0x2c] sm:$0xf0]  ;;  %567 = vmatpush.bf16.msra.mxu1 %v4158_v13 }
  0x89   : > { %v379_v19 = vmul.f32 %v5380_v17, %v5380_v17  ;;  %v377_v20 = vmul.f32 %v5383_v18, %v5383_v18 }
  0x8b   : > { %385 = vadd.xlane.f32.xlu0 %v379_v19  ;;  %381 = vadd.xlane.f32.xlu2 %v377_v20 }
  0x8c   : > { %v361_v21 = vpop.xlane.xlu1 %360  ;;  %v357_v22 = vpop.xlane.xlu0 %356 }
  0x8d   : > { %v372_v23 = vmul.f32 %v5375_v12, %v361_v21  ;;  %v370_v24 = vmul.f32 %v5375_v12, %v357_v22  ;;  %v4146_v21 = vor.u32 %v4860_v11, %v4145_v10  ;;  %v4150_v22 = vor.u32 %v4859_v14, %v4147_v15 }
  0x8f   : > { %v5392_v25 = vsub.f32 %v5369_v4, %v372_v23  ;;  %v5395_v26 = vsub.f32 %v5371_v5, %v370_v24  ;;  %549 = vmatpush.bf16.msra.mxu0 %v4146_v21  ;;  %568 = vmatpush.bf16.msra.mxu1 %v4150_v22  ;;  %v4890_v21 = vld [vmem:[%s7437_s4 + $0xf4] sm:$0xf0] }
  0x91   : > { %v380_v27 = vmul.f32 %v5392_v25, %v5392_v25  ;;  %v378_v28 = vmul.f32 %v5395_v26, %v5395_v26 }
  0x93   : > { %387 = vadd.xlane.f32.xlu1 %v380_v27  ;;  %383 = vadd.xlane.f32.xlu2 %v378_v28 }
  0xfe   : > { %v382_v16 = vpop.xlane.xlu2 %381  ;;  %v386_v20 = vpop.xlane.xlu0 %385 }
  0xff   : > { %v389_v19 = vmul.f32 %v382_v16, %v5375_v12  ;;  %v391_v24 = vmul.f32 %v386_v20, %v5375_v12  ;;  %v4882_v20 = vld [vmem:[%s7437_s4 + $0x74] sm:$0xf0] }
 0x101   : > { %v393_v23 = vadd.f32 1e-12, %v389_v19  ;;  %v395_v27 = vadd.f32 1e-12, %v391_v24  ;;  %v4245_v19 = vld [vmem:[%s7437_s4 + $0x70] sm:$0xf] }
 0x102   : > { %v4881_v24 = vld [vmem:[%s7437_s4 + $0x64] sm:$0xf0] }
 0x103   : > { %5078 = vrsqrt.f32 %v393_v23  ;;  %vm403_vm2 = vweird.f32 %v393_v23  ;;  %vm423_vm9 = vweird.f32 %v395_v27 }
 0x104   : > { %5080 = vrsqrt.f32 %v395_v27 }
 0x106   : > { %v388_v28 = vpop.xlane.xlu1 %387  ;;  %v384_v29 = vpop.xlane.xlu2 %383 }
 0x107   : > { %v392_v30 = vmul.f32 %v388_v28, %v5375_v12  ;;  %v390_v31 = vmul.f32 %v384_v29, %v5375_v12  ;;  %v4889_v29 = vld [vmem:[%s7437_s4 + $0xe4] sm:$0xf0] }
 0x109   : > { %v5079_v32 = vpop.eup %5078  ;;  %v396_v33 = vadd.f32 1e-12, %v392_v30  ;;  %v394_v34 = vadd.f32 1e-12, %v390_v31  ;;  %v4237_v31 = vld [vmem:[%s7437_s4 + $0x50] sm:$0xf] }
 0x10a   : > { %v398_v35 = vmul.f32 %v5079_v32, %v393_v23  ;;  %v5081_v38 = vpop.eup %5080  ;;  %vm404_vm1 = vweird.f32 %v5079_v32  ;;  %v4241_v23 = vld [vmem:[%s7437_s4 + $0x60] sm:$0xf] }
 0x10b   : > { %5082 = vrsqrt.f32 %v396_v33  ;;  %v418_v44 = vmul.f32 %v5081_v38, %v395_v27  ;;  %vm405_vm3 = vmor %vm403_vm2, %vm404_vm1  ;;  %vm413_vm5 = vweird.f32 %v394_v34  ;;  %vm433_vm7 = vweird.f32 %v396_v33  ;;  %v4273_v27 = vld [vmem:[%s7437_s4 + $0xe0] sm:$0xf] }
 0x10c   : > { %v399_v36 = vmul.f32 %v5079_v32, %v398_v35  ;;  %5084 = vrsqrt.f32 %v394_v34  ;;  %vm424_vm10 = vweird.f32 %v5081_v38  ;;  %v4242_v28 = vor.u32 %v4881_v24, %v4241_v23  ;;  %v4888_v35 = vld [vmem:[%s7437_s4 + $0xd4] sm:$0xf0] }
 0x10d   : > { %v419_v48 = vmul.f32 %v5081_v38, %v418_v44  ;;  %vm425_vm12 = vmor %vm423_vm9, %vm424_vm10  ;;  %v4274_v30 = vor.u32 %v4889_v29, %v4273_v27 }
 0x10e   : > { %v400_v37 = vmul.f32 0.5, %v399_v36 }
 0x10f   : > { %v420_v55 = vmul.f32 0.5, %v419_v48  ;;  %v4261_v48 = vld [vmem:[%s7437_s4 + $0xb0] sm:$0xf] }
 0x110   : > { %v401_v39 = vsub.f32 1.5, %v400_v37  ;;  %v320_v37 = vld [vmem:[%s7438_s5 + $0x2] sm:$0x3] }
 0x111   : > { %v5083_v40 = vpop.eup %5082  ;;  %v421_v62 = vsub.f32 1.5, %v420_v55  ;;  %v5562_v44 = vperm.slane %v320_v37, 0 }
 0x112   : > { %v5085_v41 = vpop.eup %5084  ;;  %v428_v42 = vmul.f32 %v5083_v40, %v396_v33  ;;  %v402_v43 = vmul.f32 %v5079_v32, %v401_v39  ;;  %vm434_vm8 = vweird.f32 %v5083_v40  ;;  %v4269_v33 = vld [vmem:[%s7437_s4 + $0xd0] sm:$0xf]  ;;  %v4879_v39 = vld [vmem:[%s7437_s4 + $0x44] sm:$0xf0] }
 0x113   : > { %v408_v45 = vmul.f32 %v5085_v41, %v394_v34  ;;  %vm414_vm4 = vweird.f32 %v5085_v41  ;;  %vm435_vm11 = vmor %vm433_vm7, %vm434_vm8  ;;  %v422_v6 = vmul.f32 %v5081_v38, %v421_v62  ;;  %v4270_v36 = vor.u32 %v4888_v35, %v4269_v33 }
 0x114   : > { %v429_v46 = vmul.f32 %v5083_v40, %v428_v42  ;;  %v406_v50 = vsel %vm405_vm3, %v5079_v32, %v402_v43  ;;  %vm415_vm6 = vmor %vm413_vm5, %vm414_vm4  ;;  %v4880_v32 = vld [vmem:[%s7437_s4 + $0x54] sm:$0xf0]  ;;  %v4887_v42 = vld [vmem:[%s7437_s4 + $0xc4] sm:$0xf0] }
 0x115   : > { %v409_v47 = vmul.f32 %v5085_v41, %v408_v45  ;;  %v437_v53 = vmul.f32 %v406_v50, %v5383_v18  ;;  %v4238_v34 = vor.u32 %v4880_v32, %v4237_v31  ;;  %v5564_v45 = vperm.slane %v320_v37, 1  ;;  %v4886_v50 = vld [vmem:[%s7437_s4 + $0xb4] sm:$0xf0] }
 0x116   : > { %v430_v51 = vmul.f32 0.5, %v429_v46  ;;  %v4229_v46 = vld [vmem:[%s7437_s4 + $0x30] sm:$0xf] }
 0x117   : > { %v410_v49 = vmul.f32 0.5, %v409_v47  ;;  %v444_v60 = vmul.f32 %v5054_v54, %v437_v53  ;;  %v4878_v47 = vld [vmem:[%s7437_s4 + $0x34] sm:$0xf0] }
 0x118   : > { %v431_v57 = vsub.f32 1.5, %v430_v51  ;;  %v4262_v51 = vor.u32 %v4886_v50, %v4261_v48 }
 0x119   : > { %v411_v52 = vsub.f32 1.5, %v410_v49  ;;  %v451_v0 = vadd.f32 %v5055_v61, %v444_v60  ;;  %v4230_v49 = vor.u32 %v4878_v47, %v4229_v46  ;;  %v4885_v60 = vld [vmem:[%s7437_s4 + $0xa4] sm:$0xf0] }
 0x11a   : > { %v432_v63 = vmul.f32 %v5083_v40, %v431_v57  ;;  %v4877_v57 = vld [vmem:[%s7437_s4 + $0x24] sm:$0xf0] }
 0x11b   : > { %v412_v56 = vmul.f32 %v5085_v41, %v411_v52 }
 0x11c   : > { %v436_v8 = vsel %vm435_vm11, %v5083_v40, %v432_v63  ;;  %v4265_v40 = vld [vmem:[%s7437_s4 + $0xc0] sm:$0xf]  ;;  %v4221_v63 = vld [vmem:[%s7437_s4 + $0x10] sm:$0xf] }
 0x11d   : > { %v416_v58 = vsel %vm415_vm6, %v5085_v41, %v412_v56  ;;  %v440_v9 = vmul.f32 %v436_v8, %v5392_v25  ;;  %v4277_v25 = vld [vmem:[%s7437_s4 + $0xf0] sm:$0xf]  ;;  %v4266_v43 = vor.u32 %v4887_v42, %v4265_v40  ;;  %v4225_v56 = vld [vmem:[%s7437_s4 + $0x20] sm:$0xf] }
 0x11e   : > { %v438_v59 = vmul.f32 %v416_v58, %v5395_v26  ;;  %v426_v26 = vsel %vm425_vm12, %v5081_v38, %v422_v6  ;;  %v4278_v22 = vor.u32 %v4890_v21, %v4277_v25  ;;  %v4233_v38 = vld [vmem:[%s7437_s4 + $0x40] sm:$0xf] }
 0x11f   : > { %v439_v10 = vmul.f32 %v426_v26, %v5380_v17  ;;  %v447_v11 = vmul.f32 %v5054_v54, %v440_v9  ;;  %v4246_v17 = vor.u32 %v4882_v20, %v4245_v19  ;;  %v4234_v41 = vor.u32 %v4879_v39, %v4233_v38  ;;  %v4257_v58 = vld [vmem:[%s7437_s4 + $0xa0] sm:$0xf]  ;;  %v4883_v19 = vld [vmem:[%s7437_s4 + $0x84] sm:$0xf0] }
 0x120   : > { %v445_v18 = vmul.f32 %v5054_v54, %v438_v59  ;;  %862 = vmatpush.bf16.msra.mxu3 %v4278_v22  ;;  %v4226_v59 = vor.u32 %v4877_v57, %v4225_v56 }
 0x121   : > { %v446_v13 = vmul.f32 %v5054_v54, %v439_v10  ;;  %v454_v14 = vadd.f32 %v5055_v61, %v447_v11  ;;  %843 = vmatpush.bf16.msra.mxu2 %v4246_v17 }
 0x122   : > { %v452_v1 = vadd.f32 %v5055_v61, %v445_v18  ;;  %v4258_v18 = vor.u32 %v4885_v60, %v4257_v58 }
 0x123   : > { %v453_v15 = vadd.f32 %v5055_v61, %v446_v13  ;;  %v4217_v13 = vld [vmem:[%s7437_s4] sm:$0xf] }
 0x124   : > { %v455_v7 = vpack.c.bf16 %v452_v1, %v451_v0  ;;  %863 = vmatpush.bf16.msra.mxu3 %v4274_v30  ;;  %v4876_v0 = vld [vmem:[%s7437_s4 + $0x14] sm:$0xf0]  ;;  %v4253_v1 = vld [vmem:[%s7437_s4 + $0x90] sm:$0xf] }
 0x125   : > { %v456_v16 = vpack.c.bf16 %v454_v14, %v453_v15  ;;  %844 = vmatpush.bf16.msra.mxu2 %v4242_v28  ;;  %v4222_v6 = vor.u32 %v4876_v0, %v4221_v63  ;;  %v4875_v14 = vld [vmem:[%s7437_s4 + $0x4] sm:$0xf0]  ;;  %v4249_v15 = vld [vmem:[%s7437_s4 + $0x80] sm:$0xf] }
 0x126   : > { %550 = vmatmul.bf16.vlgmr.msra.gmra.mxu0 %v455_v7  ;;  %569 = vmatmul.bf16.vlgmr.msra.gmra.mxu1 %v455_v7  ;;  %v4884_v7 = vld [vmem:[%s7437_s4 + $0x94] sm:$0xf0]  ;;  %v4250_v17 = vor.u32 %v4883_v19, %v4249_v15 }
 0x127   : > { %v4254_v8 = vor.u32 %v4884_v7, %v4253_v1 }
 0x128   : > { %864 = vmatpush.bf16.msra.mxu3 %v4270_v36 }
 0x129   : > { %845 = vmatpush.bf16.msra.mxu2 %v4238_v34 }
 0x12c   : > { %865 = vmatpush.bf16.msra.mxu3 %v4266_v43 }
 0x12d   : > { %846 = vmatpush.bf16.msra.mxu2 %v4234_v41 }
 0x130   : > { %866 = vmatpush.bf16.msra.mxu3 %v4262_v51 }
 0x131   : > { %847 = vmatpush.bf16.msra.mxu2 %v4230_v49 }
 0x134   : > { %867 = vmatpush.bf16.msra.mxu3 %v4258_v18 }
 0x135   : > { %848 = vmatpush.bf16.msra.mxu2 %v4226_v59 }
 0x136   : > { %555 = vmatmul.bf16.gmra.mxu0 %v456_v16  ;;  %574 = vmatmul.bf16.gmra.mxu1 %v456_v16  ;;  %v4218_v16 = vor.u32 %v4875_v14, %v4217_v13 }
 0x138   : > { %868 = vmatpush.bf16.msra.mxu3 %v4254_v8 }
 0x139   : > { %849 = vmatpush.bf16.msra.mxu2 %v4222_v6 }
 0x13c   : > { %869 = vmatpush.bf16.msra.mxu3 %v4250_v17 }
 0x13d   : > { %850 = vmatpush.bf16.msra.mxu2 %v4218_v16 }
 0x1a3   : > { %v551_v52 = vpop.f32.mrf.mxu0  ;;  %v570_v53 = vpop.f32.mrf.mxu1 }
 0x1a4   : > { %v5579_v54 = vadd.f32 %v551_v52, %v5562_v44  ;;  %v5582_v55 = vadd.f32 %v570_v53, %v5564_v45 }
 0x1a6   : > { %v4207_v61 = vmul.f32 -1.442695, %v5579_v54  ;;  %v4208_v62 = vmul.f32 -1.442695, %v5582_v55 }
 0x1a8   : > { %5086 = vpow2.f32 %v4207_v61 }
 0x1a9   : > { %5088 = vpow2.f32 %v4208_v62 }
 0x1ab   : > { %v553_v26 = vpop.f32.mrf.mxu0  ;;  %v572_v9 = vpop.f32.mrf.mxu1 }
 0x1ac   : > { %v5611_v10 = vadd.f32 %v553_v26, %v5562_v44  ;;  %v5614_v11 = vadd.f32 %v572_v9, %v5564_v45 }
 0x1ae   : > { %v5087_v20 = vpop.eup %5086  ;;  %v4209_v25 = vmul.f32 -1.442695, %v5611_v10  ;;  %v4210_v23 = vmul.f32 -1.442695, %v5614_v11 }
 0x1af   : > { %v5089_v21 = vpop.eup %5088  ;;  %v604_v22 = vadd.f32 1.0, %v5087_v20 }
 0x1b0   : > { %v5630_v24 = vadd.f32 1.0, %v5089_v21  ;;  %5090 = vpow2.f32 %v4209_v25 }
 0x1b1   : > { %5092 = vrcp.f32 %v604_v22  ;;  %v621_v53 = vand.u32 2147483647, %v604_v22  ;;  %v623_v59 = vand.u32 2147483648, %v604_v22  ;;  %vm617_vm14 = vweird.f32 %v604_v22 }
 0x1b2   : > { %5094 = vrcp.f32 %v5630_v24  ;;  %vm632_vm15 = vweird.f32 %v5630_v24  ;;  %v636_v18 = vand.u32 2147483647, %v5630_v24 }
 0x1b3   : > { %5096 = vpow2.f32 %v4210_v23  ;;  %v556_v27 = vpop.f32.mrf.mxu0  ;;  %v575_v28 = vpop.f32.mrf.mxu1  ;;  %vm5681_vm1 = vcmp.eq.f32.partialorder %v621_v53, 8.507059e+37  ;;  %v624_v26 = vor.u32 1.1754944e-38, %v623_v59 }
 0x1b4   : > { %v5634_v29 = vadd.f32 %v556_v27, %v5562_v44  ;;  %v5637_v30 = vadd.f32 %v575_v28, %v5564_v45  ;;  %vm637_vm9 = vcmp.eq.f32.partialorder %v636_v18, 8.507059e+37 }
 0x1b6   : > { %v5091_v31 = vpop.eup %5090  ;;  %v4211_v32 = vmul.f32 -1.442695, %v5634_v29  ;;  %v4212_v33 = vmul.f32 -1.442695, %v5637_v30 }
 0x1b7   : > { %v5641_v34 = vpop.eup %5092  ;;  %v5643_v35 = vadd.f32 1.0, %v5091_v31 }
 0x1b8   : > { %v5645_v36 = vpop.eup %5094  ;;  %v613_v37 = vmul.f32 %v5641_v34, %v604_v22  ;;  %5098 = vpow2.f32 %v4211_v32  ;;  %vm618_vm13 = vweird.f32 %v5641_v34 }
 0x1b9   : > { %v5097_v38 = vpop.eup %5096  ;;  %v628_v39 = vmul.f32 %v5645_v36, %v5630_v24  ;;  %5100 = vrcp.f32 %v5643_v35  ;;  %v651_v63 = vand.u32 2147483647, %v5643_v35  ;;  %v653_v6 = vand.u32 2147483648, %v5643_v35  ;;  %vm5677_vm0 = vmor %vm617_vm14, %vm618_vm13 }
 0x1ba   : > { %v614_v40 = vsub.f32 1.0, %v613_v37  ;;  %v5651_v41 = vadd.f32 1.0, %v5097_v38  ;;  %5102 = vpow2.f32 %v4212_v33  ;;  %vm633_vm2 = vweird.f32 %v5645_v36 }
 0x1bb   : > { %v558_v42 = vpop.f32.mrf.mxu0  ;;  %v577_v43 = vpop.f32.mrf.mxu1  ;;  %v629_v49 = vsub.f32 1.0, %v628_v39  ;;  %vm647_vm3 = vweird.f32 %v5643_v35  ;;  %vm5697_vm5 = vcmp.eq.f32.partialorder %v651_v63, 8.507059e+37  ;;  %v654_v22 = vor.u32 1.1754944e-38, %v653_v6  ;;  %vm5706_vm6 = vmor %vm632_vm15, %vm633_vm2 }
 0x1bc   : > { %5104 = vrcp.f32 %v5651_v41  ;;  %v5655_v46 = vadd.f32 %v558_v42, %v5562_v44  ;;  %v5658_v47 = vadd.f32 %v577_v43, %v5564_v45  ;;  %v615_v48 = vmul.f32 %v5641_v34, %v614_v40 }
 0x1bd   : > { %v638_v44 = vand.u32 2147483648, %v5630_v24  ;;  %v630_v61 = vmul.f32 %v5645_v36, %v629_v49  ;;  %v668_v23 = vand.u32 2147483648, %v5651_v41  ;;  %v666_v24 = vand.u32 2147483647, %v5651_v41 }
 0x1be   : > { %v5099_v50 = vpop.eup %5098  ;;  %v4213_v51 = vmul.f32 -1.442695, %v5655_v46  ;;  %v4214_v57 = vmul.f32 -1.442695, %v5658_v47  ;;  %v616_v60 = vadd.f32 %v5641_v34, %v615_v48  ;;  %vm662_vm10 = vweird.f32 %v5651_v41 }
 0x1bf   : > { %v5101_v52 = vpop.eup %5100  ;;  %v5662_v56 = vadd.f32 1.0, %v5099_v50  ;;  %v639_v9 = vor.u32 1.1754944e-38, %v638_v44  ;;  %v631_v15 = vadd.f32 %v5645_v36, %v630_v61  ;;  %v669_v50 = vor.u32 1.1754944e-38, %v668_v23 }
 0x1c0   : > { %v5103_v58 = vpop.eup %5102  ;;  %5106 = vpow2.f32 %v4213_v51  ;;  %v643_v45 = vmul.f32 %v5101_v52, %v5643_v35  ;;  %v620_v14 = vsel %vm5677_vm0, %v5641_v34, %v616_v60  ;;  %vm648_vm4 = vweird.f32 %v5101_v52 }
 0x1c1   : > { %5108 = vrcp.f32 %v5662_v56  ;;  %v5674_v0 = vadd.f32 1.0, %v5103_v58  ;;  %v625_v27 = vsel %vm5681_vm1, %v624_v26, %v620_v14  ;;  %v635_v37 = vsel %vm5706_vm6, %v5645_v36, %v631_v15  ;;  %vm649_vm7 = vmor %vm647_vm3, %vm648_vm4 }
 0x1c2   : > { %v5105_v62 = vpop.eup %5104  ;;  %5110 = vpow2.f32 %v4214_v57  ;;  %v644_v1 = vsub.f32 1.0, %v643_v45  ;;  %v732_v48 = vmul.f32 %v625_v27, %v5579_v54  ;;  %v640_v35 = vsel %vm637_vm9, %v639_v9, %v635_v37 }
 0x1c3   : > { %v658_v13 = vmul.f32 %v5105_v62, %v5651_v41  ;;  %5112 = vrcp.f32 %v5674_v0  ;;  %vm663_vm8 = vweird.f32 %v5105_v62  ;;  %vm667_vm12 = vcmp.eq.f32.partialorder %v666_v24, 8.507059e+37 }
 0x1c4   : > { %v645_v19 = vmul.f32 %v5101_v52, %v644_v1  ;;  %vm664_vm11 = vmor %vm662_vm10, %vm663_vm8  ;;  %v681_v54 = vand.u32 2147483647, %v5662_v56  ;;  %v733_v41 = vmul.f32 %v640_v35, %v5582_v55  ;;  %v683_v44 = vand.u32 2147483648, %v5662_v56 }
 0x1c5   : > { %v659_v20 = vsub.f32 1.0, %v658_v13  ;;  %vm677_vm14 = vweird.f32 %v5662_v56  ;;  %vm692_vm3 = vweird.f32 %v5674_v0  ;;  %v696_v15 = vand.u32 2147483647, %v5674_v0 }
 0x1c6   : > { %v5107_v16 = vpop.eup %5106  ;;  %v646_v32 = vadd.f32 %v5101_v52, %v645_v19  ;;  %vm5742_vm15 = vcmp.eq.f32.partialorder %v681_v54, 8.507059e+37  ;;  %v684_v6 = vor.u32 1.1754944e-38, %v683_v44  ;;  %v4365_v19 = vld [vmem:[%s7436_s3 + $0x270] sm:$0xf] }
 0x1c7   : > { %v5693_v25 = vpop.eup %5108  ;;  %v5695_v17 = vadd.f32 1.0, %v5107_v16  ;;  %v660_v33 = vmul.f32 %v5105_v62, %v659_v20  ;;  %vm697_vm9 = vcmp.eq.f32.partialorder %v696_v15, 8.507059e+37 }
 0x1c8   : > { %v673_v31 = vmul.f32 %v5693_v25, %v5662_v56  ;;  %v5111_v34 = vpop.eup %5110  ;;  %v650_v40 = vsel %vm649_vm7, %v5101_v52, %v646_v32  ;;  %vm678_vm13 = vweird.f32 %v5693_v25  ;;  %v698_v56 = vand.u32 2147483648, %v5674_v0 }
 0x1c9   : > { %5114 = vrcp.f32 %v5695_v17  ;;  %v5720_v39 = vadd.f32 1.0, %v5111_v34  ;;  %v661_v42 = vadd.f32 %v5105_v62, %v660_v33  ;;  %v5722_v43 = vpop.eup %5112  ;;  %v655_v36 = vsel %vm5697_vm5, %v654_v22, %v650_v40  ;;  %vm5750_vm1 = vmor %vm677_vm14, %vm678_vm13 }
 0x1ca   : > { %v674_v38 = vsub.f32 1.0, %v673_v31  ;;  %v688_v49 = vmul.f32 %v5722_v43, %v5674_v0  ;;  %v734_v52 = vmul.f32 %v655_v36, %v5611_v10  ;;  %vm693_vm0 = vweird.f32 %v5722_v43 }
 0x1cb   : > { %5116 = vrcp.f32 %v5720_v39  ;;  %v665_v53 = vsel %vm664_vm11, %v5105_v62, %v661_v42  ;;  %v711_v13 = vand.u32 2147483647, %v5695_v17  ;;  %vm5761_vm4 = vmor %vm692_vm3, %vm693_vm0  ;;  %vm707_vm5 = vweird.f32 %v5695_v17 }
 0x1cc   : > { %v675_v51 = vmul.f32 %v5693_v25, %v674_v38  ;;  %v689_v57 = vsub.f32 1.0, %v688_v49  ;;  %v670_v58 = vsel %vm667_vm12, %v669_v50, %v665_v53  ;;  %v740_v45 = vpack.c.bf16 %v734_v52, %v732_v48 }
 0x1cd   : > { %v735_v60 = vmul.f32 %v670_v58, %v5614_v11  ;;  %v713_v11 = vand.u32 2147483648, %v5695_v17  ;;  %v728_v22 = vand.u32 2147483648, %v5720_v39  ;;  %v726_v0 = vand.u32 2147483647, %v5720_v39 }
 0x1ce   : > { %v690_v61 = vmul.f32 %v5722_v43, %v689_v57  ;;  %v676_v10 = vadd.f32 %v5693_v25, %v675_v51  ;;  %851 = vmatmul.bf16.vlgmr.msra.gmra.mxu2 %v740_v45  ;;  %v699_v28 = vor.u32 1.1754944e-38, %v698_v56  ;;  %vm712_vm8 = vcmp.eq.f32.partialorder %v711_v13, 8.507059e+37 }
 0x1cf   : > { %v5115_v59 = vpop.eup %5114  ;;  %v741_v62 = vpack.c.bf16 %v735_v60, %v733_v41  ;;  %v714_v21 = vor.u32 1.1754944e-38, %v713_v11  ;;  %vm722_vm10 = vweird.f32 %v5720_v39  ;;  %v729_v37 = vor.u32 1.1754944e-38, %v728_v22 }
 0x1d0   : > { %v703_v18 = vmul.f32 %v5115_v59, %v5695_v17  ;;  %v691_v7 = vadd.f32 %v5722_v43, %v690_v61  ;;  %vm708_vm2 = vweird.f32 %v5115_v59  ;;  %v680_v14 = vsel %vm5750_vm1, %v5693_v25, %v676_v10 }
 0x1d1   : > { %v5117_v63 = vpop.eup %5116  ;;  %870 = vmatmul.bf16.vlgmr.msra.gmra.mxu3 %v741_v62  ;;  %vm709_vm6 = vmor %vm707_vm5, %vm708_vm2  ;;  %v685_v27 = vsel %vm5742_vm15, %v684_v6, %v680_v14  ;;  %vm727_vm12 = vcmp.eq.f32.partialorder %v726_v0, 8.507059e+37  ;;  %v4914_v0 = vld [vmem:[%s7436_s3 + $0x2a0] sm:$0xf0]  ;;  %vm1330_vm0 = vcmask 261120  }
 0x1d2   : > { %v704_v1 = vsub.f32 1.0, %v703_v18  ;;  %v718_v8 = vmul.f32 %v5117_v63, %v5720_v39  ;;  %v695_v23 = vsel %vm5761_vm4, %v5722_v43, %v691_v7  ;;  %vm723_vm7 = vweird.f32 %v5117_v63  ;;  %v5056_v39 = vld [vmem:[%s7438_s5 + $0x4] ss:$0 sm:$0xff] }
 0x1d3   : > { %v700_v33 = vsel %vm697_vm9, %v699_v28, %v695_v23  ;;  %vm724_vm11 = vmor %vm722_vm10, %vm723_vm7  ;;  %v736_v24 = vmul.f32 %v685_v27, %v5634_v29  ;;  %v4367_v23 = vld [vmem:[%s7436_s3 + $0x29c] sm:$0xf0] }
 0x1d4   : > { %v705_v9 = vmul.f32 %v5115_v59, %v704_v1  ;;  %v719_v16 = vsub.f32 1.0, %v718_v8  ;;  %v737_v42 = vmul.f32 %v700_v33, %v5637_v30 }
 0x1d6   : > { %v706_v20 = vadd.f32 %v5115_v59, %v705_v9  ;;  %v720_v25 = vmul.f32 %v5117_v63, %v719_v16 }
 0x1d8   : > { %v710_v31 = vsel %vm709_vm6, %v5115_v59, %v706_v20  ;;  %v721_v32 = vadd.f32 %v5117_v63, %v720_v25  ;;  %v4913_v20 = vld [vmem:[%s7436_s3 + $0x298] sm:$0xf0]  ;;  %v4373_v25 = vld [vmem:[%s7436_s3 + $0x278] sm:$0xf] }
 0x1d9   : > { %v715_v17 = vsel %vm712_vm8, %v714_v21, %v710_v31  ;;  %v4912_v21 = vld [vmem:[%s7436_s3 + $0x274] sm:$0xf]  ;;  %v4366_v22 = vor.u32 %v4913_v20, %v4365_v19  ;;  %v4374_v28 = vor.u32 %v4914_v0, %v4373_v25  ;;  %v4353_v31 = vld [vmem:[%s7436_s3 + $0x218] sm:$0xf]  ;;  %v4295_v0 = vld [vmem:[%s7436_s3 + $0x8c] sm:$0xf0] }
 0x1da   : > { %v738_v34 = vmul.f32 %v715_v17, %v5655_v46  ;;  %v725_v38 = vsel %vm724_vm11, %v5117_v63, %v721_v32  ;;  %v4370_v27 = vor.u32 %v4912_v21, %v4367_v23  ;;  %v4910_v17 = vld [vmem:[%s7436_s3 + $0x240] sm:$0xf0]  ;;  %v4909_v32 = vld [vmem:[%s7436_s3 + $0x21c] sm:$0xf]  ;;  %v4293_v21 = vld [vmem:[%s7436_s3 + $0x60] sm:$0xf] }
 0x1db   : > { %v730_v40 = vsel %vm727_vm12, %v729_v37, %v725_v38  ;;  %1155 = vmatpush.bf16.msrb.mxu0 %v4366_v22  ;;  %1193 = vmatpush.bf16.msrb.mxu2 %v4374_v28  ;;  %v4354_v33 = vor.u32 %v4910_v17, %v4353_v31  ;;  %v4361_v37 = vld [vmem:[%s7436_s3 + $0x220] sm:$0xf]  ;;  %v4895_v22 = vld [vmem:[%s7436_s3 + $0x88] sm:$0xf0]  ;;  %v4894_v23 = vld [vmem:[%s7436_s3 + $0x64] sm:$0xf] }
 0x1dc   : > { %v742_v43 = vpack.c.bf16 %v738_v34, %v736_v24  ;;  %v739_v48 = vmul.f32 %v730_v40, %v5658_v47  ;;  %1174 = vmatpush.bf16.msrb.mxu1 %v4370_v27  ;;  %v4355_v34 = vld [vmem:[%s7436_s3 + $0x244] sm:$0xf0]  ;;  %v4911_v24 = vld [vmem:[%s7436_s3 + $0x248] sm:$0xf0]  ;;  %v4294_v25 = vor.u32 %v4895_v22, %v4293_v21  ;;  %v4896_v28 = vld [vmem:[%s7436_s3 + $0x90] sm:$0xf0]  ;;  %v4298_v31 = vor.u32 %v4894_v23, %v4295_v0 }
 0x1dd   : > { %v4358_v38 = vor.u32 %v4909_v32, %v4355_v34  ;;  %v4362_v40 = vor.u32 %v4911_v24, %v4361_v37  ;;  %v4301_v27 = vld [vmem:[%s7436_s3 + $0x68] sm:$0xf]  ;;  %v4892_v37 = vld [vmem:[%s7436_s3 + $0x30] sm:$0xf0]  ;;  %v4891_v24 = vld [vmem:[%s7436_s3 + $0xc] sm:$0xf] }
 0x1de   : > { %v743_v36 = vpack.c.bf16 %v739_v48, %v737_v42  ;;  %856 = vmatmul.bf16.gmra.mxu2 %v742_v43  ;;  %v4341_v42 = vld [vmem:[%s7436_s3 + $0x1c0] sm:$0xf]  ;;  %v4907_v43 = vld [vmem:[%s7436_s3 + $0x1e8] sm:$0xf0]  ;;  %v4906_v48 = vld [vmem:[%s7436_s3 + $0x1c4] sm:$0xf]  ;;  %v4302_v17 = vor.u32 %v4896_v28, %v4301_v27 }
 0x1df   : > { %1156 = vmatpush.bf16.msrb.mxu0 %v4354_v33  ;;  %1194 = vmatpush.bf16.msrb.mxu2 %v4362_v40  ;;  %v4281_v34 = vld [vmem:[%s7436_s3 + $0x8] sm:$0xf]  ;;  %v4283_v40 = vld [vmem:[%s7436_s3 + $0x34] sm:$0xf0] }
 0x1e0   : > { %1175 = vmatpush.bf16.msrb.mxu1 %v4358_v38  ;;  %v4282_v38 = vor.u32 %v4892_v37, %v4281_v34 }
 0x1e1   : > { %875 = vmatmul.bf16.gmra.mxu3 %v743_v36  ;;  %v4342_v36 = vor.u32 %v4907_v43, %v4341_v42  ;;  %v4289_v42 = vld [vmem:[%s7436_s3 + $0x10] sm:$0xf]  ;;  %v4893_v43 = vld [vmem:[%s7436_s3 + $0x38] sm:$0xf0] }
 0x1e3   : > { %1157 = vmatpush.bf16.msrb.mxu0 %v4342_v36 }
 0x251   : > { %v852_v46 = vpop.f32.mrf.mxu2 }
 0x252   : > { %v853_v35 = vadd.f32 %v5056_v39, %v852_v46  ;;  %v4349_v46 = vld [vmem:[%s7436_s3 + $0x1c8] sm:$0xf] }
 0x254   : > { %v871_v49 = vpop.f32.mrf.mxu3 }
 0x255   : > { %v872_v50 = vadd.f32 %v871_v49, %v853_v35  ;;  %v4908_v35 = vld [vmem:[%s7436_s3 + $0x1f0] sm:$0xf0] }
 0x257   : > { %v881_v29 = vmul.f32 0.5, %v872_v50  ;;  %v4350_v50 = vor.u32 %v4908_v35, %v4349_v46  ;;  %v4290_v46 = vor.u32 %v4893_v43, %v4289_v42 }
 0x259   : > { %v5782_v51 = vadd.f32 %v5365_v3, %v881_v29  ;;  %v854_v52 = vpop.f32.mrf.mxu2  ;;  %1195 = vmatpush.bf16.msrb.mxu2 %v4350_v50  ;;  %v4329_v29 = vld [vmem:[%s7436_s3 + $0x168] sm:$0xf] }
 0x25a   : > { %v855_v30 = vadd.f32 %v5056_v39, %v854_v52  ;;  %v4904_v52 = vld [vmem:[%s7436_s3 + $0x190] sm:$0xf0] }
 0x25b   : > { %891 = vadd.xlane.f32.xlu2 %v5782_v51 }
 0x25c   : > { %v873_v47 = vpop.f32.mrf.mxu3 }
 0x25d   : > { %v874_v53 = vadd.f32 %v873_v47, %v855_v30  ;;  %v4903_v30 = vld [vmem:[%s7436_s3 + $0x16c] sm:$0xf]  ;;  %v4330_v47 = vor.u32 %v4904_v52, %v4329_v29 }
 0x25f   : > { %v882_v54 = vmul.f32 0.5, %v874_v53  ;;  %v4331_v53 = vld [vmem:[%s7436_s3 + $0x194] sm:$0xf0]  ;;  %1158 = vmatpush.bf16.msrb.mxu0 %v4330_v47 }
 0x261   : > { %v5786_v57 = vadd.f32 %v5371_v5, %v882_v54  ;;  %v857_v58 = vpop.f32.mrf.mxu2  ;;  %v4337_v54 = vld [vmem:[%s7436_s3 + $0x170] sm:$0xf] }
 0x262   : > { %v858_v59 = vadd.f32 %v5056_v39, %v857_v58  ;;  %v4905_v58 = vld [vmem:[%s7436_s3 + $0x198] sm:$0xf0] }
 0x263   : > { %893 = vadd.xlane.f32.xlu0 %v5786_v57 }
 0x264   : > { %v876_v41 = vpop.f32.mrf.mxu3 }
 0x265   : > { %v877_v44 = vadd.f32 %v876_v41, %v858_v59  ;;  %v4334_v59 = vor.u32 %v4903_v30, %v4331_v53  ;;  %v4338_v41 = vor.u32 %v4905_v58, %v4337_v54 }
 0x267   : > { %v883_v45 = vmul.f32 0.5, %v877_v44  ;;  %1196 = vmatpush.bf16.msrb.mxu2 %v4338_v41  ;;  %v4317_v44 = vld [vmem:[%s7436_s3 + $0x110] sm:$0xf] }
 0x269   : > { %v5790_v3 = vadd.f32 %v5363_v2, %v883_v45  ;;  %v859_v60 = vpop.f32.mrf.mxu2  ;;  %v4901_v45 = vld [vmem:[%s7436_s3 + $0x138] sm:$0xf0] }
 0x26a   : > { %v860_v61 = vadd.f32 %v5056_v39, %v859_v60  ;;  %v4343_v39 = vld [vmem:[%s7436_s3 + $0x1ec] sm:$0xf0]  ;;  %v4900_v60 = vld [vmem:[%s7436_s3 + $0x114] sm:$0xf] }
 0x26b   : > { %895 = vadd.xlane.f32.xlu1 %v5790_v3  ;;  %v4346_v49 = vor.u32 %v4906_v48, %v4343_v39  ;;  %v4286_v39 = vor.u32 %v4891_v24, %v4283_v40  ;;  %v4927_v24 = vld [vmem:[%s7434_s1 + $0x20] sm:$0xff] }
 0x26c   : > { %v878_v18 = vpop.f32.mrf.mxu3  ;;  %v1350_v43 = vsel %vm1330_vm0, %v4927_v24, 0 }
 0x26d   : > { %v879_v10 = vadd.f32 %v878_v18, %v860_v61  ;;  %1176 = vmatpush.bf16.msrb.mxu1 %v4346_v49  ;;  %v4318_v61 = vor.u32 %v4901_v45, %v4317_v44  ;;  %v4319_v18 = vld [vmem:[%s7436_s3 + $0x13c] sm:$0xf0] }
 0x26f   : > { %v884_v62 = vmul.f32 0.5, %v879_v10  ;;  %v4325_v10 = vld [vmem:[%s7436_s3 + $0x118] sm:$0xf]  ;;  %1159 = vmatpush.bf16.msrb.mxu0 %v4318_v61 }
 0x271   : > { %v5794_v5 = vadd.f32 %v5369_v4, %v884_v62  ;;  %1177 = vmatpush.bf16.msrb.mxu1 %v4334_v59  ;;  %v4902_v62 = vld [vmem:[%s7436_s3 + $0x140] sm:$0xf0] }
 0x273   : > { %897 = vadd.xlane.f32.xlu2 %v5794_v5 }
 0x2ce   : > { %v892_v63 = vpop.xlane.xlu2 %891 }
 0x2cf   : > { %v899_v55 = vmul.f32 %v892_v63, %v5375_v12  ;;  %v4322_v63 = vor.u32 %v4900_v60, %v4319_v18  ;;  %v4930_v60 = vld [vmem:[%s7434_s1 + $0x38] sm:$0xff] }
 0x2d1   : > { %v5799_v1 = vsub.f32 %v5782_v51, %v899_v55  ;;  %v4326_v55 = vor.u32 %v4902_v62, %v4325_v10  ;;  %1178 = vmatpush.bf16.msrb.mxu1 %v4322_v63  ;;  %v1359_v10 = vsel %vm1330_vm0, %v4930_v60, 0 }
 0x2d2   : > { %1361 = vmatpush.bf16.xpose.msrb.mxu3 %v1359_v10  ;;  %v5059_v10 = vld [vmem:[%s7438_s5 + $0xa] ss:$0 sm:$0xff] }
 0x2d3   : > { %v907_v2 = vmul.f32 %v5799_v1, %v5799_v1  ;;  %1197 = vmatpush.bf16.msrb.mxu2 %v4326_v55 }
 0x2d5   : > { %911 = vadd.xlane.f32.xlu0 %v907_v2 }
 0x2d6   : > { %v894_v11 = vpop.xlane.xlu0 %893 }
 0x2d7   : > { %v900_v6 = vmul.f32 %v894_v11, %v5375_v12 }
 0x2d9   : > { %v5805_v7 = vsub.f32 %v5786_v57, %v900_v6  ;;  %v4305_v6 = vld [vmem:[%s7436_s3 + $0xb8] sm:$0xf] }
 0x2db   : > { %v908_v4 = vmul.f32 %v5805_v7, %v5805_v7 }
 0x2dd   : > { %913 = vadd.xlane.f32.xlu1 %v908_v4  ;;  %v4898_v4 = vld [vmem:[%s7436_s3 + $0xe0] sm:$0xf0] }
 0x2de   : > { %v896_v8 = vpop.xlane.xlu1 %895 }
 0x2df   : > { %v901_v26 = vmul.f32 %v896_v8, %v5375_v12  ;;  %v4897_v8 = vld [vmem:[%s7436_s3 + $0xbc] sm:$0xf] }
 0x2e1   : > { %v5811_v56 = vsub.f32 %v5790_v3, %v901_v26  ;;  %v4306_v26 = vor.u32 %v4898_v4, %v4305_v6  ;;  %v4929_v4 = vld [vmem:[%s7434_s1 + $0x30] sm:$0xff] }
 0x2e3   : > { %v909_v9 = vmul.f32 %v5811_v56, %v5811_v56  ;;  %1160 = vmatpush.bf16.msrb.mxu0 %v4306_v26 }
 0x2e5   : > { %915 = vadd.xlane.f32.xlu2 %v909_v9  ;;  %v4307_v9 = vld [vmem:[%s7436_s3 + $0xe4] sm:$0xf0] }
 0x2e6   : > { %v898_v13 = vpop.xlane.xlu2 %897  ;;  %v4310_v19 = vor.u32 %v4897_v8, %v4307_v9 }
 0x2e7   : > { %v902_v14 = vmul.f32 %v898_v13, %v5375_v12  ;;  %v4313_v13 = vld [vmem:[%s7436_s3 + $0xc0] sm:$0xf]  ;;  %1161 = vmatpush.bf16.msrb.mxu0 %v4294_v25 }
 0x2e8   : > { %1179 = vmatpush.bf16.msrb.mxu1 %v4310_v19 }
 0x2e9   : > { %v5817_v15 = vsub.f32 %v5794_v5, %v902_v14  ;;  %v4899_v14 = vld [vmem:[%s7436_s3 + $0xe8] sm:$0xf0] }
 0x2ea   : > { %v4314_v20 = vor.u32 %v4899_v14, %v4313_v13  ;;  %v5058_v13 = vld [vmem:[%s7438_s5 + $0x6] ss:$0 sm:$0xff] }
 0x2eb   : > { %v910_v16 = vmul.f32 %v5817_v15, %v5817_v15  ;;  %1162 = vmatpush.bf16.msrb.mxu0 %v4282_v38 }
 0x2ec   : > { %1198 = vmatpush.bf16.msrb.mxu2 %v4314_v20  ;;  %1180 = vmatpush.bf16.msrb.mxu1 %v4298_v31 }
 0x2ed   : > { %917 = vadd.xlane.f32.xlu0 %v910_v16 }
 0x2f0   : > { %1199 = vmatpush.bf16.msrb.mxu2 %v4302_v17  ;;  %1181 = vmatpush.bf16.msrb.mxu1 %v4286_v39 }
 0x2f4   : > { %1200 = vmatpush.bf16.msrb.mxu2 %v4290_v46 }
 0x348   : > { %v912_v2 = vpop.xlane.xlu0 %911 }
 0x349   : > { %v919_v11 = vmul.f32 %v912_v2, %v5375_v12  ;;  %v5057_v2 = vld [vmem:[%s7438_s5 + $0x5] ss:$0 sm:$0xff] }
 0x34b   : > { %v923_v16 = vadd.f32 1e-12, %v919_v11 }
 0x34d   : > { %5118 = vrsqrt.f32 %v923_v16  ;;  %vm933_vm14 = vweird.f32 %v923_v16 }
 0x350   : > { %v914_v32 = vpop.xlane.xlu1 %913 }
 0x351   : > { %v920_v33 = vmul.f32 %v914_v32, %v5375_v12 }
 0x353   : > { %v5119_v48 = vpop.eup %5118  ;;  %v924_v36 = vadd.f32 1e-12, %v920_v33 }
 0x354   : > { %v928_v35 = vmul.f32 %v5119_v48, %v923_v16  ;;  %vm934_vm13 = vweird.f32 %v5119_v48  ;;  %v1356_v16 = vsel %vm1330_vm0, %v4929_v4, 0 }
 0x355   : > { %5120 = vrsqrt.f32 %v924_v36  ;;  %vm935_vm15 = vmor %vm933_vm14, %vm934_vm13  ;;  %vm943_vm2 = vweird.f32 %v924_v36  ;;  %1362 = vmatpush.bf16.xpose.msrb.mxu3 %v1356_v16 }
 0x356   : > { %v929_v49 = vmul.f32 %v5119_v48, %v928_v35 }
 0x358   : > { %v930_v50 = vmul.f32 0.5, %v929_v49  ;;  %v916_v29 = vpop.xlane.xlu2 %915 }
 0x359   : > { %v921_v52 = vmul.f32 %v916_v29, %v5375_v12 }
 0x35a   : > { %v931_v30 = vsub.f32 1.5, %v930_v50  ;;  %v4924_v50 = vld [vmem:[%s7434_s1 + $0x8] sm:$0xff] }
 0x35b   : > { %v5121_v47 = vpop.eup %5120  ;;  %v925_v53 = vadd.f32 1e-12, %v921_v52  ;;  %v1341_v29 = vsel %vm1330_vm0, %v4924_v50, 0  ;;  %v4923_v52 = vld [vmem:[%s7434_s1] sm:$0xff] }
 0x35c   : > { %v932_v54 = vmul.f32 %v5119_v48, %v931_v30  ;;  %v938_v58 = vmul.f32 %v5121_v47, %v924_v36  ;;  %vm944_vm1 = vweird.f32 %v5121_v47  ;;  %v1338_v30 = vsel %vm1330_vm0, %v4923_v52, 0 }
 0x35d   : > { %5122 = vrsqrt.f32 %v925_v53  ;;  %vm945_vm3 = vmor %vm943_vm2, %vm944_vm1  ;;  %vm953_vm5 = vweird.f32 %v925_v53 }
 0x35e   : > { %v939_v59 = vmul.f32 %v5121_v47, %v938_v58  ;;  %v936_v41 = vsel %vm935_vm15, %v5119_v48, %v932_v54 }
 0x35f   : > { %v967_v63 = vmul.f32 %v936_v41, %v5799_v1  ;;  %v5060_v41 = vld [vmem:[%s7438_s5 + $0xb] ss:$0 sm:$0xff] }
 0x360   : > { %v940_v44 = vmul.f32 0.5, %v939_v59  ;;  %v918_v45 = vpop.xlane.xlu0 %917 }
 0x361   : > { %v922_v61 = vmul.f32 %v918_v45, %v5375_v12  ;;  %v974_v1 = vmul.f32 %v5057_v2, %v967_v63 }
 0x362   : > { %v941_v18 = vsub.f32 1.5, %v940_v44 }
 0x363   : > { %v5123_v62 = vpop.eup %5122  ;;  %v926_v55 = vadd.f32 1e-12, %v922_v61  ;;  %v981_v22 = vadd.f32 %v5058_v13, %v974_v1 }
 0x364   : > { %v942_v11 = vmul.f32 %v5121_v47, %v941_v18  ;;  %v948_v6 = vmul.f32 %v5123_v62, %v925_v53  ;;  %vm954_vm4 = vweird.f32 %v5123_v62 }
 0x365   : > { %5124 = vrsqrt.f32 %v926_v55  ;;  %vm955_vm6 = vmor %vm953_vm5, %vm954_vm4  ;;  %vm963_vm8 = vweird.f32 %v926_v55 }
 0x366   : > { %v946_v8 = vsel %vm945_vm3, %v5121_v47, %v942_v11  ;;  %v949_v26 = vmul.f32 %v5123_v62, %v948_v6  ;;  %v1019_v47 = vld [vmem:[%s7438_s5 + $0x7] sm:$0x7] }
 0x367   : > { %v968_v9 = vmul.f32 %v946_v8, %v5805_v7  ;;  %v4928_v7 = vld [vmem:[%s7434_s1 + $0x28] sm:$0xff]  ;;  %v1021_v53 = vperm.slane %v1019_v47, 0  ;;  %v1022_v16 = vperm.slane %v1019_v47, 1 }
 0x368   : > { %v950_v14 = vmul.f32 0.5, %v949_v26  ;;  %v1353_v32 = vsel %vm1330_vm0, %v4928_v7, 0 }
 0x369   : > { %v975_v19 = vmul.f32 %v5057_v2, %v968_v9  ;;  %1363 = vmatpush.bf16.xpose.msrb.mxu3 %v1353_v32 }
 0x36a   : > { %v951_v20 = vsub.f32 1.5, %v950_v14 }
 0x36b   : > { %v5125_v21 = vpop.eup %5124  ;;  %v982_v23 = vadd.f32 %v5058_v13, %v975_v19 }
 0x36c   : > { %v952_v25 = vmul.f32 %v5123_v62, %v951_v20  ;;  %v958_v0 = vmul.f32 %v5125_v21, %v926_v55  ;;  %vm964_vm7 = vweird.f32 %v5125_v21 }
 0x36d   : > { %v985_v27 = vpack.c.bf16 %v982_v23, %v981_v22  ;;  %vm965_vm9 = vmor %vm963_vm8, %vm964_vm7 }
 0x36e   : > { %v959_v28 = vmul.f32 %v5125_v21, %v958_v0  ;;  %v956_v31 = vsel %vm955_vm6, %v5123_v62, %v952_v25 }
 0x36f   : > { %1163 = vmatmul.bf16.vlgmr.msrb.gmra.mxu0 %v985_v27  ;;  %1182 = vmatmul.bf16.vlgmr.msrb.gmra.mxu1 %v985_v27  ;;  %v969_v34 = vmul.f32 %v956_v31, %v5811_v56  ;;  %v4926_v56 = vld [vmem:[%s7434_s1 + $0x18] sm:$0xff] }
 0x370   : > { %v960_v17 = vmul.f32 0.5, %v959_v28  ;;  %1201 = vmatmul.bf16.vlgmr.msrb.gmra.mxu2 %v985_v27  ;;  %v1347_v35 = vsel %vm1330_vm0, %v4926_v56, 0 }
 0x371   : > { %v976_v42 = vmul.f32 %v5057_v2, %v969_v34  ;;  %1364 = vmatpush.bf16.xpose.msrb.mxu3 %v1350_v43  ;;  %v1023_v34 = vperm.slane %v1019_v47, 2 }
 0x372   : > { %v961_v33 = vsub.f32 1.5, %v960_v17 }
 0x373   : > { %v983_v36 = vadd.f32 %v5058_v13, %v976_v42 }
 0x374   : > { %v962_v37 = vmul.f32 %v5125_v21, %v961_v33 }
 0x376   : > { %v966_v38 = vsel %vm965_vm9, %v5125_v21, %v962_v37 }
 0x377   : > { %v970_v40 = vmul.f32 %v966_v38, %v5817_v15  ;;  %v4925_v15 = vld [vmem:[%s7434_s1 + $0x10] sm:$0xff] }
 0x378   : > { %v1344_v49 = vsel %vm1330_vm0, %v4925_v15, 0 }
 0x379   : > { %v977_v48 = vmul.f32 %v5057_v2, %v970_v40  ;;  %1365 = vmatpush.bf16.xpose.msrb.mxu3 %v1347_v35 }
 0x37b   : > { %v984_v39 = vadd.f32 %v5058_v13, %v977_v48 }
 0x37d   : > { %v986_v46 = vpack.c.bf16 %v984_v39, %v983_v36 }
 0x37f   : > { %1168 = vmatmul.bf16.gmra.mxu0 %v986_v46  ;;  %1187 = vmatmul.bf16.gmra.mxu1 %v986_v46 }
 0x380   : > { %1206 = vmatmul.bf16.gmra.mxu2 %v986_v46 }
 0x381   : > { %1366 = vmatpush.bf16.xpose.msrb.mxu3 %v1344_v49 }
 0x389   : > { %1367 = vmatpush.bf16.xpose.msrb.mxu3 %v1341_v29 }
 0x391   : > { %1368 = vmatpush.bf16.xpose.msrb.mxu3 %v1338_v30 }
 0x3ec   : > { %v1164_v54 = vpop.f32.mrf.mxu0  ;;  %v1183_v58 = vpop.f32.mrf.mxu1 }
 0x3ed   : > { %v1165_v59 = vadd.f32 %v1164_v54, %v1021_v53  ;;  %v1184_v33 = vadd.f32 %v1183_v58, %v1022_v16 }
 0x3ef   : > { %v1228_v44 = vadd.f32 %v5060_v41, %v1165_v59  ;;  %v1216_v11 = vadd.f32 %v5059_v10, %v1165_v59  ;;  %v1236_v46 = vpack.c.bf16 %v1184_v33, %v1184_v33 }
 0x3f1   : > { %v1232_v62 = vpack.c.bf16 %v1228_v44, %v1228_v44  ;;  %v1220_v14 = vpack.c.bf16 %v1216_v11, %v1216_v11  ;;  %v4938_v44 = vld [vmem:[%s7434_s1 + $0x78] sm:$0xff] }
 0x3f3   : > { %v1202_v45 = vpop.f32.mrf.mxu2  ;;  %v1284_v6 = vunpack.c.l.b16 %v1232_v62  ;;  %v1399_v22 = vunpack.c.l.b16 %v1220_v14 }
 0x3f4   : > { %v1166_v60 = vpop.f32.mrf.mxu0  ;;  %v1185_v61 = vpop.f32.mrf.mxu1  ;;  %v1203_v30 = vadd.f32 %v1202_v45, %v1023_v34  ;;  %v1409_v45 = vunpack.c.l.b16 %v1236_v46 }
 0x3f5   : > { %v1167_v18 = vadd.f32 %v1166_v60, %v1021_v53  ;;  %v1186_v0 = vadd.f32 %v1185_v61, %v1022_v16 }
 0x3f6   : > { %v1240_v62 = vpack.c.bf16 %v1203_v30, %v1203_v30 }
 0x3f7   : > { %v1229_v63 = vadd.f32 %v5060_v41, %v1167_v18  ;;  %v1217_v55 = vadd.f32 %v5059_v10, %v1167_v18  ;;  %v1237_v42 = vpack.c.bf16 %v1186_v0, %v1186_v0  ;;  %v4933_v0 = vld [vmem:[%s7434_s1 + $0x50] sm:$0xff] }
 0x3f9   : > { %v1233_v2 = vpack.c.bf16 %v1229_v63, %v1229_v63  ;;  %v1221_v1 = vpack.c.bf16 %v1217_v55, %v1217_v55  ;;  %v1410_v54 = vunpack.c.l.b16 %v1237_v42 }
 0x3fb   : > { %v1285_v4 = vunpack.c.l.b16 %v1233_v2  ;;  %v1204_v8 = vpop.f32.mrf.mxu2  ;;  %v1400_v20 = vunpack.c.l.b16 %v1221_v1  ;;  %v6046_v2 = vpack.c.b16 %v1410_v54, %v1409_v45 }
 0x3fc   : > { %v1169_v26 = vpop.f32.mrf.mxu0  ;;  %v1188_v9 = vpop.f32.mrf.mxu1  ;;  %v1205_v35 = vadd.f32 %v1204_v8, %v1023_v34  ;;  %v4937_v8 = vld [vmem:[%s7434_s1 + $0x70] sm:$0xff] }
 0x3fd   : > { %v6020_v13 = vpack.c.b16 %v1285_v4, %v1284_v6  ;;  %v1170_v19 = vadd.f32 %v1169_v26, %v1021_v53  ;;  %v1189_v21 = vadd.f32 %v1188_v9, %v1022_v16  ;;  %v6026_v28 = vpack.c.b16 %v1400_v20, %v1399_v22 }
 0x3fe   : > { %v1241_v60 = vpack.c.bf16 %v1205_v35, %v1205_v35  ;;  %v1530_v9 = vunpack.c.l.b16 %v1240_v62  ;;  %v1438_v1 = vsel %vm1330_vm0, %v6046_v2, 0 }
 0x3ff   : > { %1582 = vrot.lane.b32.xlu1 %v6020_v13, %s5297_s28  ;;  %4407 = vmatmul.msk.bf16.vlgmr.msrb.gmra.mxu3 %vm1330_vm0, %v6020_v13  ;;  %v1230_v23 = vadd.f32 %v5060_v41, %v1170_v19  ;;  %v1238_v31 = vpack.c.bf16 %v1189_v21, %v1189_v21  ;;  %v1218_v48 = vadd.f32 %v5059_v10, %v1170_v19  ;;  %v4936_v19 = vld [vmem:[%s7434_s1 + $0x68] sm:$0xff]  ;;  %v4935_v21 = vld [vmem:[%s7434_s1 + $0x60] sm:$0xff] }
 0x400   : > { %v1531_v6 = vunpack.c.l.b16 %v1241_v60  ;;  %v1648_v20 = vsel %vm1330_vm0, %v4936_v19, 0  ;;  %v1645_v22 = vsel %vm1330_vm0, %v4935_v21, 0 }
 0x401   : > { %v1234_v37 = vpack.c.bf16 %v1230_v23, %v1230_v23  ;;  %v1411_v36 = vunpack.c.l.b16 %v1238_v31  ;;  %v1222_v58 = vpack.c.bf16 %v1218_v48, %v1218_v48  ;;  %v4934_v23 = vld [vmem:[%s7434_s1 + $0x58] sm:$0xff] }
 0x402   : > { %v6061_v14 = vpack.c.b16 %v1531_v6, %v1530_v9 }
 0x403   : > { %v1207_v25 = vpop.f32.mrf.mxu2  ;;  %v1286_v15 = vunpack.c.l.b16 %v1234_v37  ;;  %v1401_v11 = vunpack.c.l.b16 %v1222_v58 }
 0x404   : > { %v1171_v7 = vpop.f32.mrf.mxu0  ;;  %v1190_v27 = vpop.f32.mrf.mxu1  ;;  %v1208_v43 = vadd.f32 %v1207_v25, %v1023_v34  ;;  %v1642_v25 = vsel %vm1330_vm0, %v4934_v23, 0 }
 0x405   : > { %v1172_v17 = vadd.f32 %v1171_v7, %v1021_v53  ;;  %v1191_v32 = vadd.f32 %v1190_v27, %v1022_v16  ;;  %v1651_v16 = vsel %vm1330_vm0, %v4937_v8, 0  ;;  %v1639_v7 = vsel %vm1330_vm0, %v4933_v0, 0  ;;  %v4932_v27 = vld [vmem:[%s7434_s1 + $0x48] sm:$0xff] }
 0x406   : > { %v1242_v47 = vpack.c.bf16 %v1208_v43, %v1208_v43  ;;  %v1636_v31 = vsel %vm1330_vm0, %v4932_v27, 0 }
 0x407   : > { %v1219_v24 = vadd.f32 %v5059_v10, %v1172_v17  ;;  %v1231_v38 = vadd.f32 %v5060_v41, %v1172_v17  ;;  %v1239_v40 = vpack.c.bf16 %v1191_v32, %v1191_v32  ;;  %1690 = vrot.lane.b32.xlu1 %v6026_v28, %s5297_s28  ;;  %v1654_v10 = vsel %vm1330_vm0, %v4938_v44, 0  ;;  %v4931_v17 = vld [vmem:[%s7434_s1 + $0x40] sm:$0xff] }
 0x408   : > { %v1532_v63 = vunpack.c.l.b16 %v1242_v47  ;;  %1656 = vmatpush.bf16.xpose.msra.mxu2 %v1654_v10  ;;  %v1633_v32 = vsel %vm1330_vm0, %v4931_v17, 0 }
 0x409   : > { %v1235_v39 = vpack.c.bf16 %v1231_v38, %v1231_v38  ;;  %v1412_v56 = vunpack.c.l.b16 %v1239_v40  ;;  %v1223_v49 = vpack.c.bf16 %v1219_v24, %v1219_v24 }
 0x40b   : > { %v1287_v50 = vunpack.c.l.b16 %v1235_v39  ;;  %v6030_v29 = vpack.c.b16 %v1412_v56, %v1411_v36  ;;  %v1209_v52 = vpop.f32.mrf.mxu2  ;;  %v1402_v18 = vunpack.c.l.b16 %v1223_v49 }
 0x40c   : > { %v1210_v53 = vadd.f32 %v1209_v52, %v1023_v34  ;;  %v5303_v52 = vmov 0.0  }
 0x40d   : > { %v6032_v59 = vpack.c.b16 %v1287_v50, %v1286_v15  ;;  %1696 = vrot.lane.b32.xlu0 %v6030_v29, %s5297_s28  ;;  %v1441_v41 = vsel %vm1330_vm0, %v6030_v29, 0  ;;  %v6053_v26 = vpack.c.b16 %v1402_v18, %v1401_v11  ;;  %v6114_v50 = vld [vmem:[%s287_s10] sm:$0x1] }
 0x40e   : > { %v1243_v61 = vpack.c.bf16 %v1210_v53, %v1210_v53  ;;  %1449 = vmatpush.bf16.xpose.msra.mxu0 %v1441_v41  ;;  %vm1261_vm10 = vcmp.gt.s32.totalorder %v6114_v50, 0 }
 0x40f   : > { %1584 = vrot.lane.b32.xlu2 %v6032_v59, %s5297_s28  ;;  %4408 = vmatmul.msk.bf16.gmra.mxu3 %vm1330_vm0, %v6032_v59  ;;  %v1262_v30 = vsel %vm1261_vm10, -1e+09, %v5303_v52 }
 0x410   : > { %v1533_v55 = vunpack.c.l.b16 %v1243_v61  ;;  %1657 = vmatpush.bf16.xpose.msra.mxu2 %v1651_v16  ;;  %v6119_v54 = vperm.slane %v1262_v30, 0 }
 0x412   : > { %v6048_v4 = vpack.c.b16 %v1533_v55, %v1532_v63 }
 0x414   : > { %1550 = vmatpush.bf16.msra.mxu1 %v6048_v4  ;;  %5031 = vmatpush.bf16.msra.mxu3 %v6048_v4 }
 0x415   : > { %1692 = vrot.lane.b32.xlu0 %v6053_v26, %s5297_s28 }
 0x416   : > { %1450 = vmatpush.bf16.xpose.msra.mxu0 %v1438_v1 }
 0x417   : > { %1694 = vrot.lane.b32.xlu2 %v6046_v2, %s5297_s28 }
 0x418   : > { %1551 = vmatpush.bf16.msra.mxu1 %v6061_v14  ;;  %5032 = vmatpush.bf16.msra.mxu3 %v6061_v14 }
 0x419   : > { %1658 = vmatpush.bf16.xpose.msra.mxu2 %v1648_v20 }
 0x41d   : > { %4409 = vmatmul.msk.bf16.vlgmr.msra.gmra.mxu0 %vm1330_vm0, %v6026_v28 }
 0x421   : > { %1659 = vmatpush.bf16.xpose.msra.mxu2 %v1645_v22 }
 0x429   : > { %1660 = vmatpush.bf16.xpose.msra.mxu2 %v1642_v25 }
 0x42d   : > { %4410 = vmatmul.msk.bf16.gmra.mxu0 %vm1330_vm0, %v6053_v26 }
 0x431   : > { %1661 = vmatpush.bf16.xpose.msra.mxu2 %v1639_v7 }
 0x439   : > { %1662 = vmatpush.bf16.xpose.msra.mxu2 %v1636_v31 }
 0x441   : > { %1663 = vmatpush.bf16.xpose.msra.mxu2 %v1633_v32 }
 0x469   : > { %v1585_v34 = vpop.permute.xlu2 %1584 }
 0x471   : > { %v1583_v33 = vpop.permute.xlu1 %1582  ;;  %v1695_v40 = vpop.permute.xlu2 %1694 }
 0x472   : > { %4461 = vmatmul.msk.bf16.vlgmr.msra.gmra.mxu2 %vm1330_vm0, %v1583_v33  ;;  %v1721_v42 = vsel %vm1330_vm0, %v1695_v40, 0 }
 0x479   : > { %v1691_v48 = vpop.permute.xlu1 %1690 }
 0x47f   : > { %v1697_v37 = vpop.permute.xlu0 %1696 }
 0x480   : > { %v1724_v24 = vsel %vm1330_vm0, %v1697_v37, 0 }
 0x481   : > { %1732 = vmatpush.bf16.xpose.msrb.mxu0 %v1724_v24  ;;  %5033 = vmatpush.bf16.xpose.msrb.mxu2 %v1724_v24 }
 0x482   : > { %v1370_v38 = vpop.f32.mrf.mxu3  ;;  %4462 = vmatmul.msk.bf16.gmra.mxu2 %vm1330_vm0, %v1585_v34 }
 0x483   : > { %1381 = vrot.lane.b32.xlu2 %v1370_v38, %s5298_s22 }
 0x487   : > { %v1693_v36 = vpop.permute.xlu0 %1692 }
 0x489   : > { %1733 = vmatpush.bf16.xpose.msrb.mxu0 %v1721_v42  ;;  %5034 = vmatpush.bf16.xpose.msrb.mxu2 %v1721_v42 }
 0x48a   : > { %v1372_v43 = vpop.f32.mrf.mxu3 }
 0x48b   : > { %1385 = vrot.lane.b32.xlu1 %v1372_v43, %s5299_s23 }
 0x490   : > { %4463 = vmatmul.msk.bf16.vlgmr.msrb.gmra.mxu0 %vm1330_vm0, %v1691_v48 }
 0x492   : > { %4464 = vmatmul.msk.bf16.vlgmr.msrb.gmra.mxu2 %vm1330_vm0, %v1693_v36 }
 0x49a   : > { %v1452_v47 = vpop.f32.mrf.mxu0 }
 0x4a2   : > { %v1454_v63 = vpop.f32.mrf.mxu0 }
 0x4aa   : > { %v6129_v9 = vpop.f32.mrf.mxu0 }
 0x4b2   : > { %v6131_v1 = vpop.f32.mrf.mxu0 }
 0x4dd   : > { %v1382_v39 = vpop.permute.xlu2 %1381 }
 0x4de   : > { %1419 = vrot.lane.b32.xlu1 %v1382_v39, %s5300_s27 }
 0x4f5   : > { %v1665_v56 = vpop.f32.mrf.mxu2 }
 0x4f6   : > { %1676 = vrot.lane.b32.xlu0 %v1665_v56, %s5298_s22 }
 0x4fd   : > { %v1386_v46 = vpop.permute.xlu1 %1385  ;;  %v1667_v35 = vpop.f32.mrf.mxu2 }
 0x4fe   : > { %1680 = vrot.lane.b32.xlu2 %v1667_v35, %s5299_s23  ;;  %1421 = vrot.lane.b32.xlu0 %v1386_v46, %s5300_s27 }
 0x505   : > { %v1670_v15 = vpop.f32.mrf.mxu2 }
 0x506   : > { %1684 = vrot.lane.b32.xlu2 %v1670_v15, %s5301_s29 }
 0x50d   : > { %v1672_v49 = vpop.f32.mrf.mxu2  ;;  %v1735_v16 = vpop.f32.mrf.mxu0 }
 0x50e   : > { %1688 = vrot.lane.b32.xlu1 %v1672_v49, %s5302_s30 }
 0x515   : > { %v1737_v19 = vpop.f32.mrf.mxu0  ;;  %v1740_v31 = vpop.f32.mrf.mxu2 }
 0x51d   : > { %v1742_v24 = vpop.f32.mrf.mxu2 }
 0x550   : > { %v1420_v53 = vpop.permute.xlu1 %1419 }
 0x551   : > { %v1453_v58 = vadd.f32 %v1452_v47, %v1420_v53 }
 0x553   : > { %v1462_v41 = vmul.f32 0.17677669, %v1453_v58 }
 0x555   : > { %v1469_v44 = vadd.f32 %v6119_v54, %v1462_v41 }
 0x557   : > { %v1473_v60 = vsel %vm1330_vm0, %v1469_v44, -inf }
 0x558   : > { %1474 = vmax.xlane.f32.xlu1 %v1473_v60  ;;  %v1681_v61 = vpop.permute.xlu2 %1680 }
 0x559   : > { %1704 = vrot.lane.b32.xlu2 %v1681_v61, %s5300_s27 }
 0x560   : > { %v1685_v45 = vpop.permute.xlu2 %1684 }
 0x561   : > { %1706 = vrot.lane.b32.xlu2 %v1685_v45, %s5300_s27 }
 0x568   : > { %v1677_v18 = vpop.permute.xlu0 %1676 }
 0x569   : > { %1702 = vrot.lane.b32.xlu0 %v1677_v18, %s5300_s27  ;;  %v1375_v18 = vpop.f32.mrf.mxu3 }
 0x570   : > { %v1422_v62 = vpop.permute.xlu0 %1421 }
 0x571   : > { %v1455_v55 = vadd.f32 %v1454_v63, %v1422_v62 }
 0x573   : > { %v1463_v11 = vmul.f32 0.17677669, %v1455_v55 }
 0x575   : > { %v1470_v6 = vadd.f32 %v6119_v54, %v1463_v11 }
 0x577   : > { %v1476_v8 = vsel %vm1330_vm0, %v1470_v6, -inf }
 0x580   : > { %v1689_v10 = vpop.permute.xlu1 %1688 }
 0x581   : > { %1708 = vrot.lane.b32.xlu2 %v1689_v10, %s5300_s27 }
 0x593   : > { %1477 = vmax.xlane.f32.xlu0 %v1476_v8 }
 0x5b3   : > { %v1705_v20 = vpop.permute.xlu2 %1704 }
 0x5b4   : > { %v1738_v21 = vadd.f32 %v1737_v19, %v1705_v20 }
 0x5b6   : > { %v1746_v22 = vmul.f32 0.17677669, %v1738_v21 }
 0x5b8   : > { %v1750_v23 = vadd.f32 %v1746_v22, %v6119_v54 }
 0x5ba   : > { %v1756_v25 = vsel %vm1330_vm0, %v1750_v23, -inf }
 0x5bb   : > { %1757 = vmax.xlane.f32.xlu1 %v1756_v25  ;;  %v1707_v17 = vpop.permute.xlu2 %1706 }
 0x5bc   : > { %v1741_v32 = vadd.f32 %v1740_v31, %v1707_v17  ;;  %v1377_v31 = vpop.f32.mrf.mxu3 }
 0x5be   : > { %v1747_v34 = vmul.f32 0.17677669, %v1741_v32  ;;  %v5305_v32 = vmov 1.0  }
 0x5c0   : > { %v1751_v42 = vadd.f32 %v1747_v34, %v6119_v54  ;;  %v1263_v34 = vsel %vm1261_vm10, 0.0, %v5305_v32 }
 0x5c2   : > { %v1759_v56 = vsel %vm1330_vm0, %v1751_v42, -inf }
 0x5cb   : > { %v1475_v0 = vpop.xlane.xlu1 %1474 }
 0x5cc   : > { %v1485_v7 = vsub.f32 %v1469_v44, %v1475_v0 }
 0x5ce   : > { %v1489_v27 = vmul.f32 1.442695, %v1485_v7 }
 0x5d0   : > { %5126 = vpow2.f32 %v1489_v27 }
 0x5d6   : > { %v6135_v33 = vpop.eup %5126 }
 0x5d7   : > { %v1497_v37 = vsel %vm1330_vm0, %v6135_v33, 0.0 }
 0x5d8   : > { %1498 = vadd.xlane.f32.xlu0 %v1497_v37  ;;  %v6174_v37 = vperm.slane %v1263_v34, 0 }
 0x5db   : > { %v1709_v38 = vpop.permute.xlu2 %1708  ;;  %v1703_v40 = vpop.permute.xlu0 %1702 }
 0x5dc   : > { %v1743_v43 = vadd.f32 %v1742_v24, %v1709_v38  ;;  %v1736_v48 = vadd.f32 %v1735_v16, %v1703_v40 }
 0x5de   : > { %v1748_v36 = vmul.f32 0.17677669, %v1743_v43  ;;  %v1745_v39 = vmul.f32 0.17677669, %v1736_v48 }
 0x5e0   : > { %1760 = vmax.xlane.f32.xlu0 %v1759_v56  ;;  %v1752_v46 = vadd.f32 %v1748_v36, %v6119_v54  ;;  %v1749_v35 = vadd.f32 %v1745_v39, %v6119_v54 }
 0x5e2   : > { %v1762_v15 = vsel %vm1330_vm0, %v1752_v46, -inf  ;;  %v1753_v49 = vsel %vm1330_vm0, %v1749_v35, -inf }
 0x5e3   : > { %1763 = vmax.xlane.f32.xlu1 %v1762_v15  ;;  %1754 = vmax.xlane.f32.xlu2 %v1753_v49 }
 0x606   : > { %v1478_v52 = vpop.xlane.xlu0 %1477 }
 0x607   : > { %v1486_v30 = vsub.f32 %v1470_v6, %v1478_v52 }
 0x609   : > { %v1491_v47 = vmul.f32 1.442695, %v1486_v30 }
 0x60b   : > { %5128 = vpow2.f32 %v1491_v47 }
 0x611   : > { %v5129_v53 = vpop.eup %5128 }
 0x612   : > { %v1500_v58 = vsel %vm1330_vm0, %v5129_v53, 0.0 }
 0x613   : > { %1501 = vadd.xlane.f32.xlu1 %v1500_v58  ;;  %v4946_v58 = vld [vmem:[%s7434_s1 + $0xb8] sm:$0xff] }
 0x62c   : > { %1805 = vrot.lane.b32.xlu1 %v6048_v4, %s5297_s28 }
 0x62e   : > { %v1758_v41 = vpop.xlane.xlu1 %1757 }
 0x62f   : > { %v1766_v44 = vsub.f32 %v1750_v23, %v1758_v41 }
 0x631   : > { %v1771_v60 = vmul.f32 1.442695, %v1766_v44 }
 0x633   : > { %5130 = vpow2.f32 %v1771_v60  ;;  %v1999_v60 = vsel %vm1330_vm0, %v4946_v58, 0 }
 0x634   : > { %2041 = vrot.lane.b32.xlu1 %v6030_v29, %s5304_s11 }
 0x639   : > { %v6150_v61 = vpop.eup %5130 }
 0x63a   : > { %v1780_v45 = vsel %vm1330_vm0, %v6150_v61, 0.0 }
 0x63b   : > { %1781 = vadd.xlane.f32.xlu2 %v1780_v45 }
 0x63c   : > { %2035 = vrot.lane.b32.xlu1 %v6026_v28, %s5304_s11 }
 0x644   : > { %1389 = vrot.lane.b32.xlu1 %v1375_v18, %s5301_s29 }
 0x64b   : > { %v1499_v10 = vpop.xlane.xlu0 %1498 }
 0x653   : > { %v1761_v62 = vpop.xlane.xlu0 %1760 }
 0x654   : > { %v1767_v63 = vsub.f32 %v1751_v42, %v1761_v62 }
 0x656   : > { %v1773_v55 = vmul.f32 1.442695, %v1767_v63  ;;  %v1764_v11 = vpop.xlane.xlu1 %1763  ;;  %v1755_v6 = vpop.xlane.xlu2 %1754  ;;  %v4945_v63 = vld [vmem:[%s7434_s1 + $0xb0] sm:$0xff] }
 0x657   : > { %v1768_v8 = vsub.f32 %v1752_v46, %v1764_v11  ;;  %v1765_v16 = vsub.f32 %v1749_v35, %v1755_v6 }
 0x658   : > { %5132 = vpow2.f32 %v1773_v55  ;;  %v1996_v55 = vsel %vm1330_vm0, %v4945_v63, 0 }
 0x659   : > { %v1769_v19 = vmul.f32 1.442695, %v1765_v16  ;;  %v1775_v20 = vmul.f32 1.442695, %v1768_v8  ;;  %v4483_v16 = vld [vmem:[%s7436_s3 + $0x6c] sm:$0xf] }
 0x65b   : > { %5134 = vpow2.f32 %v1769_v19  ;;  %v4916_v19 = vld [vmem:[%s7436_s3 + $0x94] sm:$0xf0] }
 0x65c   : > { %5136 = vpow2.f32 %v1775_v20  ;;  %v4944_v20 = vld [vmem:[%s7434_s1 + $0xa8] sm:$0xff] }
 0x65d   : > { %5138 = vrcp.f32 %v1499_v10 }
 0x65e   : > { %v6157_v21 = vpop.eup %5132 }
 0x65f   : > { %v1783_v22 = vsel %vm1330_vm0, %v6157_v21, 0.0 }
 0x660   : > { %1784 = vadd.xlane.f32.xlu2 %v1783_v22  ;;  %v4484_v22 = vor.u32 %v4916_v19, %v4483_v16 }
 0x661   : > { %v5135_v23 = vpop.eup %5134 }
 0x662   : > { %v1777_v25 = vsel %vm1330_vm0, %v5135_v23, 0.0  ;;  %v5137_v0 = vpop.eup %5136  ;;  %1897 = vmatpush.bf16.msra.mxu0 %v4484_v22 }
 0x663   : > { %1778 = vadd.xlane.f32.xlu0 %v1777_v25  ;;  %v1786_v7 = vsel %vm1330_vm0, %v5137_v0, 0.0  ;;  %v5139_v17 = vpop.eup %5138 }
 0x664   : > { %v1513_v24 = vmul.f32 %v5139_v17, %v6135_v33  ;;  %v4915_v17 = vld [vmem:[%s7436_s3 + $0x3c] sm:$0xf0] }
 0x666   : > { %v1520_v42 = vmul.f32 %v6174_v37, %v1513_v24  ;;  %v4943_v24 = vld [vmem:[%s7434_s1 + $0xa0] sm:$0xff] }
 0x668   : > { %1787 = vadd.xlane.f32.xlu2 %v1786_v7 }
 0x677   : > { %1803 = vrot.lane.b32.xlu0 %v6061_v14, %s5297_s28 }
 0x67f   : > { %1929 = vrot.lane.b32.xlu0 %v6032_v59, %s5304_s11 }
 0x680   : > { %1927 = vrot.lane.b32.xlu2 %v6020_v13, %s5304_s11 }
 0x686   : > { %v1502_v27 = vpop.xlane.xlu1 %1501 }
 0x687   : > { %5140 = vrcp.f32 %v1502_v27  ;;  %2039 = vrot.lane.b32.xlu0 %v6046_v2, %s5304_s11 }
 0x688   : > { %1393 = vrot.lane.b32.xlu2 %v1377_v31, %s5302_s30  ;;  %v4479_v31 = vld [vmem:[%s7436_s3 + $0x14] sm:$0xf] }
 0x689   : > { %v4480_v34 = vor.u32 %v4915_v17, %v4479_v31 }
 0x68b   : > { %1898 = vmatpush.bf16.msra.mxu0 %v4480_v34 }
 0x68d   : > { %v5141_v38 = vpop.eup %5140 }
 0x68e   : > { %v1514_v40 = vmul.f32 %v5141_v38, %v5129_v53  ;;  %v1990_v38 = vsel %vm1330_vm0, %v4943_v24, 0 }
 0x68f   : > { %2037 = vrot.lane.b32.xlu0 %v6053_v26, %s5304_s11 }
 0x690   : > { %v1521_v43 = vmul.f32 %v6174_v37, %v1514_v40  ;;  %v4942_v40 = vld [vmem:[%s7434_s1 + $0x98] sm:$0xff] }
 0x692   : > { %v1524_v48 = vpack.c.bf16 %v1521_v43, %v1520_v42  ;;  %v1987_v42 = vsel %vm1330_vm0, %v4942_v40, 0  ;;  %v4941_v43 = vld [vmem:[%s7434_s1 + $0x90] sm:$0xff] }
 0x694   : > { %4411 = vmatmul.msk.bf16.vlgmr.msra.gmra.mxu1 %vm1330_vm0, %v1524_v48 }
 0x69e   : > { %v1806_v36 = vpop.permute.xlu1 %1805 }
 0x69f   : > { %1821 = vmatpush.bf16.msrb.mxu1 %v1806_v36  ;;  %v1984_v36 = vsel %vm1330_vm0, %v4941_v43, 0 }
 0x6a6   : > { %v2042_v50 = vpop.permute.xlu1 %2041 }
 0x6a7   : > { %v2069_v39 = vsel %vm1330_vm0, %v2042_v50, 0 }
 0x6a8   : > { %2077 = vmatpush.bf16.xpose.msra.mxu2 %v2069_v39  ;;  %v4940_v39 = vld [vmem:[%s7434_s1 + $0x88] sm:$0xff] }
 0x6ae   : > { %v2036_v56 = vpop.permute.xlu1 %2035  ;;  %v1782_v46 = vpop.xlane.xlu2 %1781 }
 0x6b6   : > { %v1390_v33 = vpop.permute.xlu1 %1389 }
 0x6b7   : > { %1423 = vrot.lane.b32.xlu0 %v1390_v33, %s5300_s27  ;;  %v1981_v33 = vsel %vm1330_vm0, %v4940_v39, 0 }
 0x6d3   : > { %v1785_v35 = vpop.xlane.xlu2 %1784 }
 0x6d6   : > { %v1779_v15 = vpop.xlane.xlu0 %1778 }
 0x6d7   : > { %5142 = vrcp.f32 %v1779_v15 }
 0x6d8   : > { %5144 = vrcp.f32 %v1782_v46 }
 0x6db   : > { %v1788_v49 = vpop.xlane.xlu2 %1787 }
 0x6dc   : > { %5146 = vrcp.f32 %v1788_v49 }
 0x6dd   : > { %v5143_v52 = vpop.eup %5142  ;;  %5148 = vrcp.f32 %v1785_v35  ;;  %v4939_v35 = vld [vmem:[%s7434_s1 + $0x80] sm:$0xff] }
 0x6de   : > { %v5145_v30 = vpop.eup %5144  ;;  %v1793_v53 = vmul.f32 %v5143_v52, %v5135_v23  ;;  %v1978_v15 = vsel %vm1330_vm0, %v4939_v35, 0 }
 0x6df   : > { %v1794_v41 = vmul.f32 %v5145_v30, %v6150_v61 }
 0x6e0   : > { %v1797_v44 = vmul.f32 %v1793_v53, %v6174_v37 }
 0x6e1   : > { %v1798_v45 = vmul.f32 %v1794_v41, %v6174_v37 }
 0x6e2   : > { %v5147_v61 = vpop.eup %5146 }
 0x6e3   : > { %v6184_v47 = vpop.permute.xlu2 %1927  ;;  %v1801_v62 = vpack.c.bf16 %v1798_v45, %v1797_v44  ;;  %v5149_v6 = vpop.eup %5148  ;;  %v1796_v8 = vmul.f32 %v5147_v61, %v5137_v0  ;;  %v1993_v0 = vsel %vm1330_vm0, %v4944_v20, 0 }
 0x6e4   : > { %v1795_v23 = vmul.f32 %v5149_v6, %v6157_v21 }
 0x6e5   : > { %v1800_v25 = vmul.f32 %v1796_v8, %v6174_v37 }
 0x6e6   : > { %v1799_v27 = vmul.f32 %v1795_v23, %v6174_v37 }
 0x6e8   : > { %v1802_v21 = vpack.c.bf16 %v1800_v25, %v1799_v27 }
 0x6e9   : > { %v1804_v18 = vpop.permute.xlu0 %1803 }
 0x6ea   : > { %1822 = vmatpush.bf16.msrb.mxu1 %v1804_v18 }
 0x6eb   : > { %v1394_v10 = vpop.permute.xlu2 %1393 }
 0x6ec   : > { %1425 = vrot.lane.b32.xlu1 %v1394_v10, %s5300_s27 }
 0x6ed   : > { %4465 = vmatmul.msk.bf16.vlgmr.msrb.gmra.mxu1 %vm1330_vm0, %v1801_v62 }
 0x6ee   : > { %2001 = vmatpush.bf16.xpose.msra.mxu1 %v1999_v60 }
 0x6f1   : > { %v1930_v11 = vpop.permute.xlu0 %1929 }
 0x6f6   : > { %2002 = vmatpush.bf16.xpose.msra.mxu1 %v1996_v55 }
 0x6f9   : > { %v2040_v7 = vpop.permute.xlu0 %2039 }
 0x6fa   : > { %v2066_v32 = vsel %vm1330_vm0, %v2040_v7, 0 }
 0x6fb   : > { %2078 = vmatpush.bf16.xpose.msra.mxu2 %v2066_v32 }
 0x6fd   : > { %4466 = vmatmul.msk.bf16.gmra.mxu1 %vm1330_vm0, %v1802_v21 }
 0x6fe   : > { %2003 = vmatpush.bf16.xpose.msra.mxu1 %v1993_v0 }
 0x701   : > { %v2038_v50 = vpop.permute.xlu0 %2037 }
 0x702   : > { %4537 = vmatmul.msk.bf16.vlgmr.msra.gmra.mxu2 %vm1330_vm0, %v2036_v56 }
 0x706   : > { %2004 = vmatpush.bf16.xpose.msra.mxu1 %v1990_v38 }
 0x70e   : > { %2005 = vmatpush.bf16.xpose.msra.mxu1 %v1987_v42 }
 0x711   : > { %v1553_v48 = vpop.f32.mrf.mxu1 }
 0x712   : > { %4538 = vmatmul.msk.bf16.gmra.mxu2 %vm1330_vm0, %v2038_v50 }
 0x716   : > { %2006 = vmatpush.bf16.xpose.msra.mxu1 %v1984_v36 }
 0x719   : > { %v1555_v56 = vpop.f32.mrf.mxu1 }
 0x71a   : > { %v1563_v46 = vpack.c.bf16 %v1555_v56, %v1553_v48 }
 0x71c   : > { %4485 = vmatmul.msk.bf16.vlgmr.msra.gmra.mxu0 %vm1330_vm0, %v1563_v46 }
 0x71e   : > { %2007 = vmatpush.bf16.xpose.msra.mxu1 %v1981_v33 }
 0x726   : > { %2008 = vmatpush.bf16.xpose.msra.mxu1 %v1978_v15 }
 0x729   : > { %v1424_v18 = vpop.permute.xlu0 %1423 }
 0x72a   : > { %v1458_v10 = vadd.f32 %v6129_v9, %v1424_v18 }
 0x72c   : > { %v1464_v62 = vmul.f32 0.17677669, %v1458_v10 }
 0x72d   : > { %4535 = vmatmul.msk.bf16.vlgmr.msra.gmra.mxu1 %vm1330_vm0, %v6184_v47 }
 0x72e   : > { %v1471_v55 = vadd.f32 %v6119_v54, %v1464_v62 }
 0x730   : > { %v1479_v6 = vsel %vm1330_vm0, %v1471_v55, -inf }
 0x73d   : > { %4536 = vmatmul.msk.bf16.gmra.mxu1 %vm1330_vm0, %v1930_v11 }
 0x75e   : > { %v1426_v63 = vpop.permute.xlu1 %1425 }
 0x75f   : > { %v1460_v61 = vadd.f32 %v6131_v1, %v1426_v63 }
 0x761   : > { %v1465_v11 = vmul.f32 0.17677669, %v1460_v61  ;;  %v4954_v61 = vld [vmem:[%s7434_s1 + $0xf8] sm:$0xff] }
 0x763   : > { %v1472_v8 = vadd.f32 %v6119_v54, %v1465_v11  ;;  %v4473_v11 = vld [vmem:[%s7436_s3 + $0x11c] sm:$0xf] }
 0x765   : > { %v1482_v16 = vsel %vm1330_vm0, %v1472_v8, -inf }
 0x76a   : > { %v6246_v49 = vpop.f32.mrf.mxu1 }
 0x772   : > { %v6248_v52 = vpop.f32.mrf.mxu1 }
 0x773   : > { %v1834_v30 = vpack.c.bf16 %v6248_v52, %v6246_v49 }
 0x77a   : > { %v6252_v53 = vpop.f32.mrf.mxu1 }
 0x782   : > { %v6254_v58 = vpop.f32.mrf.mxu1 }
 0x783   : > { %v1835_v41 = vpack.c.bf16 %v6254_v58, %v6252_v53 }
 0x785   : > { %v2080_v32 = vpop.f32.mrf.mxu2 }
 0x78d   : > { %v2082_v48 = vpop.f32.mrf.mxu2 }
 0x795   : > { %v2085_v46 = vpop.f32.mrf.mxu2 }
 0x79d   : > { %v2087_v18 = vpop.f32.mrf.mxu2 }
 0x7aa   : > { %v2010_v44 = vpop.f32.mrf.mxu1 }
 0x7ab   : > { %2021 = vrot.lane.b32.xlu2 %v2010_v44, %s5298_s22 }
 0x7b2   : > { %v2012_v47 = vpop.f32.mrf.mxu1 }
 0x7b3   : > { %2025 = vrot.lane.b32.xlu0 %v2012_v47, %s5299_s23 }
 0x7ba   : > { %v2015_v60 = vpop.f32.mrf.mxu1 }
 0x7bb   : > { %2029 = vrot.lane.b32.xlu1 %v2015_v60, %s5301_s29 }
 0x7c2   : > { %v2017_v45 = vpop.f32.mrf.mxu1 }
 0x7c3   : > { %2033 = vrot.lane.b32.xlu2 %v2017_v45, %s5302_s30 }
 0x7dd   : > { %1480 = vmax.xlane.f32.xlu0 %v1479_v6  ;;  %v4918_v6 = vld [vmem:[%s7436_s3 + $0x144] sm:$0xf0] }
 0x7e5   : > { %1483 = vmax.xlane.f32.xlu1 %v1482_v16  ;;  %v4474_v16 = vor.u32 %v4918_v6, %v4473_v11 }
 0x7e7   : > { %1860 = vmatpush.bf16.msrb.mxu3 %v4474_v16 }
 0x805   : > { %v2022_v19 = vpop.permute.xlu2 %2021 }
 0x806   : > { %2047 = vrot.lane.b32.xlu2 %v2022_v19, %s5300_s27  ;;  %v4469_v19 = vld [vmem:[%s7436_s3 + $0xc4] sm:$0xf] }
 0x81d   : > { %v2034_v1 = vpop.permute.xlu2 %2033 }
 0x825   : > { %v2026_v20 = vpop.permute.xlu0 %2025 }
 0x826   : > { %2049 = vrot.lane.b32.xlu2 %v2026_v20, %s5300_s27  ;;  %v4917_v20 = vld [vmem:[%s7436_s3 + $0xec] sm:$0xf0] }
 0x82d   : > { %v2030_v9 = vpop.permute.xlu1 %2029 }
 0x82e   : > { %2051 = vrot.lane.b32.xlu2 %v2030_v9, %s5300_s27  ;;  %v4470_v9 = vor.u32 %v4917_v20, %v4469_v19 }
 0x830   : > { %1861 = vmatpush.bf16.msrb.mxu3 %v4470_v9 }
 0x836   : > { %2053 = vrot.lane.b32.xlu2 %v2034_v1, %s5300_s27  ;;  %v4952_v1 = vld [vmem:[%s7434_s1 + $0xe8] sm:$0xff] }
 0x850   : > { %v1481_v22 = vpop.xlane.xlu0 %1480 }
 0x851   : > { %v1487_v23 = vsub.f32 %v1471_v55, %v1481_v22  ;;  %v2311_v55 = vsel %vm1330_vm0, %v4954_v61, 0  ;;  %v2305_v22 = vsel %vm1330_vm0, %v4952_v1, 0 }
 0x852   : > { %2313 = vmatpush.bf16.xpose.msrb.mxu2 %v2311_v55 }
 0x853   : > { %v1493_v25 = vmul.f32 1.442695, %v1487_v23 }
 0x855   : > { %5150 = vpow2.f32 %v1493_v25  ;;  %v4951_v25 = vld [vmem:[%s7434_s1 + $0xe0] sm:$0xff] }
 0x858   : > { %v1484_v0 = vpop.xlane.xlu1 %1483 }
 0x859   : > { %v1488_v7 = vsub.f32 %v1472_v8, %v1484_v0 }
 0x85b   : > { %v6272_v27 = vpop.eup %5150  ;;  %v1495_v31 = vmul.f32 1.442695, %v1488_v7  ;;  %v2302_v7 = vsel %vm1330_vm0, %v4951_v25, 0 }
 0x85c   : > { %v1503_v17 = vsel %vm1330_vm0, %v6272_v27, 0.0 }
 0x85d   : > { %5152 = vpow2.f32 %v1495_v31  ;;  %1504 = vadd.xlane.f32.xlu1 %v1503_v17 }
 0x860   : > { %v2048_v34 = vpop.permute.xlu2 %2047 }
 0x861   : > { %v2081_v21 = vadd.f32 %v2080_v32, %v2048_v34 }
 0x863   : > { %v5153_v24 = vpop.eup %5152  ;;  %v2090_v38 = vmul.f32 0.17677669, %v2081_v21 }
 0x864   : > { %v1506_v40 = vsel %vm1330_vm0, %v5153_v24, 0.0 }
 0x865   : > { %1507 = vadd.xlane.f32.xlu0 %v1506_v40  ;;  %v2094_v42 = vadd.f32 %v2090_v38, %v6119_v54 }
 0x867   : > { %v2098_v43 = vsel %vm1330_vm0, %v2094_v42, -inf }
 0x868   : > { %2099 = vmax.xlane.f32.xlu2 %v2098_v43  ;;  %v4950_v43 = vld [vmem:[%s7434_s1 + $0xd8] sm:$0xff] }
 0x880   : > { %v2050_v36 = vpop.permute.xlu2 %2049 }
 0x881   : > { %v2083_v50 = vadd.f32 %v2082_v48, %v2050_v36 }
 0x883   : > { %v2091_v39 = vmul.f32 0.17677669, %v2083_v50  ;;  %v2299_v50 = vsel %vm1330_vm0, %v4950_v43, 0 }
 0x885   : > { %v6280_v56 = vadd.f32 %v2091_v39, %v6119_v54 }
 0x887   : > { %v2101_v33 = vsel %vm1330_vm0, %v6280_v56, -inf }
 0x888   : > { %v2052_v35 = vpop.permute.xlu2 %2051  ;;  %2102 = vmax.xlane.f32.xlu0 %v2101_v33 }
 0x889   : > { %v2086_v15 = vadd.f32 %v2085_v46, %v2052_v35  ;;  %v4948_v46 = vld [vmem:[%s7434_s1 + $0xc8] sm:$0xff] }
 0x88a   : > { %v2293_v35 = vsel %vm1330_vm0, %v4948_v46, 0  ;;  %v4547_v46 = vld [vmem:[%s7436_s3 + $0x1cc] sm:$0xf] }
 0x88b   : > { %v2092_v44 = vmul.f32 0.17677669, %v2086_v15  ;;  %v4947_v15 = vld [vmem:[%s7434_s1 + $0xc0] sm:$0xff] }
 0x88d   : > { %v6285_v47 = vadd.f32 %v2092_v44, %v6119_v54  ;;  %v2290_v44 = vsel %vm1330_vm0, %v4947_v15, 0 }
 0x88f   : > { %v2104_v60 = vsel %vm1330_vm0, %v6285_v47, -inf }
 0x890   : > { %2105 = vmax.xlane.f32.xlu1 %v2104_v60  ;;  %v2054_v45 = vpop.permute.xlu2 %2053 }
 0x891   : > { %v2088_v10 = vadd.f32 %v2087_v18, %v2054_v45 }
 0x893   : > { %v2093_v62 = vmul.f32 0.17677669, %v2088_v10 }
 0x895   : > { %v6294_v63 = vadd.f32 %v2093_v62, %v6119_v54 }
 0x89c   : > { %2241 = vrot.lane.b32.xlu0 %v6032_v59, %s5306_s21  ;;  %v2107_v59 = vsel %vm1330_vm0, %v6294_v63, -inf }
 0x8a9   : > { %2239 = vrot.lane.b32.xlu1 %v6020_v13, %s5306_s21  ;;  %v4953_v13 = vld [vmem:[%s7434_s1 + $0xf0] sm:$0xff] }
 0x8aa   : > { %v2308_v8 = vsel %vm1330_vm0, %v4953_v13, 0 }
 0x8ab   : > { %2314 = vmatpush.bf16.xpose.msrb.mxu2 %v2308_v8 }
 0x8b3   : > { %2315 = vmatpush.bf16.xpose.msrb.mxu2 %v2305_v22 }
 0x8bb   : > { %2316 = vmatpush.bf16.xpose.msrb.mxu2 %v2302_v7 }
 0x8c3   : > { %2317 = vmatpush.bf16.xpose.msrb.mxu2 %v2299_v50 }
 0x8c6   : > { %2108 = vmax.xlane.f32.xlu0 %v2107_v59 }
 0x8d0   : > { %v1505_v23 = vpop.xlane.xlu1 %1504 }
 0x8d1   : > { %5154 = vrcp.f32 %v1505_v23 }
 0x8d7   : > { %v5155_v31 = vpop.eup %5154 }
 0x8d8   : > { %v1508_v0 = vpop.xlane.xlu0 %1507  ;;  %v1515_v34 = vmul.f32 %v5155_v31, %v6272_v27 }
 0x8d9   : > { %5156 = vrcp.f32 %v1508_v0 }
 0x8da   : > { %2150 = vrot.lane.b32.xlu0 %v6048_v4, %s5304_s11  ;;  %v1522_v48 = vmul.f32 %v6174_v37, %v1515_v34 }
 0x8db   : > { %v2100_v17 = vpop.xlane.xlu2 %2099 }
 0x8dc   : > { %v2110_v32 = vsub.f32 %v2094_v42, %v2100_v17 }
 0x8de   : > { %v2114_v21 = vmul.f32 1.442695, %v2110_v32 }
 0x8df   : > { %v5157_v38 = vpop.eup %5156 }
 0x8e0   : > { %v1516_v40 = vmul.f32 %v5157_v38, %v5153_v24  ;;  %5158 = vpow2.f32 %v2114_v21  ;;  %v4949_v24 = vld [vmem:[%s7434_s1 + $0xd0] sm:$0xff] }
 0x8e1   : > { %v2296_v33 = vsel %vm1330_vm0, %v4949_v24, 0 }
 0x8e2   : > { %v1523_v36 = vmul.f32 %v6174_v37, %v1516_v40  ;;  %2318 = vmatpush.bf16.xpose.msrb.mxu2 %v2296_v33 }
 0x8e4   : > { %v1525_v39 = vpack.c.bf16 %v1523_v36, %v1522_v48 }
 0x8e6   : > { %v5159_v42 = vpop.eup %5158  ;;  %4412 = vmatmul.msk.bf16.vlgmr.msra.gmra.mxu3 %vm1330_vm0, %v1525_v39 }
 0x8e7   : > { %v2122_v27 = vsel %vm1330_vm0, %v5159_v42, 0.0 }
 0x8e8   : > { %2123 = vadd.xlane.f32.xlu2 %v2122_v27 }
 0x8ea   : > { %2319 = vmatpush.bf16.xpose.msrb.mxu2 %v2293_v35  ;;  %v4920_v35 = vld [vmem:[%s7436_s3 + $0x1f4] sm:$0xf0] }
 0x8eb   : > { %v4548_v15 = vor.u32 %v4920_v35, %v4547_v46 }
 0x8ed   : > { %2205 = vmatpush.bf16.msrb.mxu0 %v4548_v15 }
 0x8f2   : > { %2320 = vmatpush.bf16.xpose.msrb.mxu2 %v2290_v44 }
 0x8f6   : > { %4475 = vmatmul.msk.bf16.vlgmr.msrb.gmra.mxu3 %vm1330_vm0, %v1834_v30 }
 0x8fb   : > { %v2103_v60 = vpop.xlane.xlu0 %2102 }
 0x8fc   : > { %v2111_v45 = vsub.f32 %v6280_v56, %v2103_v60  ;;  %v4543_v60 = vld [vmem:[%s7436_s3 + $0x174] sm:$0xf] }
 0x8fe   : > { %v2116_v18 = vmul.f32 1.442695, %v2111_v45  ;;  %v4919_v45 = vld [vmem:[%s7436_s3 + $0x19c] sm:$0xf0] }
 0x900   : > { %5160 = vpow2.f32 %v2116_v18  ;;  %2148 = vrot.lane.b32.xlu2 %v6061_v14, %s5304_s11  ;;  %v4544_v18 = vor.u32 %v4919_v45, %v4543_v60 }
 0x902   : > { %2206 = vmatpush.bf16.msrb.mxu0 %v4544_v18 }
 0x903   : > { %v2106_v10 = vpop.xlane.xlu1 %2105 }
 0x904   : > { %v2112_v62 = vsub.f32 %v6285_v47, %v2106_v10 }
 0x906   : > { %v5161_v61 = vpop.eup %5160  ;;  %v2118_v55 = vmul.f32 1.442695, %v2112_v62  ;;  %4476 = vmatmul.msk.bf16.gmra.mxu3 %vm1330_vm0, %v1835_v41 }
 0x907   : > { %v2125_v49 = vsel %vm1330_vm0, %v5161_v61, 0.0 }
 0x908   : > { %5162 = vpow2.f32 %v2118_v55  ;;  %2126 = vadd.xlane.f32.xlu1 %v2125_v49 }
 0x90e   : > { %v5163_v52 = vpop.eup %5162  ;;  %v2242_v53 = vpop.permute.xlu0 %2241 }
 0x90f   : > { %v2128_v30 = vsel %vm1330_vm0, %v5163_v52, 0.0 }
 0x910   : > { %2129 = vadd.xlane.f32.xlu0 %v2128_v30 }
 0x91b   : > { %v2240_v56 = vpop.permute.xlu1 %2239 }
 0x91c   : > { %4599 = vmatmul.msk.bf16.vlgmr.msrb.gmra.mxu2 %vm1330_vm0, %v2240_v56 }
 0x921   : > { %2353 = vrot.lane.b32.xlu1 %v6030_v29, %s5306_s21 }
 0x924   : > { %2351 = vrot.lane.b32.xlu0 %v6046_v2, %s5306_s21 }
 0x929   : > { %2347 = vrot.lane.b32.xlu1 %v6026_v28, %s5306_s21 }
 0x92c   : > { %4600 = vmatmul.msk.bf16.gmra.mxu2 %vm1330_vm0, %v2242_v53 }
 0x939   : > { %v2109_v58 = vpop.xlane.xlu0 %2108 }
 0x93a   : > { %v2113_v41 = vsub.f32 %v6294_v63, %v2109_v58 }
 0x93c   : > { %v2120_v47 = vmul.f32 1.442695, %v2113_v41 }
 0x93e   : > { %5164 = vpow2.f32 %v2120_v47 }
 0x944   : > { %v5165_v59 = vpop.eup %5164 }
 0x945   : > { %v2131_v13 = vsel %vm1330_vm0, %v5165_v59, 0.0 }
 0x946   : > { %2132 = vadd.xlane.f32.xlu2 %v2131_v13  ;;  %v1900_v13 = vpop.f32.mrf.mxu0 }
 0x94c   : > { %v2151_v11 = vpop.permute.xlu0 %2150 }
 0x94d   : > { %2166 = vmatpush.bf16.msra.mxu3 %v2151_v11 }
 0x95b   : > { %v2124_v29 = vpop.xlane.xlu2 %2123 }
 0x95c   : > { %5166 = vrcp.f32 %v2124_v29  ;;  %v1902_v29 = vpop.f32.mrf.mxu0 }
 0x95e   : > { %2349 = vrot.lane.b32.xlu2 %v6053_v26, %s5306_s21 }
 0x962   : > { %v5167_v16 = vpop.eup %5166 }
 0x963   : > { %v2149_v2 = vpop.permute.xlu2 %2148  ;;  %v2138_v19 = vmul.f32 %v5167_v16, %v5159_v42 }
 0x964   : > { %2167 = vmatpush.bf16.msra.mxu3 %v2149_v2 }
 0x965   : > { %v2142_v1 = vmul.f32 %v2138_v19, %v6174_v37 }
 0x969   : > { %v1558_v28 = vpop.f32.mrf.mxu3 }
 0x971   : > { %v1560_v6 = vpop.f32.mrf.mxu3 }
 0x972   : > { %v1564_v8 = vpack.c.bf16 %v1560_v6, %v1558_v28 }
 0x974   : > { %4486 = vmatmul.msk.bf16.gmra.mxu0 %vm1330_vm0, %v1564_v8 }
 0x979   : > { %v1863_v24 = vpop.f32.mrf.mxu3 }
 0x97b   : > { %v2127_v63 = vpop.xlane.xlu1 %2126 }
 0x97c   : > { %5168 = vrcp.f32 %v2127_v63 }
 0x981   : > { %v1865_v44 = vpop.f32.mrf.mxu3 }
 0x982   : > { %v5169_v20 = vpop.eup %5168 }
 0x983   : > { %v2139_v9 = vmul.f32 %v5169_v20, %v5161_v61  ;;  %v2130_v26 = vpop.xlane.xlu0 %2129 }
 0x984   : > { %5170 = vrcp.f32 %v2130_v26 }
 0x985   : > { %v2143_v22 = vmul.f32 %v2139_v9, %v6174_v37 }
 0x987   : > { %v2146_v23 = vpack.c.bf16 %v2143_v22, %v2142_v1 }
 0x989   : > { %4539 = vmatmul.msk.bf16.vlgmr.msra.gmra.mxu3 %vm1330_vm0, %v2146_v23  ;;  %v1868_v10 = vpop.f32.mrf.mxu3 }
 0x98a   : > { %v5171_v40 = vpop.eup %5170 }
 0x98b   : > { %v2140_v43 = vmul.f32 %v5171_v40, %v5163_v52 }
 0x98d   : > { %v2144_v50 = vmul.f32 %v2140_v43, %v6174_v37 }
 0x991   : > { %v6402_v62 = vpop.f32.mrf.mxu3 }
 0x993   : > { %v2354_v25 = vpop.permute.xlu1 %2353 }
 0x994   : > { %v2381_v0 = vsel %vm1330_vm0, %v2354_v25, 0 }
 0x995   : > { %2389 = vmatpush.bf16.xpose.msrb.mxu3 %v2381_v0 }
 0x996   : > { %v2352_v7 = vpop.permute.xlu0 %2351 }
 0x997   : > { %v2378_v31 = vsel %vm1330_vm0, %v2352_v7, 0 }
 0x99b   : > { %v2348_v27 = vpop.permute.xlu1 %2347 }
 0x99d   : > { %2390 = vmatpush.bf16.xpose.msrb.mxu3 %v2378_v31 }
 0x99f   : > { %v2322_v17 = vpop.f32.mrf.mxu2 }
 0x9a0   : > { %2333 = vrot.lane.b32.xlu0 %v2322_v17, %s5298_s22  ;;  %v1901_v17 = vadd.f32 %v1900_v13, %v1863_v24  ;;  %s292_s22 = scalar_lea.vmem %s7440_s7, %s4857_s26 }
 0x9a7   : > { %v2324_v32 = vpop.f32.mrf.mxu2 }
 0x9a8   : > { %2337 = vrot.lane.b32.xlu1 %v2324_v32, %s5299_s23 }
 0x9af   : > { %v2327_v34 = vpop.f32.mrf.mxu2 }
 0x9b0   : > { %2341 = vrot.lane.b32.xlu0 %v2327_v34, %s5301_s29 }
 0x9b7   : > { %v2329_v21 = vpop.f32.mrf.mxu2 }
 0x9b8   : > { %2345 = vrot.lane.b32.xlu1 %v2329_v21, %s5302_s30 }
 0x9b9   : > { %v2133_v38 = vpop.xlane.xlu2 %2132 }
 0x9ba   : > { %5172 = vrcp.f32 %v2133_v38  ;;  %v1903_v38 = vadd.f32 %v1902_v29, %v1865_v44  ;;  %v4611_v29 = vld [vmem:[%s7436_s3 + $0x27c] sm:$0xf] }
 0x9c0   : > { %v5173_v48 = vpop.eup %5172 }
 0x9c1   : > { %v2141_v36 = vmul.f32 %v5173_v48, %v5165_v59  ;;  %v2350_v33 = vpop.permute.xlu2 %2349 }
 0x9c3   : > { %v2145_v39 = vmul.f32 %v2141_v36, %v6174_v37 }
 0x9c5   : > { %v2147_v42 = vpack.c.bf16 %v2145_v39, %v2144_v50 }
 0x9c7   : > { %4540 = vmatmul.msk.bf16.gmra.mxu3 %vm1330_vm0, %v2147_v42 }
 0x9d7   : > { %4601 = vmatmul.msk.bf16.vlgmr.msrb.gmra.mxu3 %vm1330_vm0, %v2348_v27 }
 0x9e7   : > { %4602 = vmatmul.msk.bf16.gmra.mxu3 %vm1330_vm0, %v2350_v33 }
 0x9f1   : > { %v1905_v63 = vpop.f32.mrf.mxu0 }
 0x9f2   : > { %v1906_v24 = vadd.f32 %v1905_v63, %v1868_v10 }
 0x9f9   : > { %v6413_v23 = vpop.f32.mrf.mxu0 }
 0xa0c   : > { %v2169_v61 = vpop.f32.mrf.mxu3 }
 0xa12   : > { %v2334_v55 = vpop.permute.xlu0 %2333 }
 0xa13   : > { %2359 = vrot.lane.b32.xlu0 %v2334_v55, %s5300_s27 }
 0xa14   : > { %v2171_v49 = vpop.f32.mrf.mxu3 }
 0xa15   : > { %v2179_v52 = vpack.c.bf16 %v2171_v49, %v2169_v61 }
 0xa17   : > { %4549 = vmatmul.msk.bf16.vlgmr.msrb.gmra.mxu0 %vm1330_vm0, %v2179_v52 }
 0xa1a   : > { %v2338_v30 = vpop.permute.xlu1 %2337 }
 0xa1b   : > { %2361 = vrot.lane.b32.xlu1 %v2338_v30, %s5300_s27 }
 0xa22   : > { %v2342_v56 = vpop.permute.xlu0 %2341 }
 0xa23   : > { %2363 = vrot.lane.b32.xlu2 %v2342_v56, %s5300_s27 }
 0xa2a   : > { %v2346_v53 = vpop.permute.xlu1 %2345 }
 0xa2b   : > { %2365 = vrot.lane.b32.xlu0 %v2346_v53, %s5300_s27 }
 0xa4a   : > { %v2174_v58 = vpop.f32.mrf.mxu3 }
 0xa52   : > { %v2176_v41 = vpop.f32.mrf.mxu3 }
 0xa53   : > { %v2180_v47 = vpack.c.bf16 %v2176_v41, %v2174_v58 }
 0xa55   : > { %4550 = vmatmul.msk.bf16.gmra.mxu0 %vm1330_vm0, %v2180_v47 }
 0xa5a   : > { %v2392_v59 = vpop.f32.mrf.mxu3 }
 0xa62   : > { %v2394_v11 = vpop.f32.mrf.mxu3 }
 0xa6a   : > { %v2397_v2 = vpop.f32.mrf.mxu3 }
 0xa72   : > { %v2399_v43 = vpop.f32.mrf.mxu3 }
 0xa7d   : > { %v2364_v28 = vpop.permute.xlu2 %2363 }
 0xa7e   : > { %v2398_v6 = vadd.f32 %v2397_v2, %v2364_v28  ;;  %v4922_v2 = vld [vmem:[%s7436_s3 + $0x2a4] sm:$0xf0]  ;;  %v4607_v28 = vld [vmem:[%s7436_s3 + $0x224] sm:$0xf] }
 0xa80   : > { %v2404_v8 = vmul.f32 0.17677669, %v2398_v6  ;;  %v4612_v6 = vor.u32 %v4922_v2, %v4611_v29 }
 0xa82   : > { %v2408_v16 = vadd.f32 %v2404_v8, %v6119_v54  ;;  %2517 = vmatpush.bf16.msrb.mxu1 %v4612_v6  ;;  %v4673_v6 = vld [vmem:[%s7436_s3 + $0x280] sm:$0xf] }
 0xa84   : > { %v2416_v19 = vsel %vm1330_vm0, %v2408_v16, -inf }
 0xa85   : > { %v2360_v20 = vpop.permute.xlu0 %2359  ;;  %2417 = vmax.xlane.f32.xlu0 %v2416_v19 }
 0xa86   : > { %v2393_v9 = vadd.f32 %v2392_v59, %v2360_v20 }
 0xa88   : > { %v2402_v1 = vmul.f32 0.17677669, %v2393_v9 }
 0xa8a   : > { %v2406_v22 = vadd.f32 %v2402_v1, %v6119_v54 }
 0xa8c   : > { %v2410_v26 = vsel %vm1330_vm0, %v2406_v22, -inf }
 0xa8d   : > { %2411 = vmax.xlane.f32.xlu1 %v2410_v26  ;;  %v2362_v25 = vpop.permute.xlu1 %2361 }
 0xa8e   : > { %v2395_v0 = vadd.f32 %v2394_v11, %v2362_v25 }
 0xa90   : > { %v2403_v7 = vmul.f32 0.17677669, %v2395_v0 }
 0xa92   : > { %v2407_v31 = vadd.f32 %v2403_v7, %v6119_v54 }
 0xa94   : > { %v2208_v32 = vpop.f32.mrf.mxu0  ;;  %v2413_v34 = vsel %vm1330_vm0, %v2407_v31, -inf }
 0xa95   : > { %v6418_v21 = vadd.f32 %v2208_v32, %v1901_v17  ;;  %2414 = vmax.xlane.f32.xlu2 %v2413_v34 }
 0xa9c   : > { %v2210_v40 = vpop.f32.mrf.mxu0 }
 0xa9d   : > { %v6420_v48 = vadd.f32 %v2210_v40, %v1903_v38  ;;  %v2366_v36 = vpop.permute.xlu0 %2365 }
 0xa9e   : > { %v2400_v50 = vadd.f32 %v2399_v43, %v2366_v36 }
 0xaa0   : > { %v2405_v39 = vmul.f32 0.17677669, %v2400_v50 }
 0xaa2   : > { %v2409_v42 = vadd.f32 %v2405_v39, %v6119_v54 }
 0xaa4   : > { %v2419_v27 = vsel %vm1330_vm0, %v2409_v42, -inf }
 0xaa5   : > { %2420 = vmax.xlane.f32.xlu1 %v2419_v27 }
 0xabe   : > { %2462 = vrot.lane.b32.xlu1 %v6048_v4, %s5306_s21 }
 0xad2   : > { %v2213_v33 = vpop.f32.mrf.mxu0 }
 0xad3   : > { %v6426_v46 = vadd.f32 %v2213_v33, %v1906_v24 }
 0xada   : > { %v2215_v36 = vpop.f32.mrf.mxu0 }
 0xaf8   : > { %v2418_v60 = vpop.xlane.xlu0 %2417 }
 0xaf9   : > { %v2424_v55 = vsub.f32 %v2408_v16, %v2418_v60 }
 0xafb   : > { %v2430_v52 = vmul.f32 1.442695, %v2424_v55 }
 0xb00   : > { %v2412_v35 = vpop.xlane.xlu1 %2411 }
 0xb01   : > { %v2422_v15 = vsub.f32 %v2406_v22, %v2412_v35 }
 0xb03   : > { %v2426_v44 = vmul.f32 1.442695, %v2422_v15 }
 0xb05   : > { %5174 = vpow2.f32 %v2426_v44 }
 0xb08   : > { %v2415_v45 = vpop.xlane.xlu2 %2414 }
 0xb09   : > { %v2423_v18 = vsub.f32 %v2407_v31, %v2415_v45 }
 0xb0b   : > { %v5175_v61 = vpop.eup %5174  ;;  %v2428_v54 = vmul.f32 1.442695, %v2423_v18 }
 0xb0c   : > { %v2434_v49 = vsel %vm1330_vm0, %v5175_v61, 0.0 }
 0xb0d   : > { %5176 = vpow2.f32 %v2428_v54  ;;  %2435 = vadd.xlane.f32.xlu2 %v2434_v49 }
 0xb0e   : > { %5178 = vpow2.f32 %v2430_v52 }
 0xb13   : > { %v5177_v4 = vpop.eup %5176 }
 0xb14   : > { %v2437_v10 = vsel %vm1330_vm0, %v5177_v4, 0.0  ;;  %v5179_v56 = vpop.eup %5178 }
 0xb15   : > { %2438 = vadd.xlane.f32.xlu0 %v2437_v10  ;;  %v2440_v41 = vsel %vm1330_vm0, %v5179_v56, 0.0 }
 0xb18   : > { %v2421_v30 = vpop.xlane.xlu1 %2420 }
 0xb19   : > { %v2425_v53 = vsub.f32 %v2409_v42, %v2421_v30 }
 0xb1b   : > { %v2432_v58 = vmul.f32 1.442695, %v2425_v53 }
 0xb1d   : > { %5180 = vpow2.f32 %v2432_v58  ;;  %2441 = vadd.xlane.f32.xlu0 %v2440_v41 }
 0xb23   : > { %v5181_v47 = vpop.eup %5180 }
 0xb24   : > { %v2443_v59 = vsel %vm1330_vm0, %v5181_v47, 0.0 }
 0xb25   : > { %2460 = vrot.lane.b32.xlu2 %v6061_v14, %s5306_s21  ;;  %2444 = vadd.xlane.f32.xlu0 %v2443_v59  ;;  %v4921_v14 = vld [vmem:[%s7436_s3 + $0x24c] sm:$0xf0] }
 0xb26   : > { %v4608_v16 = vor.u32 %v4921_v14, %v4607_v28  ;;  %v4970_v14 = vld [vmem:[%s7436_s3 + $0x2a8] sm:$0xf0] }
 0xb28   : > { %2518 = vmatpush.bf16.msrb.mxu1 %v4608_v16  ;;  %v4675_v16 = vld [vmem:[%s7436_s3 + $0x2ac] sm:$0xf0] }
 0xb30   : > { %v2463_v13 = vpop.permute.xlu1 %2462 }
 0xb31   : > { %2478 = vmatpush.bf16.msra.mxu0 %v2463_v13 }
 0xb80   : > { %v2436_v11 = vpop.xlane.xlu2 %2435 }
 0xb81   : > { %5182 = vrcp.f32 %v2436_v11 }
 0xb87   : > { %v5183_v19 = vpop.eup %5182 }
 0xb88   : > { %v2439_v8 = vpop.xlane.xlu0 %2438  ;;  %v2461_v63 = vpop.permute.xlu2 %2460  ;;  %v2450_v20 = vmul.f32 %v5183_v19, %v5175_v61 }
 0xb89   : > { %5184 = vrcp.f32 %v2439_v8  ;;  %2479 = vmatpush.bf16.msra.mxu0 %v2461_v63  ;;  %v4969_v8 = vld [vmem:[%s7436_s3 + $0x284] sm:$0xf]  ;;  %v4674_v63 = vor.u32 %v4970_v14, %v4673_v6 }
 0xb8a   : > { %v2454_v26 = vmul.f32 %v2450_v20, %v6174_v37  ;;  %v4678_v19 = vor.u32 %v4969_v8, %v4675_v16  ;;  %v4665_v20 = vld [vmem:[%s7436_s3 + $0x228] sm:$0xf] }
 0xb8b   : > { %2746 = vmatpush.bf16.msra.mxu3 %v4674_v63 }
 0xb8d   : > { %2765 = vmatpush.bf16.msrb.mxu0 %v4678_v19 }
 0xb8f   : > { %v5185_v9 = vpop.eup %5184 }
 0xb90   : > { %v2451_v1 = vmul.f32 %v5185_v9, %v5177_v4  ;;  %v2442_v22 = vpop.xlane.xlu0 %2441  ;;  %v4968_v9 = vld [vmem:[%s7436_s3 + $0x250] sm:$0xf0] }
 0xb91   : > { %5186 = vrcp.f32 %v2442_v22  ;;  %v4666_v22 = vor.u32 %v4968_v9, %v4665_v20 }
 0xb92   : > { %v2455_v25 = vmul.f32 %v2451_v1, %v6174_v37  ;;  %v4967_v1 = vld [vmem:[%s7436_s3 + $0x22c] sm:$0xf] }
 0xb93   : > { %2747 = vmatpush.bf16.msra.mxu3 %v4666_v22 }
 0xb94   : > { %v2458_v0 = vpack.c.bf16 %v2455_v25, %v2454_v26  ;;  %v4667_v26 = vld [vmem:[%s7436_s3 + $0x254] sm:$0xf0] }
 0xb95   : > { %v4670_v25 = vor.u32 %v4967_v1, %v4667_v26 }
 0xb96   : > { %4603 = vmatmul.msk.bf16.vlgmr.msra.gmra.mxu0 %vm1330_vm0, %v2458_v0  ;;  %v4657_v0 = vld [vmem:[%s7436_s3 + $0x1d0] sm:$0xf] }
 0xb97   : > { %v5187_v31 = vpop.eup %5186  ;;  %2766 = vmatpush.bf16.msrb.mxu0 %v4670_v25 }
 0xb98   : > { %v2445_v7 = vpop.xlane.xlu0 %2444  ;;  %v2452_v17 = vmul.f32 %v5187_v31, %v5179_v56  ;;  %v4965_v31 = vld [vmem:[%s7436_s3 + $0x1d4] sm:$0xf] }
 0xb99   : > { %5188 = vrcp.f32 %v2445_v7  ;;  %v4966_v7 = vld [vmem:[%s7436_s3 + $0x1f8] sm:$0xf0] }
 0xb9a   : > { %v2456_v38 = vmul.f32 %v2452_v17, %v6174_v37  ;;  %v4658_v17 = vor.u32 %v4966_v7, %v4657_v0 }
 0xb9c   : > { %2748 = vmatpush.bf16.msra.mxu3 %v4658_v17 }
 0xb9f   : > { %v5189_v32 = vpop.eup %5188 }
 0xba0   : > { %v2453_v34 = vmul.f32 %v5189_v32, %v5181_v47  ;;  %v4659_v32 = vld [vmem:[%s7436_s3 + $0x1fc] sm:$0xf0] }
 0xba2   : > { %v2457_v40 = vmul.f32 %v2453_v34, %v6174_v37  ;;  %v5061_v37 = vld [vmem:[%s7438_s5 + $0xc] ss:$0 sm:$0xff]  ;;  %v4662_v34 = vor.u32 %v4965_v31, %v4659_v32 }
 0xba4   : > { %v2459_v43 = vpack.c.bf16 %v2457_v40, %v2456_v38  ;;  %2767 = vmatpush.bf16.msrb.mxu0 %v4662_v34  ;;  %v4649_v38 = vld [vmem:[%s7436_s3 + $0x178] sm:$0xf]  ;;  %v4964_v40 = vld [vmem:[%s7436_s3 + $0x1a0] sm:$0xf0] }
 0xba6   : > { %4604 = vmatmul.msk.bf16.gmra.mxu0 %vm1330_vm0, %v2459_v43  ;;  %v4963_v43 = vld [vmem:[%s7436_s3 + $0x17c] sm:$0xf] }
 0xc13   : > { %v2481_v50 = vpop.f32.mrf.mxu0 }
 0xc1b   : > { %v2483_v39 = vpop.f32.mrf.mxu0 }
 0xc1c   : > { %v2491_v42 = vpack.c.bf16 %v2483_v39, %v2481_v50  ;;  %v4651_v50 = vld [vmem:[%s7436_s3 + $0x1a4] sm:$0xf0] }
 0xc1d   : > { %v4654_v39 = vor.u32 %v4963_v43, %v4651_v50 }
 0xc1e   : > { %4613 = vmatmul.msk.bf16.vlgmr.msrb.gmra.mxu1 %vm1330_vm0, %v2491_v42  ;;  %v4641_v42 = vld [vmem:[%s7436_s3 + $0x120] sm:$0xf] }
 0xc1f   : > { %2768 = vmatpush.bf16.msrb.mxu0 %v4654_v39 }
 0xc23   : > { %v2486_v27 = vpop.f32.mrf.mxu0 }
 0xc2b   : > { %v2488_v24 = vpop.f32.mrf.mxu0 }
 0xc2c   : > { %v2492_v33 = vpack.c.bf16 %v2488_v24, %v2486_v27  ;;  %v4962_v27 = vld [vmem:[%s7436_s3 + $0x148] sm:$0xf0]  ;;  %v4961_v24 = vld [vmem:[%s7436_s3 + $0x124] sm:$0xf] }
 0xc2e   : > { %4614 = vmatmul.msk.bf16.gmra.mxu1 %vm1330_vm0, %v2492_v33  ;;  %v4642_v33 = vor.u32 %v4962_v27, %v4641_v42 }
 0xc9b   : > { %v2520_v35 = vpop.f32.mrf.mxu1 }
 0xc9c   : > { %v2530_v15 = vadd.f32 %v2520_v35, %v6418_v21  ;;  %v4643_v35 = vld [vmem:[%s7436_s3 + $0x14c] sm:$0xf0] }
 0xc9e   : > { %v2534_v44 = vadd.f32 %v2530_v15, %v5782_v51  ;;  %v1908_v51 = vadd.f32 %v6413_v23, %v6402_v62  ;;  %v4646_v15 = vor.u32 %v4961_v24, %v4643_v35  ;;  %v5063_v24 = vld [vmem:[%s7438_s5 + $0xe] ss:$0 sm:$0xff] }
 0xca0   : > { %v6459_v60 = vadd.f32 %v5061_v37, %v2534_v44  ;;  %v2221_v4 = vadd.f32 %v2215_v36, %v1908_v51  ;;  %v4650_v36 = vor.u32 %v4964_v40, %v4649_v38  ;;  %2769 = vmatpush.bf16.msrb.mxu0 %v4646_v15  ;;  %v4633_v44 = vld [vmem:[%s7436_s3 + $0xc8] sm:$0xf]  ;;  %v5062_v40 = vld [vmem:[%s7438_s5 + $0xd] ss:$0 sm:$0xff] }
 0xca2   : > { %2548 = vadd.xlane.f32.xlu0 %v6459_v60  ;;  %2749 = vmatpush.bf16.msra.mxu3 %v4650_v36 }
 0xca3   : > { %v2522_v45 = vpop.f32.mrf.mxu1 }
 0xca4   : > { %v2531_v18 = vadd.f32 %v2522_v45, %v6420_v48  ;;  %v4960_v45 = vld [vmem:[%s7436_s3 + $0xf0] sm:$0xf0] }
 0xca6   : > { %v2535_v61 = vadd.f32 %v2531_v18, %v5786_v57  ;;  %2750 = vmatpush.bf16.msra.mxu3 %v4642_v33  ;;  %v4959_v18 = vld [vmem:[%s7436_s3 + $0xcc] sm:$0xf] }
 0xca8   : > { %v6464_v55 = vadd.f32 %v5061_v37, %v2535_v61 }
 0xcaa   : > { %2550 = vadd.xlane.f32.xlu2 %v6464_v55 }
 0xcab   : > { %v2525_v21 = vpop.f32.mrf.mxu1 }
 0xcac   : > { %v2532_v54 = vadd.f32 %v2525_v21, %v6426_v46  ;;  %v4634_v21 = vor.u32 %v4960_v45, %v4633_v44 }
 0xcae   : > { %v2536_v49 = vadd.f32 %v2532_v54, %v5790_v3  ;;  %v4635_v54 = vld [vmem:[%s7436_s3 + $0xf4] sm:$0xf0]  ;;  %2751 = vmatpush.bf16.msra.mxu3 %v4634_v21 }
 0xcb0   : > { %v6471_v52 = vadd.f32 %v5061_v37, %v2536_v49  ;;  %v4638_v49 = vor.u32 %v4959_v18, %v4635_v54 }
 0xcb2   : > { %2552 = vadd.xlane.f32.xlu1 %v6471_v52  ;;  %2770 = vmatpush.bf16.msrb.mxu0 %v4638_v49 }
 0xcb3   : > { %v2527_v48 = vpop.f32.mrf.mxu1 }
 0xcb4   : > { %v2533_v10 = vadd.f32 %v2527_v48, %v2221_v4  ;;  %v4625_v4 = vld [vmem:[%s7436_s3 + $0x70] sm:$0xf]  ;;  %v4958_v48 = vld [vmem:[%s7436_s3 + $0x98] sm:$0xf0] }
 0xcb6   : > { %v2537_v57 = vadd.f32 %v2533_v10, %v5794_v5  ;;  %v4957_v10 = vld [vmem:[%s7436_s3 + $0x74] sm:$0xf] }
 0xcb8   : > { %v6475_v30 = vadd.f32 %v5061_v37, %v2537_v57  ;;  %v4626_v57 = vor.u32 %v4958_v48, %v4625_v4 }
 0xcba   : > { %2554 = vadd.xlane.f32.xlu0 %v6475_v30  ;;  %2752 = vmatpush.bf16.msra.mxu3 %v4626_v57 }
 0xd15   : > { %v2549_v56 = vpop.xlane.xlu0 %2548 }
 0xd16   : > { %v2556_v46 = vmul.f32 %v2549_v56, %v5375_v12  ;;  %v4627_v56 = vld [vmem:[%s7436_s3 + $0x9c] sm:$0xf0] }
 0xd18   : > { %v6480_v3 = vsub.f32 %v6459_v60, %v2556_v46  ;;  %v4630_v46 = vor.u32 %v4957_v10, %v4627_v56 }
 0xd1a   : > { %v2564_v62 = vmul.f32 %v6480_v3, %v6480_v3  ;;  %2771 = vmatpush.bf16.msrb.mxu0 %v4630_v46 }
 0xd1c   : > { %2568 = vadd.xlane.f32.xlu0 %v2564_v62 }
 0xd1d   : > { %v2551_v23 = vpop.xlane.xlu2 %2550 }
 0xd1e   : > { %v2557_v53 = vmul.f32 %v2551_v23, %v5375_v12  ;;  %v4617_v23 = vld [vmem:[%s7436_s3 + $0x18] sm:$0xf] }
 0xd20   : > { %v6486_v58 = vsub.f32 %v6464_v55, %v2557_v53  ;;  %v4956_v53 = vld [vmem:[%s7436_s3 + $0x40] sm:$0xf0] }
 0xd22   : > { %v2565_v5 = vmul.f32 %v6486_v58, %v6486_v58 }
 0xd24   : > { %2570 = vadd.xlane.f32.xlu0 %v2565_v5  ;;  %v4955_v5 = vld [vmem:[%s7436_s3 + $0x1c] sm:$0xf] }
 0xd25   : > { %v2553_v41 = vpop.xlane.xlu1 %2552 }
 0xd26   : > { %v2558_v47 = vmul.f32 %v2553_v41, %v5375_v12 }
 0xd28   : > { %v6492_v59 = vsub.f32 %v6471_v52, %v2558_v47  ;;  %v4618_v47 = vor.u32 %v4956_v53, %v4617_v23  ;;  %v2660_v53 = vld [vmem:[%s7438_s5 + $0xf] sm:$0x3] }
 0xd2a   : > { %v2566_v13 = vmul.f32 %v6492_v59, %v6492_v59  ;;  %2753 = vmatpush.bf16.msra.mxu3 %v4618_v47 }
 0xd2c   : > { %2572 = vadd.xlane.f32.xlu0 %v2566_v13  ;;  %v4619_v13 = vld [vmem:[%s7436_s3 + $0x44] sm:$0xf0] }
 0xd2d   : > { %v2555_v11 = vpop.xlane.xlu0 %2554 }
 0xd2e   : > { %v2559_v29 = vmul.f32 %v2555_v11, %v5375_v12  ;;  %v4622_v11 = vor.u32 %v4955_v5, %v4619_v13  ;;  %v2663_v5 = vperm.slane %v2660_v53, 1 }
 0xd30   : > { %v6498_v2 = vsub.f32 %v6475_v30, %v2559_v29  ;;  %2772 = vmatpush.bf16.msrb.mxu0 %v4622_v11 }
 0xd32   : > { %v2567_v28 = vmul.f32 %v6498_v2, %v6498_v2 }
 0xd34   : > { %2574 = vadd.xlane.f32.xlu0 %v2567_v28 }
 0xd8f   : > { %v2569_v37 = vpop.xlane.xlu0 %2568 }
 0xd90   : > { %v2576_v61 = vmul.f32 %v2569_v37, %v5375_v12 }
 0xd92   : > { %v2580_v51 = vadd.f32 1e-12, %v2576_v61 }
 0xd94   : > { %5190 = vrsqrt.f32 %v2580_v51  ;;  %vm2590_vm12 = vweird.f32 %v2580_v51 }
 0xd97   : > { %v2571_v62 = vpop.xlane.xlu0 %2570 }
 0xd98   : > { %v2577_v41 = vmul.f32 %v2571_v62, %v5375_v12 }
 0xd9a   : > { %v5191_v29 = vpop.eup %5190  ;;  %v2581_v28 = vadd.f32 1e-12, %v2577_v41 }
 0xd9b   : > { %v2585_v6 = vmul.f32 %v5191_v29, %v2580_v51  ;;  %vm2591_vm11 = vweird.f32 %v5191_v29 }
 0xd9c   : > { %5192 = vrsqrt.f32 %v2581_v28  ;;  %vm2592_vm13 = vmor %vm2590_vm12, %vm2591_vm11  ;;  %vm2600_vm15 = vweird.f32 %v2581_v28  ;;  %vm2868_vm11 = vcmask 1042432  }
 0xd9d   : > { %v2586_v14 = vmul.f32 %v5191_v29, %v2585_v6 }
 0xd9f   : > { %v2587_v8 = vmul.f32 0.5, %v2586_v14  ;;  %v2573_v63 = vpop.xlane.xlu0 %2572 }
 0xda0   : > { %v2578_v16 = vmul.f32 %v2573_v63, %v5375_v12 }
 0xda1   : > { %v2588_v19 = vsub.f32 1.5, %v2587_v8 }
 0xda2   : > { %v5193_v20 = vpop.eup %5192  ;;  %v2582_v9 = vadd.f32 1e-12, %v2578_v16 }
 0xda3   : > { %v2589_v1 = vmul.f32 %v5191_v29, %v2588_v19  ;;  %v2595_v22 = vmul.f32 %v5193_v20, %v2581_v28  ;;  %vm2601_vm14 = vweird.f32 %v5193_v20 }
 0xda4   : > { %5194 = vrsqrt.f32 %v2582_v9  ;;  %vm2602_vm0 = vmor %vm2600_vm15, %vm2601_vm14  ;;  %vm2610_vm2 = vweird.f32 %v2582_v9 }
 0xda5   : > { %v2596_v26 = vmul.f32 %v5193_v20, %v2595_v22  ;;  %v2593_v25 = vsel %vm2592_vm13, %v5191_v29, %v2589_v1  ;;  %v3082_v22 = vld [vmem:[%s7438_s5 + $0x15] sm:$0x1] }
 0xda6   : > { %v2624_v34 = vmul.f32 %v2593_v25, %v6480_v3  ;;  %v6618_v25 = vperm.slane %v2660_v53, 0 }
 0xda7   : > { %v2597_v0 = vmul.f32 0.5, %v2596_v26  ;;  %v2575_v7 = vpop.xlane.xlu0 %2574 }
 0xda8   : > { %v2579_v31 = vmul.f32 %v2575_v7, %v5375_v12  ;;  %v2631_v27 = vmul.f32 %v5062_v40, %v2624_v34  ;;  %v6620_v34 = vadd.f32 1e-05, %v3082_v22 }
 0xda9   : > { %v2598_v17 = vsub.f32 1.5, %v2597_v0 }
 0xdaa   : > { %v5195_v32 = vpop.eup %5194  ;;  %v2583_v38 = vadd.f32 1e-12, %v2579_v31  ;;  %v2638_v37 = vadd.f32 %v5063_v24, %v2631_v27 }
 0xdab   : > { %v2599_v43 = vmul.f32 %v5193_v20, %v2598_v17  ;;  %v2605_v36 = vmul.f32 %v5195_v32, %v2582_v9  ;;  %vm2611_vm1 = vweird.f32 %v5195_v32 }
 0xdac   : > { %5196 = vrsqrt.f32 %v2583_v38  ;;  %vm2612_vm3 = vmor %vm2610_vm2, %vm2611_vm1  ;;  %vm2620_vm5 = vweird.f32 %v2583_v38  ;;  %vm2933_vm2 = vcmask 1045504  }
 0xdad   : > { %v2603_v50 = vsel %vm2602_vm0, %v5193_v20, %v2599_v43  ;;  %v2606_v39 = vmul.f32 %v5195_v32, %v2605_v36  ;;  %vm2904_vm0 = vcmask 1046528  }
 0xdae   : > { %v2625_v42 = vmul.f32 %v2603_v50, %v6486_v58 }
 0xdaf   : > { %v2607_v3 = vmul.f32 0.5, %v2606_v39 }
 0xdb0   : > { %v2632_v33 = vmul.f32 %v5062_v40, %v2625_v42 }
 0xdb1   : > { %v2608_v35 = vsub.f32 1.5, %v2607_v3 }
 0xdb2   : > { %v5197_v15 = vpop.eup %5196  ;;  %v2639_v44 = vadd.f32 %v5063_v24, %v2632_v33 }
 0xdb3   : > { %v2609_v45 = vmul.f32 %v5195_v32, %v2608_v35  ;;  %v2615_v18 = vmul.f32 %v5197_v15, %v2583_v38  ;;  %vm2621_vm4 = vweird.f32 %v5197_v15 }
 0xdb4   : > { %v2642_v61 = vpack.c.bf16 %v2639_v44, %v2638_v37  ;;  %vm2622_vm6 = vmor %vm2620_vm5, %vm2621_vm4  ;;  %vm2962_vm4 = vcmask 1044480   ;;  %vm2991_vm5 = vcmask 1043456  }
 0xdb5   : > { %v2616_v21 = vmul.f32 %v5197_v15, %v2615_v18  ;;  %v2613_v58 = vsel %vm2612_vm3, %v5195_v32, %v2609_v45 }
 0xdb6   : > { %2754 = vmatmul.bf16.vlgmr.msra.gmra.mxu3 %v2642_v61  ;;  %2773 = vmatmul.bf16.vlgmr.msrb.gmra.mxu0 %v2642_v61  ;;  %v2626_v51 = vmul.f32 %v2613_v58, %v6492_v59 }
 0xdb7   : > { %v2617_v54 = vmul.f32 0.5, %v2616_v21 }
 0xdb8   : > { %v2633_v57 = vmul.f32 %v5062_v40, %v2626_v51 }
 0xdb9   : > { %v2618_v49 = vsub.f32 1.5, %v2617_v54 }
 0xdba   : > { %v2640_v46 = vadd.f32 %v5063_v24, %v2633_v57 }
 0xdbb   : > { %v2619_v4 = vmul.f32 %v5197_v15, %v2618_v49 }
 0xdbd   : > { %v2623_v48 = vsel %vm2622_vm6, %v5197_v15, %v2619_v4  ;;  %v2883_v15 = vld [vmem:[%s7439_s6] sm:$0x7f] }
 0xdbe   : > { %v2627_v10 = vmul.f32 %v2623_v48, %v6498_v2  ;;  %v6630_v21 = vperm.slane %v2883_v15, 0  ;;  %v6632_v58 = vperm.slane %v2883_v15, 1  ;;  %v6634_v54 = vperm.slane %v2883_v15, 2 }
 0xdbf   : > { %v6638_v51 = vperm.slane %v2883_v15, 3  ;;  %v6640_v4 = vperm.slane %v2883_v15, 4 }
 0xdc0   : > { %v2634_v56 = vmul.f32 %v5062_v40, %v2627_v10 }
 0xdc2   : > { %v2641_v62 = vadd.f32 %v5063_v24, %v2634_v56  ;;  %v6643_v56 = vperm.slane %v2883_v15, 5 }
 0xdc4   : > { %v2643_v23 = vpack.c.bf16 %v2641_v62, %v2640_v46 }
 0xdc6   : > { %2759 = vmatmul.bf16.gmra.mxu3 %v2643_v23  ;;  %2778 = vmatmul.bf16.gmra.mxu0 %v2643_v23 }
 0xe33   : > { %v2774_v41 = vpop.f32.mrf.mxu0 }
 0xe34   : > { %v2775_v59 = vadd.f32 %v2774_v41, %v2663_v5 }
 0xe36   : > { %v4679_v47 = vmul.f32 -1.442695, %v2775_v59 }
 0xe38   : > { %5198 = vpow2.f32 %v4679_v47  ;;  %v6650_v47 = vperm.slane %v2883_v15, 6 }
 0xe39   : > { %v2755_v13 = vpop.f32.mrf.mxu3 }
 0xe3a   : > { %v2756_v39 = vadd.f32 %v2755_v13, %v6618_v25 }
 0xe3b   : > { %v2776_v11 = vpop.f32.mrf.mxu0 }
 0xe3c   : > { %v2777_v29 = vadd.f32 %v2776_v11, %v2663_v5 }
 0xe3e   : > { %v5199_v2 = vpop.eup %5198  ;;  %v4680_v28 = vmul.f32 -1.442695, %v2777_v29 }
 0xe3f   : > { %v2796_v6 = vadd.f32 1.0, %v5199_v2 }
 0xe40   : > { %5200 = vpow2.f32 %v4680_v28 }
 0xe41   : > { %5202 = vrcp.f32 %v2796_v6  ;;  %v2757_v8 = vpop.f32.mrf.mxu3  ;;  %v2809_v0 = vand.u32 2147483647, %v2796_v6  ;;  %v2811_v7 = vand.u32 2147483648, %v2796_v6  ;;  %vm2805_vm8 = vweird.f32 %v2796_v6 }
 0xe42   : > { %v2758_v46 = vadd.f32 %v2757_v8, %v6618_v25 }
 0xe43   : > { %v2779_v14 = vpop.f32.mrf.mxu0  ;;  %v2812_v42 = vor.u32 1.1754944e-38, %v2811_v7  ;;  %vm2810_vm10 = vcmp.eq.f32.partialorder %v2809_v0, 8.507059e+37 }
 0xe44   : > { %v2780_v63 = vadd.f32 %v2779_v14, %v2663_v5 }
 0xe46   : > { %v5201_v16 = vpop.eup %5200  ;;  %v4681_v19 = vmul.f32 -1.442695, %v2780_v63 }
 0xe47   : > { %v5203_v20 = vpop.eup %5202  ;;  %v2797_v9 = vadd.f32 1.0, %v5201_v16 }
 0xe48   : > { %v2801_v1 = vmul.f32 %v5203_v20, %v2796_v6  ;;  %5204 = vpow2.f32 %v4681_v19  ;;  %vm2806_vm7 = vweird.f32 %v5203_v20 }
 0xe49   : > { %5206 = vrcp.f32 %v2797_v9  ;;  %v2760_v43 = vpop.f32.mrf.mxu3  ;;  %vm2807_vm9 = vmor %vm2805_vm8, %vm2806_vm7  ;;  %v2826_v44 = vand.u32 2147483648, %v2797_v9  ;;  %v2824_v61 = vand.u32 2147483647, %v2797_v9  ;;  %vm2820_vm13 = vweird.f32 %v2797_v9 }
 0xe4a   : > { %v2802_v26 = vsub.f32 1.0, %v2801_v1  ;;  %5208 = vrsqrt.f32 %v6620_v34  ;;  %v6653_v11 = vadd.f32 %v2760_v43, %v6618_v25 }
 0xe4b   : > { %v2781_v31 = vpop.f32.mrf.mxu0  ;;  %v2827_v62 = vor.u32 1.1754944e-38, %v2826_v44  ;;  %vm2825_vm15 = vcmp.eq.f32.partialorder %v2824_v61, 8.507059e+37 }
 0xe4c   : > { %v2803_v17 = vmul.f32 %v5203_v20, %v2802_v26  ;;  %v2782_v32 = vadd.f32 %v2781_v31, %v2663_v5 }
 0xe4e   : > { %v5205_v38 = vpop.eup %5204  ;;  %v2804_v40 = vadd.f32 %v5203_v20, %v2803_v17  ;;  %v4682_v36 = vmul.f32 -1.442695, %v2782_v32 }
 0xe4f   : > { %v5207_v50 = vpop.eup %5206  ;;  %v6623_v27 = vadd.f32 1.0, %v5205_v38 }
 0xe50   : > { %v2808_v24 = vsel %vm2807_vm9, %v5203_v20, %v2804_v40  ;;  %v2816_v3 = vmul.f32 %v5207_v50, %v2797_v9  ;;  %5210 = vpow2.f32 %v4682_v36  ;;  %vm2821_vm12 = vweird.f32 %v5207_v50  ;;  %v6636_v49 = vpop.eup %5208 }
 0xe51   : > { %v2813_v33 = vsel %vm2810_vm10, %v2812_v42, %v2808_v24  ;;  %5212 = vrcp.f32 %v6623_v27  ;;  %vm2822_vm14 = vmor %vm2820_vm13, %vm2821_vm12  ;;  %v2839_v5 = vand.u32 2147483647, %v6623_v27  ;;  %v2841_v41 = vand.u32 2147483648, %v6623_v27  ;;  %v2762_v59 = vpop.f32.mrf.mxu3 }
 0xe52   : > { %v2860_v35 = vmul.f32 %v2813_v33, %v2756_v39  ;;  %v2817_v37 = vsub.f32 1.0, %v2816_v3  ;;  %vm2835_vm1 = vweird.f32 %v6623_v27  ;;  %v3085_v6 = vmul.f32 %v6636_v49, %v6620_v34 }
 0xe53   : > { %v6670_v16 = vadd.f32 %v2762_v59, %v6618_v25  ;;  %vm6679_vm3 = vcmp.eq.f32.partialorder %v2839_v5, 8.507059e+37  ;;  %v2842_v22 = vor.u32 1.1754944e-38, %v2841_v41  ;;  %vm3048_vm9 = vcmask 1041408  }
 0xe54   : > { %v2869_v45 = vrot.slane %v2860_v35, 5  ;;  %v2818_v18 = vmul.f32 %v5207_v50, %v2817_v37  ;;  %v3086_v32 = vmul.f32 %v6636_v49, %v3085_v6 }
 0xe56   : > { %v2819_v48 = vadd.f32 %v5207_v50, %v2818_v18  ;;  %v5211_v10 = vpop.eup %5210  ;;  %v2881_v57 = vsel %vm2868_vm11, 0.0, %v2869_v45  ;;  %v4978_v18 = vld [vmem:[%s7436_s3 + $0x2b0] sm:$0xf0]  ;;  %v6722_v61 = vmul.f32 0.5, %v3086_v32 }
 0xe57   : > { %v6646_v23 = vpop.eup %5212  ;;  %v2894_v29 = vmul.f32 %v6632_v58, %v2881_v57  ;;  %v2923_v2 = vmul.f32 %v6634_v54, %v2881_v57  ;;  %v6663_v14 = vmul.f32 %v6638_v51, %v2881_v57  ;;  %v6667_v63 = vadd.f32 1.0, %v5211_v10 }
 0xe58   : > { %v2823_v53 = vsel %vm2822_vm14, %v5207_v50, %v2819_v48  ;;  %v2831_v8 = vmul.f32 %v6646_v23, %v6623_v27  ;;  %v6673_v19 = vmul.f32 %v6640_v4, %v2881_v57  ;;  %v6676_v20 = vmul.f32 %v6643_v56, %v2881_v57  ;;  %v4977_v27 = vld [vmem:[%s7436_s3 + $0x258] sm:$0xf0] }
 0xe59   : > { %v2828_v13 = vsel %vm2825_vm15, %v2827_v62, %v2823_v53  ;;  %v2885_v26 = vmul.f32 %v6630_v21, %v2881_v57  ;;  %v6685_v0 = vmul.f32 %v6650_v47, %v2881_v57  ;;  %5214 = vrcp.f32 %v6667_v63  ;;  %v4713_v53 = vld [vmem:[%s7436_s3 + $0x230] sm:$0xf] }
 0xe5a   : > { %v6657_v28 = vmul.f32 %v2828_v13, %v2758_v46  ;;  %v2832_v25 = vsub.f32 1.0, %v2831_v8  ;;  %v2905_v7 = vrot.slane %v2894_v29, 1  ;;  %v2934_v31 = vrot.slane %v2923_v2, 2  ;;  %v4709_v29 = vld [vmem:[%s7436_s3 + $0x1d8] sm:$0xf] }
 0xe5b   : > { %v2963_v38 = vrot.slane %v6663_v14, 3  ;;  %v2992_v50 = vrot.slane %v6673_v19, 4  ;;  %v3020_v39 = vrot.slane %v6676_v20, 5  ;;  %vm2836_vm6 = vweird.f32 %v6646_v23  ;;  %v4976_v2 = vld [vmem:[%s7436_s3 + $0x200] sm:$0xf0] }
 0xe5c   : > { %v2870_v9 = vrot.slane %v6657_v28, 5  ;;  %v2833_v42 = vmul.f32 %v6646_v23, %v2832_v25  ;;  %v3049_v24 = vrot.slane %v6685_v0, 6  ;;  %v2854_v35 = vand.u32 2147483647, %v6667_v63  ;;  %vm2837_vm8 = vmor %vm2835_vm1, %vm2836_vm6  ;;  %v6770_v19 = vld [vmem:[%s7436_s3 + $0x180] sm:$0xf] }
 0xe5d   : > { %vm2850_vm7 = vweird.f32 %v6667_v63  ;;  %v2856_v44 = vand.u32 2147483648, %v6667_v63  ;;  %vm3090_vm14 = vweird.f32 %v6620_v34  ;;  %vm3091_vm15 = vweird.f32 %v6636_v49  ;;  %v4689_v34 = vld [vmem:[%s7436_s3 + $0x20] sm:$0xf] }
 0xe5e   : > { %v2871_v17 = vsel %vm2868_vm11, %v2869_v45, %v2870_v9  ;;  %v2834_v37 = vadd.f32 %v6646_v23, %v2833_v42  ;;  %v4717_v45 = vld [vmem:[%s7436_s3 + $0x288] sm:$0xf]  ;;  %vm6760_vm10 = vcmp.eq.f32.partialorder %v2854_v35, 8.507059e+37  ;;  %v4714_v35 = vor.u32 %v4977_v27, %v4713_v53 }
 0xe5f   : > { %v6694_v40 = vmul.f32 %v6632_v58, %v2871_v17  ;;  %v6697_v43 = vmul.f32 %v6634_v54, %v2871_v17  ;;  %v6700_v36 = vmul.f32 %v6638_v51, %v2871_v17  ;;  %v6711_v15 = vmul.f32 %v6640_v4, %v2871_v17  ;;  %v6724_v48 = vpop.eup %5214 }
 0xe60   : > { %v6728_v57 = vmul.f32 %v6643_v56, %v2871_v17  ;;  %v6731_v46 = vmul.f32 %v6650_v47, %v2871_v17  ;;  %v6744_v5 = vmul.f32 %v6630_v21, %v2871_v17  ;;  %v2838_v41 = vsel %vm2837_vm8, %v6646_v23, %v2834_v37  ;;  %v6787_v17 = vld [vmem:[%s7436_s3 + $0x150] sm:$0xf0]  ;;  %v6802_v37 = vld [vmem:[%s7436_s3 + $0xf8] sm:$0xf0] }
 0xe61   : > { %v2906_v3 = vrot.slane %v6694_v40, 1  ;;  %v2935_v33 = vrot.slane %v6697_v43, 2  ;;  %v2964_v10 = vrot.slane %v6700_v36, 3  ;;  %v2846_v59 = vmul.f32 %v6724_v48, %v6667_v63  ;;  %v6842_v63 = vld [vmem:[%s7436_s3 + $0xa0] sm:$0xf0] }
 0xe62   : > { %v2843_v23 = vsel %vm6679_vm3, %v2842_v22, %v2838_v41  ;;  %v4718_v8 = vor.u32 %v4978_v18, %v4717_v45  ;;  %v2993_v1 = vrot.slane %v6711_v15, 4  ;;  %v3021_v32 = vrot.slane %v6728_v57, 5  ;;  %v6797_v15 = vld [vmem:[%s7436_s3 + $0xd0] sm:$0xf] }
 0xe63   : > { %v2907_v62 = vsel %vm2904_vm0, %v2905_v7, %v2906_v3  ;;  %v2936_v14 = vsel %vm2933_vm2, %v2934_v31, %v2935_v33  ;;  %v2862_v22 = vmul.f32 %v2843_v23, %v6653_v11  ;;  %v2847_v25 = vsub.f32 1.0, %v2846_v59  ;;  %v6782_v31 = vld [vmem:[%s7436_s3 + $0x128] sm:$0xf] }
 0xe64   : > { %v2918_v13 = vadd.f32 %v2907_v62, %v2885_v26  ;;  %v6775_v26 = vld [vmem:[%s7436_s3 + $0x1a8] sm:$0xf0]  ;;  %v3050_v42 = vrot.slane %v6731_v46, 6  ;;  %v2965_v11 = vsel %vm2962_vm4, %v2963_v38, %v2964_v10  ;;  %3267 = vmatpush.bf16.msra.mxu1 %v4718_v8  ;;  %vm2851_vm12 = vweird.f32 %v6724_v48 }
 0xe65   : > { %v2872_v45 = vrot.slane %v2862_v22, 5  ;;  %v2848_v18 = vmul.f32 %v6724_v48, %v2847_v25  ;;  %v2857_v41 = vor.u32 1.1754944e-38, %v2856_v44  ;;  %v4710_v38 = vor.u32 %v4976_v2, %v4709_v29  ;;  %vm2852_vm13 = vmor %vm2850_vm7, %vm2851_vm12 }
 0xe66   : > { %v2947_v7 = vadd.f32 %v2936_v14, %v2918_v13  ;;  %v4706_v53 = vor.u32 %v6775_v26, %v6770_v19  ;;  %v4702_v59 = vor.u32 %v6787_v17, %v6782_v31  ;;  %v4698_v23 = vor.u32 %v6802_v37, %v6797_v15  ;;  %v6837_v26 = vld [vmem:[%s7436_s3 + $0x78] sm:$0xf]  ;;  %v5065_v31 = vld [vmem:[%s7438_s5 + $0x14] ss:$0 sm:$0xff] }
 0xe67   : > { %v2873_v13 = vsel %vm2868_vm11, %v2870_v9, %v2872_v45  ;;  %v2849_v27 = vadd.f32 %v6724_v48, %v2848_v18  ;;  %v2994_v14 = vsel %vm2991_vm5, %v2992_v50, %v2993_v1  ;;  %v3022_v18 = vsel %vm2868_vm11, %v3020_v39, %v3021_v32 }
 0xe68   : > { %v2976_v62 = vadd.f32 %v2965_v11, %v2947_v7  ;;  %v2896_v44 = vmul.f32 %v6632_v58, %v2873_v13  ;;  %v2925_v29 = vmul.f32 %v6634_v54, %v2873_v13  ;;  %v6820_v2 = vmul.f32 %v6638_v51, %v2873_v13  ;;  %3268 = vmatpush.bf16.msra.mxu1 %v4714_v35 }
 0xe69   : > { %v6825_v9 = vmul.f32 %v6640_v4, %v2873_v13  ;;  %v6828_v8 = vmul.f32 %v6643_v56, %v2873_v13  ;;  %v6831_v50 = vmul.f32 %v6650_v47, %v2873_v13  ;;  %v2853_v19 = vsel %vm2852_vm13, %v6724_v48, %v2849_v27 }
 0xe6a   : > { %v3005_v28 = vadd.f32 %v2994_v14, %v2976_v62  ;;  %v2908_v22 = vrot.slane %v2896_v44, 1  ;;  %v2937_v25 = vrot.slane %v2925_v29, 2  ;;  %v2966_v7 = vrot.slane %v6820_v2, 3 }
 0xe6b   : > { %v2858_v11 = vsel %vm6760_vm10, %v2857_v41, %v2853_v19  ;;  %v2995_v35 = vrot.slane %v6825_v9, 4  ;;  %v3088_v62 = vsub.f32 1.5, %v6722_v61  ;;  %v3051_v20 = vsel %vm3048_vm9, %v3049_v24, %v3050_v42 }
 0xe6c   : > { %v2863_v48 = vmul.f32 %v2858_v11, %v6670_v16  ;;  %v2909_v6 = vsel %vm2904_vm0, %v2906_v3, %v2908_v22  ;;  %3269 = vmatpush.bf16.msra.mxu1 %v4710_v38  ;;  %v4694_v16 = vor.u32 %v6842_v63, %v6837_v26  ;;  %v3033_v41 = vadd.f32 %v3022_v18, %v3005_v28 }
 0xe6d   : > { %v2887_v39 = vmul.f32 %v6630_v21, %v2873_v13  ;;  %v3023_v61 = vrot.slane %v6828_v8, 5  ;;  %v2919_v40 = vadd.f32 %v2909_v6, %v6744_v5  ;;  %v3052_v3 = vrot.slane %v6831_v50, 6 }
 0xe6e   : > { %v2874_v27 = vrot.slane %v2863_v48, 5  ;;  %v2938_v38 = vsel %vm2933_vm2, %v2935_v33, %v2937_v25  ;;  %v2967_v14 = vsel %vm2962_vm4, %v2964_v10, %v2966_v7  ;;  %v2996_v0 = vsel %vm2991_vm5, %v2993_v1, %v2995_v35 }
 0xe6f   : > { %v3062_v44 = vadd.f32 %v3051_v20, %v3033_v41  ;;  %v3089_v5 = vmul.f32 %v6636_v49, %v3088_v62  ;;  %v2948_v36 = vadd.f32 %v2938_v38, %v2919_v40  ;;  %v3053_v57 = vsel %vm3048_vm9, %v3050_v42, %v3052_v3 }
 0xe70   : > { %v2875_v24 = vsel %vm2868_vm11, %v2872_v45, %v2874_v27  ;;  %v2882_v13 = vsel %vm2868_vm11, %v2874_v27, 0.0  ;;  %3270 = vmatpush.bf16.msra.mxu1 %v4706_v53 }
 0xe71   : > { %v2897_v29 = vmul.f32 %v6632_v58, %v2875_v24  ;;  %v2898_v43 = vmul.f32 %v6632_v58, %v2882_v13  ;;  %v2926_v33 = vmul.f32 %v6634_v54, %v2875_v24  ;;  %v2927_v10 = vmul.f32 %v6634_v54, %v2882_v13 }
 0xe72   : > { %v2955_v2 = vmul.f32 %v6638_v51, %v2875_v24  ;;  %v2956_v1 = vmul.f32 %v6638_v51, %v2882_v13  ;;  %v2984_v45 = vmul.f32 %v6640_v4, %v2875_v24  ;;  %v2985_v48 = vmul.f32 %v6640_v4, %v2882_v13  ;;  %v5064_v51 = vld [vmem:[%s7438_s5 + $0x11] ss:$0 sm:$0xff] }
 0xe73   : > { %v2910_v28 = vrot.slane %v2897_v29, 1  ;;  %v2912_v19 = vrot.slane %v2898_v43, 1  ;;  %v2939_v11 = vrot.slane %v2926_v33, 2  ;;  %v2888_v18 = vmul.f32 %v6630_v21, %v2875_v24 }
 0xe74   : > { %v2941_v58 = vrot.slane %v2927_v10, 2  ;;  %v2968_v62 = vrot.slane %v2955_v2, 3  ;;  %v2970_v6 = vrot.slane %v2956_v1, 3  ;;  %v2997_v20 = vrot.slane %v2984_v45, 4  ;;  %3271 = vmatpush.bf16.msra.mxu1 %v4702_v59  ;;  %v4971_v10 = vld [vmem:[%s7436_s3 + $0x48] sm:$0xf0] }
 0xe75   : > { %v2911_v53 = vsel %vm2904_vm0, %v2908_v22, %v2910_v28  ;;  %v2913_v54 = vsel %vm2904_vm0, %v2910_v28, %v2912_v19  ;;  %v2940_v41 = vsel %vm2933_vm2, %v2937_v25, %v2939_v11  ;;  %v2999_v40 = vrot.slane %v2985_v48, 4  ;;  %vm6913_vm0 = vmor %vm3090_vm14, %vm3091_vm15  ;;  %v5066_v19 = vld [vmem:[%s7438_s5 + $0x12] ss:$0 sm:$0xff] }
 0xe76   : > { %v2920_v4 = vadd.f32 %v2911_v53, %v2887_v39  ;;  %v2921_v21 = vadd.f32 %v2913_v54, %v2888_v18  ;;  %v2942_v27 = vsel %vm2933_vm2, %v2939_v11, %v2941_v58  ;;  %v2969_v22 = vsel %vm2962_vm4, %v2966_v7, %v2968_v62 }
 0xe77   : > { %v2971_v38 = vsel %vm2962_vm4, %v2968_v62, %v2970_v6  ;;  %v3013_v25 = vmul.f32 %v6643_v56, %v2875_v24  ;;  %v3014_v29 = vmul.f32 %v6643_v56, %v2882_v13  ;;  %v3041_v39 = vmul.f32 %v6650_v47, %v2875_v24 }
 0xe78   : > { %v2949_v59 = vadd.f32 %v2940_v41, %v2920_v4  ;;  %v2950_v7 = vadd.f32 %v2942_v27, %v2921_v21  ;;  %v3042_v43 = vmul.f32 %v6650_v47, %v2882_v13  ;;  %3272 = vmatpush.bf16.msra.mxu1 %v4698_v23  ;;  %v2977_v2 = vadd.f32 %v2967_v14, %v2948_v36 }
 0xe79   : > { %v3025_v33 = vrot.slane %v3013_v25, 5  ;;  %v3027_v56 = vrot.slane %v3014_v29, 5  ;;  %v3070_v1 = vadd.f32 %v5064_v51, %v3062_v44  ;;  %v3000_v24 = vsel %vm2991_vm5, %v2997_v20, %v2999_v40 }
 0xe7a   : > { %v2979_v45 = vadd.f32 %v2971_v38, %v2950_v7  ;;  %v3054_v47 = vrot.slane %v3041_v39, 6  ;;  %v3093_v13 = vsel %vm6913_vm0, %v6636_v49, %v3089_v5  ;;  %v3056_v15 = vrot.slane %v3042_v43, 6  ;;  %v5067_v5 = vld [vmem:[%s7438_s5 + $0x13] ss:$0 sm:$0xff] }
 0xe7b   : > { %v3006_v37 = vadd.f32 %v2996_v0, %v2977_v2  ;;  %v3078_v23 = vsub.f32 %v3070_v1, %v5065_v31  ;;  %v3095_v28 = vperm.slane %v3093_v13, 0  ;;  %v4690_v48 = vor.u32 %v4971_v10, %v4689_v34 }
 0xe7c   : > { %v3008_v11 = vadd.f32 %v3000_v24, %v2979_v45  ;;  %v3024_v14 = vsel %vm2868_vm11, %v3021_v32, %v3023_v61  ;;  %v2978_v44 = vadd.f32 %v2969_v22, %v2949_v59  ;;  %v3028_v36 = vsel %vm2868_vm11, %v3025_v33, %v3027_v56  ;;  %3273 = vmatpush.bf16.msra.mxu1 %v4694_v16 }
 0xe7d   : > { %v3034_v49 = vadd.f32 %v3024_v14, %v3006_v37  ;;  %v3097_v0 = vmul.f32 %v3095_v28, %v3078_v23  ;;  %v2998_v18 = vsel %vm2991_vm5, %v2995_v35, %v2997_v20  ;;  %v3026_v16 = vsel %vm2868_vm11, %v3023_v61, %v3025_v33 }
 0xe7e   : > { %v3007_v32 = vadd.f32 %v2998_v18, %v2978_v44  ;;  %v3036_v58 = vadd.f32 %v3028_v36, %v3008_v11  ;;  %v3057_v62 = vsel %vm3048_vm9, %v3054_v47, %v3056_v15  ;;  %v3055_v46 = vsel %vm3048_vm9, %v3052_v3, %v3054_v47 }
 0xe7f   : > { %v3063_v26 = vadd.f32 %v3053_v57, %v3034_v49  ;;  %v3105_v63 = vmul.f32 %v5066_v19, %v3097_v0 }
 0xe80   : > { %v3035_v6 = vadd.f32 %v3026_v16, %v3007_v32  ;;  %v3065_v9 = vadd.f32 %v3057_v62, %v3036_v58  ;;  %3274 = vmatpush.bf16.msra.mxu1 %v4690_v48 }
 0xe81   : > { %v3071_v35 = vadd.f32 %v5064_v51, %v3063_v26  ;;  %v6959_v53 = vadd.f32 %v5067_v5, %v3105_v63 }
 0xe82   : > { %v3064_v42 = vadd.f32 %v3055_v46, %v3035_v6  ;;  %v3073_v54 = vadd.f32 %v5064_v51, %v3065_v9 }
 0xe83   : > { %v3079_v41 = vsub.f32 %v3071_v35, %v5065_v31  ;;  %v4683_v20 = vmul.f32 -1.442695, %v6959_v53 }
 0xe84   : > { %v3072_v8 = vadd.f32 %v5064_v51, %v3064_v42  ;;  %v3081_v4 = vsub.f32 %v3073_v54, %v5065_v31 }
 0xe85   : > { %v3098_v61 = vmul.f32 %v3095_v28, %v3079_v41  ;;  %5216 = vpow2.f32 %v4683_v20 }
 0xe86   : > { %v3080_v21 = vsub.f32 %v3072_v8, %v5065_v31  ;;  %v3100_v27 = vmul.f32 %v3095_v28, %v3081_v4 }
 0xe87   : > { %v3106_v40 = vmul.f32 %v5066_v19, %v3098_v61 }
 0xe88   : > { %v3099_v22 = vmul.f32 %v3095_v28, %v3080_v21  ;;  %v3108_v38 = vmul.f32 %v5066_v19, %v3100_v27 }
 0xe89   : > { %v3114_v25 = vadd.f32 %v5067_v5, %v3106_v40 }
 0xe8a   : > { %v3107_v29 = vmul.f32 %v5066_v19, %v3099_v22  ;;  %v6965_v17 = vadd.f32 %v5067_v5, %v3108_v38 }
 0xe8b   : > { %v5217_v50 = vpop.eup %5216  ;;  %v4684_v3 = vmul.f32 -1.442695, %v3114_v25 }
 0xe8c   : > { %v3129_v59 = vadd.f32 1.0, %v5217_v50  ;;  %v6967_v7 = vadd.f32 %v5067_v5, %v3107_v29  ;;  %v4686_v39 = vmul.f32 -1.442695, %v6965_v17  ;;  %v5068_v50 = vld [vmem:[%s7438_s5 + $0x16] ss:$0 sm:$0xff] }
 0xe8d   : > { %5218 = vpow2.f32 %v4684_v3 }
 0xe8e   : > { %5220 = vrcp.f32 %v3129_v59  ;;  %v4685_v51 = vmul.f32 -1.442695, %v6967_v7  ;;  %v3142_v37 = vand.u32 2147483647, %v3129_v59  ;;  %v3144_v23 = vand.u32 2147483648, %v3129_v59 }
 0xe8f   : > { %5222 = vpow2.f32 %v4686_v39  ;;  %vm3138_vm1 = vweird.f32 %v3129_v59 }
 0xe90   : > { %5224 = vpow2.f32 %v4685_v51  ;;  %vm3143_vm4 = vcmp.eq.f32.partialorder %v3142_v37, 8.507059e+37  ;;  %v3145_v5 = vor.u32 1.1754944e-38, %v3144_v23 }
 0xe93   : > { %v5219_v31 = vpop.eup %5218 }
 0xe94   : > { %v5221_v43 = vpop.eup %5220  ;;  %v3130_v33 = vadd.f32 1.0, %v5219_v31 }
 0xe95   : > { %v5223_v56 = vpop.eup %5222  ;;  %v3134_v34 = vmul.f32 %v5221_v43, %v3129_v59  ;;  %vm3139_vm11 = vweird.f32 %v5221_v43 }
 0xe96   : > { %5226 = vrcp.f32 %v3130_v33  ;;  %v5225_v10 = vpop.eup %5224  ;;  %v3132_v1 = vadd.f32 1.0, %v5223_v56  ;;  %vm3140_vm2 = vmor %vm3138_vm1, %vm3139_vm11  ;;  %v3157_v48 = vand.u32 2147483647, %v3130_v33  ;;  %v3159_v14 = vand.u32 2147483648, %v3130_v33 }
 0xe97   : > { %v3135_v2 = vsub.f32 1.0, %v3134_v34  ;;  %v3131_v45 = vadd.f32 1.0, %v5225_v10  ;;  %vm3153_vm5 = vweird.f32 %v3130_v33 }
 0xe98   : > { %5228 = vrcp.f32 %v3132_v1  ;;  %v3160_v26 = vor.u32 1.1754944e-38, %v3159_v14  ;;  %vm3158_vm7 = vcmp.eq.f32.partialorder %v3157_v48, 8.507059e+37  ;;  %vm3183_vm10 = vweird.f32 %v3132_v1  ;;  %v4777_v48 = vld [vmem:[%s7436_s3 + $0x28c] sm:$0xf]  ;;  %v4994_v14 = vld [vmem:[%s7436_s3 + $0x2b4] sm:$0xf0] }
 0xe99   : > { %v3136_v24 = vmul.f32 %v5221_v43, %v3135_v2  ;;  %5230 = vrcp.f32 %v3131_v45  ;;  %v3174_v41 = vand.u32 2147483648, %v3131_v45  ;;  %v3189_v20 = vand.u32 2147483648, %v3132_v1 }
 0xe9a   : > { %vm3168_vm12 = vweird.f32 %v3131_v45  ;;  %v3172_v8 = vand.u32 2147483647, %v3131_v45  ;;  %v3187_v4 = vand.u32 2147483647, %v3132_v1 }
 0xe9b   : > { %v3137_v13 = vadd.f32 %v5221_v43, %v3136_v24  ;;  %v3190_v27 = vor.u32 1.1754944e-38, %v3189_v20  ;;  %v4755_v20 = vld [vmem:[%s7436_s3 + $0x1b0] sm:$0xf0] }
 0xe9c   : > { %v5227_v47 = vpop.eup %5226  ;;  %vm3173_vm15 = vcmp.eq.f32.partialorder %v3172_v8, 8.507059e+37  ;;  %vm3188_vm0 = vcmp.eq.f32.partialorder %v3187_v4, 8.507059e+37  ;;  %v4745_v4 = vld [vmem:[%s7436_s3 + $0x12c] sm:$0xf] }
 0xe9d   : > { %v3149_v15 = vmul.f32 %v5227_v47, %v3130_v33  ;;  %v3141_v36 = vsel %vm3140_vm2, %v5221_v43, %v3137_v13  ;;  %vm3154_vm3 = vweird.f32 %v5227_v47 }
 0xe9e   : > { %v5229_v28 = vpop.eup %5228  ;;  %v3146_v58 = vsel %vm3143_vm4, %v3145_v5, %v3141_v36  ;;  %vm3155_vm6 = vmor %vm3153_vm5, %vm3154_vm3  ;;  %v4778_v36 = vor.u32 %v4994_v14, %v4777_v48  ;;  %v4769_v5 = vld [vmem:[%s7436_s3 + $0x234] sm:$0xf] }
 0xe9f   : > { %v3150_v19 = vsub.f32 1.0, %v3149_v15  ;;  %v5231_v11 = vpop.eup %5230  ;;  %v3179_v44 = vmul.f32 %v5229_v28, %v3132_v1  ;;  %v3193_v62 = vmul.f32 %v3146_v58, %v6959_v53  ;;  %vm3184_vm8 = vweird.f32 %v5229_v28  ;;  %v4771_v58 = vld [vmem:[%s7436_s3 + $0x260] sm:$0xf0] }
 0xea0   : > { %v3164_v0 = vmul.f32 %v5231_v11, %v3131_v45  ;;  %vm3169_vm9 = vweird.f32 %v5231_v11  ;;  %vm3185_vm13 = vmor %vm3183_vm10, %vm3184_vm8  ;;  %v3175_v53 = vor.u32 1.1754944e-38, %v3174_v41  ;;  %3523 = vmatpush.bf16.msra.mxu2 %v4778_v36 }
 0xea1   : > { %v3151_v49 = vmul.f32 %v5227_v47, %v3150_v19  ;;  %v3180_v32 = vsub.f32 1.0, %v3179_v44  ;;  %vm3170_vm14 = vmor %vm3168_vm12, %vm3169_vm9  ;;  %v4993_v44 = vld [vmem:[%s7436_s3 + $0x290] sm:$0xf] }
 0xea2   : > { %v3165_v57 = vsub.f32 1.0, %v3164_v0 }
 0xea3   : > { %v3152_v18 = vadd.f32 %v5227_v47, %v3151_v49  ;;  %v3181_v35 = vmul.f32 %v5229_v28, %v3180_v32  ;;  %v4779_v49 = vld [vmem:[%s7436_s3 + $0x2b8] sm:$0xf0] }
 0xea4   : > { %v3166_v9 = vmul.f32 %v5231_v11, %v3165_v57  ;;  %v4782_v0 = vor.u32 %v4993_v44, %v4779_v49  ;;  %v4991_v57 = vld [vmem:[%s7436_s3 + $0x238] sm:$0xf] }
 0xea5   : > { %v3156_v63 = vsel %vm3155_vm6, %v5227_v47, %v3152_v18  ;;  %v3182_v54 = vadd.f32 %v5229_v28, %v3181_v35  ;;  %v4992_v18 = vld [vmem:[%s7436_s3 + $0x25c] sm:$0xf0] }
 0xea6   : > { %v3161_v16 = vsel %vm3158_vm7, %v3160_v26, %v3156_v63  ;;  %v3167_v42 = vadd.f32 %v5231_v11, %v3166_v9  ;;  %3542 = vmatpush.bf16.msrb.mxu3 %v4782_v0  ;;  %v4770_v32 = vor.u32 %v4992_v18, %v4769_v5  ;;  %v4774_v26 = vor.u32 %v4991_v57, %v4771_v58  ;;  %v4761_v63 = vld [vmem:[%s7436_s3 + $0x1dc] sm:$0xf]  ;;  %v4763_v9 = vld [vmem:[%s7436_s3 + $0x208] sm:$0xf0] }
 0xea7   : > { %v3194_v6 = vmul.f32 %v3161_v16, %v3114_v25  ;;  %v3186_v21 = vsel %vm3185_vm13, %v5229_v28, %v3182_v54  ;;  %v4990_v16 = vld [vmem:[%s7436_s3 + $0x204] sm:$0xf0] }
 0xea8   : > { %v3171_v61 = vsel %vm3170_vm14, %v5231_v11, %v3167_v42  ;;  %v3191_v22 = vsel %vm3188_vm0, %v3190_v27, %v3186_v21  ;;  %3524 = vmatpush.bf16.msra.mxu2 %v4770_v32  ;;  %v4988_v42 = vld [vmem:[%s7436_s3 + $0x1ac] sm:$0xf0]  ;;  %v4987_v54 = vld [vmem:[%s7436_s3 + $0x188] sm:$0xf]  ;;  %v4747_v27 = vld [vmem:[%s7436_s3 + $0x158] sm:$0xf0] }
 0xea9   : > { %v3197_v46 = vpack.c.bf16 %v3194_v6, %v3193_v62  ;;  %v3176_v40 = vsel %vm3173_vm15, %v3175_v53, %v3171_v61  ;;  %v3196_v25 = vmul.f32 %v3191_v22, %v6965_v17  ;;  %v4989_v62 = vld [vmem:[%s7436_s3 + $0x1e0] sm:$0xf]  ;;  %v4762_v6 = vor.u32 %v4990_v16, %v4761_v63  ;;  %v4986_v61 = vld [vmem:[%s7436_s3 + $0x154] sm:$0xf0]  ;;  %v4985_v21 = vld [vmem:[%s7436_s3 + $0x130] sm:$0xf] }
 0xeaa   : > { %v3195_v38 = vmul.f32 %v3176_v40, %v6967_v7  ;;  %3543 = vmatpush.bf16.msrb.mxu3 %v4774_v26  ;;  %v4766_v35 = vor.u32 %v4989_v62, %v4763_v9  ;;  %v4758_v8 = vor.u32 %v4987_v54, %v4755_v20  ;;  %v4746_v53 = vor.u32 %v4986_v61, %v4745_v4  ;;  %v4737_v22 = vld [vmem:[%s7436_s3 + $0xd4] sm:$0xf] }
 0xeab   : > { %3275 = vmatmul.bf16.vlgmr.msra.gmra.mxu1 %v3197_v46  ;;  %v4753_v46 = vld [vmem:[%s7436_s3 + $0x184] sm:$0xf]  ;;  %v4750_v40 = vor.u32 %v4985_v21, %v4747_v27  ;;  %v5070_v21 = vld [vmem:[%s7438_s5 + $0x18] ss:$0 sm:$0xff] }
 0xeac   : > { %v3198_v29 = vpack.c.bf16 %v3196_v25, %v3195_v38  ;;  %3525 = vmatpush.bf16.msra.mxu2 %v4762_v6  ;;  %v4754_v41 = vor.u32 %v4988_v42, %v4753_v46  ;;  %v4984_v38 = vld [vmem:[%s7436_s3 + $0xfc] sm:$0xf0]  ;;  %v4983_v25 = vld [vmem:[%s7436_s3 + $0xd8] sm:$0xf]  ;;  %v5069_v42 = vld [vmem:[%s7438_s5 + $0x17] ss:$0 sm:$0xff] }
 0xeae   : > { %3544 = vmatpush.bf16.msrb.mxu3 %v4766_v35 }
 0xeb0   : > { %3526 = vmatpush.bf16.msra.mxu2 %v4754_v41 }
 0xeb2   : > { %3545 = vmatpush.bf16.msrb.mxu3 %v4758_v8 }
 0xeb4   : > { %3527 = vmatpush.bf16.msra.mxu2 %v4746_v53 }
 0xeb6   : > { %3546 = vmatpush.bf16.msrb.mxu3 %v4750_v40 }
 0xebb   : > { %3280 = vmatmul.bf16.gmra.mxu1 %v3198_v29  ;;  %v4738_v29 = vor.u32 %v4984_v38, %v4737_v22 }
 0xebd   : > { %3528 = vmatpush.bf16.msra.mxu2 %v4738_v29 }
 0xf28   : > { %v3276_v3 = vpop.f32.mrf.mxu1 }
 0xf29   : > { %v3277_v59 = vadd.f32 %v5068_v50, %v3276_v3 }
 0xf2b   : > { %v6978_v39 = vadd.f32 %v3277_v59, %v6459_v60  ;;  %v4729_v59 = vld [vmem:[%s7436_s3 + $0x7c] sm:$0xf] }
 0xf2d   : > { %3342 = vadd.xlane.f32.xlu2 %v6978_v39 }
 0xf30   : > { %v3278_v51 = vpop.f32.mrf.mxu1 }
 0xf31   : > { %v3279_v31 = vadd.f32 %v5068_v50, %v3278_v51  ;;  %v4982_v51 = vld [vmem:[%s7436_s3 + $0xa4] sm:$0xf0] }
 0xf33   : > { %v6982_v43 = vadd.f32 %v3279_v31, %v6464_v55  ;;  %v4981_v31 = vld [vmem:[%s7436_s3 + $0x80] sm:$0xf] }
 0xf35   : > { %3344 = vadd.xlane.f32.xlu1 %v6982_v43 }
 0xf38   : > { %v3281_v17 = vpop.f32.mrf.mxu1 }
 0xf39   : > { %v3282_v7 = vadd.f32 %v5068_v50, %v3281_v17  ;;  %v4730_v17 = vor.u32 %v4982_v51, %v4729_v59 }
 0xf3b   : > { %v6986_v33 = vadd.f32 %v3282_v7, %v6471_v52  ;;  %v4731_v7 = vld [vmem:[%s7436_s3 + $0xa8] sm:$0xf0]  ;;  %3529 = vmatpush.bf16.msra.mxu2 %v4730_v17 }
 0xf3d   : > { %3346 = vadd.xlane.f32.xlu0 %v6986_v33 }
 0xf40   : > { %v3283_v56 = vpop.f32.mrf.mxu1 }
 0xf41   : > { %v3284_v34 = vadd.f32 %v5068_v50, %v3283_v56  ;;  %v4739_v50 = vld [vmem:[%s7436_s3 + $0x100] sm:$0xf0] }
 0xf42   : > { %v4742_v3 = vor.u32 %v4983_v25, %v4739_v50 }
 0xf43   : > { %v6990_v60 = vadd.f32 %v3284_v34, %v6475_v30  ;;  %v4734_v34 = vor.u32 %v4981_v31, %v4731_v7 }
 0xf44   : > { %3547 = vmatpush.bf16.msrb.mxu3 %v4742_v3 }
 0xf45   : > { %3348 = vadd.xlane.f32.xlu2 %v6990_v60 }
 0xf48   : > { %3548 = vmatpush.bf16.msrb.mxu3 %v4734_v34 }
 0xfa0   : > { %v3343_v10 = vpop.xlane.xlu2 %3342 }
 0xfa1   : > { %v3350_v55 = vmul.f32 %v3343_v10, %v5375_v12 }
 0xfa3   : > { %v6995_v2 = vsub.f32 %v6978_v39, %v3350_v55  ;;  %v4721_v55 = vld [vmem:[%s7436_s3 + $0x24] sm:$0xf] }
 0xfa5   : > { %v3358_v1 = vmul.f32 %v6995_v2, %v6995_v2 }
 0xfa7   : > { %3362 = vadd.xlane.f32.xlu1 %v3358_v1  ;;  %v4980_v1 = vld [vmem:[%s7436_s3 + $0x4c] sm:$0xf0] }
 0xfa8   : > { %v3345_v52 = vpop.xlane.xlu1 %3344 }
 0xfa9   : > { %v3351_v45 = vmul.f32 %v3345_v52, %v5375_v12  ;;  %v4979_v52 = vld [vmem:[%s7436_s3 + $0x28] sm:$0xf] }
 0xfab   : > { %v7001_v24 = vsub.f32 %v6982_v43, %v3351_v45 }
 0xfad   : > { %v3359_v30 = vmul.f32 %v7001_v24, %v7001_v24 }
 0xfaf   : > { %3364 = vadd.xlane.f32.xlu0 %v3359_v30  ;;  %v4722_v30 = vor.u32 %v4980_v1, %v4721_v55 }
 0xfb0   : > { %v3347_v47 = vpop.xlane.xlu0 %3346 }
 0xfb1   : > { %v3352_v13 = vmul.f32 %v3347_v47, %v5375_v12  ;;  %v4723_v47 = vld [vmem:[%s7436_s3 + $0x50] sm:$0xf0]  ;;  %3530 = vmatpush.bf16.msra.mxu2 %v4722_v30 }
 0xfb2   : > { %v4853_v30 = vld [vmem:[%s7437_s4 + $0xf4] sm:$0xf] }
 0xfb3   : > { %v7007_v15 = vsub.f32 %v6986_v33, %v3352_v13  ;;  %v4726_v13 = vor.u32 %v4979_v52, %v4723_v47  ;;  %v5010_v47 = vld [vmem:[%s7437_s4 + $0xf8] sm:$0xf0] }
 0xfb5   : > { %v3360_v37 = vmul.f32 %v7007_v15, %v7007_v15  ;;  %3549 = vmatpush.bf16.msrb.mxu3 %v4726_v13  ;;  %v4854_v13 = vor.u32 %v5010_v47, %v4853_v30  ;;  %v4793_v30 = vld [vmem:[%s7437_s4 + $0x4] sm:$0xf] }
 0xfb7   : > { %3366 = vadd.xlane.f32.xlu2 %v3360_v37  ;;  %3843 = vmatpush.bf16.msrb.mxu1 %v4854_v13 }
 0xfb8   : > { %v3349_v23 = vpop.xlane.xlu2 %3348 }
 0xfb9   : > { %v3353_v28 = vmul.f32 %v3349_v23, %v5375_v12 }
 0xfbb   : > { %v7013_v19 = vsub.f32 %v6990_v60, %v3353_v28 }
 0xfbd   : > { %v3361_v11 = vmul.f32 %v7013_v19, %v7013_v19 }
 0xfbf   : > { %3368 = vadd.xlane.f32.xlu1 %v3361_v11 }
0x101a   : > { %v3363_v56 = vpop.xlane.xlu1 %3362 }
0x101b   : > { %v3370_v10 = vmul.f32 %v3363_v56, %v5375_v12 }
0x101d   : > { %v3374_v45 = vadd.f32 1e-12, %v3370_v10 }
0x101f   : > { %5232 = vrsqrt.f32 %v3374_v45  ;;  %vm3384_vm1 = vweird.f32 %v3374_v45 }
0x1022   : > { %v3365_v37 = vpop.xlane.xlu0 %3364 }
0x1023   : > { %v3371_v23 = vmul.f32 %v3365_v37, %v5375_v12  ;;  %v4817_v37 = vld [vmem:[%s7437_s4 + $0x64] sm:$0xf] }
0x1025   : > { %v5233_v28 = vpop.eup %5232  ;;  %v3375_v11 = vadd.f32 1e-12, %v3371_v23  ;;  %v5001_v23 = vld [vmem:[%s7437_s4 + $0x68] sm:$0xf0] }
0x1026   : > { %v3379_v48 = vmul.f32 %v5233_v28, %v3374_v45  ;;  %vm3385_vm11 = vweird.f32 %v5233_v28  ;;  %v4821_v45 = vld [vmem:[%s7437_s4 + $0x74] sm:$0xf] }
0x1027   : > { %5234 = vrsqrt.f32 %v3375_v11  ;;  %vm3386_vm2 = vmor %vm3384_vm1, %vm3385_vm11  ;;  %vm3394_vm4 = vweird.f32 %v3375_v11 }
0x1028   : > { %v3380_v14 = vmul.f32 %v5233_v28, %v3379_v48  ;;  %v5009_v48 = vld [vmem:[%s7437_s4 + $0xe8] sm:$0xf0] }
0x102a   : > { %v3381_v44 = vmul.f32 0.5, %v3380_v14  ;;  %v3367_v36 = vpop.xlane.xlu2 %3366 }
0x102b   : > { %v3372_v49 = vmul.f32 %v3367_v36, %v5375_v12  ;;  %v5000_v36 = vld [vmem:[%s7437_s4 + $0x58] sm:$0xf0] }
0x102c   : > { %v3382_v0 = vsub.f32 1.5, %v3381_v44  ;;  %v4813_v44 = vld [vmem:[%s7437_s4 + $0x54] sm:$0xf] }
0x102d   : > { %v5235_v5 = vpop.eup %5234  ;;  %v3376_v18 = vadd.f32 1e-12, %v3372_v49  ;;  %v4845_v49 = vld [vmem:[%s7437_s4 + $0xd4] sm:$0xf] }
0x102e   : > { %v3383_v57 = vmul.f32 %v5233_v28, %v3382_v0  ;;  %v3389_v32 = vmul.f32 %v5235_v5, %v3375_v11  ;;  %vm3395_vm3 = vweird.f32 %v5235_v5  ;;  %v4818_v11 = vor.u32 %v5001_v23, %v4817_v37  ;;  %v4825_v23 = vld [vmem:[%s7437_s4 + $0x84] sm:$0xf] }
0x102f   : > { %5236 = vrsqrt.f32 %v3376_v18  ;;  %vm3396_vm5 = vmor %vm3394_vm4, %vm3395_vm3  ;;  %vm3404_vm7 = vweird.f32 %v3376_v18  ;;  %v4814_v0 = vor.u32 %v5000_v36, %v4813_v44 }
0x1030   : > { %v3390_v58 = vmul.f32 %v5235_v5, %v3389_v32  ;;  %v3387_v26 = vsel %vm3386_vm2, %v5233_v28, %v3383_v57  ;;  %v4849_v28 = vld [vmem:[%s7437_s4 + $0xe4] sm:$0xf]  ;;  %v3308_v57 = vld [vmem:[%s7438_s5 + $0x19] sm:$0x3] }
0x1031   : > { %v3418_v35 = vmul.f32 %v3387_v26, %v6995_v2  ;;  %v4850_v14 = vor.u32 %v5009_v48, %v4849_v28  ;;  %v7166_v32 = vperm.slane %v3308_v57, 0  ;;  %v4809_v26 = vld [vmem:[%s7437_s4 + $0x44] sm:$0xf]  ;;  %v5003_v28 = vld [vmem:[%s7437_s4 + $0x88] sm:$0xf0] }
0x1032   : > { %v3391_v63 = vmul.f32 0.5, %v3390_v58  ;;  %v3369_v16 = vpop.xlane.xlu1 %3368  ;;  %v7168_v58 = vperm.slane %v3308_v57, 1 }
0x1033   : > { %v3373_v62 = vmul.f32 %v3369_v16, %v5375_v12  ;;  %v3425_v61 = vmul.f32 %v5069_v42, %v3418_v35  ;;  %3844 = vmatpush.bf16.msrb.mxu1 %v4850_v14  ;;  %v4841_v16 = vld [vmem:[%s7437_s4 + $0xc4] sm:$0xf]  ;;  %v4826_v14 = vor.u32 %v5003_v28, %v4825_v23 }
0x1034   : > { %v3392_v6 = vsub.f32 1.5, %v3391_v63  ;;  %v4999_v63 = vld [vmem:[%s7437_s4 + $0x48] sm:$0xf0] }
0x1035   : > { %v5237_v9 = vpop.eup %5236  ;;  %v3377_v46 = vadd.f32 1e-12, %v3373_v62  ;;  %v3432_v22 = vadd.f32 %v5070_v21, %v3425_v61  ;;  %v4810_v62 = vor.u32 %v4999_v63, %v4809_v26 }
0x1036   : > { %v3393_v54 = vmul.f32 %v5235_v5, %v3392_v6  ;;  %v3399_v41 = vmul.f32 %v5237_v9, %v3376_v18  ;;  %vm3405_vm6 = vweird.f32 %v5237_v9  ;;  %v5007_v6 = vld [vmem:[%s7437_s4 + $0xc8] sm:$0xf0] }
0x1037   : > { %5238 = vrsqrt.f32 %v3377_v46  ;;  %vm3406_vm8 = vmor %vm3404_vm7, %vm3405_vm6  ;;  %vm3414_vm10 = vweird.f32 %v3377_v46 }
0x1038   : > { %v3397_v20 = vsel %vm3396_vm5, %v5235_v5, %v3393_v54  ;;  %v3400_v8 = vmul.f32 %v5237_v9, %v3399_v41  ;;  %v5008_v5 = vld [vmem:[%s7437_s4 + $0xd8] sm:$0xf0]  ;;  %v4805_v41 = vld [vmem:[%s7437_s4 + $0x34] sm:$0xf] }
0x1039   : > { %v3419_v4 = vmul.f32 %v3397_v20, %v7001_v24  ;;  %v4846_v18 = vor.u32 %v5008_v5, %v4845_v49  ;;  %v4998_v20 = vld [vmem:[%s7437_s4 + $0x38] sm:$0xf0] }
0x103a   : > { %v3401_v2 = vmul.f32 0.5, %v3400_v8  ;;  %v4837_v8 = vld [vmem:[%s7437_s4 + $0xb4] sm:$0xf] }
0x103b   : > { %v3426_v53 = vmul.f32 %v5069_v42, %v3419_v4  ;;  %3845 = vmatpush.bf16.msrb.mxu1 %v4846_v18 }
0x103c   : > { %v3402_v27 = vsub.f32 1.5, %v3401_v2  ;;  %v5006_v2 = vld [vmem:[%s7437_s4 + $0xb8] sm:$0xf0] }
0x103d   : > { %v5239_v40 = vpop.eup %5238  ;;  %v3433_v38 = vadd.f32 %v5070_v21, %v3426_v53  ;;  %v4838_v53 = vor.u32 %v5006_v2, %v4837_v8 }
0x103e   : > { %v3403_v25 = vmul.f32 %v5237_v9, %v3402_v27  ;;  %v3409_v29 = vmul.f32 %v5239_v40, %v3377_v46  ;;  %vm3415_vm9 = vweird.f32 %v5239_v40  ;;  %v4842_v46 = vor.u32 %v5007_v6, %v4841_v16  ;;  %v4801_v27 = vld [vmem:[%s7437_s4 + $0x24] sm:$0xf] }
0x103f   : > { %v3436_v50 = vpack.c.bf16 %v3433_v38, %v3432_v22  ;;  %vm3416_vm12 = vmor %vm3414_vm10, %vm3415_vm9  ;;  %v4833_v22 = vld [vmem:[%s7437_s4 + $0xa4] sm:$0xf] }
0x1040   : > { %v3410_v3 = vmul.f32 %v5239_v40, %v3409_v29  ;;  %v3407_v24 = vsel %vm3406_vm8, %v5237_v9, %v3403_v25  ;;  %3846 = vmatpush.bf16.msrb.mxu1 %v4842_v46  ;;  %v5005_v25 = vld [vmem:[%s7437_s4 + $0xa8] sm:$0xf0] }
0x1041   : > { %3531 = vmatmul.bf16.vlgmr.msra.gmra.mxu2 %v3436_v50  ;;  %3550 = vmatmul.bf16.vlgmr.msrb.gmra.mxu3 %v3436_v50  ;;  %v3420_v31 = vmul.f32 %v3407_v24, %v7007_v15  ;;  %v5002_v15 = vld [vmem:[%s7437_s4 + $0x78] sm:$0xf0] }
0x1042   : > { %v3411_v59 = vmul.f32 0.5, %v3410_v3  ;;  %v4834_v3 = vor.u32 %v5005_v25, %v4833_v22 }
0x1043   : > { %v3427_v34 = vmul.f32 %v5069_v42, %v3420_v31  ;;  %v4996_v31 = vld [vmem:[%s7437_s4 + $0x18] sm:$0xf0] }
0x1044   : > { %v3412_v51 = vsub.f32 1.5, %v3411_v59  ;;  %3847 = vmatpush.bf16.msrb.mxu1 %v4838_v53 }
0x1045   : > { %v3434_v55 = vadd.f32 %v5070_v21, %v3427_v34 }
0x1046   : > { %v3413_v17 = vmul.f32 %v5239_v40, %v3412_v51  ;;  %v4797_v51 = vld [vmem:[%s7437_s4 + $0x14] sm:$0xf] }
0x1047   : > { %v4798_v34 = vor.u32 %v4996_v31, %v4797_v51 }
0x1048   : > { %v3417_v7 = vsel %vm3416_vm12, %v5239_v40, %v3413_v17  ;;  %v4997_v40 = vld [vmem:[%s7437_s4 + $0x28] sm:$0xf0]  ;;  %3848 = vmatpush.bf16.msrb.mxu1 %v4834_v3  ;;  %v4829_v17 = vld [vmem:[%s7437_s4 + $0x94] sm:$0xf] }
0x1049   : > { %v3421_v56 = vmul.f32 %v3417_v7, %v7013_v19  ;;  %v4822_v19 = vor.u32 %v5002_v15, %v4821_v45  ;;  %v4802_v38 = vor.u32 %v4997_v40, %v4801_v27 }
0x104b   : > { %v3428_v10 = vmul.f32 %v5069_v42, %v3421_v56  ;;  %3824 = vmatpush.bf16.msra.mxu0 %v4822_v19  ;;  %v4995_v19 = vld [vmem:[%s7437_s4 + $0x8] sm:$0xf0] }
0x104c   : > { %v4794_v37 = vor.u32 %v4995_v19, %v4793_v30 }
0x104d   : > { %v3435_v1 = vadd.f32 %v5070_v21, %v3428_v10  ;;  %v4806_v21 = vor.u32 %v4998_v20, %v4805_v41  ;;  %v5004_v10 = vld [vmem:[%s7437_s4 + $0x98] sm:$0xf0] }
0x104e   : > { %v4830_v45 = vor.u32 %v5004_v10, %v4829_v17 }
0x104f   : > { %v3437_v52 = vpack.c.bf16 %v3435_v1, %v3434_v55  ;;  %3825 = vmatpush.bf16.msra.mxu0 %v4818_v11 }
0x1050   : > { %3849 = vmatpush.bf16.msrb.mxu1 %v4830_v45 }
0x1051   : > { %3536 = vmatmul.bf16.gmra.mxu2 %v3437_v52  ;;  %3555 = vmatmul.bf16.gmra.mxu3 %v3437_v52 }
0x1053   : > { %3826 = vmatpush.bf16.msra.mxu0 %v4814_v0 }
0x1054   : > { %3850 = vmatpush.bf16.msrb.mxu1 %v4826_v14 }
0x1057   : > { %3827 = vmatpush.bf16.msra.mxu0 %v4810_v62 }
0x105b   : > { %3828 = vmatpush.bf16.msra.mxu0 %v4806_v21 }
0x105f   : > { %3829 = vmatpush.bf16.msra.mxu0 %v4802_v38 }
0x1063   : > { %3830 = vmatpush.bf16.msra.mxu0 %v4798_v34 }
0x1067   : > { %3831 = vmatpush.bf16.msra.mxu0 %v4794_v37 }
0x10c4   : > { %v3532_v9 = vpop.f32.mrf.mxu2  ;;  %v3551_v35 = vpop.f32.mrf.mxu3 }
0x10c5   : > { %v7183_v42 = vadd.f32 %v3532_v9, %v7166_v32  ;;  %v7186_v54 = vadd.f32 %v3551_v35, %v7168_v58 }
0x10c7   : > { %v4783_v4 = vmul.f32 -1.442695, %v7183_v42  ;;  %v4784_v61 = vmul.f32 -1.442695, %v7186_v54 }
0x10c9   : > { %5240 = vpow2.f32 %v4783_v4 }
0x10ca   : > { %5242 = vpow2.f32 %v4784_v61 }
0x10cc   : > { %v3534_v29 = vpop.f32.mrf.mxu2  ;;  %v3553_v50 = vpop.f32.mrf.mxu3 }
0x10cd   : > { %v7215_v24 = vadd.f32 %v3534_v29, %v7166_v32  ;;  %v7218_v59 = vadd.f32 %v3553_v50, %v7168_v58 }
0x10cf   : > { %v5241_v7 = vpop.eup %5240  ;;  %v4785_v56 = vmul.f32 -1.442695, %v7215_v24  ;;  %v4786_v52 = vmul.f32 -1.442695, %v7218_v59 }
0x10d0   : > { %v5243_v55 = vpop.eup %5242  ;;  %v7233_v1 = vadd.f32 1.0, %v5241_v7 }
0x10d1   : > { %v7236_v15 = vadd.f32 1.0, %v5243_v55  ;;  %5244 = vpow2.f32 %v4785_v56 }
0x10d2   : > { %5246 = vrcp.f32 %v7233_v1  ;;  %v3602_v46 = vand.u32 2147483647, %v7233_v1  ;;  %vm3598_vm13 = vweird.f32 %v7233_v1  ;;  %v3604_v20 = vand.u32 2147483648, %v7233_v1 }
0x10d3   : > { %5248 = vrcp.f32 %v7236_v15  ;;  %vm3613_vm14 = vweird.f32 %v7236_v15  ;;  %v3617_v27 = vand.u32 2147483647, %v7236_v15  ;;  %v3619_v40 = vand.u32 2147483648, %v7236_v15 }
0x10d4   : > { %5250 = vpow2.f32 %v4786_v52  ;;  %v3537_v47 = vpop.f32.mrf.mxu2  ;;  %v3556_v13 = vpop.f32.mrf.mxu3  ;;  %vm7285_vm0 = vcmp.eq.f32.partialorder %v3602_v46, 8.507059e+37  ;;  %v3605_v31 = vor.u32 1.1754944e-38, %v3604_v20 }
0x10d5   : > { %v7253_v11 = vadd.f32 %v3537_v47, %v7166_v32  ;;  %v7256_v48 = vadd.f32 %v3556_v13, %v7168_v58  ;;  %vm3618_vm8 = vcmp.eq.f32.partialorder %v3617_v27, 8.507059e+37 }
0x10d7   : > { %v5245_v44 = vpop.eup %5244  ;;  %v4787_v36 = vmul.f32 -1.442695, %v7253_v11  ;;  %v4788_v5 = vmul.f32 -1.442695, %v7256_v48 }
0x10d8   : > { %v5247_v49 = vpop.eup %5246  ;;  %v7259_v0 = vadd.f32 1.0, %v5245_v44 }
0x10d9   : > { %v7262_v18 = vpop.eup %5248  ;;  %v3594_v57 = vmul.f32 %v5247_v49, %v7233_v1  ;;  %5252 = vpow2.f32 %v4787_v36  ;;  %vm3599_vm15 = vweird.f32 %v5247_v49 }
0x10da   : > { %v5251_v26 = vpop.eup %5250  ;;  %v3609_v63 = vmul.f32 %v7262_v18, %v7236_v15  ;;  %5254 = vrcp.f32 %v7259_v0  ;;  %v3634_v29 = vand.u32 2147483648, %v7259_v0  ;;  %vm7296_vm11 = vmor %vm3598_vm13, %vm3599_vm15  ;;  %vm3614_vm1 = vweird.f32 %v7262_v18 }
0x10db   : > { %v3595_v16 = vsub.f32 1.0, %v3594_v57  ;;  %v7268_v62 = vadd.f32 1.0, %v5251_v26  ;;  %5256 = vpow2.f32 %v4788_v5  ;;  %vm3628_vm2 = vweird.f32 %v7259_v0  ;;  %vm7317_vm4 = vmor %vm3613_vm14, %vm3614_vm1 }
0x10dc   : > { %v3610_v6 = vsub.f32 1.0, %v3609_v63  ;;  %v3539_v9 = vpop.f32.mrf.mxu2  ;;  %v3558_v4 = vpop.f32.mrf.mxu3  ;;  %v3635_v1 = vor.u32 1.1754944e-38, %v3634_v29  ;;  %v3620_v15 = vor.u32 1.1754944e-38, %v3619_v40 }
0x10dd   : > { %v3596_v35 = vmul.f32 %v5247_v49, %v3595_v16  ;;  %5258 = vrcp.f32 %v7268_v62  ;;  %v7276_v8 = vadd.f32 %v3539_v9, %v7166_v32  ;;  %v7292_v50 = vadd.f32 %v3558_v4, %v7168_v58 }
0x10de   : > { %v3611_v2 = vmul.f32 %v7262_v18, %v3610_v6  ;;  %v3632_v58 = vand.u32 2147483647, %v7259_v0  ;;  %v3647_v45 = vand.u32 2147483647, %v7268_v62  ;;  %v3649_v37 = vand.u32 2147483648, %v7268_v62 }
0x10df   : > { %v5253_v41 = vpop.eup %5252  ;;  %v3597_v21 = vadd.f32 %v5247_v49, %v3596_v35  ;;  %v4789_v38 = vmul.f32 -1.442695, %v7276_v8  ;;  %v4790_v30 = vmul.f32 -1.442695, %v7292_v50  ;;  %vm3643_vm9 = vweird.f32 %v7268_v62 }
0x10e0   : > { %v5255_v61 = vpop.eup %5254  ;;  %v7279_v53 = vadd.f32 1.0, %v5253_v41  ;;  %v3612_v56 = vadd.f32 %v7262_v18, %v3611_v2  ;;  %vm3633_vm7 = vcmp.eq.f32.partialorder %v3632_v58, 8.507059e+37  ;;  %v3650_v63 = vor.u32 1.1754944e-38, %v3649_v37 }
0x10e1   : > { %v3624_v22 = vmul.f32 %v5255_v61, %v7259_v0  ;;  %v5257_v25 = vpop.eup %5256  ;;  %v3601_v7 = vsel %vm7296_vm11, %v5247_v49, %v3597_v21  ;;  %vm3629_vm3 = vweird.f32 %v5255_v61  ;;  %vm3648_vm12 = vcmp.eq.f32.partialorder %v3647_v45, 8.507059e+37 }
0x10e2   : > { %5260 = vrcp.f32 %v7279_v53  ;;  %v7307_v55 = vadd.f32 1.0, %v5257_v25  ;;  %v3606_v19 = vsel %vm7285_vm0, %v3605_v31, %v3601_v7  ;;  %v3616_v28 = vsel %vm7317_vm4, %v7262_v18, %v3612_v56  ;;  %vm3630_vm5 = vmor %vm3628_vm2, %vm3629_vm3 }
0x10e3   : > { %v5259_v3 = vpop.eup %5258  ;;  %v3625_v17 = vsub.f32 1.0, %v3624_v22  ;;  %5262 = vpow2.f32 %v4789_v38  ;;  %v3713_v18 = vmul.f32 %v3606_v19, %v7183_v42  ;;  %v3621_v26 = vsel %vm3618_vm8, %v3620_v15, %v3616_v28 }
0x10e4   : > { %v3639_v34 = vmul.f32 %v5259_v3, %v7268_v62  ;;  %5264 = vrcp.f32 %v7307_v55  ;;  %vm3644_vm6 = vweird.f32 %v5259_v3  ;;  %v3714_v4 = vmul.f32 %v3621_v26, %v7186_v54 }
0x10e5   : > { %v3626_v10 = vmul.f32 %v5255_v61, %v3625_v17  ;;  %5266 = vpow2.f32 %v4790_v30  ;;  %vm3645_vm10 = vmor %vm3643_vm9, %vm3644_vm6  ;;  %v3662_v54 = vand.u32 2147483647, %v7279_v53  ;;  %vm3658_vm14 = vweird.f32 %v7279_v53 }
0x10e6   : > { %v3640_v52 = vsub.f32 1.0, %v3639_v34  ;;  %v3664_v38 = vand.u32 2147483648, %v7279_v53  ;;  %vm3673_vm2 = vweird.f32 %v7307_v55  ;;  %v3677_v34 = vand.u32 2147483647, %v7307_v55 }
0x10e7   : > { %v3627_v13 = vadd.f32 %v5255_v61, %v3626_v10  ;;  %vm7351_vm0 = vcmp.eq.f32.partialorder %v3662_v54, 8.507059e+37  ;;  %v3679_v10 = vand.u32 2147483648, %v7307_v55 }
0x10e8   : > { %v7323_v23 = vpop.eup %5260  ;;  %v3641_v14 = vmul.f32 %v5259_v3, %v3640_v52  ;;  %v3665_v58 = vor.u32 1.1754944e-38, %v3664_v38  ;;  %vm3678_vm8 = vcmp.eq.f32.partialorder %v3677_v34, 8.507059e+37 }
0x10e9   : > { %v3631_v44 = vsel %vm3630_vm5, %v5255_v61, %v3627_v13  ;;  %v3654_v36 = vmul.f32 %v7323_v23, %v7279_v53  ;;  %v5263_v57 = vpop.eup %5262  ;;  %vm3659_vm13 = vweird.f32 %v7323_v23  ;;  %v3680_v28 = vor.u32 1.1754944e-38, %v3679_v10 }
0x10ea   : > { %v3636_v49 = vsel %vm3633_vm7, %v3635_v1, %v3631_v44  ;;  %v3642_v5 = vadd.f32 %v5259_v3, %v3641_v14  ;;  %v3591_v9 = vadd.f32 1.0, %v5263_v57  ;;  %v5265_v35 = vpop.eup %5264  ;;  %vm7344_vm15 = vmor %vm3658_vm14, %vm3659_vm13 }
0x10eb   : > { %v3715_v0 = vmul.f32 %v3636_v49, %v7215_v24  ;;  %v3655_v6 = vsub.f32 1.0, %v3654_v36  ;;  %v5267_v20 = vpop.eup %5266  ;;  %v3669_v61 = vmul.f32 %v5265_v35, %v7307_v55  ;;  %vm3674_vm11 = vweird.f32 %v5265_v35 }
0x10ec   : > { %v3646_v16 = vsel %vm3645_vm10, %v5259_v3, %v3642_v5  ;;  %5268 = vrcp.f32 %v3591_v9  ;;  %v3592_v21 = vadd.f32 1.0, %v5267_v20  ;;  %v3692_v29 = vand.u32 2147483647, %v3591_v9  ;;  %vm7358_vm3 = vmor %vm3673_vm2, %vm3674_vm11 }
0x10ed   : > { %v3721_v46 = vpack.c.bf16 %v3715_v0, %v3713_v18  ;;  %v3651_v41 = vsel %vm3648_vm12, %v3650_v63, %v3646_v16  ;;  %v3656_v24 = vmul.f32 %v7323_v23, %v3655_v6  ;;  %v3670_v2 = vsub.f32 1.0, %v3669_v61 }
0x10ee   : > { %v3716_v62 = vmul.f32 %v3651_v41, %v7218_v59  ;;  %5270 = vrcp.f32 %v3592_v21  ;;  %v3694_v17 = vand.u32 2147483648, %v3591_v9  ;;  %vm3688_vm4 = vweird.f32 %v3591_v9 }
0x10ef   : > { %3832 = vmatmul.bf16.vlgmr.msra.gmra.mxu0 %v3721_v46  ;;  %v3657_v40 = vadd.f32 %v7323_v23, %v3656_v24  ;;  %v3671_v22 = vmul.f32 %v5265_v35, %v3670_v2  ;;  %vm3693_vm5 = vcmp.eq.f32.partialorder %v3692_v29, 8.507059e+37  ;;  %v3707_v47 = vand.u32 2147483647, %v3592_v21 }
0x10f0   : > { %v3722_v42 = vpack.c.bf16 %v3716_v62, %v3714_v4  ;;  %v3695_v19 = vor.u32 1.1754944e-38, %v3694_v17  ;;  %v3709_v13 = vand.u32 2147483648, %v3592_v21  ;;  %vm3703_vm9 = vweird.f32 %v3592_v21 }
0x10f1   : > { %v3661_v51 = vsel %vm7344_vm15, %v7323_v23, %v3657_v40  ;;  %v3672_v7 = vadd.f32 %v5265_v35, %v3671_v22  ;;  %vm3708_vm12 = vcmp.eq.f32.partialorder %v3707_v47, 8.507059e+37 }
0x10f2   : > { %3851 = vmatmul.bf16.vlgmr.msrb.gmra.mxu1 %v3722_v42  ;;  %v5269_v27 = vpop.eup %5268  ;;  %v3666_v30 = vsel %vm7351_vm0, %v3665_v58, %v3661_v51  ;;  %v3710_v5 = vor.u32 1.1754944e-38, %v3709_v13 }
0x10f3   : > { %v3684_v59 = vmul.f32 %v5269_v27, %v3591_v9  ;;  %vm3689_vm1 = vweird.f32 %v5269_v27  ;;  %v3676_v37 = vsel %vm7358_vm3, %v5265_v35, %v3672_v7  ;;  %v3717_v15 = vmul.f32 %v3666_v30, %v7253_v11  ;;  %v5071_v11 = vld [vmem:[%s7438_s5 + $0x1b] ss:$0 sm:$0xff] }
0x10f4   : > { %v5271_v3 = vpop.eup %5270  ;;  %vm3690_vm6 = vmor %vm3688_vm4, %vm3689_vm1  ;;  %v3681_v49 = vsel %vm3678_vm8, %v3680_v28, %v3676_v37 }
0x10f5   : > { %v3685_v32 = vsub.f32 1.0, %v3684_v59  ;;  %v3699_v53 = vmul.f32 %v5271_v3, %v3592_v21  ;;  %vm3704_vm7 = vweird.f32 %v5271_v3  ;;  %v3718_v0 = vmul.f32 %v3681_v49, %v7256_v48 }
0x10f6   : > { %vm3705_vm10 = vmor %vm3703_vm9, %vm3704_vm7 }
0x10f7   : > { %v3686_v56 = vmul.f32 %v5269_v27, %v3685_v32  ;;  %v3700_v45 = vsub.f32 1.0, %v3699_v53 }
0x10f9   : > { %v3687_v52 = vadd.f32 %v5269_v27, %v3686_v56  ;;  %v3701_v55 = vmul.f32 %v5271_v3, %v3700_v45 }
0x10fb   : > { %v3691_v23 = vsel %vm3690_vm6, %v5269_v27, %v3687_v52  ;;  %v3702_v36 = vadd.f32 %v5271_v3, %v3701_v55 }
0x10fc   : > { %v3696_v14 = vsel %vm3693_vm5, %v3695_v19, %v3691_v23 }
0x10fd   : > { %v3719_v44 = vmul.f32 %v3696_v14, %v7276_v8  ;;  %v3706_v57 = vsel %vm3705_vm10, %v5271_v3, %v3702_v36 }
0x10fe   : > { %v3711_v26 = vsel %vm3708_vm12, %v3710_v5, %v3706_v57  ;;  %v5072_v5 = vld [vmem:[%s7438_s5 + $0x1c] ss:$0 sm:$0xff] }
0x10ff   : > { %v3723_v18 = vpack.c.bf16 %v3719_v44, %v3717_v15  ;;  %v3720_v63 = vmul.f32 %v3711_v26, %v7292_v50 }
0x1101   : > { %3837 = vmatmul.bf16.gmra.mxu0 %v3723_v18  ;;  %v3724_v16 = vpack.c.bf16 %v3720_v63, %v3718_v0  ;;  %v5073_v63 = vld [vmem:[%s7438_s5 + $0x1d] ss:$0 sm:$0xff] }
0x1103   : > { %3856 = vmatmul.bf16.gmra.mxu1 %v3724_v16 }
0x116c   : > { %v3833_v8 = vpop.f32.mrf.mxu0 }
0x116d   : > { %v3834_v6 = vadd.f32 %v5071_v11, %v3833_v8 }
0x116f   : > { %v3852_v9 = vpop.f32.mrf.mxu1 }
0x1170   : > { %v3853_v35 = vadd.f32 %v3852_v9, %v3834_v6 }
0x1172   : > { %v3862_v46 = vmul.f32 0.5, %v3853_v35 }
0x1174   : > { %v3835_v41 = vpop.f32.mrf.mxu0  ;;  %v3866_v20 = vadd.f32 %v3862_v46, %v6978_v39 }
0x1175   : > { %v3836_v4 = vadd.f32 %v5071_v11, %v3835_v41 }
0x1176   : > { %3872 = vadd.xlane.f32.xlu0 %v3866_v20 }
0x1177   : > { %v3854_v48 = vpop.f32.mrf.mxu1 }
0x1178   : > { %v3855_v62 = vadd.f32 %v3854_v48, %v3836_v4 }
0x117a   : > { %v3863_v50 = vmul.f32 0.5, %v3855_v62 }
0x117c   : > { %v3867_v61 = vadd.f32 %v3863_v50, %v6982_v43 }
0x117e   : > { %3874 = vadd.xlane.f32.xlu2 %v3867_v61  ;;  %v3838_v42 = vpop.f32.mrf.mxu0 }
0x117f   : > { %v3839_v24 = vadd.f32 %v5071_v11, %v3838_v42 }
0x1180   : > { %v3857_v21 = vpop.f32.mrf.mxu1 }
0x1181   : > { %v3858_v2 = vadd.f32 %v3857_v21, %v3839_v24 }
0x1183   : > { %v3864_v27 = vmul.f32 0.5, %v3858_v2 }
0x1185   : > { %v3868_v22 = vadd.f32 %v3864_v27, %v6986_v33 }
0x1186   : > { %v3840_v40 = vpop.f32.mrf.mxu0 }
0x1187   : > { %v3841_v54 = vadd.f32 %v5071_v11, %v3840_v40  ;;  %3876 = vadd.xlane.f32.xlu1 %v3868_v22 }
0x1188   : > { %v3859_v59 = vpop.f32.mrf.mxu1 }
0x1189   : > { %v3860_v39 = vadd.f32 %v3859_v59, %v3841_v54 }
0x118b   : > { %v3865_v38 = vmul.f32 0.5, %v3860_v39 }
0x118d   : > { %v3869_v25 = vadd.f32 %v3865_v38, %v6990_v60 }
0x118f   : > { %3878 = vadd.xlane.f32.xlu0 %v3869_v25 }
0x11e9   : > { %v3873_v32 = vpop.xlane.xlu0 %3872 }
0x11ea   : > { %v3880_v43 = vmul.f32 %v3873_v32, %v5375_v12 }
0x11ec   : > { %v3884_v29 = vsub.f32 %v3866_v20, %v3880_v43 }
0x11ee   : > { %v3888_v3 = vmul.f32 %v3884_v29, %v3884_v29 }
0x11f0   : > { %3892 = vadd.xlane.f32.xlu2 %v3888_v3 }
0x11f1   : > { %v3875_v51 = vpop.xlane.xlu2 %3874 }
0x11f2   : > { %v3881_v31 = vmul.f32 %v3875_v51, %v5375_v12 }
0x11f4   : > { %v3885_v17 = vsub.f32 %v3867_v61, %v3881_v31 }
0x11f6   : > { %v3889_v7 = vmul.f32 %v3885_v17, %v3885_v17 }
0x11f8   : > { %3894 = vadd.xlane.f32.xlu1 %v3889_v7 }
0x11fa   : > { %v3877_v33 = vpop.xlane.xlu1 %3876 }
0x11fb   : > { %v3882_v56 = vmul.f32 %v3877_v33, %v5375_v12 }
0x11fd   : > { %v7380_v53 = vsub.f32 %v3868_v22, %v3882_v56 }
0x11ff   : > { %v3890_v60 = vmul.f32 %v7380_v53, %v7380_v53 }
0x1201   : > { %3896 = vadd.xlane.f32.xlu0 %v3890_v60 }
0x1202   : > { %v3879_v58 = vpop.xlane.xlu0 %3878 }
0x1203   : > { %v3883_v34 = vmul.f32 %v3879_v58, %v5375_v12 }
0x1205   : > { %v7385_v10 = vsub.f32 %v3869_v25, %v3883_v34 }
0x1207   : > { %v3891_v1 = vmul.f32 %v7385_v10, %v7385_v10 }
0x1209   : > { %3898 = vadd.xlane.f32.xlu2 %v3891_v1 }
0x1263   : > { %v3893_v52 = vpop.xlane.xlu2 %3892 }
0x1264   : > { %v3900_v45 = vmul.f32 %v3893_v52, %v5375_v12 }
0x1266   : > { %v3904_v30 = vadd.f32 1e-12, %v3900_v45 }
0x1268   : > { %5272 = vrsqrt.f32 %v3904_v30  ;;  %vm3914_vm14 = vweird.f32 %v3904_v30 }
0x126b   : > { %v3895_v19 = vpop.xlane.xlu1 %3894 }
0x126c   : > { %v3901_v47 = vmul.f32 %v3895_v19, %v5375_v12 }
0x126e   : > { %v5273_v13 = vpop.eup %5272  ;;  %v3905_v37 = vadd.f32 1e-12, %v3901_v47 }
0x126f   : > { %v3909_v23 = vmul.f32 %v5273_v13, %v3904_v30  ;;  %vm3915_vm13 = vweird.f32 %v5273_v13 }
0x1270   : > { %5274 = vrsqrt.f32 %v3905_v37  ;;  %vm3916_vm15 = vmor %vm3914_vm14, %vm3915_vm13  ;;  %vm3924_vm11 = vweird.f32 %v3905_v37 }
0x1271   : > { %v3910_v55 = vmul.f32 %v5273_v13, %v3909_v23 }
0x1273   : > { %v3911_v28 = vmul.f32 0.5, %v3910_v55 }
0x1274   : > { %v3897_v49 = vpop.xlane.xlu0 %3896 }
0x1275   : > { %v3912_v14 = vsub.f32 1.5, %v3911_v28  ;;  %v3902_v18 = vmul.f32 %v3897_v49, %v5375_v12 }
0x1276   : > { %v5275_v15 = vpop.eup %5274 }
0x1277   : > { %v3913_v44 = vmul.f32 %v5273_v13, %v3912_v14  ;;  %v3919_v36 = vmul.f32 %v5275_v15, %v3905_v37  ;;  %v3906_v11 = vadd.f32 1e-12, %v3902_v18  ;;  %vm3925_vm0 = vweird.f32 %v5275_v15 }
0x1278   : > { %vm3926_vm1 = vmor %vm3924_vm11, %vm3925_vm0 }
0x1279   : > { %v3920_v57 = vmul.f32 %v5275_v15, %v3919_v36  ;;  %v3917_v26 = vsel %vm3916_vm15, %v5273_v13, %v3913_v44  ;;  %5276 = vrsqrt.f32 %v3906_v11  ;;  %vm3934_vm3 = vweird.f32 %v3906_v11 }
0x127a   : > { %v3948_v0 = vmul.f32 %v3917_v26, %v3884_v29 }
0x127b   : > { %v3921_v16 = vmul.f32 0.5, %v3920_v57 }
0x127c   : > { %v3955_v8 = vmul.f32 %v5072_v5, %v3948_v0  ;;  %v3899_v46 = vpop.xlane.xlu2 %3898 }
0x127d   : > { %v3922_v6 = vsub.f32 1.5, %v3921_v16  ;;  %v3903_v41 = vmul.f32 %v3899_v46, %v5375_v12 }
0x127e   : > { %v3962_v9 = vadd.f32 %v5073_v63, %v3955_v8 }
0x127f   : > { %v3923_v35 = vmul.f32 %v5275_v15, %v3922_v6  ;;  %v5277_v48 = vpop.eup %5276  ;;  %v3907_v62 = vadd.f32 1e-12, %v3903_v41  ;;  %v5074_v41 = vld [vmem:[%s7438_s5 + $0x1e] ss:$0 sm:$0xff] }
0x1280   : > { %3968 = vadd.xlane.f32.xlu1 %v3962_v9  ;;  %v3929_v50 = vmul.f32 %v5277_v48, %v3906_v11  ;;  %vm3935_vm2 = vweird.f32 %v5277_v48 }
0x1281   : > { %v3927_v20 = vsel %vm3926_vm1, %v5275_v15, %v3923_v35  ;;  %5278 = vrsqrt.f32 %v3907_v62  ;;  %vm3936_vm4 = vmor %vm3934_vm3, %vm3935_vm2  ;;  %vm3944_vm6 = vweird.f32 %v3907_v62 }
0x1282   : > { %v3949_v4 = vmul.f32 %v3927_v20, %v3885_v17  ;;  %v3930_v42 = vmul.f32 %v5277_v48, %v3929_v50 }
0x1284   : > { %v3956_v61 = vmul.f32 %v5072_v5, %v3949_v4  ;;  %v3931_v21 = vmul.f32 0.5, %v3930_v42 }
0x1286   : > { %v3963_v24 = vadd.f32 %v5073_v63, %v3956_v61  ;;  %v3932_v2 = vsub.f32 1.5, %v3931_v21  ;;  %v5075_v61 = vld [vmem:[%s7438_s5 + $0x1f] ss:$0 sm:$0xff] }
0x1287   : > { %v5279_v27 = vpop.eup %5278 }
0x1288   : > { %3970 = vadd.xlane.f32.xlu0 %v3963_v24  ;;  %v3933_v40 = vmul.f32 %v5277_v48, %v3932_v2  ;;  %v3939_v54 = vmul.f32 %v5279_v27, %v3907_v62  ;;  %vm3945_vm5 = vweird.f32 %v5279_v27 }
0x1289   : > { %vm3946_vm7 = vmor %vm3944_vm6, %vm3945_vm5 }
0x128a   : > { %v3940_v22 = vmul.f32 %v5279_v27, %v3939_v54  ;;  %v3937_v59 = vsel %vm3936_vm4, %v5277_v48, %v3933_v40 }
0x128b   : > { %v3950_v39 = vmul.f32 %v3937_v59, %v7380_v53 }
0x128c   : > { %v3941_v38 = vmul.f32 0.5, %v3940_v22 }
0x128d   : > { %v3957_v25 = vmul.f32 %v5072_v5, %v3950_v39 }
0x128e   : > { %v3942_v32 = vsub.f32 1.5, %v3941_v38 }
0x128f   : > { %v3964_v43 = vadd.f32 %v5073_v63, %v3957_v25 }
0x1290   : > { %v3943_v29 = vmul.f32 %v5279_v27, %v3942_v32 }
0x1291   : > { %3972 = vadd.xlane.f32.xlu2 %v3964_v43 }
0x1292   : > { %v3947_v3 = vsel %vm3946_vm7, %v5279_v27, %v3943_v29 }
0x1293   : > { %v3951_v51 = vmul.f32 %v3947_v3, %v7385_v10 }
0x1295   : > { %v3958_v31 = vmul.f32 %v5072_v5, %v3951_v51 }
0x1297   : > { %v3965_v17 = vadd.f32 %v5073_v63, %v3958_v31 }
0x1299   : > { %3974 = vadd.xlane.f32.xlu1 %v3965_v17 }
0x12f3   : > { %v3969_v7 = vpop.xlane.xlu1 %3968 }
0x12f4   : > { %v3976_v33 = vmul.f32 %v3969_v7, %v5375_v12 }
0x12f6   : > { %v3980_v56 = vsub.f32 %v3962_v9, %v3976_v33 }
0x12f8   : > { %v3984_v53 = vmul.f32 %v3980_v56, %v3980_v56 }
0x12fa   : > { %3988 = vadd.xlane.f32.xlu0 %v3984_v53 }
0x12fb   : > { %v3971_v60 = vpop.xlane.xlu0 %3970 }
0x12fc   : > { %v3977_v58 = vmul.f32 %v3971_v60, %v5375_v12 }
0x12fe   : > { %v3981_v34 = vsub.f32 %v3963_v24, %v3977_v58 }
0x1300   : > { %v3985_v1 = vmul.f32 %v3981_v34, %v3981_v34 }
0x1302   : > { %3990 = vadd.xlane.f32.xlu2 %v3985_v1 }
0x1304   : > { %v3973_v52 = vpop.xlane.xlu2 %3972 }
0x1305   : > { %v3978_v45 = vmul.f32 %v3973_v52, %v5375_v12 }
0x1307   : > { %v7404_v30 = vsub.f32 %v3964_v43, %v3978_v45 }
0x1309   : > { %v3986_v10 = vmul.f32 %v7404_v30, %v7404_v30 }
0x130b   : > { %3992 = vadd.xlane.f32.xlu1 %v3986_v10 }
0x130c   : > { %v3975_v19 = vpop.xlane.xlu1 %3974 }
0x130d   : > { %v3979_v47 = vmul.f32 %v3975_v19, %v5375_v12 }
0x130f   : > { %v7409_v13 = vsub.f32 %v3965_v17, %v3979_v47 }
0x1311   : > { %v3987_v37 = vmul.f32 %v7409_v13, %v7409_v13 }
0x1313   : > { %3994 = vadd.xlane.f32.xlu0 %v3987_v37 }
0x136d   : > { %v3989_v23 = vpop.xlane.xlu0 %3988 }
0x136e   : > { %v3996_v55 = vmul.f32 %v3989_v23, %v5375_v12 }
0x1370   : > { %v4000_v28 = vadd.f32 1e-12, %v3996_v55 }
0x1372   : > { %5280 = vrsqrt.f32 %v4000_v28  ;;  %vm4010_vm9 = vweird.f32 %v4000_v28 }
0x1375   : > { %v3991_v14 = vpop.xlane.xlu2 %3990 }
0x1376   : > { %v3997_v15 = vmul.f32 %v3991_v14, %v5375_v12 }
0x1378   : > { %v5281_v44 = vpop.eup %5280  ;;  %v4001_v36 = vadd.f32 1e-12, %v3997_v15 }
0x1379   : > { %v4005_v49 = vmul.f32 %v5281_v44, %v4000_v28  ;;  %vm4011_vm8 = vweird.f32 %v5281_v44 }
0x137a   : > { %5282 = vrsqrt.f32 %v4001_v36  ;;  %vm4012_vm10 = vmor %vm4010_vm9, %vm4011_vm8  ;;  %vm4020_vm13 = vweird.f32 %v4001_v36 }
0x137b   : > { %v4006_v5 = vmul.f32 %v5281_v44, %v4005_v49 }
0x137d   : > { %v4007_v57 = vmul.f32 0.5, %v4006_v5 }
0x137e   : > { %v3993_v16 = vpop.xlane.xlu1 %3992 }
0x137f   : > { %v4008_v18 = vsub.f32 1.5, %v4007_v57  ;;  %v3998_v8 = vmul.f32 %v3993_v16, %v5375_v12 }
0x1380   : > { %v5283_v26 = vpop.eup %5282 }
0x1381   : > { %v4009_v0 = vmul.f32 %v5281_v44, %v4008_v18  ;;  %v4015_v63 = vmul.f32 %v5283_v26, %v4001_v36  ;;  %v4002_v35 = vadd.f32 1e-12, %v3998_v8  ;;  %vm4021_vm12 = vweird.f32 %v5283_v26 }
0x1382   : > { %vm4022_vm14 = vmor %vm4020_vm13, %vm4021_vm12 }
0x1383   : > { %v4016_v11 = vmul.f32 %v5283_v26, %v4015_v63  ;;  %v4013_v6 = vsel %vm4012_vm10, %v5281_v44, %v4009_v0  ;;  %5284 = vrsqrt.f32 %v4002_v35  ;;  %vm4030_vm0 = vweird.f32 %v4002_v35 }
0x1384   : > { %v4044_v20 = vmul.f32 %v4013_v6, %v3980_v56 }
0x1385   : > { %v4017_v9 = vmul.f32 0.5, %v4016_v11 }
0x1386   : > { %v3995_v48 = vpop.xlane.xlu0 %3994  ;;  %v4051_v42 = vmul.f32 %v5074_v41, %v4044_v20 }
0x1387   : > { %v4018_v46 = vsub.f32 1.5, %v4017_v9  ;;  %v3999_v50 = vmul.f32 %v3995_v48, %v5375_v12 }
0x1388   : > { %v4058_v54 = vadd.f32 %v5075_v61, %v4051_v42 }
0x1389   : > { %v4019_v4 = vmul.f32 %v5283_v26, %v4018_v46  ;;  %v5285_v21 = vpop.eup %5284  ;;  %v4003_v2 = vadd.f32 1e-12, %v3999_v50 }
0x138a   : > { %v4025_v40 = vmul.f32 %v5285_v21, %v4002_v35  ;;  %vm4031_vm15 = vweird.f32 %v5285_v21 }
0x138b   : > { %v4023_v62 = vsel %vm4022_vm14, %v5283_v26, %v4019_v4  ;;  %5286 = vrsqrt.f32 %v4003_v2  ;;  %vm4032_vm11 = vmor %vm4030_vm0, %vm4031_vm15  ;;  %vm4040_vm2 = vweird.f32 %v4003_v2 }
0x138c   : > { %v4045_v24 = vmul.f32 %v4023_v62, %v3981_v34  ;;  %v4026_v59 = vmul.f32 %v5285_v21, %v4025_v40 }
0x138e   : > { %v4052_v27 = vmul.f32 %v5074_v41, %v4045_v24  ;;  %v4027_v39 = vmul.f32 0.5, %v4026_v59 }
0x1390   : > { %v4059_v22 = vadd.f32 %v5075_v61, %v4052_v27  ;;  %v4028_v38 = vsub.f32 1.5, %v4027_v39 }
0x1391   : > { %v5287_v25 = vpop.eup %5286 }
0x1392   : > { %v5022_v12 = vpack.c.bf16 %v4059_v22, %v4058_v54  ;;  %v4029_v32 = vmul.f32 %v5285_v21, %v4028_v38  ;;  %v4035_v43 = vmul.f32 %v5287_v25, %v4003_v2  ;;  %vm4041_vm1 = vweird.f32 %v5287_v25 }
0x1393   : > { %vm4042_vm3 = vmor %vm4040_vm2, %vm4041_vm1 }
0x1394   : > { %5023 = vst [vmem:[%s292_s22] sm:$0xff] %v5022_v12   ;;  %v4036_v29 = vmul.f32 %v5287_v25, %v4035_v43  ;;  %v4033_v3 = vsel %vm4032_vm11, %v5285_v21, %v4029_v32 }
0x1395   : > { %v4046_v17 = vmul.f32 %v4033_v3, %v7404_v30 }
0x1396   : > { %v4037_v51 = vmul.f32 0.5, %v4036_v29 }
0x1397   : > { %v4053_v56 = vmul.f32 %v5074_v41, %v4046_v17 }
0x1398   : > { %v4038_v31 = vsub.f32 1.5, %v4037_v51 }
0x1399   : > { %v4060_v58 = vadd.f32 %v5075_v61, %v4053_v56 }
0x139a   : > { %v4039_v7 = vmul.f32 %v5287_v25, %v4038_v31 }
0x139c   : > { %v4043_v33 = vsel %vm4042_vm3, %v5287_v25, %v4039_v7 }
0x139d   : > { %v4047_v53 = vmul.f32 %v4043_v33, %v7409_v13 }
0x139f   : > { %v4054_v60 = vmul.f32 %v5074_v41, %v4047_v53 }
0x13a1   : > { %v4061_v34 = vadd.f32 %v5075_v61, %v4054_v60 }
0x13a3   : > { %v5027_v1 = vpack.c.bf16 %v4061_v34, %v4060_v58 }
0x13a5   : > { %5030 = vst [vmem:[%s292_s22 + $0x8] sm:$0xff] %v5027_v1  }
0x13a6 PF: > { %s17_s24 = sadd.s32 1, %s5294_s24  }
0x13a7   : > { %p14_p4 = scmp.ge.s32.totalorder %s17_s24, 4  }
0x13a9   :  { %16 = sbr.rel (!%p14_p4) target bundleno = 1 (0x1), region = 84 }

</bundles_post_ra>
